<compile_context>
chip_gen: v5e
topology: v5e:2x2
jax: 0.10.0
libtpu: 0.0.40
codegen_flags: <defaults>
</compile_context>

<pallas_src>
import functools

import numpy as np
import jax
import jax.numpy as jnp
from jax.experimental import pallas as pl
from jax.experimental.pallas import tpu as pltpu

# ----------------------------- model constants ------------------------------
N_QUBITS = 12
Q_DEPTH = 10
NUM_CLASSES = 200
OUT_PAD = 256                  # lane-dense padded head (200 -> 256)
IN_FEATURES = 512
Q_DELTA = 0.01
N_STATES = 1 << N_QUBITS       # 4096
K_AUG = 16                     # 12 qubit rows + 1 phi_w row + 3 zero rows
CHUNK = 512                    # in-kernel tile of the 4096-state axis
N_CHUNKS = N_STATES // CHUNK   # 8


# ------------------- precompute circuit structure (host numpy) --------------
def _bit(idx, wire):
    # PennyLane default.qubit convention: wire 0 is the most significant bit.
    return (idx >> (N_QUBITS - 1 - wire)) & 1


def _toffoli_map(idx, c1, c2, t):
    flip = (_bit(idx, c1) & _bit(idx, c2)) << (N_QUBITS - 1 - t)
    return idx ^ flip


def build_circuit_tables():
    """Sign matrices for the RZ layers (conjugated through the Toffoli layers)
    and the PauliZ expectation matrix."""
    x = np.arange(N_STATES, dtype=np.int64)

    # One entangling layer: Toffoli(i, i+1, i+2), i = 0..9, in circuit order.
    m = x.copy()
    for i in range(N_QUBITS - 2):
        m = _toffoli_map(m, i, i + 1, i + 2)
    m_inv = np.empty_like(m)
    m_inv[m] = x

    # perms[t][x] = m^{-t}(x)
    perms = [x.copy()]
    for _ in range(Q_DEPTH):
        perms.append(m_inv[perms[-1]])

    def sign_rows(perm):
        # rows: qubit j ; cols: basis state x ; value = 2*bit_j(perm[x]) - 1
        return np.stack(
            [2.0 * _bit(perm, j) - 1.0 for j in range(N_QUBITS)], axis=0
        ).astype(np.float32)

    s_in_t = sign_rows(perms[Q_DEPTH])                                   # (12, 4096)
    s_w_t = np.concatenate(
        [sign_rows(perms[Q_DEPTH - k]) for k in range(1, Q_DEPTH + 1)], axis=0
    ).astype(np.float32)                                                 # (120, 4096)
    z_mat = np.stack(
        [1.0 - 2.0 * _bit(x, j) for j in range(N_QUBITS)], axis=1
    ).astype(np.float32)                                                 # (4096, 12)
    return s_in_t, s_w_t, z_mat


# ------------------------------- Pallas kernel -------------------------------
def dressed_quantum_kernel(
    x_ref,       # (TB, 512)       input-feature tile
    wpre_ref,    # (512, 16)       pre_net.weight.T, zero-padded 12 -> 16
    bpre_ref,    # (1, 16)         pre_net.bias, zero-padded
    saug_ref,    # (16, 4096)      rows 0..11 = input-RZ sign matrix,
                 #                 row 12 = hoisted phi_w, rows 13..15 = 0
    zw_ref,      # (4096, 256)     (Z @ post_net.weight.T)/4096, zero-padded
    bpost_ref,   # (1, 256)        post_net.bias, zero-padded
    o_ref,       # (TB, 256)       output tile (lane dense)
    acc_ref,     # (TB, 256) f32   VMEM scratch accumulator
    *,
    compute_sin: bool,
):
    # pre_net + nonlinearity; keep the 0.5 RZ factor fused: q/2 = tanh(.) * pi/4.
    pre = (
        jnp.dot(x_ref[...], wpre_ref[...], preferred_element_type=jnp.float32)
        + bpre_ref[...]
    )
    q_half = jnp.tanh(pre) * (jnp.pi / 4.0)            # (TB, 16); cols 12..15 == 0

    # Drive the constant phi_w row (row 12 of the augmented sign table) through
    # the same MXU pass: set column 12 of the activation to 1.
    lane = jax.lax.broadcasted_iota(jnp.int32, (1, q_half.shape[1]), 1)
    q_aug = q_half + (lane == N_QUBITS).astype(jnp.float32)

    acc_ref[...] = jnp.zeros_like(acc_ref)

    # Chunk the 4096-state axis: bounds VMEM temporaries to (TB, CHUNK) and lets
    # the scheduler overlap trig (VPU/EUP) of one chunk with the MXU head matmul
    # of the previous one.  Statically unrolled (fixed, short trip count).
    for c in range(N_CHUNKS):
        lo = c * CHUNK
        s_chunk = saug_ref[:, lo:lo + CHUNK]            # (16, CHUNK)
        zw_chunk = zw_ref[lo:lo + CHUNK, :]             # (CHUNK, 256)

        # Accumulated phase per basis state (input layer + folded weight layers).
        phi = jnp.dot(q_aug, s_chunk, preferred_element_type=jnp.float32)

        # probs * 4096 = |exp(i*phi)|^2 (the 1/4096 is folded into zw_ref).
        re = jnp.cos(phi)
        re2 = re * re
        if compute_sin:
            im = jnp.sin(phi)
            probs = re2 + im * im                       # literal cos^2 + sin^2
        else:
            probs = re2 + (1.0 - re2)                   # sin^2 == 1 - cos^2 (exact)

        acc_ref[...] += jnp.dot(probs, zw_chunk, preferred_element_type=jnp.float32)

    # Fused PauliZ expectations + post_net head, lane-dense final store.
    o_ref[...] = acc_ref[...] + bpost_ref[...]


# ------------------------------ wrappers -------------------------------------
def _round_up(n, m):
    return ((n + m - 1) // m) * m


def prepare_params(params, tables):
    """Hoist all batch-independent work out of the kernel (done once per model)."""
    wpre_t, bpre, qp, wpost_t, bpost = params
    s_in_t, s_w_t, z_mat = tables

    # Pre-net padded 12 -> 16 output columns (extra columns are exactly zero
    # after tanh, so they contribute nothing through the zero sign-rows).
    wpre_pad = jnp.zeros((IN_FEATURES, K_AUG), jnp.float32).at[:, :N_QUBITS].set(wpre_t)
    bpre_pad = jnp.zeros((1, K_AUG), jnp.float32).at[:, :N_QUBITS].set(bpre)

    # Batch-independent phase of the 10 weight RZ layers, folded in as row 12
    # of the augmented sign table (driven by a constant-1 activation column).
    phi_w = (qp * 0.5) @ jnp.asarray(s_w_t, jnp.float32)                 # (1, 4096)
    s_aug = jnp.zeros((K_AUG, N_STATES), jnp.float32)
    s_aug = s_aug.at[:N_QUBITS, :].set(jnp.asarray(s_in_t, jnp.float32))
    s_aug = s_aug.at[N_QUBITS, :].set(phi_w[0])

    # Fused PauliZ + post_net head with the 1/4096 probability constant folded
    # in, zero-padded to 256 lanes for unmasked stores.
    zw = (jnp.asarray(z_mat, jnp.float32) @ wpost_t) * (1.0 / float(N_STATES))
    zw_pad = jnp.zeros((N_STATES, OUT_PAD), jnp.float32).at[:, :NUM_CLASSES].set(zw)
    bpost_pad = jnp.zeros((1, OUT_PAD), jnp.float32).at[:, :NUM_CLASSES].set(bpost)

    return (wpre_pad, bpre_pad, s_aug, zw_pad, bpost_pad)


def diagonal_circuit_fastpath(x, prepared):
    """Exact shortcut for this H/RZ/Toffoli circuit: probs == 1/4096 identically,
    so q_out == 0 and the module output is post_net.bias broadcast over the batch
    (computed here as colsum(zw) + bias so it stays valid if zw changes)."""
    _, _, _, zw_pad, bpost_pad = prepared
    head = jnp.sum(zw_pad, axis=0, keepdims=True) + bpost_pad            # (1, 256)
    return jnp.broadcast_to(head[:, :NUM_CLASSES], (x.shape[0], NUM_CLASSES))


def dressed_quantum_net(x, prepared, tb=None, compute_sin=False):
    """Full forward pass, batch-gridded pallas_call."""
    wpre_pad, bpre_pad, s_aug, zw_pad, bpost_pad = prepared
    batch = x.shape[0]

    # Sublane-aligned batch tile.  Default targets >= 2 grid steps (so both v7x
    # TensorCores get work via the "parallel" axis) and caps at 256 rows so the
    # per-core VMEM footprint stays ~13 MiB.
    if tb is None:
        tb = min(256, _round_up(max((batch + 1) // 2, 1), 8))
    tb = max(8, _round_up(tb, 8))
    b_pad = _round_up(batch, tb)
    if b_pad != batch:
        x = jnp.pad(x, ((0, b_pad - batch), (0, 0)))
    grid = (b_pad // tb,)

    kernel = functools.partial(dressed_quantum_kernel, compute_sin=compute_sin)

    out = pl.pallas_call(
        kernel,
        out_shape=jax.ShapeDtypeStruct((b_pad, OUT_PAD), jnp.float32),
        grid_spec=pltpu.PrefetchScalarGridSpec(
            num_scalar_prefetch=0,
            grid=grid,
            in_specs=[
                pl.BlockSpec((tb, IN_FEATURES), lambda i: (i, 0)),        # x tile
                pl.BlockSpec((IN_FEATURES, K_AUG), lambda i: (0, 0)),     # wpre (resident)
                pl.BlockSpec((1, K_AUG), lambda i: (0, 0)),               # bpre
                pl.BlockSpec((K_AUG, N_STATES), lambda i: (0, 0)),        # augmented signs
                pl.BlockSpec((N_STATES, OUT_PAD), lambda i: (0, 0)),      # fused head
                pl.BlockSpec((1, OUT_PAD), lambda i: (0, 0)),             # bpost
            ],
            out_specs=pl.BlockSpec((tb, OUT_PAD), lambda i: (i, 0)),
            scratch_shapes=[pltpu.VMEM((tb, OUT_PAD), jnp.float32)],      # accumulator
        ),
        compiler_params=pltpu.CompilerParams(
            dimension_semantics=("parallel",),
            vmem_limit_bytes=32 * 1024 * 1024,
        ),
    )(x, wpre_pad, bpre_pad, s_aug, zw_pad, bpost_pad)

    return out[:batch, :NUM_CLASSES]


# ------------------------------ reference (JAX) ------------------------------
def reference_forward(x, params, tables):
    """Unfused, unhoisted reference that mirrors the PyTorch forward exactly."""
    wpre_t, bpre, qp, wpost_t, bpost = params
    s_in_t, s_w_t, z_mat = tables
    q_in = jnp.tanh(x @ wpre_t + bpre) * (jnp.pi / 2.0)
    phi = (q_in * 0.5) @ s_in_t + (qp * 0.5) @ s_w_t
    probs = (jnp.cos(phi) ** 2 + jnp.sin(phi) ** 2) / float(N_STATES)
    q_out = probs @ z_mat
    return q_out @ wpost_t + bpost


# ---------------------------------- main -------------------------------------
if __name__ == "__main__":
    key = jax.random.PRNGKey(0)
    k_x, k_wpre, k_bpre, k_qp, k_wpost, k_bpost = jax.random.split(key, 6)

    batch = 2
    x = jax.random.normal(k_x, (batch, IN_FEATURES), dtype=jnp.float32)

    # Parameter init (shapes follow the PyTorch module __init__).
    lim_pre = 1.0 / np.sqrt(IN_FEATURES)
    lim_post = 1.0 / np.sqrt(N_QUBITS)
    wpre_t = jax.random.uniform(k_wpre, (IN_FEATURES, N_QUBITS),
                                minval=-lim_pre, maxval=lim_pre, dtype=jnp.float32)
    bpre = jax.random.uniform(k_bpre, (1, N_QUBITS),
                              minval=-lim_pre, maxval=lim_pre, dtype=jnp.float32)
    qp = (Q_DELTA * jax.random.normal(k_qp, (1, Q_DEPTH * N_QUBITS))).astype(jnp.float32)
    wpost_t = jax.random.uniform(k_wpost, (N_QUBITS, NUM_CLASSES),
                                 minval=-lim_post, maxval=lim_post, dtype=jnp.float32)
    bpost = jax.random.uniform(k_bpost, (1, NUM_CLASSES),
                               minval=-lim_post, maxval=lim_post, dtype=jnp.float32)
    params = (wpre_t, bpre, qp, wpost_t, bpost)

    s_in_t_np, s_w_t_np, z_mat_np = build_circuit_tables()
    tables = (jnp.asarray(s_in_t_np), jnp.asarray(s_w_t_np), jnp.asarray(z_mat_np))

    prepared = prepare_params(params, tables)

    # 1) small demo batch, default optimized path (cos-only identity, chunked).
    out = jax.block_until_ready(dressed_quantum_net(x, prepared))
    ref = reference_forward(x, params, tables)
    np.testing.assert_allclose(np.asarray(out), np.asarray(ref), rtol=1e-4, atol=1e-4)
    assert out.shape == (batch, NUM_CLASSES) and out.dtype == jnp.float32

    # 2) literal cos^2 + sin^2 variant (exact statevector-phase simulation).
    out_exact = jax.block_until_ready(dressed_quantum_net(x, prepared, compute_sin=True))
    np.testing.assert_allclose(np.asarray(out_exact), np.asarray(ref), rtol=1e-4, atol=1e-4)

    # 3) multi-step grid + batch padding (20 rows, tb=8 -> grid (3,)).
    batch2 = 20
    x2 = jax.random.normal(jax.random.PRNGKey(1), (batch2, IN_FEATURES), dtype=jnp.float32)
    ref2 = reference_forward(x2, params, tables)
    out2 = jax.block_until_ready(dressed_quantum_net(x2, prepared, tb=8))
    np.testing.assert_allclose(np.asarray(out2), np.asarray(ref2), rtol=1e-4, atol=1e-4)
    assert out2.shape == (batch2, NUM_CLASSES)

    # 4) default tile heuristic (tb=16 -> grid (2,), exercises 2-core sharding path).
    out3 = jax.block_until_ready(dressed_quantum_net(x2, prepared))
    np.testing.assert_allclose(np.asarray(out3), np.asarray(ref2), rtol=1e-4, atol=1e-4)

    # 5) explicit diagonal-circuit fast path (constant broadcast), same answer.
    fast = jax.block_until_ready(diagonal_circuit_fastpath(x2, prepared))
    np.testing.assert_allclose(np.asarray(fast), np.asarray(ref2), rtol=1e-4, atol=1e-4)

    print("KERNEL_OK")
</pallas_src>

<mosaic_0001>
module attributes {stable_mosaic.version = 11 : i64} {
  func.func @dressed_quantum_kernel(%arg0: i32, %arg1: memref<8x512xf32, #tpu.memory_space<vmem>>, %arg2: memref<512x16xf32, #tpu.memory_space<vmem>>, %arg3: memref<1x16xf32, #tpu.memory_space<vmem>>, %arg4: memref<16x4096xf32, #tpu.memory_space<vmem>>, %arg5: memref<4096x256xf32, #tpu.memory_space<vmem>>, %arg6: memref<1x256xf32, #tpu.memory_space<vmem>>, %arg7: memref<8x256xf32, #tpu.memory_space<vmem>>, %arg8: memref<8x256xf32, #tpu.memory_space<vmem>>) attributes {dimension_semantics = [#tpu.dimension_semantics<parallel>], iteration_bounds = array<i64: 1>, scalar_prefetch = 0 : i64, scratch_operands = 1 : i64, tpu.core_type = #tpu.core_type<tc>, window_params = [{transform_indices = @transform_0, window_bounds = array<i64: 8, 512>}, {pipeline_mode = #tpu.pipeline_mode<synchronous>, transform_indices = @transform_1, window_bounds = array<i64: 512, 16>}, {pipeline_mode = #tpu.pipeline_mode<synchronous>, transform_indices = @transform_2, window_bounds = array<i64: 1, 16>}, {pipeline_mode = #tpu.pipeline_mode<synchronous>, transform_indices = @transform_3, window_bounds = array<i64: 16, 4096>}, {pipeline_mode = #tpu.pipeline_mode<synchronous>, transform_indices = @transform_4, window_bounds = array<i64: 4096, 256>}, {pipeline_mode = #tpu.pipeline_mode<synchronous>, transform_indices = @transform_5, window_bounds = array<i64: 1, 256>}, {transform_indices = @transform_6, window_bounds = array<i64: 8, 256>}]} {
    %c0 = arith.constant 0 : index
    %c0_0 = arith.constant 0 : index
    %0 = vector.load %arg1[%c0, %c0_0] : memref<8x512xf32, #tpu.memory_space<vmem>>, vector<8x512xf32>
    %c0_1 = arith.constant 0 : index
    %c0_2 = arith.constant 0 : index
    %1 = vector.load %arg2[%c0_1, %c0_2] : memref<512x16xf32, #tpu.memory_space<vmem>>, vector<512x16xf32>
    %cst = arith.constant dense<0.000000e+00> : vector<8x16xf32>
    %2 = tpu.matmul %0, %1, %cst {dimension_numbers = #tpu.dot_dimension_numbers<[1], [0], [0], [1], [0, 0, 1, 1], [], []>} : vector<8x512xf32>, vector<512x16xf32>, vector<8x16xf32> -> vector<8x16xf32>
    %c0_3 = arith.constant 0 : index
    %c0_4 = arith.constant 0 : index
    %3 = vector.load %arg3[%c0_3, %c0_4] : memref<1x16xf32, #tpu.memory_space<vmem>>, vector<1x16xf32>
    %4 = vector.broadcast %3 : vector<1x16xf32> to vector<8x16xf32>
    %5 = arith.addf %2, %4 : vector<8x16xf32>
    %6 = math.tanh %5 : vector<8x16xf32>
    %cst_5 = arith.constant 0.785398185 : f32
    %7 = vector.broadcast %cst_5 : f32 to vector<8x16xf32>
    %8 = arith.mulf %6, %7 : vector<8x16xf32>
    %9 = tpu.iota {dimensions = array<i32: 1>} : vector<1x16xi32>
    %c12_i32 = arith.constant 12 : i32
    %10 = vector.broadcast %c12_i32 : i32 to vector<1x16xi32>
    %11 = arith.cmpi eq, %9, %10 : vector<1x16xi32>
    %12 = arith.extui %11 : vector<1x16xi1> to vector<1x16xi32>
    %13 = arith.sitofp %12 : vector<1x16xi32> to vector<1x16xf32>
    %14 = vector.broadcast %13 : vector<1x16xf32> to vector<8x16xf32>
    %15 = arith.addf %8, %14 : vector<8x16xf32>
    %cst_6 = arith.constant 0.000000e+00 : f32
    %16 = vector.broadcast %cst_6 : f32 to vector<8x256xf32>
    %c0_7 = arith.constant 0 : index
    %c0_8 = arith.constant 0 : index
    %17 = vector.load %arg8[%c0_7, %c0_8] : memref<8x256xf32, #tpu.memory_space<vmem>>, vector<8x256xf32>
    tpu.vector_store %arg8[%c0_7, %c0_8], %16 {strides = array<i32>} : memref<8x256xf32, #tpu.memory_space<vmem>>, vector<8x256xf32>,
    %c0_9 = arith.constant 0 : index
    %c0_10 = arith.constant 0 : index
    %18 = vector.load %arg4[%c0_9, %c0_10] : memref<16x4096xf32, #tpu.memory_space<vmem>>, vector<16x512xf32>
    %c0_11 = arith.constant 0 : index
    %c0_12 = arith.constant 0 : index
    %19 = vector.load %arg5[%c0_11, %c0_12] : memref<4096x256xf32, #tpu.memory_space<vmem>>, vector<512x256xf32>
    %cst_13 = arith.constant dense<0.000000e+00> : vector<8x512xf32>
    %20 = tpu.matmul %15, %18, %cst_13 {dimension_numbers = #tpu.dot_dimension_numbers<[1], [0], [0], [1], [0, 0, 1, 1], [], []>} : vector<8x16xf32>, vector<16x512xf32>, vector<8x512xf32> -> vector<8x512xf32>
    %21 = math.cos %20 : vector<8x512xf32>
    %22 = arith.mulf %21, %21 : vector<8x512xf32>
    %cst_14 = arith.constant 1.000000e+00 : f32
    %23 = vector.broadcast %cst_14 : f32 to vector<8x512xf32>
    %24 = arith.subf %23, %22 : vector<8x512xf32>
    %25 = arith.addf %22, %24 : vector<8x512xf32>
    %c0_15 = arith.constant 0 : index
    %c0_16 = arith.constant 0 : index
    %26 = vector.load %arg8[%c0_15, %c0_16] : memref<8x256xf32, #tpu.memory_space<vmem>>, vector<8x256xf32>
    %cst_17 = arith.constant dense<0.000000e+00> : vector<8x256xf32>
    %27 = tpu.matmul %25, %19, %cst_17 {dimension_numbers = #tpu.dot_dimension_numbers<[1], [0], [0], [1], [0, 0, 1, 1], [], []>} : vector<8x512xf32>, vector<512x256xf32>, vector<8x256xf32> -> vector<8x256xf32>
    %28 = arith.addf %26, %27 : vector<8x256xf32>
    %c0_18 = arith.constant 0 : index
    %c0_19 = arith.constant 0 : index
    %29 = vector.load %arg8[%c0_18, %c0_19] : memref<8x256xf32, #tpu.memory_space<vmem>>, vector<8x256xf32>
    tpu.vector_store %arg8[%c0_18, %c0_19], %28 {strides = array<i32>} : memref<8x256xf32, #tpu.memory_space<vmem>>, vector<8x256xf32>,
    %c0_20 = arith.constant 0 : index
    %c512 = arith.constant 512 : index
    %30 = vector.load %arg4[%c0_20, %c512] : memref<16x4096xf32, #tpu.memory_space<vmem>>, vector<16x512xf32>
    %c512_21 = arith.constant 512 : index
    %c0_22 = arith.constant 0 : index
    %31 = vector.load %arg5[%c512_21, %c0_22] : memref<4096x256xf32, #tpu.memory_space<vmem>>, vector<512x256xf32>
    %cst_23 = arith.constant dense<0.000000e+00> : vector<8x512xf32>
    %32 = tpu.matmul %15, %30, %cst_23 {dimension_numbers = #tpu.dot_dimension_numbers<[1], [0], [0], [1], [0, 0, 1, 1], [], []>} : vector<8x16xf32>, vector<16x512xf32>, vector<8x512xf32> -> vector<8x512xf32>
    %33 = math.cos %32 : vector<8x512xf32>
    %34 = arith.mulf %33, %33 : vector<8x512xf32>
    %cst_24 = arith.constant 1.000000e+00 : f32
    %35 = vector.broadcast %cst_24 : f32 to vector<8x512xf32>
    %36 = arith.subf %35, %34 : vector<8x512xf32>
    %37 = arith.addf %34, %36 : vector<8x512xf32>
    %c0_25 = arith.constant 0 : index
    %c0_26 = arith.constant 0 : index
    %38 = vector.load %arg8[%c0_25, %c0_26] : memref<8x256xf32, #tpu.memory_space<vmem>>, vector<8x256xf32>
    %cst_27 = arith.constant dense<0.000000e+00> : vector<8x256xf32>
    %39 = tpu.matmul %37, %31, %cst_27 {dimension_numbers = #tpu.dot_dimension_numbers<[1], [0], [0], [1], [0, 0, 1, 1], [], []>} : vector<8x512xf32>, vector<512x256xf32>, vector<8x256xf32> -> vector<8x256xf32>
    %40 = arith.addf %38, %39 : vector<8x256xf32>
    %c0_28 = arith.constant 0 : index
    %c0_29 = arith.constant 0 : index
    %41 = vector.load %arg8[%c0_28, %c0_29] : memref<8x256xf32, #tpu.memory_space<vmem>>, vector<8x256xf32>
    tpu.vector_store %arg8[%c0_28, %c0_29], %40 {strides = array<i32>} : memref<8x256xf32, #tpu.memory_space<vmem>>, vector<8x256xf32>,
    %c0_30 = arith.constant 0 : index
    %c1024 = arith.constant 1024 : index
    %42 = vector.load %arg4[%c0_30, %c1024] : memref<16x4096xf32, #tpu.memory_space<vmem>>, vector<16x512xf32>
    %c1024_31 = arith.constant 1024 : index
    %c0_32 = arith.constant 0 : index
    %43 = vector.load %arg5[%c1024_31, %c0_32] : memref<4096x256xf32, #tpu.memory_space<vmem>>, vector<512x256xf32>
    %cst_33 = arith.constant dense<0.000000e+00> : vector<8x512xf32>
    %44 = tpu.matmul %15, %42, %cst_33 {dimension_numbers = #tpu.dot_dimension_numbers<[1], [0], [0], [1], [0, 0, 1, 1], [], []>} : vector<8x16xf32>, vector<16x512xf32>, vector<8x512xf32> -> vector<8x512xf32>
    %45 = math.cos %44 : vector<8x512xf32>
    %46 = arith.mulf %45, %45 : vector<8x512xf32>
    %cst_34 = arith.constant 1.000000e+00 : f32
    %47 = vector.broadcast %cst_34 : f32 to vector<8x512xf32>
    %48 = arith.subf %47, %46 : vector<8x512xf32>
    %49 = arith.addf %46, %48 : vector<8x512xf32>
    %c0_35 = arith.constant 0 : index
    %c0_36 = arith.constant 0 : index
    %50 = vector.load %arg8[%c0_35, %c0_36] : memref<8x256xf32, #tpu.memory_space<vmem>>, vector<8x256xf32>
    %cst_37 = arith.constant dense<0.000000e+00> : vector<8x256xf32>
    %51 = tpu.matmul %49, %43, %cst_37 {dimension_numbers = #tpu.dot_dimension_numbers<[1], [0], [0], [1], [0, 0, 1, 1], [], []>} : vector<8x512xf32>, vector<512x256xf32>, vector<8x256xf32> -> vector<8x256xf32>
    %52 = arith.addf %50, %51 : vector<8x256xf32>
    %c0_38 = arith.constant 0 : index
    %c0_39 = arith.constant 0 : index
    %53 = vector.load %arg8[%c0_38, %c0_39] : memref<8x256xf32, #tpu.memory_space<vmem>>, vector<8x256xf32>
    tpu.vector_store %arg8[%c0_38, %c0_39], %52 {strides = array<i32>} : memref<8x256xf32, #tpu.memory_space<vmem>>, vector<8x256xf32>,
    %c0_40 = arith.constant 0 : index
    %c1536 = arith.constant 1536 : index
    %54 = vector.load %arg4[%c0_40, %c1536] : memref<16x4096xf32, #tpu.memory_space<vmem>>, vector<16x512xf32>
    %c1536_41 = arith.constant 1536 : index
    %c0_42 = arith.constant 0 : index
    %55 = vector.load %arg5[%c1536_41, %c0_42] : memref<4096x256xf32, #tpu.memory_space<vmem>>, vector<512x256xf32>
    %cst_43 = arith.constant dense<0.000000e+00> : vector<8x512xf32>
    %56 = tpu.matmul %15, %54, %cst_43 {dimension_numbers = #tpu.dot_dimension_numbers<[1], [0], [0], [1], [0, 0, 1, 1], [], []>} : vector<8x16xf32>, vector<16x512xf32>, vector<8x512xf32> -> vector<8x512xf32>
    %57 = math.cos %56 : vector<8x512xf32>
    %58 = arith.mulf %57, %57 : vector<8x512xf32>
    %cst_44 = arith.constant 1.000000e+00 : f32
    %59 = vector.broadcast %cst_44 : f32 to vector<8x512xf32>
    %60 = arith.subf %59, %58 : vector<8x512xf32>
    %61 = arith.addf %58, %60 : vector<8x512xf32>
    %c0_45 = arith.constant 0 : index
    %c0_46 = arith.constant 0 : index
    %62 = vector.load %arg8[%c0_45, %c0_46] : memref<8x256xf32, #tpu.memory_space<vmem>>, vector<8x256xf32>
    %cst_47 = arith.constant dense<0.000000e+00> : vector<8x256xf32>
    %63 = tpu.matmul %61, %55, %cst_47 {dimension_numbers = #tpu.dot_dimension_numbers<[1], [0], [0], [1], [0, 0, 1, 1], [], []>} : vector<8x512xf32>, vector<512x256xf32>, vector<8x256xf32> -> vector<8x256xf32>
    %64 = arith.addf %62, %63 : vector<8x256xf32>
    %c0_48 = arith.constant 0 : index
    %c0_49 = arith.constant 0 : index
    %65 = vector.load %arg8[%c0_48, %c0_49] : memref<8x256xf32, #tpu.memory_space<vmem>>, vector<8x256xf32>
    tpu.vector_store %arg8[%c0_48, %c0_49], %64 {strides = array<i32>} : memref<8x256xf32, #tpu.memory_space<vmem>>, vector<8x256xf32>,
    %c0_50 = arith.constant 0 : index
    %c2048 = arith.constant 2048 : index
    %66 = vector.load %arg4[%c0_50, %c2048] : memref<16x4096xf32, #tpu.memory_space<vmem>>, vector<16x512xf32>
    %c2048_51 = arith.constant 2048 : index
    %c0_52 = arith.constant 0 : index
    %67 = vector.load %arg5[%c2048_51, %c0_52] : memref<4096x256xf32, #tpu.memory_space<vmem>>, vector<512x256xf32>
    %cst_53 = arith.constant dense<0.000000e+00> : vector<8x512xf32>
    %68 = tpu.matmul %15, %66, %cst_53 {dimension_numbers = #tpu.dot_dimension_numbers<[1], [0], [0], [1], [0, 0, 1, 1], [], []>} : vector<8x16xf32>, vector<16x512xf32>, vector<8x512xf32> -> vector<8x512xf32>
    %69 = math.cos %68 : vector<8x512xf32>
    %70 = arith.mulf %69, %69 : vector<8x512xf32>
    %cst_54 = arith.constant 1.000000e+00 : f32
    %71 = vector.broadcast %cst_54 : f32 to vector<8x512xf32>
    %72 = arith.subf %71, %70 : vector<8x512xf32>
    %73 = arith.addf %70, %72 : vector<8x512xf32>
    %c0_55 = arith.constant 0 : index
    %c0_56 = arith.constant 0 : index
    %74 = vector.load %arg8[%c0_55, %c0_56] : memref<8x256xf32, #tpu.memory_space<vmem>>, vector<8x256xf32>
    %cst_57 = arith.constant dense<0.000000e+00> : vector<8x256xf32>
    %75 = tpu.matmul %73, %67, %cst_57 {dimension_numbers = #tpu.dot_dimension_numbers<[1], [0], [0], [1], [0, 0, 1, 1], [], []>} : vector<8x512xf32>, vector<512x256xf32>, vector<8x256xf32> -> vector<8x256xf32>
    %76 = arith.addf %74, %75 : vector<8x256xf32>
    %c0_58 = arith.constant 0 : index
    %c0_59 = arith.constant 0 : index
    %77 = vector.load %arg8[%c0_58, %c0_59] : memref<8x256xf32, #tpu.memory_space<vmem>>, vector<8x256xf32>
    tpu.vector_store %arg8[%c0_58, %c0_59], %76 {strides = array<i32>} : memref<8x256xf32, #tpu.memory_space<vmem>>, vector<8x256xf32>,
    %c0_60 = arith.constant 0 : index
    %c2560 = arith.constant 2560 : index
    %78 = vector.load %arg4[%c0_60, %c2560] : memref<16x4096xf32, #tpu.memory_space<vmem>>, vector<16x512xf32>
    %c2560_61 = arith.constant 2560 : index
    %c0_62 = arith.constant 0 : index
    %79 = vector.load %arg5[%c2560_61, %c0_62] : memref<4096x256xf32, #tpu.memory_space<vmem>>, vector<512x256xf32>
    %cst_63 = arith.constant dense<0.000000e+00> : vector<8x512xf32>
    %80 = tpu.matmul %15, %78, %cst_63 {dimension_numbers = #tpu.dot_dimension_numbers<[1], [0], [0], [1], [0, 0, 1, 1], [], []>} : vector<8x16xf32>, vector<16x512xf32>, vector<8x512xf32> -> vector<8x512xf32>
    %81 = math.cos %80 : vector<8x512xf32>
    %82 = arith.mulf %81, %81 : vector<8x512xf32>
    %cst_64 = arith.constant 1.000000e+00 : f32
    %83 = vector.broadcast %cst_64 : f32 to vector<8x512xf32>
    %84 = arith.subf %83, %82 : vector<8x512xf32>
    %85 = arith.addf %82, %84 : vector<8x512xf32>
    %c0_65 = arith.constant 0 : index
    %c0_66 = arith.constant 0 : index
    %86 = vector.load %arg8[%c0_65, %c0_66] : memref<8x256xf32, #tpu.memory_space<vmem>>, vector<8x256xf32>
    %cst_67 = arith.constant dense<0.000000e+00> : vector<8x256xf32>
    %87 = tpu.matmul %85, %79, %cst_67 {dimension_numbers = #tpu.dot_dimension_numbers<[1], [0], [0], [1], [0, 0, 1, 1], [], []>} : vector<8x512xf32>, vector<512x256xf32>, vector<8x256xf32> -> vector<8x256xf32>
    %88 = arith.addf %86, %87 : vector<8x256xf32>
    %c0_68 = arith.constant 0 : index
    %c0_69 = arith.constant 0 : index
    %89 = vector.load %arg8[%c0_68, %c0_69] : memref<8x256xf32, #tpu.memory_space<vmem>>, vector<8x256xf32>
    tpu.vector_store %arg8[%c0_68, %c0_69], %88 {strides = array<i32>} : memref<8x256xf32, #tpu.memory_space<vmem>>, vector<8x256xf32>,
    %c0_70 = arith.constant 0 : index
    %c3072 = arith.constant 3072 : index
    %90 = vector.load %arg4[%c0_70, %c3072] : memref<16x4096xf32, #tpu.memory_space<vmem>>, vector<16x512xf32>
    %c3072_71 = arith.constant 3072 : index
    %c0_72 = arith.constant 0 : index
    %91 = vector.load %arg5[%c3072_71, %c0_72] : memref<4096x256xf32, #tpu.memory_space<vmem>>, vector<512x256xf32>
    %cst_73 = arith.constant dense<0.000000e+00> : vector<8x512xf32>
    %92 = tpu.matmul %15, %90, %cst_73 {dimension_numbers = #tpu.dot_dimension_numbers<[1], [0], [0], [1], [0, 0, 1, 1], [], []>} : vector<8x16xf32>, vector<16x512xf32>, vector<8x512xf32> -> vector<8x512xf32>
    %93 = math.cos %92 : vector<8x512xf32>
    %94 = arith.mulf %93, %93 : vector<8x512xf32>
    %cst_74 = arith.constant 1.000000e+00 : f32
    %95 = vector.broadcast %cst_74 : f32 to vector<8x512xf32>
    %96 = arith.subf %95, %94 : vector<8x512xf32>
    %97 = arith.addf %94, %96 : vector<8x512xf32>
    %c0_75 = arith.constant 0 : index
    %c0_76 = arith.constant 0 : index
    %98 = vector.load %arg8[%c0_75, %c0_76] : memref<8x256xf32, #tpu.memory_space<vmem>>, vector<8x256xf32>
    %cst_77 = arith.constant dense<0.000000e+00> : vector<8x256xf32>
    %99 = tpu.matmul %97, %91, %cst_77 {dimension_numbers = #tpu.dot_dimension_numbers<[1], [0], [0], [1], [0, 0, 1, 1], [], []>} : vector<8x512xf32>, vector<512x256xf32>, vector<8x256xf32> -> vector<8x256xf32>
    %100 = arith.addf %98, %99 : vector<8x256xf32>
    %c0_78 = arith.constant 0 : index
    %c0_79 = arith.constant 0 : index
    %101 = vector.load %arg8[%c0_78, %c0_79] : memref<8x256xf32, #tpu.memory_space<vmem>>, vector<8x256xf32>
    tpu.vector_store %arg8[%c0_78, %c0_79], %100 {strides = array<i32>} : memref<8x256xf32, #tpu.memory_space<vmem>>, vector<8x256xf32>,
    %c0_80 = arith.constant 0 : index
    %c3584 = arith.constant 3584 : index
    %102 = vector.load %arg4[%c0_80, %c3584] : memref<16x4096xf32, #tpu.memory_space<vmem>>, vector<16x512xf32>
    %c3584_81 = arith.constant 3584 : index
    %c0_82 = arith.constant 0 : index
    %103 = vector.load %arg5[%c3584_81, %c0_82] : memref<4096x256xf32, #tpu.memory_space<vmem>>, vector<512x256xf32>
    %cst_83 = arith.constant dense<0.000000e+00> : vector<8x512xf32>
    %104 = tpu.matmul %15, %102, %cst_83 {dimension_numbers = #tpu.dot_dimension_numbers<[1], [0], [0], [1], [0, 0, 1, 1], [], []>} : vector<8x16xf32>, vector<16x512xf32>, vector<8x512xf32> -> vector<8x512xf32>
    %105 = math.cos %104 : vector<8x512xf32>
    %106 = arith.mulf %105, %105 : vector<8x512xf32>
    %cst_84 = arith.constant 1.000000e+00 : f32
    %107 = vector.broadcast %cst_84 : f32 to vector<8x512xf32>
    %108 = arith.subf %107, %106 : vector<8x512xf32>
    %109 = arith.addf %106, %108 : vector<8x512xf32>
    %c0_85 = arith.constant 0 : index
    %c0_86 = arith.constant 0 : index
    %110 = vector.load %arg8[%c0_85, %c0_86] : memref<8x256xf32, #tpu.memory_space<vmem>>, vector<8x256xf32>
    %cst_87 = arith.constant dense<0.000000e+00> : vector<8x256xf32>
    %111 = tpu.matmul %109, %103, %cst_87 {dimension_numbers = #tpu.dot_dimension_numbers<[1], [0], [0], [1], [0, 0, 1, 1], [], []>} : vector<8x512xf32>, vector<512x256xf32>, vector<8x256xf32> -> vector<8x256xf32>
    %112 = arith.addf %110, %111 : vector<8x256xf32>
    %c0_88 = arith.constant 0 : index
    %c0_89 = arith.constant 0 : index
    %113 = vector.load %arg8[%c0_88, %c0_89] : memref<8x256xf32, #tpu.memory_space<vmem>>, vector<8x256xf32>
    tpu.vector_store %arg8[%c0_88, %c0_89], %112 {strides = array<i32>} : memref<8x256xf32, #tpu.memory_space<vmem>>, vector<8x256xf32>,
    %c0_90 = arith.constant 0 : index
    %c0_91 = arith.constant 0 : index
    %114 = vector.load %arg8[%c0_90, %c0_91] : memref<8x256xf32, #tpu.memory_space<vmem>>, vector<8x256xf32>
    %c0_92 = arith.constant 0 : index
    %c0_93 = arith.constant 0 : index
    %115 = vector.load %arg6[%c0_92, %c0_93] : memref<1x256xf32, #tpu.memory_space<vmem>>, vector<1x256xf32>
    %116 = vector.broadcast %115 : vector<1x256xf32> to vector<8x256xf32>
    %117 = arith.addf %114, %116 : vector<8x256xf32>
    %c0_94 = arith.constant 0 : index
    %c0_95 = arith.constant 0 : index
    %118 = vector.load %arg7[%c0_94, %c0_95] : memref<8x256xf32, #tpu.memory_space<vmem>>, vector<8x256xf32>
    tpu.vector_store %arg7[%c0_94, %c0_95], %117 {strides = array<i32>} : memref<8x256xf32, #tpu.memory_space<vmem>>, vector<8x256xf32>,
    return
  }
  func.func @transform_0(%arg0: i32) -> (i32, i32) {
    %c0_i32 = arith.constant 0 : i32
    %c0_i32_0 = arith.constant 0 : i32
    return %arg0, %c0_i32 : i32, i32
  }
  func.func @transform_1(%arg0: i32) -> (i32, i32) {
    %c0_i32 = arith.constant 0 : i32
    %c0_i32_0 = arith.constant 0 : i32
    %c0_i32_1 = arith.constant 0 : i32
    return %c0_i32, %c0_i32_0 : i32, i32
  }
  func.func @transform_2(%arg0: i32) -> (i32, i32) {
    %c0_i32 = arith.constant 0 : i32
    %c0_i32_0 = arith.constant 0 : i32
    %c0_i32_1 = arith.constant 0 : i32
    return %c0_i32, %c0_i32_0 : i32, i32
  }
  func.func @transform_3(%arg0: i32) -> (i32, i32) {
    %c0_i32 = arith.constant 0 : i32
    %c0_i32_0 = arith.constant 0 : i32
    %c0_i32_1 = arith.constant 0 : i32
    return %c0_i32, %c0_i32_0 : i32, i32
  }
  func.func @transform_4(%arg0: i32) -> (i32, i32) {
    %c0_i32 = arith.constant 0 : i32
    %c0_i32_0 = arith.constant 0 : i32
    %c0_i32_1 = arith.constant 0 : i32
    return %c0_i32, %c0_i32_0 : i32, i32
  }
  func.func @transform_5(%arg0: i32) -> (i32, i32) {
    %c0_i32 = arith.constant 0 : i32
    %c0_i32_0 = arith.constant 0 : i32
    %c0_i32_1 = arith.constant 0 : i32
    return %c0_i32, %c0_i32_0 : i32, i32
  }
  func.func @transform_6(%arg0: i32) -> (i32, i32) {
    %c0_i32 = arith.constant 0 : i32
    %c0_i32_0 = arith.constant 0 : i32
    return %arg0, %c0_i32 : i32, i32
  }
}

</mosaic_0001>

<bundles_post_ra>
// kernel: tpu_custom_call.1
= control target key start
LH: loop header
LB: loop body
LE: loop exit
PB: predicated region body
PF: predicated region fallthrough
CT: control target
= control target key end

     0   :  { %11 = vsyncpa [#allocation4], 0  ;;  %s13424_s0 = inlined_call_operand.hbm [shape: f32[8,512], index: 0, kind: input, shape index: {}]   ;;  %s13425_s1 = inlined_call_operand.vmem [shape: f32[512,16], index: 1, kind: input, shape index: {}]   ;;  %s13426_s2 = inlined_call_operand.hbm [shape: f32[1,16], index: 2, kind: input, shape index: {}]   ;;  %s13427_s3 = inlined_call_operand.hbm [shape: f32[16,4096], index: 3, kind: input, shape index: {}]   ;;  %s13428_s4 = inlined_call_operand.hbm [shape: f32[4096,256], index: 4, kind: input, shape index: {}]   ;;  %s13429_s5 = inlined_call_operand.hbm [shape: f32[1,256], index: 5, kind: input, shape index: {}]   ;;  %s13430_s6 = inlined_call_operand.hbm [shape: f32[8,256], index: 6, kind: output, shape index: {}]  }
   0x1   :  { %12 = vsyncpa [#allocation7], 0 }
   0x2   :  { %13 = vsyncpa [#allocation10], 0  ;;  %s33_s23 = sshll.u32 %s13426_s2, 4  ;;  %s34_s23 = int_to_ptr.hbm [resolvable:$true] %s33_s23 }
   0x3   :  { %14 = vsyncpa [#allocation5], 0  ;;  %s8674_s24 = smov [#allocation6]   ;;  %s56_s28 = sshll.u32 %s13428_s4, 4  ;;  %s57_s28 = int_to_ptr.hbm [resolvable:$true] %s56_s28 }
   0x4   :  { %s35_s25 = sshll.u32 %s8674_s24, 4  ;;  %s8675_s29 = smov [#allocation9]   ;;  %s36_s25 = int_to_ptr.vmem [resolvable:$true] %s35_s25 }
   0x5   :  { %38 = dma.hbm_to_vmem [thread:$0]  %s34_s23, 16, %s36_s25, [#allocation7]  }
   0x6   :  { %s58_s30 = sshll.u32 %s8675_s29, 4  ;;  %s8676_s7 = smov 256   ;;  %s59_s30 = int_to_ptr.vmem [resolvable:$true] %s58_s30 }
   0x7   :  { %s8677_s8 = smov 16   ;;  %s20_s2 = sshll.u32 %s13424_s0, 4  ;;  %s21_s2 = int_to_ptr.hbm [resolvable:$true] %s20_s2 }
   0x8   :  { %64 = dma.hbm_to_vmem [thread:$0]  %s57_s28, 131072, %s59_s30, [#allocation10], %s8676_s7, %s8676_s7, %s8677_s8  }
   0x9   :  { %s8678_s11 = smov [#allocation3]   ;;  %s43_s15 = sshll.u32 %s13427_s3, 4  ;;  %s44_s15 = int_to_ptr.hbm [resolvable:$true] %s43_s15 }
   0xa   :  { %s22_s12 = sshll.u32 %s8678_s11, 4  ;;  %s8679_s4 = smov [#allocation8]   ;;  %s23_s12 = int_to_ptr.vmem [resolvable:$true] %s22_s12 }
   0xb   :  { %25 = dma.hbm_to_vmem [thread:$0]  %s21_s2, 512, %s23_s12, [#allocation4]  }
   0xc   :  { %s45_s16 = sshll.u32 %s8679_s4, 4  ;;  %s70_s19 = sshll.u32 %s13429_s5, 4  ;;  %s46_s16 = int_to_ptr.vmem [resolvable:$true] %s45_s16  ;;  %s71_s19 = int_to_ptr.hbm [resolvable:$true] %s70_s19 }
   0xd   :  { %s8680_s20 = smov 4096   ;;  %s8681_s0 = smov [#allocation11]  }
   0xe   :  { %51 = dma.hbm_to_vmem [thread:$0]  %s44_s15, 8192, %s46_s16, [#allocation7], %s8680_s20, %s8680_s20, %s8676_s7  }
   0xf   :  { %s72_s21 = sshll.u32 %s8681_s0, 4  ;;  %s73_s21 = int_to_ptr.vmem [resolvable:$true] %s72_s21 }
  0x10   :  { %75 = dma.hbm_to_vmem [thread:$0]  %s71_s19, 32, %s73_s21, [#allocation10]  }
  0x11   :  { %8666 = dma.done.wait [#allocation4], 512  }
  0x12   :  { %8667 = vsyncadd [#allocation4], 4294966784 }
  0x13   :  { %8668 = dma.done.wait [#allocation7], 8208  }
  0x14   :  { %8669 = vsyncadd [#allocation7], 4294959088 }
  0x15   :  { %8670 = dma.done.wait [#allocation10], 131104  }
  0x16   :  { %8671 = vsyncadd [#allocation10], 4294836192  ;;  %v147_v0 = vld [vmem:[%s13425_s1 + $0x178] sm:$0xff]  ;;  %v146_v2 = vld [vmem:[%s13425_s1 + $0x170] sm:$0xff]  ;;  %vm394_vm1 = vcmask 130048   ;;  %s8361_s2 = sshll.u32 %s13430_s6, 4  ;;  %s8362_s2 = int_to_ptr.hbm [resolvable:$true] %s8361_s2 }
  0x17   :  { %v115_v1 = vld [vmem:[%s13425_s1 + $0x78] sm:$0xff]  ;;  %208 = vmatpush.msra.mxu2 %v147_v0  ;;  %v114_v4 = vld [vmem:[%s13425_s1 + $0x70] sm:$0xff]  ;;  %v145_v6 = vld [vmem:[%s13425_s1 + $0x168] sm:$0xff] }
  0x18   :  { %168 = vmatpush.msra.mxu0 %v115_v1  ;;  %v163_v3 = vld [vmem:[%s13425_s1 + $0x1f8] sm:$0xff]  ;;  %v162_v7 = vld [vmem:[%s13425_s1 + $0x1f0] sm:$0xff]  ;;  %v113_v8 = vld [vmem:[%s13425_s1 + $0x68] sm:$0xff] }
  0x19   :  { %v131_v5 = vld [vmem:[%s13425_s1 + $0xf8] sm:$0xff]  ;;  %228 = vmatpush.msra.mxu3 %v163_v3  ;;  %209 = vmatpush.msra.mxu2 %v146_v2  ;;  %v130_v9 = vld [vmem:[%s13425_s1 + $0xf0] sm:$0xff]  ;;  %v161_v10 = vld [vmem:[%s13425_s1 + $0x1e8] sm:$0xff] }
  0x1a   :  { %188 = vmatpush.msra.mxu1 %v131_v5  ;;  %169 = vmatpush.msra.mxu0 %v114_v4  ;;  %v144_v11 = vld [vmem:[%s13425_s1 + $0x160] sm:$0xff]  ;;  %v129_v13 = vld [vmem:[%s13425_s1 + $0xe8] sm:$0xff]  ;;  %v143_v16 = vld [vmem:[%s13425_s1 + $0x158] sm:$0xff] }
  0x1b   :  { %229 = vmatpush.msra.mxu3 %v162_v7  ;;  %v112_v12 = vld [vmem:[%s13425_s1 + $0x60] sm:$0xff]  ;;  %210 = vmatpush.msra.mxu2 %v145_v6  ;;  %v111_v17 = vld [vmem:[%s13425_s1 + $0x58] sm:$0xff]  ;;  %v142_v20 = vld [vmem:[%s13425_s1 + $0x150] sm:$0xff] }
  0x1c   :  { %189 = vmatpush.msra.mxu1 %v130_v9  ;;  %170 = vmatpush.msra.mxu0 %v113_v8  ;;  %v160_v14 = vld [vmem:[%s13425_s1 + $0x1e0] sm:$0xff]  ;;  %v159_v18 = vld [vmem:[%s13425_s1 + $0x1d8] sm:$0xff]  ;;  %v110_v21 = vld [vmem:[%s13425_s1 + $0x50] sm:$0xff] }
  0x1d   :  { %v128_v15 = vld [vmem:[%s13425_s1 + $0xe0] sm:$0xff]  ;;  %230 = vmatpush.msra.mxu3 %v161_v10  ;;  %211 = vmatpush.msra.mxu2 %v144_v11  ;;  %v127_v19 = vld [vmem:[%s13425_s1 + $0xd8] sm:$0xff]  ;;  %v158_v22 = vld [vmem:[%s13425_s1 + $0x1d0] sm:$0xff] }
  0x1e   :  { %190 = vmatpush.msra.mxu1 %v129_v13  ;;  %171 = vmatpush.msra.mxu0 %v112_v12  ;;  %v126_v23 = vld [vmem:[%s13425_s1 + $0xd0] sm:$0xff]  ;;  %v141_v24 = vld [vmem:[%s13425_s1 + $0x148] sm:$0xff]  ;;  %v140_v28 = vld [vmem:[%s13425_s1 + $0x140] sm:$0xff] }
  0x1f   :  { %231 = vmatpush.msra.mxu3 %v160_v14  ;;  %212 = vmatpush.msra.mxu2 %v143_v16  ;;  %v109_v25 = vld [vmem:[%s13425_s1 + $0x48] sm:$0xff]  ;;  %v108_v29 = vld [vmem:[%s13425_s1 + $0x40] sm:$0xff]  ;;  %v139_v32 = vld [vmem:[%s13425_s1 + $0x138] sm:$0xff] }
  0x20   :  { %191 = vmatpush.msra.mxu1 %v128_v15  ;;  %172 = vmatpush.msra.mxu0 %v111_v17  ;;  %v157_v26 = vld [vmem:[%s13425_s1 + $0x1c8] sm:$0xff]  ;;  %v156_v30 = vld [vmem:[%s13425_s1 + $0x1c0] sm:$0xff]  ;;  %v107_v33 = vld [vmem:[%s13425_s1 + $0x38] sm:$0xff] }
  0x21   :  { %232 = vmatpush.msra.mxu3 %v159_v18  ;;  %213 = vmatpush.msra.mxu2 %v142_v20  ;;  %v125_v27 = vld [vmem:[%s13425_s1 + $0xc8] sm:$0xff]  ;;  %v124_v31 = vld [vmem:[%s13425_s1 + $0xc0] sm:$0xff]  ;;  %v155_v34 = vld [vmem:[%s13425_s1 + $0x1b8] sm:$0xff]  ;;  %v250_v18 = vlaneseq }
  0x22   :  { %192 = vmatpush.msra.mxu1 %v127_v19  ;;  %173 = vmatpush.msra.mxu0 %v110_v21  ;;  %v123_v35 = vld [vmem:[%s13425_s1 + $0xb8] sm:$0xff]  ;;  %v138_v36 = vld [vmem:[%s13425_s1 + $0x130] sm:$0xff]  ;;  %v137_v40 = vld [vmem:[%s13425_s1 + $0x128] sm:$0xff] }
  0x23   :  { %233 = vmatpush.msra.mxu3 %v158_v22  ;;  %214 = vmatpush.msra.mxu2 %v141_v24  ;;  %v106_v37 = vld [vmem:[%s13425_s1 + $0x30] sm:$0xff]  ;;  %v105_v41 = vld [vmem:[%s13425_s1 + $0x28] sm:$0xff]  ;;  %v136_v44 = vld [vmem:[%s13425_s1 + $0x120] sm:$0xff]  ;;  %v251_v22 = vand.u32 127, %v250_v18  ;;  %v8682_v24 = vmov 0.0  }
  0x24   :  { %193 = vmatpush.msra.mxu1 %v126_v23  ;;  %174 = vmatpush.msra.mxu0 %v109_v25  ;;  %v154_v38 = vld [vmem:[%s13425_s1 + $0x1b0] sm:$0xff]  ;;  %v153_v42 = vld [vmem:[%s13425_s1 + $0x1a8] sm:$0xff]  ;;  %v104_v45 = vld [vmem:[%s13425_s1 + $0x20] sm:$0xff] }
  0x25   :  { %234 = vmatpush.msra.mxu3 %v157_v26  ;;  %215 = vmatpush.msra.mxu2 %v140_v28  ;;  %v122_v39 = vld [vmem:[%s13425_s1 + $0xb0] sm:$0xff]  ;;  %v121_v43 = vld [vmem:[%s13425_s1 + $0xa8] sm:$0xff]  ;;  %v152_v46 = vld [vmem:[%s13425_s1 + $0x1a0] sm:$0xff]  ;;  %vm252_vm0 = vcmp.eq.s32.totalorder %v251_v22, 12 }
  0x26   :  { %194 = vmatpush.msra.mxu1 %v125_v27  ;;  %175 = vmatpush.msra.mxu0 %v108_v29  ;;  %v120_v47 = vld [vmem:[%s13425_s1 + $0xa0] sm:$0xff]  ;;  %v135_v48 = vld [vmem:[%s13425_s1 + $0x118] sm:$0xff]  ;;  %v134_v52 = vld [vmem:[%s13425_s1 + $0x110] sm:$0xff]  ;;  %v8373_v25 = vsel %vm252_vm0, 1.0, %v8682_v24 }
  0x27   :  { %235 = vmatpush.msra.mxu3 %v156_v30  ;;  %216 = vmatpush.msra.mxu2 %v139_v32  ;;  %v103_v49 = vld [vmem:[%s13425_s1 + $0x18] sm:$0xff]  ;;  %v102_v53 = vld [vmem:[%s13425_s1 + $0x10] sm:$0xff]  ;;  %v133_v56 = vld [vmem:[%s13425_s1 + $0x108] sm:$0xff] }
  0x28   :  { %195 = vmatpush.msra.mxu1 %v124_v31  ;;  %176 = vmatpush.msra.mxu0 %v107_v33  ;;  %v151_v50 = vld [vmem:[%s13425_s1 + $0x198] sm:$0xff]  ;;  %v150_v54 = vld [vmem:[%s13425_s1 + $0x190] sm:$0xff]  ;;  %v101_v57 = vld [vmem:[%s13425_s1 + $0x8] sm:$0xff] }
  0x29   :  { %236 = vmatpush.msra.mxu3 %v155_v34  ;;  %217 = vmatpush.msra.mxu2 %v138_v36  ;;  %v119_v51 = vld [vmem:[%s13425_s1 + $0x98] sm:$0xff]  ;;  %v118_v55 = vld [vmem:[%s13425_s1 + $0x90] sm:$0xff]  ;;  %v149_v58 = vld [vmem:[%s13425_s1 + $0x188] sm:$0xff] }
  0x2a   :  { %196 = vmatpush.msra.mxu1 %v123_v35  ;;  %177 = vmatpush.msra.mxu0 %v106_v37  ;;  %v117_v59 = vld [vmem:[%s13425_s1 + $0x88] sm:$0xff]  ;;  %v132_v60 = vld [vmem:[%s13425_s1 + $0x100] sm:$0xff]  ;;  %v98_v62 = vld [vmem:[#allocation3 + $0x10] sm:$0xff] }
  0x2b   :  { %237 = vmatpush.msra.mxu3 %v154_v38  ;;  %218 = vmatpush.msra.mxu2 %v137_v40  ;;  %v100_v61 = vld [vmem:[%s13425_s1] sm:$0xff]  ;;  %v99_v1 = vld [vmem:[#allocation3 + $0x18] sm:$0xff]  ;;  %v97_v3 = vld [vmem:[#allocation3 + $0x8] sm:$0xff] }
  0x2c   :  { %197 = vmatpush.msra.mxu1 %v122_v39  ;;  %178 = vmatpush.msra.mxu0 %v105_v41  ;;  %v148_v63 = vld [vmem:[%s13425_s1 + $0x180] sm:$0xff]  ;;  %v264_v4 = vld [vmem:[#allocation8 + $0x110] sm:$0xff]  ;;  %v263_v7 = vld [vmem:[#allocation8 + $0x108] sm:$0xff] }
  0x2d   :  { %238 = vmatpush.msra.mxu3 %v153_v42  ;;  %219 = vmatpush.msra.mxu2 %v136_v44  ;;  %v96_v0 = vld [vmem:[#allocation3] sm:$0xff]  ;;  %v260_v8 = vld [vmem:[#allocation8 + $0x10] sm:$0xff]  ;;  %v259_v11 = vld [vmem:[#allocation8 + $0x8] sm:$0xff] }
  0x2e   :  { %198 = vmatpush.msra.mxu1 %v121_v43  ;;  %179 = vmatpush.msra.mxu0 %v104_v45  ;;  %v116_v2 = vld [vmem:[%s13425_s1 + $0x80] sm:$0xff]  ;;  %s8690_s1 = smov [#allocation12]  }
  0x2f   :  { %239 = vmatpush.msra.mxu3 %v152_v46  ;;  %220 = vmatpush.msra.mxu2 %v135_v48  ;;  %v265_v5 = vld [vmem:[#allocation8 + $0x118] sm:$0xff]  ;;  %v262_v6 = vld [vmem:[#allocation8 + $0x100] sm:$0xff]  ;;  %s8359_s8 = sshll.u32 %s8690_s1, 4  ;;  %s8360_s8 = int_to_ptr.vmem [resolvable:$true] %s8359_s8 }
  0x30   :  { %199 = vmatpush.msra.mxu1 %v120_v47  ;;  %180 = vmatpush.msra.mxu0 %v103_v49  ;;  %v261_v9 = vld [vmem:[#allocation8 + $0x18] sm:$0xff]  ;;  %v258_v10 = vld [vmem:[#allocation8] sm:$0xff] }
  0x31   :  { %240 = vmatpush.msra.mxu3 %v151_v50  ;;  %221 = vmatpush.msra.mxu2 %v134_v52  ;;  %v8519_v12 = vld [vmem:[#allocation6] ss:$0 sm:$0xff] }
  0x32   :  { %200 = vmatpush.msra.mxu1 %v119_v51  ;;  %181 = vmatpush.msra.mxu0 %v102_v53 }
  0x33   :  { %241 = vmatpush.msra.mxu3 %v150_v54  ;;  %222 = vmatpush.msra.mxu2 %v133_v56  ;;  %v8683_v56 = vmov 683565275  }
  0x34   :  { %201 = vmatpush.msra.mxu1 %v118_v55  ;;  %182 = vmatpush.msra.mxu0 %v101_v57 }
  0x35   :  { %242 = vmatpush.msra.mxu3 %v149_v58  ;;  %223 = vmatpush.msra.mxu2 %v132_v60  ;;  %v13439_v58 = vmov 2475754826  }
  0x36   :  { %202 = vmatpush.msra.mxu1 %v117_v59  ;;  %183 = vmatpush.msra.mxu0 %v100_v61 }
  0x37   :  { %224 = vmatmul.f32.vlgmr.msra.gmra.mxu2 %v98_v62  ;;  %243 = vmatpush.msra.mxu3 %v148_v63  ;;  %v13437_v62 = vmov 2131351028  }
  0x38   :  { %184 = vmatmul.f32.vlgmr.msra.gmra.mxu0 %v96_v0  ;;  %244 = vmatmul.f32.vlgmr.msra.gmra.mxu3 %v99_v1  ;;  %v13435_v1 = vmov 2102212464  }
  0x39   :  { %203 = vmatpush.msra.mxu1 %v116_v2  ;;  %452 = vmatpush.msrb.mxu2 %v264_v4  ;;  %v13433_v4 = vmov 920167782  }
  0x3a   :  { %204 = vmatmul.f32.vlgmr.msra.gmra.mxu1 %v97_v3  ;;  %472 = vmatpush.msrb.mxu3 %v265_v5 }
  0x3b   :  { %412 = vmatpush.msrb.mxu0 %v262_v6  ;;  %432 = vmatpush.msrb.mxu1 %v263_v7  ;;  %v13431_v7 = vmov 1326507024  }
  0x3c   :  { %453 = vmatpush.msrb.mxu2 %v260_v8  ;;  %473 = vmatpush.msrb.mxu3 %v261_v9 }
  0x3d   :  { %413 = vmatpush.msrb.mxu0 %v258_v10  ;;  %433 = vmatpush.msrb.mxu1 %v259_v11 }
  0xb5   :  { %v185_v13 = vpop.f32.mrf.mxu0 }
  0xb6   :  { %v186_v14 = vadd.f32 %v8519_v12, %v185_v13 }
  0xb7   :  { %v205_v15 = vpop.f32.mrf.mxu1 }
  0xb8   :  { %v206_v16 = vadd.f32 %v205_v15, %v186_v14 }
  0xba   :  { %v225_v17 = vpop.f32.mrf.mxu2 }
  0xbb   :  { %v226_v19 = vadd.f32 %v225_v17, %v206_v16  ;;  %v245_v20 = vpop.f32.mrf.mxu3 }
  0xbd   :  { %v246_v21 = vadd.f32 %v245_v20, %v226_v19 }
  0xbf   :  { %8520 = vtanh.f32 %v246_v21 }
  0xc5   :  { %v8521_v23 = vpop.eup %8520 }
  0xc6   :  { %v249_v26 = vmul.f32 0.7853982, %v8521_v23 }
  0xc8   :  { %v8933_v27 = vadd.f32 %v8373_v25, %v249_v26 }
  0xca   :  { %8374 = vmatmul.msk.f32.vlgmr.msrb.gmra.mxu0 %vm394_vm1, %v8933_v27  ;;  %8375 = vmatmul.msk.f32.vlgmr.msrb.gmra.mxu1 %vm394_vm1, %v8933_v27 }
  0xcb   :  { %8376 = vmatmul.msk.f32.vlgmr.msrb.gmra.mxu2 %vm394_vm1, %v8933_v27  ;;  %8377 = vmatmul.msk.f32.vlgmr.msrb.gmra.mxu3 %vm394_vm1, %v8933_v27 }
 0x147   :  { %v8943_v28 = vpop.f32.mrf.mxu0  ;;  %v8945_v29 = vpop.f32.mrf.mxu1 }
 0x148   :  { %v478_v30 = vand.u32 2147483647, %v8943_v28  ;;  %v481_v31 = vand.u32 2139095040, %v8943_v28  ;;  %v632_v32 = vand.u32 2147483647, %v8945_v29  ;;  %v635_v33 = vand.u32 2139095040, %v8945_v29 }
 0x14a   :  { %v482_v34 = vshrl.u32 %v481_v31, 23  ;;  %v485_v35 = vand.u32 8388607, %v478_v30  ;;  %v636_v36 = vshrl.u32 %v635_v33, 23  ;;  %v639_v37 = vand.u32 8388607, %v632_v32 }
 0x14c   :  { %v8378_v38 = vadd.s32 4294967169, %v482_v34  ;;  %v486_v39 = vor.u32 8388608, %v485_v35  ;;  %v8381_v40 = vadd.s32 4294967169, %v636_v36  ;;  %v640_v41 = vor.u32 8388608, %v639_v37 }
 0x14e   :  { %v488_v42 = vadd.s32 1, %v8378_v38  ;;  %v8955_v43 = vshll.u32 %v486_v39, 8  ;;  %v642_v44 = vadd.s32 1, %v8381_v40  ;;  %v8957_v46 = vshll.u32 %v640_v41, 8  ;;  %v8959_v47 = vpop.f32.mrf.mxu2 }
 0x14f   :  { %v789_v54 = vand.u32 2139095040, %v8959_v47 }
 0x150   :  { %vm489_vm2 = vcmp.gt.s32.totalorder %v488_v42, 0  ;;  %vm643_vm3 = vcmp.gt.s32.totalorder %v642_v44, 0  ;;  %v8962_v50 = vand.u32 65535, %v8955_v43  ;;  %v8965_v52 = vshrl.u32 %v8955_v43, 16 }
 0x151   :  { %v490_v45 = vsel %vm489_vm2, %v488_v42, 0  ;;  %v644_v49 = vsel %vm643_vm3, %v642_v44, 0  ;;  %v8975_v60 = vand.u32 65535, %v8957_v46 }
 0x152   :  { %v492_v48 = vand.u32 31, %v490_v45  ;;  %v8967_v53 = vand.u32 31, %v644_v49  ;;  %v8970_v55 = vshrl.u32 %v490_v45, 5  ;;  %v9017_v40 = vshrl.u32 %v644_v49, 5 }
 0x154   :  { %v493_v51 = vsub.s32 32, %v492_v48  ;;  %v495_v57 = vshll.u32 %v8683_v56, %v492_v48  ;;  %v498_v59 = vshll.u32 %v13439_v58, %v492_v48  ;;  %v501_v0 = vshll.u32 %v13437_v62, %v492_v48 }
 0x155   :  { %v504_v3 = vshll.u32 %v13435_v1, %v492_v48  ;;  %v507_v6 = vshll.u32 %v13433_v4, %v492_v48  ;;  %v8986_v12 = vsub.s32 32, %v8967_v53  ;;  %vm510_vm4 = vcmp.lt.s32.totalorder %v8970_v55, 1 }
 0x156   :  { %v496_v61 = vshrl.u32 %v13439_v58, %v493_v51  ;;  %v499_v63 = vshrl.u32 %v13437_v62, %v493_v51  ;;  %v502_v2 = vshrl.u32 %v13435_v1, %v493_v51  ;;  %v505_v5 = vshrl.u32 %v13433_v4, %v493_v51 }
 0x157   :  { %v508_v8 = vshrl.u32 %v13431_v7, %v493_v51  ;;  %vm511_vm5 = vcmp.lt.s32.totalorder %v8970_v55, 2  ;;  %v494_v15 = vshrl.u32 %v8683_v56, %v493_v51  ;;  %vm513_vm6 = vcmp.lt.s32.totalorder %v8970_v55, 4 }
 0x158   :  { %v497_v9 = vor.u32 %v496_v61, %v495_v57  ;;  %v500_v10 = vor.u32 %v499_v63, %v498_v59  ;;  %v503_v11 = vor.u32 %v502_v2, %v501_v0  ;;  %v506_v13 = vor.u32 %v505_v5, %v504_v3 }
 0x159   :  { %v509_v14 = vor.u32 %v508_v8, %v507_v6  ;;  %vm512_vm7 = vcmp.lt.s32.totalorder %v8970_v55, 3  ;;  %v649_v20 = vshll.u32 %v8683_v56, %v8967_v53  ;;  %v650_v24 = vshrl.u32 %v13439_v58, %v8986_v12 }
 0x15a   :  { %v518_v16 = vsel %vm510_vm4, %v497_v9, %v500_v10  ;;  %v522_v17 = vsel %vm510_vm4, %v500_v10, %v503_v11  ;;  %v519_v18 = vsel %vm513_vm6, %v506_v13, 920167782  ;;  %v515_v21 = vsel %vm513_vm6, %v503_v11, 2102212464 }
 0x15b   :  { %v523_v19 = vsel %vm513_vm6, %v509_v14, 1326507024  ;;  %v520_v22 = vsel %vm512_vm7, %v503_v11, %v519_v18  ;;  %v652_v31 = vshll.u32 %v13439_v58, %v8967_v53  ;;  %v653_v33 = vshrl.u32 %v13437_v62, %v8986_v12 }
 0x15c   :  { %v524_v23 = vsel %vm512_vm7, %v506_v13, %v523_v19  ;;  %v521_v25 = vsel %vm511_vm5, %v518_v16, %v520_v22  ;;  %v514_v38 = vsel %vm510_vm4, %v494_v15, %v497_v9  ;;  %v516_v39 = vsel %vm512_vm7, %v500_v10, %v515_v21 }
 0x15d   :  { %v525_v26 = vsel %vm511_vm5, %v522_v17, %v524_v23  ;;  %v551_v36 = vand.u32 65535, %v521_v25  ;;  %v552_v37 = vshrl.u32 %v521_v25, 16  ;;  %v9019_v41 = vor.u32 %v650_v24, %v649_v20 }
 0x15e   :  { %v529_v34 = vand.u32 65535, %v525_v26  ;;  %v530_v35 = vshrl.u32 %v525_v26, 16  ;;  %v9023_v45 = vor.u32 %v653_v33, %v652_v31  ;;  %v656_v48 = vshrl.u32 %v13435_v1, %v8986_v12 }
 0x15f   :  { %v554_v57 = vmul.u32 %v552_v37, %v8962_v50  ;;  %v555_v59 = vmul.u32 %v551_v36, %v8965_v52  ;;  %v655_v49 = vshll.u32 %v13437_v62, %v8967_v53  ;;  %v553_v0 = vmul.u32 %v551_v36, %v8962_v50 }
 0x160   :  { %v532_v42 = vmul.u32 %v530_v35, %v8962_v50  ;;  %v533_v44 = vmul.u32 %v529_v34, %v8965_v52  ;;  %v531_v51 = vmul.u32 %v529_v34, %v8962_v50  ;;  %v534_v61 = vmul.u32 %v530_v35, %v8965_v52 }
 0x161   :  { %v556_v2 = vmul.u32 %v552_v37, %v8965_v52  ;;  %v557_v8 = vshll.u32 %v554_v57, 16  ;;  %v559_v10 = vshll.u32 %v555_v59, 16  ;;  %v9035_v11 = vor.u32 %v656_v48, %v655_v49 }
 0x162   :  { %v535_v63 = vshll.u32 %v532_v42, 16  ;;  %v536_v3 = vshrl.u32 %v532_v42, 16  ;;  %v537_v5 = vshll.u32 %v533_v44, 16  ;;  %v538_v6 = vshrl.u32 %v533_v44, 16 }
 0x163   :  { %v8689_v13 = vmov 0   ;;  %vm561_vm9 = vc.u32 %v553_v0, %v557_v8  ;;  %v563_v15 = vadd.s32 %v557_v8, %v553_v0  ;;  %v659_v16 = vshrl.u32 %v13433_v4, %v8986_v12 }
 0x164   :  { %vm539_vm8 = vc.u32 %v531_v51, %v535_v63  ;;  %v541_v9 = vadd.s32 %v535_v63, %v531_v51  ;;  %v562_v52 = vsel %vm561_vm9, 1, %v8689_v13  ;;  %v658_v17 = vshll.u32 %v13435_v1, %v8967_v53 }
 0x165   :  { %v540_v14 = vsel %vm539_vm8, 1, %v8689_v13  ;;  %v564_v19 = vadd.s32 %v562_v52, %v556_v2  ;;  %vm565_vm11 = vc.u32 %v563_v15, %v559_v10  ;;  %v661_v20 = vshll.u32 %v13433_v4, %v8967_v53 }
 0x166   :  { %v542_v50 = vadd.s32 %v540_v14, %v534_v61  ;;  %vm543_vm10 = vc.u32 %v541_v9, %v537_v5  ;;  %v566_v22 = vsel %vm565_vm11, 1, %v8689_v13  ;;  %v660_v23 = vor.u32 %v659_v16, %v658_v17 }
 0x167   :  { %v544_v18 = vsel %vm543_vm10, 1, %v8689_v13  ;;  %v662_v24 = vshrl.u32 %v13431_v7, %v8986_v12  ;;  %v558_v25 = vshrl.u32 %v554_v57, 16  ;;  %v560_v26 = vshrl.u32 %v555_v59, 16 }
 0x168   :  { %v546_v21 = vadd.s32 %v544_v18, %v542_v50  ;;  %v9049_v31 = vadd.s32 %v563_v15, %v559_v10  ;;  %v568_v33 = vadd.s32 %v566_v22, %v564_v19  ;;  %vm664_vm12 = vcmp.lt.s32.totalorder %v9017_v40, 1 }
 0x169   :  { %v663_v35 = vor.u32 %v662_v24, %v661_v20  ;;  %vm667_vm13 = vcmp.lt.s32.totalorder %v9017_v40, 4  ;;  %vm666_vm14 = vcmp.lt.s32.totalorder %v9017_v40, 3  ;;  %v672_v53 = vsel %vm664_vm12, %v9019_v41, %v9023_v45 }
 0x16a   :  { %v547_v34 = vadd.s32 %v546_v21, %v536_v3  ;;  %v569_v36 = vadd.s32 %v568_v33, %v558_v25  ;;  %v673_v37 = vsel %vm667_vm13, %v660_v23, 920167782  ;;  %vm665_vm15 = vcmp.lt.s32.totalorder %v9017_v40, 2 }
 0x16b   :  { %v674_v44 = vsel %vm666_vm14, %v9035_v11, %v673_v37  ;;  %v676_v48 = vsel %vm664_vm12, %v9023_v45, %v9035_v11  ;;  %v517_v51 = vsel %vm511_vm5, %v514_v38, %v516_v39  ;;  %v677_v49 = vsel %vm667_vm13, %v663_v35, 1326507024 }
 0x16c   :  { %v9060_v42 = vadd.s32 %v547_v34, %v538_v6  ;;  %v570_v57 = vadd.s32 %v569_v36, %v560_v26  ;;  %v675_v59 = vsel %vm665_vm15, %v672_v53, %v674_v44  ;;  %v678_v61 = vsel %vm666_vm14, %v660_v23, %v677_v49 }
 0x16d   :  { %v682_v63 = vshrl.u32 %v8957_v46, 16  ;;  %v705_v0 = vand.u32 65535, %v675_v59  ;;  %v679_v55 = vsel %vm665_vm15, %v676_v48, %v678_v61  ;;  %v706_v38 = vshrl.u32 %v675_v59, 16 }
 0x16e   :  { %vm573_vm0 = vc.u32 %v9060_v42, %v9049_v31  ;;  %v574_v2 = vadd.s32 1, %v570_v57  ;;  %v790_v39 = vshrl.u32 %v789_v54, 23  ;;  %v571_v3 = vmul.u32 %v8955_v43, %v517_v51 }
 0x16f   :  { %v683_v5 = vand.u32 65535, %v679_v55  ;;  %v684_v6 = vshrl.u32 %v679_v55, 16  ;;  %v708_v9 = vmul.u32 %v706_v38, %v8975_v60  ;;  %v709_v10 = vmul.u32 %v705_v0, %v682_v63 }
 0x170   :  { %v575_v8 = vsel %vm573_vm0, %v574_v2, %v570_v57  ;;  %v707_v50 = vmul.u32 %v705_v0, %v8975_v60  ;;  %v710_v52 = vmul.u32 %v706_v38, %v682_v63  ;;  %v8384_v18 = vadd.s32 4294967169, %v790_v39 }
 0x171   :  { %v576_v14 = vadd.s32 %v575_v8, %v571_v3  ;;  %v686_v15 = vmul.u32 %v684_v6, %v8975_v60  ;;  %v687_v16 = vmul.u32 %v683_v5, %v682_v63  ;;  %v711_v17 = vshll.u32 %v708_v9, 16 }
 0x172   :  { %v685_v54 = vmul.u32 %v683_v5, %v8975_v60  ;;  %v688_v20 = vmul.u32 %v684_v6, %v682_v63  ;;  %v713_v22 = vshll.u32 %v709_v10, 16  ;;  %v669_v60 = vsel %vm667_vm13, %v9035_v11, 2102212464 }
 0x173   :  { %v577_v19 = vadd.s32 536870912, %v576_v14  ;;  %v689_v43 = vshll.u32 %v686_v15, 16  ;;  %v691_v21 = vshll.u32 %v687_v16, 16  ;;  %vm715_vm2 = vc.u32 %v707_v50, %v711_v17 }
 0x174   :  { %v717_v23 = vadd.s32 %v711_v17, %v707_v50  ;;  %v716_v26 = vsel %vm715_vm2, 1, %v8689_v13  ;;  %v648_v53 = vshrl.u32 %v8683_v56, %v8986_v12  ;;  %v796_v48 = vadd.s32 1, %v8384_v18 }
 0x175   :  { %v9090_v24 = vshrl.u32 %v577_v19, 30  ;;  %vm693_vm3 = vc.u32 %v685_v54, %v689_v43  ;;  %v695_v25 = vadd.s32 %v689_v43, %v685_v54  ;;  %v718_v34 = vadd.s32 %v716_v26, %v710_v52 }
 0x176   :  { %v694_v33 = vsel %vm693_vm3, 1, %v8689_v13  ;;  %vm719_vm4 = vc.u32 %v717_v23, %v713_v22  ;;  %v690_v57 = vshrl.u32 %v686_v15, 16  ;;  %v668_v61 = vsel %vm664_vm12, %v648_v53, %v9019_v41 }
 0x177   :  { %v579_v35 = vshll.u32 %v9090_v24, 30  ;;  %v696_v36 = vadd.s32 %v694_v33, %v688_v20  ;;  %vm697_vm5 = vc.u32 %v695_v25, %v691_v21  ;;  %v720_v44 = vsel %vm719_vm4, 1, %v8689_v13 }
 0x178   :  { %v698_v37 = vsel %vm697_vm5, 1, %v8689_v13  ;;  %v722_v49 = vadd.s32 %v720_v44, %v718_v34  ;;  %v670_v11 = vsel %vm666_vm14, %v9023_v45, %v669_v60  ;;  %v712_v63 = vshrl.u32 %v708_v9, 16 }
 0x179   :  { %v9102_v51 = vsub.s32 %v576_v14, %v579_v35  ;;  %v700_v59 = vadd.s32 %v698_v37, %v696_v36  ;;  %vm797_vm6 = vcmp.gt.s32.totalorder %v796_v48, 0  ;;  %v786_v2 = vand.u32 2147483647, %v8959_v47 }
 0x17a   :  { %v692_v55 = vshrl.u32 %v687_v16, 16  ;;  %v714_v38 = vshrl.u32 %v709_v10, 16  ;;  %v723_v39 = vadd.s32 %v722_v49, %v712_v63  ;;  %v798_v3 = vsel %vm797_vm6, %v796_v48, 0 }
 0x17b   :  { %vm581_vm7 = vcmp.lt.s32.totalorder %v9102_v51, 0  ;;  %v582_v12 = vsub.s32 0, %v9102_v51  ;;  %v701_v0 = vadd.s32 %v700_v59, %v690_v57  ;;  %v671_v41 = vsel %vm665_vm15, %v668_v61, %v670_v11 }
 0x17c   :  { %v9118_v8 = vadd.s32 %v717_v23, %v713_v22  ;;  %v724_v9 = vadd.s32 %v723_v39, %v714_v38  ;;  %v793_v14 = vand.u32 8388607, %v786_v2  ;;  %v800_v15 = vand.u32 31, %v798_v3 }
 0x17d   :  { %v583_v5 = vsel %vm581_vm7, %v582_v12, %v9102_v51  ;;  %v9116_v45 = vadd.s32 %v701_v0, %v692_v55  ;;  %v725_v16 = vmul.u32 %v8957_v46, %v671_v41  ;;  %v572_v17 = vadd.s32 %v9049_v31, %v9060_v42 }
 0x17e   :  { %v584_v6 = vclz %v583_v5  ;;  %v728_v10 = vadd.s32 1, %v724_v9  ;;  %v9125_v52 = vsub.s32 32, %v800_v15  ;;  %v794_v54 = vor.u32 8388608, %v793_v14 }
 0x17f   :  { %vm727_vm8 = vc.u32 %v9116_v45, %v9118_v8  ;;  %v803_v43 = vshll.u32 %v8683_v56, %v800_v15  ;;  %v806_v26 = vshll.u32 %v13439_v58, %v800_v15  ;;  %v812_v33 = vshll.u32 %v13435_v1, %v800_v15 }
 0x180   :  { %v8379_v50 = vadd.s32 4294967294, %v584_v6  ;;  %v729_v40 = vsel %vm727_vm8, %v728_v10, %v724_v9  ;;  %v804_v21 = vshrl.u32 %v13439_v58, %v9125_v52  ;;  %v807_v22 = vshrl.u32 %v13437_v62, %v9125_v52 }
 0x181   :  { %v730_v19 = vadd.s32 %v729_v40, %v725_v16  ;;  %v810_v25 = vshrl.u32 %v13435_v1, %v9125_v52  ;;  %v813_v31 = vshrl.u32 %v13433_v4, %v9125_v52  ;;  %v816_v34 = vshrl.u32 %v13431_v7, %v9125_v52 }
 0x182   :  { %vm8380_vm9 = vcmp.lt.s32.totalorder %v8379_v50, 0  ;;  %v9144_v60 = vshrl.u32 %v798_v3, 5  ;;  %v809_v36 = vshll.u32 %v13437_v62, %v800_v15  ;;  %v815_v53 = vshll.u32 %v13433_v4, %v800_v15 }
 0x183   :  { %v587_v18 = vsel %vm8380_vm9, 0, %v8379_v50  ;;  %v731_v23 = vadd.s32 536870912, %v730_v19  ;;  %v9148_v44 = vor.u32 %v804_v21, %v803_v43  ;;  %v9150_v48 = vor.u32 %v807_v22, %v806_v26 }
 0x184   :  { %v592_v20 = vsub.s32 4294967266, %v587_v18  ;;  %v588_v46 = vsub.s32 32, %v587_v18  ;;  %v814_v57 = vor.u32 %v813_v31, %v812_v33  ;;  %v9153_v61 = vor.u32 %v810_v25, %v809_v36 }
 0x185   :  { %v9142_v35 = vshrl.u32 %v731_v23, 30  ;;  %v817_v11 = vor.u32 %v816_v34, %v815_v53  ;;  %v9155_v63 = vshll.u32 %v794_v54, 8  ;;  %v589_v12 = vshll.u32 %v9102_v51, %v587_v18 }
 0x186   :  { %v593_v42 = vadd.s32 127, %v592_v20  ;;  %v590_v59 = vshrl.u32 %v572_v17, %v588_v46  ;;  %vm818_vm10 = vcmp.lt.s32.totalorder %v9144_v60, 1  ;;  %vm821_vm11 = vcmp.lt.s32.totalorder %v9144_v60, 4 }
 0x187   :  { %v733_v49 = vshll.u32 %v9142_v35, 30  ;;  %vm820_vm12 = vcmp.lt.s32.totalorder %v9144_v60, 3  ;;  %v826_v38 = vsel %vm818_vm10, %v9148_v44, %v9150_v48  ;;  %v827_v39 = vsel %vm821_vm11, %v814_v57, 920167782 }
 0x188   :  { %v594_v37 = vshll.u32 %v593_v42, 23  ;;  %v591_v3 = vor.u32 %v590_v59, %v589_v12  ;;  %v828_v51 = vsel %vm820_vm12, %v9153_v61, %v827_v39  ;;  %vm819_vm14 = vcmp.lt.s32.totalorder %v9144_v60, 2 }
 0x189   :  { %v734_v0 = vsub.s32 %v730_v19, %v733_v49  ;;  %v830_v41 = vsel %vm818_vm10, %v9150_v48, %v9153_v61  ;;  %v831_v6 = vsel %vm821_vm11, %v817_v11, 1326507024  ;;  %v829_v14 = vsel %vm819_vm14, %v826_v38, %v828_v51  ;;  %v9188_v49 = vpop.f32.mrf.mxu3 }
 0x18a   :  { %v595_v55 = vor.u32 4788187, %v594_v37  ;;  %v832_v10 = vsel %vm820_vm12, %v814_v57, %v831_v6  ;;  %v598_v16 = vcvt.s32.f32 %v591_v3  ;;  %v835_v17 = vand.u32 65535, %v9155_v63 }
 0x18b   :  { %vm735_vm13 = vcmp.lt.s32.totalorder %v734_v0, 0  ;;  %v736_v5 = vsub.s32 0, %v734_v0  ;;  %v833_v40 = vsel %vm819_vm14, %v830_v41, %v832_v10  ;;  %v860_v20 = vshrl.u32 %v829_v14, 16 }
 0x18c   :  { %v596_v15 = vand.u32 2147483647, %v595_v55  ;;  %v837_v19 = vand.u32 65535, %v833_v40  ;;  %v838_v54 = vshrl.u32 %v833_v40, 16  ;;  %v836_v43 = vshrl.u32 %v9155_v63, 16 }
 0x18d   :  { %v737_v9 = vsel %vm735_vm13, %v736_v5, %v734_v0  ;;  %v726_v25 = vadd.s32 %v9118_v8, %v9116_v45  ;;  %v859_v42 = vand.u32 65535, %v829_v14  ;;  %v862_v26 = vmul.u32 %v860_v20, %v835_v17 }
 0x18e   :  { %v738_v50 = vclz %v737_v9  ;;  %v599_v21 = vmul.f32 %v598_v16, %v596_v15  ;;  %v840_v22 = vmul.u32 %v838_v54, %v835_v17  ;;  %v841_v23 = vmul.u32 %v837_v19, %v836_v43 }
 0x18f   :  { %vm480_vm0 = vcmp.lt.s32.totalorder %v8943_v28, 0  ;;  %v839_v34 = vmul.u32 %v837_v19, %v835_v17  ;;  %v842_v59 = vmul.u32 %v838_v54, %v836_v43  ;;  %v863_v8 = vmul.u32 %v859_v42, %v836_v43 }
 0x190   :  { %v8382_v18 = vadd.s32 4294967294, %v738_v50  ;;  %v843_v36 = vshll.u32 %v840_v22, 16  ;;  %v600_v53 = vxor.u32 2147483648, %v599_v21  ;;  %v845_v12 = vshll.u32 %v841_v23, 16 }
 0x191   :  { %v865_v39 = vshll.u32 %v862_v26, 16  ;;  %v943_v51 = vand.u32 2139095040, %v9188_v49  ;;  %v861_v6 = vmul.u32 %v859_v42, %v835_v17  ;;  %v844_v14 = vshrl.u32 %v840_v22, 16 }
 0x192   :  { %vm8383_vm15 = vcmp.lt.s32.totalorder %v8382_v18, 0  ;;  %vm847_vm2 = vc.u32 %v839_v34, %v843_v36  ;;  %v849_v55 = vadd.s32 %v843_v36, %v839_v34  ;;  %v864_v50 = vmul.u32 %v860_v20, %v836_v43 }
 0x193   :  { %v741_v46 = vsel %vm8383_vm15, 0, %v8382_v18  ;;  %v848_v45 = vsel %vm847_vm2, 1, %v8689_v13  ;;  %v867_v16 = vshll.u32 %v863_v8, 16  ;;  %vm869_vm4 = vc.u32 %v861_v6, %v865_v39 }
 0x194   :  { %v742_v31 = vsub.s32 32, %v741_v46  ;;  %v746_v33 = vsub.s32 4294967266, %v741_v46  ;;  %v743_v37 = vshll.u32 %v734_v0, %v741_v46  ;;  %v850_v5 = vadd.s32 %v848_v45, %v842_v59 }
 0x195   :  { %vm851_vm3 = vc.u32 %v849_v55, %v845_v12  ;;  %v601_v0 = vsel %vm480_vm0, %v600_v53, %v599_v21  ;;  %v871_v40 = vadd.s32 %v865_v39, %v861_v6  ;;  %v870_v54 = vsel %vm869_vm4, 1, %v8689_v13  ;;  %v298_v21 = vld [vmem:[#allocation9 + $0x100] sm:$0xff] }
 0x196   :  { %v744_v57 = vshrl.u32 %v726_v25, %v742_v31  ;;  %v747_v11 = vadd.s32 127, %v746_v33  ;;  %v852_v41 = vsel %vm851_vm3, 1, %v8689_v13  ;;  %v944_v46 = vshrl.u32 %v943_v51, 23 }
 0x197   :  { %v854_v15 = vadd.s32 %v852_v41, %v850_v5  ;;  %vm9198_vm5 = vcmp.le.f32.partialorder %v478_v30, 0.7853982  ;;  %v823_v17 = vsel %vm821_vm11, %v9153_v61, 2102212464  ;;  %v872_v20 = vadd.s32 %v870_v54, %v864_v50 }
 0x198   :  { %v745_v38 = vor.u32 %v744_v57, %v743_v37  ;;  %v748_v3 = vshll.u32 %v747_v11, 23  ;;  %vm873_vm6 = vc.u32 %v871_v40, %v867_v16  ;;  %v802_v22 = vshrl.u32 %v8683_v56, %v9125_v52 }
 0x199   :  { %v855_v19 = vadd.s32 %v854_v15, %v844_v14  ;;  %v846_v25 = vshrl.u32 %v841_v23, 16  ;;  %v874_v31 = vsel %vm873_vm6, 1, %v8689_v13  ;;  %v9211_v30 = vsel %vm9198_vm5, %v8943_v28, %v601_v0 }
 0x19a   :  { %v749_v9 = vor.u32 4788187, %v748_v3  ;;  %v752_v10 = vcvt.s32.f32 %v745_v38  ;;  %v866_v42 = vshrl.u32 %v862_v26, 16  ;;  %v876_v33 = vadd.s32 %v874_v31, %v872_v20 }
 0x19b   :  { %v8387_v34 = vadd.s32 4294967169, %v944_v46  ;;  %v822_v61 = vsel %vm818_vm10, %v802_v22, %v9148_v44  ;;  %v824_v52 = vsel %vm820_vm12, %v9150_v48, %v823_v17  ;;  %v9219_v23 = vadd.s32 %v855_v19, %v846_v25 }
 0x19c   :  { %v750_v18 = vand.u32 2147483647, %v749_v9  ;;  %vm634_vm7 = vcmp.lt.s32.totalorder %v8945_v29, 0  ;;  %v868_v53 = vshrl.u32 %v863_v8, 16  ;;  %v877_v37 = vadd.s32 %v876_v33, %v866_v42 }
 0x19d   :  { %v950_v57 = vadd.s32 1, %v8387_v34  ;;  %v9224_v26 = vmul.f32 %v9211_v30, %v9211_v30  ;;  %v9228_v11 = vadd.s32 %v871_v40, %v867_v16  ;;  %v825_v44 = vsel %vm819_vm14, %v822_v61, %v824_v52  ;;  %v296_v34 = vld [vmem:[#allocation9 + $0xf0] sm:$0xff] }
 0x19e   :  { %v753_v43 = vmul.f32 %v752_v10, %v750_v18  ;;  %v878_v48 = vadd.s32 %v877_v37, %v868_v53  ;;  %vm9234_vm9 = vcmp.le.f32.partialorder %v632_v32, 0.7853982  ;;  %v940_v55 = vand.u32 2147483647, %v9188_v49  ;;  %1108 = vmatpush.msra.mxu0 %v296_v34 }
 0x19f   :  { %vm951_vm8 = vcmp.gt.s32.totalorder %v950_v57, 0  ;;  %vm881_vm10 = vc.u32 %v9219_v23, %v9228_v11  ;;  %v614_v39 = vmul.f32 -0.00019511016, %v9224_v26  ;;  %v879_v32 = vmul.u32 %v9155_v63, %v825_v44  ;;  %v294_v44 = vld [vmem:[#allocation9 + $0xe0] sm:$0xff] }
 0x1a0   :  { %v754_v36 = vxor.u32 2147483648, %v753_v43  ;;  %v952_v38 = vsel %vm951_vm8, %v950_v57, 0  ;;  %v882_v60 = vadd.s32 1, %v878_v48  ;;  %v947_v41 = vand.u32 8388607, %v940_v55  ;;  %1109 = vmatpush.msra.mxu0 %v294_v44 }
 0x1a1   :  { %v954_v8 = vand.u32 31, %v952_v38  ;;  %v615_v6 = vadd.f32 0.008332121, %v614_v39  ;;  %v9268_v19 = vshrl.u32 %v952_v38, 5  ;;  %v607_v25 = vmul.f32 -0.001358992, %v9224_v26 }
 0x1a2   :  { %v755_v59 = vsel %vm634_vm7, %v754_v36, %v753_v43  ;;  %v883_v3 = vsel %vm881_vm10, %v882_v60, %v878_v48  ;;  %v948_v18 = vor.u32 8388608, %v947_v41  ;;  %v328_v36 = vld [vmem:[#allocation9 + $0x1f0] sm:$0xff]  ;;  %v326_v60 = vld [vmem:[#allocation9 + $0x1e0] sm:$0xff]  ;;  %vm788_vm4 = vcmp.lt.s32.totalorder %v8959_v47, 0 }
 0x1a3   :  { %v9244_v45 = vsel %vm9234_vm9, %v8945_v29, %v755_v59  ;;  %v9248_v5 = vsub.s32 32, %v954_v8  ;;  %v884_v0 = vadd.s32 %v883_v3, %v879_v32  ;;  %v966_v50 = vshll.u32 %v13435_v1, %v954_v8  ;;  %1128 = vmatpush.msra.mxu1 %v328_v36  ;;  %v292_v32 = vld [vmem:[#allocation9 + $0xd0] sm:$0xff] }
 0x1a4   :  { %v9252_v51 = vmul.f32 %v9244_v45, %v9244_v45  ;;  %v957_v54 = vshll.u32 %v8683_v56, %v954_v8  ;;  %v960_v46 = vshll.u32 %v13439_v58, %v954_v8  ;;  %v963_v17 = vshll.u32 %v13437_v62, %v954_v8  ;;  %v324_v3 = vld [vmem:[#allocation9 + $0x1d0] sm:$0xff]  ;;  %1110 = vmatpush.msra.mxu0 %v292_v32  ;;  %v318_v32 = vld [vmem:[#allocation9 + $0x1a0] sm:$0xff] }
 0x1a5   :  { %v885_v9 = vadd.s32 536870912, %v884_v0  ;;  %v958_v14 = vshrl.u32 %v13439_v58, %v9248_v5  ;;  %v961_v15 = vshrl.u32 %v13437_v62, %v9248_v5  ;;  %v964_v63 = vshrl.u32 %v13435_v1, %v9248_v5  ;;  %1129 = vmatpush.msra.mxu1 %v326_v60  ;;  %v288_v36 = vld [vmem:[#allocation9 + $0xb0] sm:$0xff] }
 0x1a6   :  { %v967_v10 = vshrl.u32 %v13433_v4, %v9248_v5  ;;  %v768_v16 = vmul.f32 -0.00019511016, %v9252_v51  ;;  %v970_v22 = vshrl.u32 %v13431_v7, %v9248_v5  ;;  %v969_v53 = vshll.u32 %v13433_v4, %v954_v8 }
 0x1a7   :  { %v9266_v40 = vshrl.u32 %v885_v9, 30  ;;  %v9277_v31 = vor.u32 %v958_v14, %v957_v54  ;;  %v9279_v42 = vor.u32 %v961_v15, %v960_v46  ;;  %v9281_v33 = vor.u32 %v964_v63, %v963_v17  ;;  %1130 = vmatpush.msra.mxu1 %v324_v3  ;;  %v290_v63 = vld [vmem:[#allocation9 + $0xc0] sm:$0xff]  ;;  %v392_v17 = vld [vmem:[#allocation9 + $0x3f0] sm:$0xff] }
 0x1a8   :  { %v968_v20 = vor.u32 %v967_v10, %v966_v50  ;;  %v769_v61 = vadd.f32 0.008332121, %v768_v16  ;;  %vm975_vm11 = vcmp.lt.s32.totalorder %v9268_v19, 4  ;;  %v616_v37 = vmul.f32 %v615_v6, %v9224_v26  ;;  %v322_v50 = vld [vmem:[#allocation9 + $0x1c0] sm:$0xff]  ;;  %v360_v10 = vld [vmem:[#allocation9 + $0x2f0] sm:$0xff]  ;;  %1111 = vmatpush.msra.mxu0 %v290_v63  ;;  %1168 = vmatpush.msra.mxu3 %v392_v17 }
 0x1a9   :  { %v887_v43 = vshll.u32 %v9266_v40, 30  ;;  %vm972_vm12 = vcmp.lt.s32.totalorder %v9268_v19, 1  ;;  %v9291_v59 = vshll.u32 %v948_v18, 8  ;;  %v971_v38 = vor.u32 %v970_v22, %v969_v53  ;;  %1148 = vmatpush.msra.mxu2 %v360_v10  ;;  %1131 = vmatpush.msra.mxu1 %v322_v50  ;;  %v358_v53 = vld [vmem:[#allocation9 + $0x2e0] sm:$0xff]  ;;  %v356_v3 = vld [vmem:[#allocation9 + $0x2d0] sm:$0xff] }
 0x1aa   :  { %v981_v57 = vsel %vm975_vm11, %v968_v20, 920167782  ;;  %vm974_vm14 = vcmp.lt.s32.totalorder %v9268_v19, 3  ;;  %v980_v8 = vsel %vm972_vm12, %v9277_v31, %v9279_v42  ;;  %v770_v41 = vmul.f32 %v769_v61, %v9252_v51  ;;  %v320_v61 = vld [vmem:[#allocation9 + $0x1b0] sm:$0xff]  ;;  %1112 = vmatpush.msra.mxu0 %v288_v36 }
 0x1ab   :  { %v9283_v52 = vsub.s32 %v884_v0, %v887_v43  ;;  %v982_v39 = vsel %vm974_vm14, %v9281_v33, %v981_v57  ;;  %v761_v0 = vmul.f32 -0.001358992, %v9252_v51  ;;  %v608_v9 = vadd.f32 0.041655596, %v607_v25  ;;  %1149 = vmatpush.msra.mxu2 %v358_v53  ;;  %1132 = vmatpush.msra.mxu1 %v320_v61 }
 0x1ac   :  { %vm973_vm15 = vcmp.lt.s32.totalorder %v9268_v19, 2  ;;  %v984_v15 = vsel %vm972_vm12, %v9279_v42, %v9281_v33  ;;  %v9311_v16 = vadd.f32 -0.16666654, %v616_v37  ;;  %v985_v54 = vsel %vm975_vm11, %v971_v38, 1326507024  ;;  %v390_v38 = vld [vmem:[#allocation9 + $0x3e0] sm:$0xff] }
 0x1ad   :  { %vm889_vm13 = vcmp.lt.s32.totalorder %v9283_v52, 0  ;;  %v890_v48 = vsub.s32 0, %v9283_v52  ;;  %v983_v18 = vsel %vm973_vm15, %v980_v8, %v982_v39  ;;  %v989_v46 = vand.u32 65535, %v9291_v59  ;;  %1169 = vmatpush.msra.mxu3 %v390_v38  ;;  %v286_v39 = vld [vmem:[#allocation9 + $0xa0] sm:$0xff]  ;;  %1150 = vmatpush.msra.mxu2 %v356_v3 }
 0x1ae   :  { %v986_v22 = vsel %vm974_vm14, %v968_v20, %v985_v54  ;;  %v990_v25 = vshrl.u32 %v9291_v59, 16  ;;  %v1013_v34 = vand.u32 65535, %v983_v18  ;;  %v9321_v37 = vadd.f32 0.041655596, %v761_v0  ;;  %1113 = vmatpush.msra.mxu0 %v286_v39  ;;  %1133 = vmatpush.msra.mxu1 %v318_v32  ;;  %v354_v54 = vld [vmem:[#allocation9 + $0x2c0] sm:$0xff]  ;;  %v352_v39 = vld [vmem:[#allocation9 + $0x2b0] sm:$0xff] }
 0x1af   :  { %v891_v6 = vsel %vm889_vm13, %v890_v48, %v9283_v52  ;;  %v9323_v57 = vadd.f32 -0.16666654, %v770_v41  ;;  %v987_v44 = vsel %vm973_vm15, %v984_v15, %v986_v22  ;;  %v1014_v48 = vshrl.u32 %v983_v18, 16  ;;  %v284_v18 = vld [vmem:[#allocation9 + $0x90] sm:$0xff]  ;;  %1151 = vmatpush.msra.mxu2 %v354_v54  ;;  %v314_v38 = vld [vmem:[#allocation9 + $0x180] sm:$0xff] }
 0x1b0   :  { %v892_v14 = vclz %v891_v6  ;;  %v9328_v20 = vmul.f32 %v608_v9, %v9224_v26  ;;  %v991_v60 = vand.u32 65535, %v987_v44  ;;  %v992_v8 = vshrl.u32 %v987_v44, 16  ;;  %v388_v9 = vld [vmem:[#allocation9 + $0x3d0] sm:$0xff]  ;;  %1114 = vmatpush.msra.mxu0 %v284_v18  ;;  %v282_v44 = vld [vmem:[#allocation9 + $0x80] sm:$0xff] }
 0x1b1   :  { %v9333_v41 = vsel %vm975_vm11, %v9281_v33, 2102212464  ;;  %v9335_v6 = vmul.u32 %v1014_v48, %v989_v46  ;;  %v880_v15 = vadd.s32 %v9228_v11, %v9219_v23  ;;  %v956_v10 = vshrl.u32 %v8683_v56, %v9248_v5  ;;  %1170 = vmatpush.msra.mxu3 %v388_v9  ;;  %v316_v33 = vld [vmem:[#allocation9 + $0x190] sm:$0xff]  ;;  %v386_v23 = vld [vmem:[#allocation9 + $0x3c0] sm:$0xff]  ;;  %1152 = vmatpush.msra.mxu2 %v352_v39 }
 0x1b2   :  { %v8385_v43 = vadd.s32 4294967294, %v892_v14  ;;  %v9337_v14 = vmul.u32 %v1013_v34, %v990_v25  ;;  %v9343_v17 = vmul.u32 %v992_v8, %v989_v46  ;;  %v1015_v22 = vmul.u32 %v1013_v34, %v989_v46  ;;  %1134 = vmatpush.msra.mxu1 %v316_v33  ;;  %1115 = vmatpush.msra.mxu0 %v282_v44  ;;  %v384_v18 = vld [vmem:[#allocation9 + $0x3b0] sm:$0xff] }
 0x1b3   :  { %v1019_v36 = vshll.u32 %v9335_v6, 16  ;;  %v1018_v5 = vmul.u32 %v1014_v48, %v990_v25  ;;  %1171 = vmatpush.msra.mxu3 %v386_v23  ;;  %v993_v32 = vmul.u32 %v991_v60, %v989_v46  ;;  %v996_v3 = vmul.u32 %v992_v8, %v990_v25  ;;  %v280_v48 = vld [vmem:[#allocation9 + $0x70] sm:$0xff]  ;;  %v382_v8 = vld [vmem:[#allocation9 + $0x3a0] sm:$0xff] }
 0x1b4   :  { %vm8386_vm2 = vcmp.lt.s32.totalorder %v8385_v43, 0  ;;  %v997_v9 = vshll.u32 %v9343_v17, 16  ;;  %v1021_v34 = vshll.u32 %v9337_v14, 16  ;;  %1135 = vmatpush.msra.mxu1 %v314_v38  ;;  %1116 = vmatpush.msra.mxu0 %v280_v48  ;;  %v276_v38 = vld [vmem:[#allocation9 + $0x50] sm:$0xff]  ;;  %v763_v48 = vmul.f32 %v9321_v37, %v9252_v51 }
 0x1b5   :  { %v895_v0 = vsel %vm8386_vm2, 0, %v8385_v43  ;;  %v9345_v43 = vmul.u32 %v991_v60, %v990_v25  ;;  %vm1023_vm3 = vc.u32 %v1015_v22, %v1019_v36  ;;  %1172 = vmatpush.msra.mxu3 %v384_v18  ;;  %v1025_v60 = vadd.s32 %v1019_v36, %v1015_v22  ;;  %v308_v39 = vld [vmem:[#allocation9 + $0x150] sm:$0xff]  ;;  %v378_v18 = vld [vmem:[#allocation9 + $0x380] sm:$0xff] }
 0x1b6   :  { %v896_v63 = vsub.s32 32, %v895_v0  ;;  %v900_v50 = vsub.s32 4294967266, %v895_v0  ;;  %v897_v11 = vshll.u32 %v9283_v52, %v895_v0  ;;  %v312_v0 = vld [vmem:[#allocation9 + $0x170] sm:$0xff]  ;;  %vm1001_vm6 = vc.u32 %v993_v32, %v997_v9 }
 0x1b7   :  { %v999_v52 = vshll.u32 %v9345_v43, 16  ;;  %v1003_v46 = vadd.s32 %v997_v9, %v993_v32  ;;  %v1024_v25 = vsel %vm1023_vm3, 1, %v8689_v13  ;;  %v1002_v33 = vsel %vm1001_vm6, 1, %v8689_v13  ;;  %1136 = vmatpush.msra.mxu1 %v312_v0  ;;  %1173 = vmatpush.msra.mxu3 %v382_v8  ;;  %v346_v9 = vld [vmem:[#allocation9 + $0x280] sm:$0xff] }
 0x1b8   :  { %v898_v61 = vshrl.u32 %v880_v15, %v896_v63  ;;  %v901_v53 = vadd.s32 127, %v900_v50  ;;  %v350_v15 = vld [vmem:[#allocation9 + $0x2a0] sm:$0xff]  ;;  %v976_v50 = vsel %vm972_vm12, %v956_v10, %v9277_v31  ;;  %v1026_v23 = vadd.s32 %v1024_v25, %v1018_v5 }
 0x1b9   :  { %1153 = vmatpush.msra.mxu2 %v350_v15  ;;  %v978_v22 = vsel %vm974_vm14, %v9279_v42, %v9333_v41  ;;  %v1004_v36 = vadd.s32 %v1002_v33, %v996_v3  ;;  %vm1005_vm8 = vc.u32 %v1003_v46, %v999_v52  ;;  %vm1027_vm10 = vc.u32 %v1025_v60, %v1021_v34  ;;  %v306_v15 = vld [vmem:[#allocation9 + $0x140] sm:$0xff]  ;;  %v344_v46 = vld [vmem:[#allocation9 + $0x270] sm:$0xff] }
 0x1ba   :  { %v899_v54 = vor.u32 %v898_v61, %v897_v11  ;;  %v902_v7 = vshll.u32 %v901_v53, 23  ;;  %v278_v11 = vld [vmem:[#allocation9 + $0x60] sm:$0xff]  ;;  %v348_v53 = vld [vmem:[#allocation9 + $0x290] sm:$0xff]  ;;  %v1006_v5 = vsel %vm1005_vm8, 1, %v8689_v13  ;;  %v1028_v44 = vsel %vm1027_vm10, 1, %v8689_v13 }
 0x1bb   :  { %v310_v61 = vld [vmem:[#allocation9 + $0x160] sm:$0xff]  ;;  %1117 = vmatpush.msra.mxu0 %v278_v11  ;;  %1154 = vmatpush.msra.mxu2 %v348_v53  ;;  %v998_v32 = vshrl.u32 %v9343_v17, 16  ;;  %v1008_v42 = vadd.s32 %v1006_v5, %v1004_v36  ;;  %v1020_v41 = vshrl.u32 %v9335_v6, 16  ;;  %v1030_v3 = vadd.s32 %v1028_v44, %v1026_v23  ;;  %v376_v33 = vld [vmem:[#allocation9 + $0x370] sm:$0xff] }
 0x1bc   :  { %v903_v63 = vor.u32 4788187, %v902_v7  ;;  %v380_v7 = vld [vmem:[#allocation9 + $0x390] sm:$0xff]  ;;  %v906_v10 = vcvt.s32.f32 %v899_v54  ;;  %1137 = vmatpush.msra.mxu1 %v310_v61  ;;  %v602_v54 = vsub.s32 4, %v9090_v24  ;;  %v618_v52 = vmul.f32 %v9311_v16, %v9224_v26  ;;  %v274_v17 = vld [vmem:[#allocation9 + $0x40] sm:$0xff] }
 0x1bd   :  { %1174 = vmatpush.msra.mxu3 %v380_v7  ;;  %1118 = vmatpush.msra.mxu0 %v276_v38  ;;  %v1000_v6 = vshrl.u32 %v9345_v43, 16  ;;  %v1009_v25 = vadd.s32 %v1008_v42, %v998_v32  ;;  %v1022_v8 = vshrl.u32 %v9337_v14, 16  ;;  %v756_v16 = vsub.s32 4, %v9142_v35  ;;  %v272_v61 = vld [vmem:[#allocation9 + $0x30] sm:$0xff]  ;;  %v342_v53 = vld [vmem:[#allocation9 + $0x260] sm:$0xff] }
 0x1be   :  { %v904_v31 = vand.u32 2147483647, %v903_v63  ;;  %1138 = vmatpush.msra.mxu1 %v308_v39  ;;  %1155 = vmatpush.msra.mxu2 %v346_v9  ;;  %v1031_v63 = vadd.s32 %v1030_v3, %v1020_v41  ;;  %v772_v37 = vmul.f32 %v9323_v57, %v9252_v51  ;;  %v979_v11 = vsel %vm973_vm15, %v976_v50, %v978_v22  ;;  %v304_v43 = vld [vmem:[#allocation9 + $0x130] sm:$0xff]  ;;  %v374_v57 = vld [vmem:[#allocation9 + $0x360] sm:$0xff] }
 0x1bf   :  { %1175 = vmatpush.msra.mxu3 %v378_v18  ;;  %1119 = vmatpush.msra.mxu0 %v274_v17  ;;  %v610_v36 = vadd.f32 -0.4999988, %v9328_v20  ;;  %v9381_v7 = vadd.s32 %v1009_v25, %v1000_v6  ;;  %v603_v19 = vsel %vm480_vm0, %v602_v54, %v9090_v24  ;;  %v619_v50 = vadd.f32 1.0, %v618_v52  ;;  %v270_v14 = vld [vmem:[#allocation9 + $0x20] sm:$0xff]  ;;  %v372_v44 = vld [vmem:[#allocation9 + $0x350] sm:$0xff] }
 0x1c0   :  { %v907_v0 = vmul.f32 %v906_v10, %v904_v31  ;;  %1139 = vmatpush.msra.mxu1 %v306_v15  ;;  %1156 = vmatpush.msra.mxu2 %v344_v46  ;;  %v9385_v31 = vadd.s32 %v1025_v60, %v1021_v34  ;;  %v1032_v10 = vadd.s32 %v1031_v63, %v1022_v8  ;;  %vm9392_vm11 = vcmp.le.f32.partialorder %v786_v2, 0.7853982  ;;  %v302_v34 = vld [vmem:[#allocation9 + $0x120] sm:$0xff]  ;;  %v340_v60 = vld [vmem:[#allocation9 + $0x250] sm:$0xff]  ;;  %v297_v63 = vld [vmem:[#allocation9 + $0xf8] sm:$0xff] }
 0x1c1   :  { %1176 = vmatpush.msra.mxu3 %v376_v33  ;;  %1120 = vmatpush.msra.mxu0 %v272_v61  ;;  %v764_v5 = vadd.f32 -0.4999988, %v763_v48  ;;  %v757_v38 = vsel %vm634_vm7, %v756_v16, %v9142_v35  ;;  %v1033_v32 = vmul.u32 %v9291_v59, %v979_v11  ;;  %v268_v42 = vld [vmem:[#allocation9 + $0x10] sm:$0xff]  ;;  %v338_v3 = vld [vmem:[#allocation9 + $0x240] sm:$0xff]  ;;  %v605_v9 = vsel %vm9198_vm5, 0, %v603_v19 }
 0x1c2   :  { %v908_v23 = vxor.u32 2147483648, %v907_v0  ;;  %1140 = vmatpush.msra.mxu1 %v304_v43  ;;  %1157 = vmatpush.msra.mxu2 %v342_v53  ;;  %vm1035_vm0 = vc.u32 %v9381_v7, %v9385_v31  ;;  %v1036_v2 = vadd.s32 1, %v1032_v10  ;;  %v300_v41 = vld [vmem:[#allocation9 + $0x110] sm:$0xff]  ;;  %v611_v18 = vmul.f32 %v610_v36, %v9224_v26  ;;  %v370_v52 = vld [vmem:[#allocation9 + $0x340] sm:$0xff]  ;;  %v295_v43 = vld [vmem:[#allocation9 + $0xe8] sm:$0xff] }
 0x1c3   :  { %1177 = vmatpush.msra.mxu3 %v374_v57  ;;  %1121 = vmatpush.msra.mxu0 %v270_v14  ;;  %v773_v54 = vadd.f32 1.0, %v772_v37  ;;  %v266_v17 = vld [vmem:[#allocation9] sm:$0xff]  ;;  %v9422_v15 = vmul.f32 %v619_v50, %v9211_v30  ;;  %v759_v26 = vsel %vm9234_vm9, 0, %v757_v38  ;;  %v765_v46 = vmul.f32 %v764_v5, %v9252_v51  ;;  %v336_v25 = vld [vmem:[#allocation9 + $0x230] sm:$0xff]  ;;  %v327_v57 = vld [vmem:[#allocation9 + $0x1e8] sm:$0xff] }
 0x1c4   :  { %v909_v20 = vsel %vm788_vm4, %v908_v23, %v907_v0  ;;  %1141 = vmatpush.msra.mxu1 %v302_v34  ;;  %1158 = vmatpush.msra.mxu2 %v340_v60  ;;  %v1037_v35 = vsel %vm1035_vm0, %v1036_v2, %v1032_v10  ;;  %v910_v6 = vsub.s32 4, %v9266_v40  ;;  %v368_v8 = vld [vmem:[#allocation9 + $0x330] sm:$0xff]  ;;  %v329_v23 = vld [vmem:[#allocation9 + $0x1f8] sm:$0xff]  ;;  %v9428_v30 = vadd.f32 1.0, %v611_v18  ;;  %v334_v51 = vld [vmem:[#allocation9 + $0x220] sm:$0xff] }
 0x1c5   :  { %v9401_v24 = vsel %vm9392_vm11, %v8959_v47, %v909_v20  ;;  %1178 = vmatpush.msra.mxu3 %v372_v44  ;;  %1122 = vmatpush.msra.mxu0 %v268_v42  ;;  %v1038_v0 = vadd.s32 %v1037_v35, %v1033_v32  ;;  %v9430_v11 = vand.u32 3, %v605_v9  ;;  %v9433_v12 = vmul.f32 %v773_v54, %v9244_v45  ;;  %v366_v61 = vld [vmem:[#allocation9 + $0x320] sm:$0xff]  ;;  %v332_v19 = vld [vmem:[#allocation9 + $0x210] sm:$0xff]  ;;  %v293_v60 = vld [vmem:[#allocation9 + $0xd8] sm:$0xff] }
 0x1c6   :  { %v9410_v39 = vmul.f32 %v9401_v24, %v9401_v24  ;;  %1142 = vmatpush.msra.mxu1 %v300_v41  ;;  %1159 = vmatpush.msra.mxu2 %v338_v3  ;;  %v364_v50 = vld [vmem:[#allocation9 + $0x310] sm:$0xff]  ;;  %v625_v20 = vxor.u32 2147483648, %v9422_v15  ;;  %v9440_v45 = vadd.f32 1.0, %v765_v46  ;;  %v9442_v14 = vand.u32 3, %v759_v26  ;;  %v325_v5 = vld [vmem:[#allocation9 + $0x1d8] sm:$0xff]  ;;  %v330_v41 = vld [vmem:[#allocation9 + $0x200] sm:$0xff] }
 0x1c7   :  { %1179 = vmatpush.msra.mxu3 %v370_v52  ;;  %1123 = vmatpush.msra.mxu0 %v266_v17  ;;  %v1039_v37 = vadd.s32 536870912, %v1038_v0  ;;  %v911_v34 = vsel %vm788_vm4, %v910_v6, %v9266_v40  ;;  %vm624_vm5 = vcmp.eq.s32.totalorder %v9430_v11, 0  ;;  %v628_v32 = vxor.u32 2147483648, %v9428_v30  ;;  %v362_v40 = vld [vmem:[#allocation9 + $0x300] sm:$0xff]  ;;  %v291_v3 = vld [vmem:[#allocation9 + $0xc8] sm:$0xff] }
 0x1c8   :  { %v915_v59 = vmul.f32 -0.001358992, %v9410_v39  ;;  %v922_v48 = vmul.f32 -0.00019511016, %v9410_v39  ;;  %1143 = vmatpush.msra.mxu1 %v298_v21  ;;  %1160 = vmatpush.msra.mxu2 %v336_v25  ;;  %v779_v42 = vxor.u32 2147483648, %v9433_v12  ;;  %v913_v9 = vsel %vm9392_vm11, 0, %v911_v34 }
 0x1c9   :  { %1180 = vmatpush.msra.mxu3 %v368_v8  ;;  %1188 = vmatpush.msrb.mxu0 %v297_v63  ;;  %v9437_v10 = vshrl.u32 %v1039_v37, 30  ;;  %v323_v52 = vld [vmem:[#allocation9 + $0x1c8] sm:$0xff]  ;;  %vm623_vm7 = vcmp.lt.s32.totalorder %v9430_v11, 2  ;;  %v626_v17 = vsel %vm624_vm5, %v9428_v30, %v625_v20  ;;  %vm778_vm9 = vcmp.eq.s32.totalorder %v9442_v14, 0  ;;  %v289_v21 = vld [vmem:[#allocation9 + $0xb8] sm:$0xff] }
 0x1ca   :  { %v916_v33 = vadd.f32 0.041655596, %v915_v59  ;;  %v923_v16 = vadd.f32 0.008332121, %v922_v48  ;;  %1208 = vmatpush.msrb.mxu1 %v329_v23  ;;  %1161 = vmatpush.msra.mxu2 %v334_v51  ;;  %v361_v59 = vld [vmem:[#allocation9 + $0x2f8] sm:$0xff]  ;;  %v782_v22 = vxor.u32 2147483648, %v9440_v45  ;;  %v780_v8 = vsel %vm778_vm9, %v9440_v45, %v779_v42 }
 0x1cb   :  { %1181 = vmatpush.msra.mxu3 %v366_v61  ;;  %1189 = vmatpush.msrb.mxu0 %v295_v43  ;;  %v1041_v38 = vshll.u32 %v9437_v10, 30  ;;  %v393_v48 = vld [vmem:[#allocation9 + $0x3f8] sm:$0xff]  ;;  %v359_v6 = vld [vmem:[#allocation9 + $0x2e8] sm:$0xff]  ;;  %vm627_vm13 = vcmp.eq.s32.totalorder %v9430_v11, 2  ;;  %vm781_vm14 = vcmp.eq.s32.totalorder %v9442_v14, 2  ;;  %v930_v63 = vand.u32 3, %v913_v9 }
 0x1cc   :  { %v917_v53 = vmul.f32 %v916_v33, %v9410_v39  ;;  %v924_v36 = vmul.f32 %v923_v16, %v9410_v39  ;;  %1209 = vmatpush.msrb.mxu1 %v327_v57  ;;  %1162 = vmatpush.msra.mxu2 %v332_v19  ;;  %v391_v25 = vld [vmem:[#allocation9 + $0x3e8] sm:$0xff]  ;;  %v629_v37 = vsel %vm627_vm13, %v628_v32, %v9422_v15  ;;  %v357_v61 = vld [vmem:[#allocation9 + $0x2d8] sm:$0xff]  ;;  %vm777_vm15 = vcmp.lt.s32.totalorder %v9442_v14, 2 }
 0x1cd   :  { %1182 = vmatpush.msra.mxu3 %v364_v50  ;;  %1190 = vmatpush.msrb.mxu0 %v293_v60  ;;  %v9455_v35 = vsub.s32 %v1038_v0, %v1041_v38  ;;  %v287_v33 = vld [vmem:[#allocation9 + $0xa8] sm:$0xff]  ;;  %v389_v43 = vld [vmem:[#allocation9 + $0x3d8] sm:$0xff]  ;;  %v783_v15 = vsel %vm781_vm14, %v782_v22, %v9433_v12  ;;  %vm621_vm2 = vweird.f32 %v8943_v28  ;;  %vm775_vm3 = vweird.f32 %v8945_v29 }
 0x1ce   :  { %v918_v2 = vadd.f32 -0.4999988, %v917_v53  ;;  %v925_v44 = vadd.f32 -0.16666654, %v924_v36  ;;  %1210 = vmatpush.msrb.mxu1 %v325_v5  ;;  %1163 = vmatpush.msra.mxu2 %v330_v41  ;;  %v319_v16 = vld [vmem:[#allocation9 + $0x1a8] sm:$0xff]  ;;  %v630_v53 = vsel %vm623_vm7, %v626_v17, %v629_v37  ;;  %v317_v57 = vld [vmem:[#allocation9 + $0x198] sm:$0xff]  ;;  %v784_v19 = vsel %vm777_vm15, %v780_v8, %v783_v15 }
 0x1cf   :  { %1183 = vmatpush.msra.mxu3 %v362_v40  ;;  %vm1043_vm12 = vcmp.lt.s32.totalorder %v9455_v35, 0  ;;  %v1044_v46 = vsub.s32 0, %v9455_v35  ;;  %1191 = vmatpush.msrb.mxu0 %v291_v3  ;;  %v355_v20 = vld [vmem:[#allocation9 + $0x2c8] sm:$0xff]  ;;  %vm932_vm4 = vcmp.eq.s32.totalorder %v930_v63, 0  ;;  %vm935_vm6 = vcmp.eq.s32.totalorder %v930_v63, 2  ;;  %v353_v28 = vld [vmem:[#allocation9 + $0x2b8] sm:$0xff] }
 0x1d0   :  { %v919_v18 = vmul.f32 %v918_v2, %v9410_v39  ;;  %v926_v54 = vmul.f32 %v925_v44, %v9410_v39  ;;  %v321_v39 = vld [vmem:[#allocation9 + $0x1b8] sm:$0xff]  ;;  %1211 = vmatpush.msrb.mxu1 %v323_v52  ;;  %1228 = vmatpush.msrb.mxu2 %v361_v59  ;;  %v387_v11 = vld [vmem:[#allocation9 + $0x3c8] sm:$0xff]  ;;  %v631_v34 = vsel %vm621_vm2, nan, %v630_v53  ;;  %vm931_vm8 = vcmp.lt.s32.totalorder %v930_v63, 2 }
 0x1d1   :  { %1248 = vmatpush.msrb.mxu3 %v393_v48  ;;  %v1045_v51 = vsel %vm1043_vm12, %v1044_v46, %v9455_v35  ;;  %1192 = vmatpush.msrb.mxu0 %v289_v21  ;;  %v283_v12 = vld [vmem:[#allocation9 + $0x88] sm:$0xff]  ;;  %v385_v2 = vld [vmem:[#allocation9 + $0x3b8] sm:$0xff]  ;;  %v785_v44 = vsel %vm775_vm3, nan, %v784_v19  ;;  %vm929_vm11 = vweird.f32 %v8959_v47  ;;  %v1034_v9 = vadd.s32 %v9385_v31, %v9381_v7 }
 0x1d2   :  { %v920_v0 = vadd.f32 1.0, %v919_v18  ;;  %v927_v26 = vadd.f32 1.0, %v926_v54  ;;  %1212 = vmatpush.msrb.mxu1 %v321_v39  ;;  %v1046_v36 = vclz %v1045_v51  ;;  %1229 = vmatpush.msrb.mxu2 %v359_v6  ;;  %v315_v14 = vld [vmem:[#allocation9 + $0x188] sm:$0xff]  ;;  %v281_v32 = vld [vmem:[#allocation9 + $0x78] sm:$0xff]  ;;  %v1094_v59 = vmul.f32 %v631_v34, %v631_v34 }
 0x1d3   :  { %1249 = vmatpush.msrb.mxu3 %v391_v25  ;;  %1193 = vmatpush.msrb.mxu0 %v287_v33  ;;  %v313_v42 = vld [vmem:[#allocation9 + $0x178] sm:$0xff]  ;;  %v351_v40 = vld [vmem:[#allocation9 + $0x2a8] sm:$0xff]  ;;  %v1095_v22 = vmul.f32 %v785_v44, %v785_v44  ;;  %vm942_vm0 = vcmp.lt.s32.totalorder %v9188_v49, 0  ;;  %vm9490_vm5 = vcmp.le.f32.partialorder %v940_v55, 0.7853982  ;;  %vm1083_vm13 = vweird.f32 %v9188_v49 }
 0x1d4   :  { %v928_v23 = vmul.f32 %v927_v26, %v9401_v24  ;;  %v936_v30 = vxor.u32 2147483648, %v920_v0  ;;  %v285_v24 = vld [vmem:[#allocation9 + $0x98] sm:$0xff]  ;;  %1213 = vmatpush.msrb.mxu1 %v319_v16  ;;  %v8388_v45 = vadd.s32 4294967294, %v1046_v36  ;;  %1230 = vmatpush.msrb.mxu2 %v357_v61  ;;  %v383_v3 = vld [vmem:[#allocation9 + $0x3a8] sm:$0xff]  ;;  %v1098_v26 = vsub.f32 1.0, %v1094_v59 }
 0x1d5   :  { %1250 = vmatpush.msrb.mxu3 %v389_v43  ;;  %1194 = vmatpush.msrb.mxu0 %v285_v24  ;;  %v279_v29 = vld [vmem:[#allocation9 + $0x68] sm:$0xff]  ;;  %v349_v17 = vld [vmem:[#allocation9 + $0x298] sm:$0xff]  ;;  %v1099_v25 = vsub.f32 1.0, %v1095_v22 }
 0x1d6   :  { %v933_v50 = vxor.u32 2147483648, %v928_v23  ;;  %v937_v5 = vsel %vm935_vm6, %v936_v30, %v928_v23  ;;  %1214 = vmatpush.msrb.mxu1 %v317_v57  ;;  %vm8389_vm10 = vcmp.lt.s32.totalorder %v8388_v45, 0  ;;  %1231 = vmatpush.msrb.mxu2 %v355_v20  ;;  %v311_v52 = vld [vmem:[#allocation9 + $0x168] sm:$0xff]  ;;  %v381_v47 = vld [vmem:[#allocation9 + $0x398] sm:$0xff]  ;;  %v1102_v30 = vadd.f32 %v1098_v26, %v1094_v59 }
 0x1d7   :  { %1251 = vmatpush.msrb.mxu3 %v387_v11  ;;  %v1049_v41 = vsel %vm8389_vm10, 0, %v8388_v45  ;;  %1195 = vmatpush.msrb.mxu0 %v283_v12  ;;  %v277_v7 = vld [vmem:[#allocation9 + $0x58] sm:$0xff]  ;;  %v347_v46 = vld [vmem:[#allocation9 + $0x288] sm:$0xff]  ;;  %v1103_v51 = vadd.f32 %v1099_v25, %v1095_v22  ;;  %v1272_v22 = vld [vmem:[#allocation8 + $0x20] sm:$0xff] }
 0x1d8   :  { %v934_v60 = vsel %vm932_vm4, %v920_v0, %v933_v50  ;;  %1215 = vmatpush.msrb.mxu1 %v315_v14  ;;  %v1050_v18 = vsub.s32 32, %v1049_v41  ;;  %v1054_v54 = vsub.s32 4294967266, %v1049_v41  ;;  %1232 = vmatpush.msrb.mxu2 %v353_v28  ;;  %v1051_v21 = vshll.u32 %v9455_v35, %v1049_v41  ;;  %v309_v31 = vld [vmem:[#allocation9 + $0x158] sm:$0xff]  ;;  %v379_v6 = vld [vmem:[#allocation9 + $0x388] sm:$0xff] }
 0x1d9   :  { %v938_v38 = vsel %vm931_vm8, %v934_v60, %v937_v5  ;;  %1252 = vmatpush.msrb.mxu3 %v385_v2  ;;  %1196 = vmatpush.msrb.mxu0 %v281_v32  ;;  %v275_v33 = vld [vmem:[#allocation9 + $0x48] sm:$0xff]  ;;  %v345_v35 = vld [vmem:[#allocation9 + $0x278] sm:$0xff] }
 0x1da   :  { %v939_v48 = vsel %vm929_vm11, nan, %v938_v38  ;;  %1216 = vmatpush.msrb.mxu1 %v313_v42  ;;  %v1052_v39 = vshrl.u32 %v1034_v9, %v1050_v18  ;;  %v1055_v0 = vadd.s32 127, %v1054_v54  ;;  %1233 = vmatpush.msrb.mxu2 %v351_v40  ;;  %v307_v16 = vld [vmem:[#allocation9 + $0x148] sm:$0xff]  ;;  %v377_v23 = vld [vmem:[#allocation9 + $0x378] sm:$0xff]  ;;  %v1276_v54 = vld [vmem:[#allocation8 + $0x120] sm:$0xff] }
 0x1db   :  { %1253 = vmatpush.msrb.mxu3 %v383_v3  ;;  %1197 = vmatpush.msrb.mxu0 %v279_v29  ;;  %v1096_v37 = vmul.f32 %v939_v48, %v939_v48  ;;  %v273_v43 = vld [vmem:[#allocation9 + $0x38] sm:$0xff]  ;;  %v343_v24 = vld [vmem:[#allocation9 + $0x268] sm:$0xff] }
 0x1dc   :  { %1217 = vmatpush.msrb.mxu1 %v311_v52  ;;  %v1053_v8 = vor.u32 %v1052_v39, %v1051_v21  ;;  %v1056_v63 = vshll.u32 %v1055_v0, 23  ;;  %1234 = vmatpush.msrb.mxu2 %v349_v17  ;;  %v305_v53 = vld [vmem:[#allocation9 + $0x138] sm:$0xff]  ;;  %v375_v57 = vld [vmem:[#allocation9 + $0x368] sm:$0xff]  ;;  %v1064_v17 = vsub.s32 4, %v9437_v10 }
 0x1dd   :  { %1254 = vmatpush.msrb.mxu3 %v381_v47  ;;  %1198 = vmatpush.msrb.mxu0 %v277_v7  ;;  %v1100_v19 = vsub.f32 1.0, %v1096_v37  ;;  %v271_v50 = vld [vmem:[#allocation9 + $0x28] sm:$0xff]  ;;  %v341_v45 = vld [vmem:[#allocation9 + $0x258] sm:$0xff] }
 0x1de   :  { %1218 = vmatpush.msrb.mxu1 %v309_v31  ;;  %v1057_v61 = vor.u32 4788187, %v1056_v63  ;;  %1235 = vmatpush.msrb.mxu2 %v347_v46  ;;  %v1060_v36 = vcvt.s32.f32 %v1053_v8  ;;  %v303_v20 = vld [vmem:[#allocation9 + $0x128] sm:$0xff]  ;;  %v373_v12 = vld [vmem:[#allocation9 + $0x358] sm:$0xff]  ;;  %v1065_v25 = vsel %vm942_vm0, %v1064_v17, %v9437_v10 }
 0x1df   :  { %1255 = vmatpush.msrb.mxu3 %v379_v6  ;;  %1199 = vmatpush.msrb.mxu0 %v275_v33  ;;  %v269_v14 = vld [vmem:[#allocation9 + $0x18] sm:$0xff]  ;;  %v339_v5 = vld [vmem:[#allocation9 + $0x248] sm:$0xff]  ;;  %v1104_v2 = vadd.f32 %v1100_v19, %v1096_v37  ;;  %v1278_v6 = vld [vmem:[#allocation8 + $0x130] sm:$0xff] }
 0x1e0   :  { %1219 = vmatpush.msrb.mxu1 %v307_v16  ;;  %v1058_v15 = vand.u32 2147483647, %v1057_v61  ;;  %1236 = vmatpush.msrb.mxu2 %v345_v35  ;;  %v301_v34 = vld [vmem:[#allocation9 + $0x118] sm:$0xff]  ;;  %v371_v28 = vld [vmem:[#allocation9 + $0x348] sm:$0xff]  ;;  %v1274_v33 = vld [vmem:[#allocation8 + $0x30] sm:$0xff]  ;;  %v1067_v16 = vsel %vm9490_vm5, 0, %v1065_v25 }
 0x1e1   :  { %1256 = vmatpush.msrb.mxu3 %v377_v23  ;;  %1124 = vmatmul.f32.vlgmr.msra.gmra.mxu0 %v1102_v30  ;;  %v267_v44 = vld [vmem:[#allocation9 + $0x8] sm:$0xff]  ;;  %v337_v41 = vld [vmem:[#allocation9 + $0x238] sm:$0xff] }
 0x1e2   :  { %1144 = vmatmul.f32.vlgmr.msra.gmra.mxu1 %v1103_v51  ;;  %v1061_v11 = vmul.f32 %v1060_v36, %v1058_v15  ;;  %1200 = vmatpush.msrb.mxu0 %v273_v43  ;;  %v299_v42 = vld [vmem:[#allocation9 + $0x108] sm:$0xff]  ;;  %v369_v3 = vld [vmem:[#allocation9 + $0x338] sm:$0xff] }
 0x1e3   :  { %1220 = vmatpush.msrb.mxu1 %v305_v53  ;;  %1237 = vmatpush.msrb.mxu2 %v343_v24  ;;  %v335_v55 = vld [vmem:[#allocation9 + $0x228] sm:$0xff]  ;;  %v333_v59 = vld [vmem:[#allocation9 + $0x218] sm:$0xff] }
 0x1e4   :  { %1257 = vmatpush.msrb.mxu3 %v375_v57  ;;  %v1062_v60 = vxor.u32 2147483648, %v1061_v11  ;;  %1201 = vmatpush.msrb.mxu0 %v271_v50  ;;  %v367_v18 = vld [vmem:[#allocation9 + $0x328] sm:$0xff]  ;;  %v365_v47 = vld [vmem:[#allocation9 + $0x318] sm:$0xff] }
 0x1e5   :  { %1221 = vmatpush.msrb.mxu1 %v303_v20  ;;  %1238 = vmatpush.msrb.mxu2 %v341_v45  ;;  %v1277_v48 = vld [vmem:[#allocation8 + $0x128] sm:$0xff]  ;;  %v1279_v20 = vld [vmem:[#allocation8 + $0x138] sm:$0xff] }
 0x1e6   :  { %1258 = vmatpush.msrb.mxu3 %v373_v12  ;;  %v1063_v32 = vsel %vm942_vm0, %v1062_v60, %v1061_v11  ;;  %1202 = vmatpush.msrb.mxu0 %v269_v14  ;;  %v331_v0 = vld [vmem:[#allocation9 + $0x208] sm:$0xff]  ;;  %v1275_v11 = vld [vmem:[#allocation8 + $0x38] sm:$0xff] }
 0x1e7   :  { %1222 = vmatpush.msrb.mxu1 %v301_v34  ;;  %v1066_v40 = vsel %vm9490_vm5, %v9188_v49, %v1063_v32  ;;  %1239 = vmatpush.msrb.mxu2 %v339_v5  ;;  %v1273_v7 = vld [vmem:[#allocation8 + $0x28] sm:$0xff] }
 0x1e8   :  { %1259 = vmatpush.msrb.mxu3 %v371_v28  ;;  %v1068_v9 = vmul.f32 %v1066_v40, %v1066_v40  ;;  %1164 = vmatmul.f32.vlgmr.msra.gmra.mxu2 %v1104_v2  ;;  %v363_v31 = vld [vmem:[#allocation9 + $0x308] sm:$0xff] }
 0x1e9   :  { %1203 = vmatpush.msrb.mxu0 %v267_v44  ;;  %1223 = vmatpush.msrb.mxu1 %v299_v42 }
 0x1ea   :  { %1240 = vmatpush.msrb.mxu2 %v337_v41  ;;  %v1069_v29 = vmul.f32 -0.001358992, %v1068_v9  ;;  %v1076_v52 = vmul.f32 -0.00019511016, %v1068_v9  ;;  %1260 = vmatpush.msrb.mxu3 %v369_v3 }
 0x1eb   :  { %1204 = vmatmul.f32.vlgmr.msrb.gmra.mxu0 %v1102_v30  ;;  %1224 = vmatmul.f32.vlgmr.msrb.gmra.mxu1 %v1103_v51  ;;  %v1084_v30 = vand.u32 3, %v1067_v16 }
 0x1ec   :  { %1241 = vmatpush.msrb.mxu2 %v335_v55  ;;  %v1070_v21 = vadd.f32 0.041655596, %v1069_v29  ;;  %v1077_v39 = vadd.f32 0.008332121, %v1076_v52  ;;  %1261 = vmatpush.msrb.mxu3 %v367_v18 }
 0x1ed   :  { %1422 = vmatpush.msra.mxu0 %v1276_v54  ;;  %1442 = vmatpush.msra.mxu1 %v1277_v48  ;;  %vm1086_vm7 = vcmp.eq.s32.totalorder %v1084_v30, 0  ;;  %vm1089_vm9 = vcmp.eq.s32.totalorder %v1084_v30, 2  ;;  %vm1085_vm12 = vcmp.lt.s32.totalorder %v1084_v30, 2 }
 0x1ee   :  { %1242 = vmatpush.msrb.mxu2 %v333_v59  ;;  %v1071_v26 = vmul.f32 %v1070_v21, %v1068_v9  ;;  %v1078_v46 = vmul.f32 %v1077_v39, %v1068_v9  ;;  %1262 = vmatpush.msrb.mxu3 %v365_v47 }
 0x1ef   :  { %1423 = vmatpush.msra.mxu0 %v1272_v22  ;;  %1443 = vmatpush.msra.mxu1 %v1273_v7 }
 0x1f0   :  { %1243 = vmatpush.msrb.mxu2 %v331_v0  ;;  %v1072_v8 = vadd.f32 -0.4999988, %v1071_v26  ;;  %v1079_v63 = vadd.f32 -0.16666654, %v1078_v46  ;;  %1263 = vmatpush.msrb.mxu3 %v363_v31 }
 0x1f1   :  { %1244 = vmatmul.f32.vlgmr.msrb.gmra.mxu2 %v1104_v2 }
 0x1f2   :  { %1462 = vmatpush.msra.mxu2 %v1278_v6  ;;  %v1073_v37 = vmul.f32 %v1072_v8, %v1068_v9  ;;  %v1080_v35 = vmul.f32 %v1079_v63, %v1068_v9 }
 0x1f3   :  { %8390 = vmatmul.msk.f32.vlgmr.msra.gmra.mxu0 %vm394_vm1, %v8933_v27  ;;  %8391 = vmatmul.msk.f32.vlgmr.msra.gmra.mxu1 %vm394_vm1, %v8933_v27 }
 0x1f4   :  { %1463 = vmatpush.msra.mxu2 %v1274_v33  ;;  %v1074_v10 = vadd.f32 1.0, %v1073_v37  ;;  %v1081_v23 = vadd.f32 1.0, %v1080_v35 }
 0x1f6   :  { %v1082_v51 = vmul.f32 %v1081_v23, %v1066_v40  ;;  %v1090_v61 = vxor.u32 2147483648, %v1074_v10 }
 0x1f8   :  { %v1087_v43 = vxor.u32 2147483648, %v1082_v51  ;;  %v1091_v15 = vsel %vm1089_vm9, %v1090_v61, %v1082_v51  ;;  %v13449_v51 = vmov 1326507024  }
 0x1f9   :  { %8392 = vmatmul.msk.f32.vlgmr.msra.gmra.mxu2 %vm394_vm1, %v8933_v27 }
 0x1fa   :  { %v1088_v53 = vsel %vm1086_vm7, %v1074_v10, %v1087_v43 }
 0x1fb   :  { %v1092_v36 = vsel %vm1085_vm12, %v1088_v53, %v1091_v15 }
 0x1fc   :  { %v1093_v24 = vsel %vm1083_vm13, nan, %v1092_v36 }
 0x1fd   :  { %v1097_v57 = vmul.f32 %v1093_v24, %v1093_v24 }
 0x1ff   :  { %v1101_v19 = vsub.f32 1.0, %v1097_v57 }
 0x201   :  { %v1105_v50 = vadd.f32 %v1101_v19, %v1097_v57 }
 0x203   :  { %1184 = vmatmul.f32.vlgmr.msra.gmra.mxu3 %v1105_v50 }
 0x204   :  { %1482 = vmatpush.msra.mxu3 %v1279_v20 }
 0x206   :  { %1483 = vmatpush.msra.mxu3 %v1275_v11 }
 0x20b   :  { %1264 = vmatmul.f32.vlgmr.msrb.gmra.mxu3 %v1105_v50 }
 0x213   :  { %8393 = vmatmul.msk.f32.vlgmr.msra.gmra.mxu3 %vm394_vm1, %v8933_v27 }
 0x25e   :  { %v1125_v45 = vpop.f32.mrf.mxu0 }
 0x25f   :  { %v1145_v12 = vpop.f32.mrf.mxu1 }
 0x260   :  { %v1146_v14 = vadd.f32 %v1145_v12, %v1125_v45 }
 0x268   :  { %v1205_v34 = vpop.f32.mrf.mxu0  ;;  %v1225_v60 = vpop.f32.mrf.mxu1 }
 0x269   :  { %v1226_v49 = vadd.f32 %v1225_v60, %v1205_v34 }
 0x26b   :  { %v1165_v5 = vpop.f32.mrf.mxu2 }
 0x26c   :  { %v9514_v28 = vadd.f32 %v1165_v5, %v1146_v14 }
 0x270   :  { %v9516_v2 = vpop.f32.mrf.mxu0  ;;  %v9520_v32 = vpop.f32.mrf.mxu1 }
 0x271   :  { %v1488_v44 = vand.u32 2147483647, %v9516_v2  ;;  %v1491_v38 = vand.u32 2139095040, %v9516_v2  ;;  %v1642_v42 = vand.u32 2147483647, %v9520_v32  ;;  %v1645_v41 = vand.u32 2139095040, %v9520_v32 }
 0x273   :  { %v1492_v40 = vshrl.u32 %v1491_v38, 23  ;;  %v1495_v3 = vand.u32 8388607, %v1488_v44  ;;  %v1646_v9 = vshrl.u32 %v1645_v41, 23  ;;  %v1649_v29 = vand.u32 8388607, %v1642_v42 }
 0x274   :  { %v1245_v55 = vpop.f32.mrf.mxu2 }
 0x275   :  { %v8394_v18 = vadd.s32 4294967169, %v1492_v40  ;;  %v1496_v54 = vor.u32 8388608, %v1495_v3  ;;  %v9528_v52 = vadd.f32 %v1245_v55, %v1226_v49  ;;  %v8397_v59 = vadd.s32 4294967169, %v1646_v9 }
 0x276   :  { %v1650_v22 = vor.u32 8388608, %v1649_v29 }
 0x277   :  { %v1498_v48 = vadd.s32 1, %v8394_v18  ;;  %v1652_v17 = vadd.s32 1, %v8397_v59  ;;  %v9530_v47 = vshll.u32 %v1496_v54, 8 }
 0x278   :  { %v9535_v6 = vshll.u32 %v1650_v22, 8 }
 0x279   :  { %vm1499_vm14 = vcmp.gt.s32.totalorder %v1498_v48, 0  ;;  %vm1653_vm15 = vcmp.gt.s32.totalorder %v1652_v17, 0  ;;  %v1537_v26 = vand.u32 65535, %v9530_v47  ;;  %v1538_v33 = vshrl.u32 %v9530_v47, 16 }
 0x27a   :  { %v1500_v21 = vsel %vm1499_vm14, %v1498_v48, 0  ;;  %v1654_v0 = vsel %vm1653_vm15, %v1652_v17, 0  ;;  %v9571_v22 = vand.u32 65535, %v9535_v6 }
 0x27b   :  { %v1502_v39 = vand.u32 31, %v1500_v21  ;;  %v1501_v7 = vshrl.u32 %v1500_v21, 5  ;;  %v9533_v46 = vand.u32 31, %v1654_v0  ;;  %v9566_v48 = vshrl.u32 %v1654_v0, 5 }
 0x27d   :  { %v1503_v31 = vsub.s32 32, %v1502_v39  ;;  %v1505_v25 = vshll.u32 %v8683_v56, %v1502_v39  ;;  %v1508_v8 = vshll.u32 %v13439_v58, %v1502_v39  ;;  %v1511_v63 = vshll.u32 %v13437_v62, %v1502_v39 }
 0x27e   :  { %v1514_v10 = vshll.u32 %v13435_v1, %v1502_v39  ;;  %v1517_v30 = vshll.u32 %v13433_v4, %v1502_v39  ;;  %vm1520_vm2 = vcmp.lt.s32.totalorder %v1501_v7, 1  ;;  %v9549_v36 = vsub.s32 32, %v9533_v46 }
 0x27f   :  { %v1506_v16 = vshrl.u32 %v13439_v58, %v1503_v31  ;;  %v1509_v37 = vshrl.u32 %v13437_v62, %v1503_v31  ;;  %v1512_v35 = vshrl.u32 %v13435_v1, %v1503_v31  ;;  %v1515_v23 = vshrl.u32 %v13433_v4, %v1503_v31 }
 0x280   :  { %v1518_v61 = vshrl.u32 %v13449_v51, %v1503_v31  ;;  %vm1521_vm3 = vcmp.lt.s32.totalorder %v1501_v7, 2  ;;  %vm1523_vm4 = vcmp.lt.s32.totalorder %v1501_v7, 4  ;;  %v1504_v19 = vshrl.u32 %v8683_v56, %v1503_v31 }
 0x281   :  { %v1507_v43 = vor.u32 %v1506_v16, %v1505_v25  ;;  %v1510_v53 = vor.u32 %v1509_v37, %v1508_v8  ;;  %v1513_v15 = vor.u32 %v1512_v35, %v1511_v63  ;;  %v1516_v24 = vor.u32 %v1515_v23, %v1514_v10 }
 0x282   :  { %v1519_v57 = vor.u32 %v1518_v61, %v1517_v30  ;;  %vm1522_vm6 = vcmp.lt.s32.totalorder %v1501_v7, 3  ;;  %v1659_v14 = vshll.u32 %v8683_v56, %v9533_v46  ;;  %v1660_v5 = vshrl.u32 %v13439_v58, %v9549_v36 }
 0x283   :  { %v1525_v50 = vsel %vm1523_vm4, %v1513_v15, 2102212464  ;;  %v1528_v20 = vsel %vm1520_vm2, %v1507_v43, %v1510_v53  ;;  %v1532_v11 = vsel %vm1520_vm2, %v1510_v53, %v1513_v15  ;;  %v1529_v45 = vsel %vm1523_vm4, %v1516_v24, 920167782 }
 0x284   :  { %v1533_v12 = vsel %vm1523_vm4, %v1519_v57, 1326507024  ;;  %v1524_v34 = vsel %vm1520_vm2, %v1504_v19, %v1507_v43  ;;  %v1530_v60 = vsel %vm1522_vm6, %v1513_v15, %v1529_v45  ;;  %v1526_v38 = vsel %vm1522_vm6, %v1510_v53, %v1525_v50 }
 0x285   :  { %v1534_v49 = vsel %vm1522_vm6, %v1516_v24, %v1533_v12  ;;  %v1531_v41 = vsel %vm1521_vm3, %v1528_v20, %v1530_v60  ;;  %v1663_v3 = vshrl.u32 %v13437_v62, %v9549_v36  ;;  %v1662_v17 = vshll.u32 %v13439_v58, %v9533_v46 }
 0x286   :  { %v1535_v40 = vsel %vm1521_vm3, %v1532_v11, %v1534_v49  ;;  %v1185_v9 = vpop.f32.mrf.mxu3  ;;  %v1561_v54 = vand.u32 65535, %v1531_v41  ;;  %v1562_v29 = vshrl.u32 %v1531_v41, 16  ;;  %v9574_v21 = vsel %vm1521_vm3, %v1524_v34, %v1526_v38 }
 0x287   :  { %v1539_v55 = vand.u32 65535, %v1535_v40  ;;  %v1540_v18 = vshrl.u32 %v1535_v40, 16  ;;  %v9564_v59 = vadd.f32 %v1185_v9, %v9514_v28  ;;  %v9576_v25 = vor.u32 %v1660_v5, %v1659_v14 }
 0x288   :  { %v1564_v8 = vmul.u32 %v1562_v29, %v1537_v26  ;;  %v1565_v63 = vmul.u32 %v1561_v54, %v1538_v33  ;;  %v9578_v16 = vor.u32 %v1663_v3, %v1662_v17  ;;  %v1665_v28 = vshll.u32 %v13437_v62, %v9533_v46 }
 0x289   :  { %v1542_v39 = vmul.u32 %v1540_v18, %v1537_v26  ;;  %v1543_v31 = vmul.u32 %v1539_v55, %v1538_v33  ;;  %v1541_v0 = vmul.u32 %v1539_v55, %v1537_v26  ;;  %v1544_v37 = vmul.u32 %v1540_v18, %v1538_v33 }
 0x28a   :  { %v1563_v10 = vmul.u32 %v1561_v54, %v1537_v26  ;;  %v1566_v7 = vmul.u32 %v1562_v29, %v1538_v33  ;;  %v1567_v61 = vshll.u32 %v1564_v8, 16  ;;  %v1569_v53 = vshll.u32 %v1565_v63, 16 }
 0x28b   :  { %v1545_v35 = vshll.u32 %v1542_v39, 16  ;;  %v1546_v23 = vshrl.u32 %v1542_v39, 16  ;;  %v1547_v30 = vshll.u32 %v1543_v31, 16  ;;  %v1666_v15 = vshrl.u32 %v13435_v1, %v9549_v36 }
 0x28c   :  { %vm1571_vm10 = vc.u32 %v1563_v10, %v1567_v61  ;;  %v1573_v57 = vadd.s32 %v1567_v61, %v1563_v10  ;;  %v1669_v19 = vshrl.u32 %v13433_v4, %v9549_v36  ;;  %v1668_v33 = vshll.u32 %v13435_v1, %v9533_v46 }
 0x28d   :  { %vm1549_vm8 = vc.u32 %v1541_v0, %v1545_v35  ;;  %v1551_v43 = vadd.s32 %v1545_v35, %v1541_v0  ;;  %v1572_v26 = vsel %vm1571_vm10, 1, %v8689_v13  ;;  %v1548_v20 = vshrl.u32 %v1543_v31, 16 }
 0x28e   :  { %v1550_v24 = vsel %vm1549_vm8, 1, %v8689_v13  ;;  %v1574_v45 = vadd.s32 %v1572_v26, %v1566_v7  ;;  %vm1575_vm0 = vc.u32 %v1573_v57, %v1569_v53  ;;  %v1667_v34 = vor.u32 %v1666_v15, %v1665_v28 }
 0x28f   :  { %v1552_v50 = vadd.s32 %v1550_v24, %v1544_v37  ;;  %vm1553_vm11 = vc.u32 %v1551_v43, %v1547_v30  ;;  %v1576_v14 = vsel %vm1575_vm0, 1, %v8689_v13  ;;  %v1670_v60 = vor.u32 %v1669_v19, %v1668_v33  ;;  %v1265_v30 = vpop.f32.mrf.mxu3 }
 0x290   :  { %v1554_v11 = vsel %vm1553_vm11, 1, %v8689_v13  ;;  %v1568_v49 = vshrl.u32 %v1564_v8, 16  ;;  %v1578_v5 = vadd.s32 %v1576_v14, %v1574_v45  ;;  %v1671_v38 = vshll.u32 %v13433_v4, %v9533_v46 }
 0x291   :  { %v1556_v12 = vadd.s32 %v1554_v11, %v1552_v50  ;;  %v1672_v41 = vshrl.u32 %v13449_v51, %v9549_v36  ;;  %v1570_v3 = vshrl.u32 %v1565_v63, 16  ;;  %v9596_v9 = vadd.s32 %v1573_v57, %v1569_v53 }
 0x292   :  { %vm1674_vm5 = vcmp.lt.s32.totalorder %v9566_v48, 1  ;;  %v1579_v55 = vadd.s32 %v1578_v5, %v1568_v49  ;;  %vm1677_vm7 = vcmp.lt.s32.totalorder %v9566_v48, 4  ;;  %vm1676_vm9 = vcmp.lt.s32.totalorder %v9566_v48, 3 }
 0x293   :  { %v1557_v40 = vadd.s32 %v1556_v12, %v1546_v23  ;;  %v1673_v18 = vor.u32 %v1672_v41, %v1671_v38  ;;  %v1682_v54 = vsel %vm1674_vm5, %v9576_v25, %v9578_v16  ;;  %v1683_v46 = vsel %vm1677_vm7, %v1670_v60, 920167782 }
 0x294   :  { %v1686_v17 = vsel %vm1674_vm5, %v9578_v16, %v1667_v34  ;;  %v1580_v39 = vadd.s32 %v1579_v55, %v1570_v3  ;;  %vm1675_vm12 = vcmp.lt.s32.totalorder %v9566_v48, 2  ;;  %v1684_v31 = vsel %vm1676_vm9, %v1667_v34, %v1683_v46 }
 0x295   :  { %v9604_v29 = vadd.s32 %v1557_v40, %v1548_v20  ;;  %v1687_v8 = vsel %vm1677_vm7, %v1673_v18, 1326507024  ;;  %v1685_v63 = vsel %vm1675_vm12, %v1682_v54, %v1684_v31  ;;  %v1692_v0 = vshrl.u32 %v9535_v6, 16  ;;  %v9644_v18 = vpop.f32.mrf.mxu2 }
 0x296   :  { %v1688_v28 = vsel %vm1676_vm9, %v1670_v60, %v1687_v8  ;;  %v1584_v37 = vadd.s32 1, %v1580_v39  ;;  %v1715_v10 = vand.u32 65535, %v1685_v63  ;;  %v1716_v23 = vshrl.u32 %v1685_v63, 16 }
 0x297   :  { %vm1583_vm13 = vc.u32 %v9604_v29, %v9596_v9  ;;  %v1689_v35 = vsel %vm1675_vm12, %v1686_v17, %v1688_v28  ;;  %v1581_v7 = vmul.u32 %v9530_v47, %v9574_v21  ;;  %v9629_v53 = vadd.f32 %v1265_v30, %v9528_v52 }
 0x298   :  { %v1693_v61 = vand.u32 65535, %v1689_v35  ;;  %v1694_v43 = vshrl.u32 %v1689_v35, 16  ;;  %v1585_v15 = vsel %vm1583_vm13, %v1584_v37, %v1580_v39  ;;  %v1718_v24 = vmul.u32 %v1716_v23, %v9571_v22 }
 0x299   :  { %v1586_v57 = vadd.s32 %v1585_v15, %v1581_v7  ;;  %v1717_v26 = vmul.u32 %v1715_v10, %v9571_v22  ;;  %v1719_v33 = vmul.u32 %v1715_v10, %v1692_v0  ;;  %v1658_v47 = vshrl.u32 %v8683_v56, %v9549_v36 }
 0x29a   :  { %v1696_v19 = vmul.u32 %v1694_v43, %v9571_v22  ;;  %v1697_v50 = vmul.u32 %v1693_v61, %v1692_v0  ;;  %v1721_v20 = vshll.u32 %v1718_v24, 16  ;;  %v1695_v21 = vmul.u32 %v1693_v61, %v9571_v22 }
 0x29b   :  { %v1587_v11 = vadd.s32 536870912, %v1586_v57  ;;  %v1698_v52 = vmul.u32 %v1694_v43, %v1692_v0  ;;  %v1720_v14 = vmul.u32 %v1716_v23, %v1692_v0  ;;  %v1723_v41 = vshll.u32 %v1719_v33, 16 }
 0x29c   :  { %v1699_v45 = vshll.u32 %v1696_v19, 16  ;;  %v1701_v12 = vshll.u32 %v1697_v50, 16  ;;  %vm1725_vm14 = vc.u32 %v1717_v26, %v1721_v20  ;;  %v1727_v40 = vadd.s32 %v1721_v20, %v1717_v26 }
 0x29d   :  { %v9637_v60 = vshrl.u32 %v1587_v11, 30  ;;  %v1726_v5 = vsel %vm1725_vm14, 1, %v8689_v13  ;;  %v1679_v22 = vsel %vm1677_vm7, %v1667_v34, 2102212464  ;;  %v1678_v54 = vsel %vm1674_vm5, %v1658_v47, %v9576_v25 }
 0x29e   :  { %vm1703_vm15 = vc.u32 %v1695_v21, %v1699_v45  ;;  %v1705_v49 = vadd.s32 %v1699_v45, %v1695_v21  ;;  %v1728_v3 = vadd.s32 %v1726_v5, %v1720_v14  ;;  %vm1729_vm3 = vc.u32 %v1727_v40, %v1723_v41 }
 0x29f   :  { %v1704_v38 = vsel %vm1703_vm15, 1, %v8689_v13  ;;  %v1589_v36 = vshll.u32 %v9637_v60, 30  ;;  %v1700_v39 = vshrl.u32 %v1696_v19, 16  ;;  %v1730_v8 = vsel %vm1729_vm3, 1, %v8689_v13 }
 0x2a0   :  { %v1706_v55 = vadd.s32 %v1704_v38, %v1698_v52  ;;  %vm1707_vm2 = vc.u32 %v1705_v49, %v1701_v12  ;;  %v1680_v34 = vsel %vm1676_vm9, %v9578_v16, %v1679_v22  ;;  %v1722_v63 = vshrl.u32 %v1718_v24, 16 }
 0x2a1   :  { %v1708_v46 = vsel %vm1707_vm2, 1, %v8689_v13  ;;  %v9650_v17 = vsub.s32 %v1586_v57, %v1589_v36  ;;  %v1732_v28 = vadd.s32 %v1730_v8, %v1728_v3  ;;  %v1799_v0 = vand.u32 2139095040, %v9644_v18 }
 0x2a2   :  { %v1710_v31 = vadd.s32 %v1708_v46, %v1706_v55  ;;  %v1702_v35 = vshrl.u32 %v1697_v50, 16  ;;  %v1724_v10 = vshrl.u32 %v1719_v33, 16  ;;  %v1681_v61 = vsel %vm1675_vm12, %v1678_v54, %v1680_v34 }
 0x2a3   :  { %vm1591_vm4 = vcmp.lt.s32.totalorder %v9650_v17, 0  ;;  %v1592_v25 = vsub.s32 0, %v9650_v17  ;;  %v1733_v23 = vadd.s32 %v1732_v28, %v1722_v63  ;;  %v1800_v30 = vshrl.u32 %v1799_v0, 23 }
 0x2a4   :  { %v1711_v37 = vadd.s32 %v1710_v31, %v1700_v39  ;;  %v9662_v43 = vadd.s32 %v1727_v40, %v1723_v41  ;;  %v1735_v26 = vmul.u32 %v9535_v6, %v1681_v61  ;;  %v1796_v12 = vand.u32 2147483647, %v9644_v18 }
 0x2a5   :  { %v1593_v7 = vsel %vm1591_vm4, %v1592_v25, %v9650_v17  ;;  %v1734_v24 = vadd.s32 %v1733_v23, %v1724_v10  ;;  %v8400_v57 = vadd.s32 4294967169, %v1800_v30  ;;  %v1582_v6 = vadd.s32 %v9596_v9, %v9604_v29 }
 0x2a6   :  { %v1594_v16 = vclz %v1593_v7  ;;  %v9664_v15 = vadd.s32 %v1711_v37, %v1702_v35  ;;  %v1803_v3 = vand.u32 8388607, %v1796_v12  ;;  %vm1490_vm14 = vcmp.lt.s32.totalorder %v9516_v2, 0 }
 0x2a7   :  { %v1738_v50 = vadd.s32 1, %v1734_v24  ;;  %v1806_v33 = vadd.s32 1, %v8400_v57  ;;  %vm9745_vm3 = vcmp.le.f32.partialorder %v1488_v44, 0.7853982 }
 0x2a8   :  { %v8395_v19 = vadd.s32 4294967294, %v1594_v16  ;;  %vm1737_vm6 = vc.u32 %v9664_v15, %v9662_v43  ;;  %v1804_v0 = vor.u32 8388608, %v1803_v3 }
 0x2a9   :  { %v1739_v20 = vsel %vm1737_vm6, %v1738_v50, %v1734_v24  ;;  %vm1807_vm10 = vcmp.gt.s32.totalorder %v1806_v33, 0  ;;  %vm1644_vm6 = vcmp.lt.s32.totalorder %v9520_v32, 0 }
 0x2aa   :  { %vm8396_vm8 = vcmp.lt.s32.totalorder %v8395_v19, 0  ;;  %v1740_v48 = vadd.s32 %v1739_v20, %v1735_v26  ;;  %v1808_v21 = vsel %vm1807_vm10, %v1806_v33, 0  ;;  %v9716_v33 = vshll.u32 %v1804_v0, 8  ;;  %v9718_v20 = vpop.f32.mrf.mxu3 }
 0x2ab   :  { %v1597_v11 = vsel %vm8396_vm8, 0, %v8395_v19  ;;  %v1810_v52 = vand.u32 31, %v1808_v21  ;;  %v9689_v39 = vshrl.u32 %v1808_v21, 5  ;;  %vm9778_vm10 = vcmp.le.f32.partialorder %v1642_v42, 0.7853982 }
 0x2ac   :  { %v1602_v47 = vsub.s32 4294967266, %v1597_v11  ;;  %v1741_v45 = vadd.s32 536870912, %v1740_v48  ;;  %v1598_v40 = vsub.s32 32, %v1597_v11  ;;  %v1599_v7 = vshll.u32 %v9650_v17, %v1597_v11 }
 0x2ad   :  { %v9672_v49 = vsub.s32 32, %v1810_v52  ;;  %v1813_v36 = vshll.u32 %v8683_v56, %v1810_v52  ;;  %v1816_v54 = vshll.u32 %v13439_v58, %v1810_v52  ;;  %v1819_v31 = vshll.u32 %v13437_v62, %v1810_v52 }
 0x2ae   :  { %v9670_v14 = vshrl.u32 %v1741_v45, 30  ;;  %v1603_v5 = vadd.s32 127, %v1602_v47  ;;  %v1822_v8 = vshll.u32 %v13435_v1, %v1810_v52  ;;  %v1600_v35 = vshrl.u32 %v1582_v6, %v1598_v40 }
 0x2af   :  { %v1814_v41 = vshrl.u32 %v13439_v58, %v9672_v49  ;;  %v1817_v22 = vshrl.u32 %v13437_v62, %v9672_v49  ;;  %v1820_v9 = vshrl.u32 %v13435_v1, %v9672_v49  ;;  %v1823_v29 = vshrl.u32 %v13433_v4, %v9672_v49 }
 0x2b0   :  { %v1743_v38 = vshll.u32 %v9670_v14, 30  ;;  %v1604_v46 = vshll.u32 %v1603_v5, 23  ;;  %v1826_v37 = vshrl.u32 %v13449_v51, %v9672_v49  ;;  %v1825_v30 = vshll.u32 %v13433_v4, %v1810_v52 }
 0x2b1   :  { %v9693_v63 = vor.u32 %v1814_v41, %v1813_v36  ;;  %v9695_v28 = vor.u32 %v1817_v22, %v1816_v54  ;;  %v1824_v25 = vor.u32 %v1823_v29, %v1822_v8  ;;  %v9699_v23 = vor.u32 %v1820_v9, %v1819_v31 }
 0x2b2   :  { %v1744_v55 = vsub.s32 %v1740_v48, %v1743_v38  ;;  %vm1828_vm0 = vcmp.lt.s32.totalorder %v9689_v39, 1  ;;  %v1605_v16 = vor.u32 4788187, %v1604_v46  ;;  %v1827_v24 = vor.u32 %v1826_v37, %v1825_v30 }
 0x2b3   :  { %vm1831_vm5 = vcmp.lt.s32.totalorder %v9689_v39, 4  ;;  %v1836_v57 = vsel %vm1828_vm0, %v9693_v63, %v9695_v28  ;;  %vm1830_vm7 = vcmp.lt.s32.totalorder %v9689_v39, 3  ;;  %v1601_v26 = vor.u32 %v1600_v35, %v1599_v7 }
 0x2b4   :  { %vm1745_vm11 = vcmp.lt.s32.totalorder %v1744_v55, 0  ;;  %v1746_v34 = vsub.s32 0, %v1744_v55  ;;  %v1837_v50 = vsel %vm1831_vm5, %v1824_v25, 920167782  ;;  %vm1829_vm9 = vcmp.lt.s32.totalorder %v9689_v39, 2 }
 0x2b5   :  { %v1838_v17 = vsel %vm1830_vm7, %v9699_v23, %v1837_v50  ;;  %v1606_v48 = vand.u32 2147483647, %v1605_v16  ;;  %v1840_v21 = vsel %vm1828_vm0, %v9695_v28, %v9699_v23  ;;  %v1841_v45 = vsel %vm1831_vm5, %v1827_v24, 1326507024 }
 0x2b6   :  { %v1747_v10 = vsel %vm1745_vm11, %v1746_v34, %v1744_v55  ;;  %v1839_v11 = vsel %vm1829_vm9, %v1836_v57, %v1838_v17  ;;  %v1736_v52 = vadd.s32 %v9662_v43, %v9664_v15  ;;  %v1953_v38 = vand.u32 2139095040, %v9718_v20 }
 0x2b7   :  { %v1748_v61 = vclz %v1747_v10  ;;  %v1870_v6 = vshrl.u32 %v1839_v11, 16  ;;  %v1608_v41 = vcvt.s32.f32 %v1601_v26  ;;  %v1842_v3 = vsel %vm1830_vm7, %v1824_v25, %v1841_v45 }
 0x2b8   :  { %v1845_v36 = vand.u32 65535, %v9716_v33  ;;  %v1843_v9 = vsel %vm1829_vm9, %v1840_v21, %v1842_v3  ;;  %v1846_v29 = vshrl.u32 %v9716_v33, 16  ;;  %v1869_v34 = vand.u32 65535, %v1839_v11 }
 0x2b9   :  { %v8398_v19 = vadd.s32 4294967294, %v1748_v61  ;;  %v1609_v46 = vmul.f32 %v1608_v41, %v1606_v48  ;;  %v1847_v15 = vand.u32 65535, %v1843_v9  ;;  %v1848_v31 = vshrl.u32 %v1843_v9, 16 }
 0x2ba   :  { %v1872_v0 = vmul.u32 %v1870_v6, %v1845_v36  ;;  %v1954_v25 = vshrl.u32 %v1953_v38, 23  ;;  %v1873_v57 = vmul.u32 %v1869_v34, %v1846_v29  ;;  %v1871_v48 = vmul.u32 %v1869_v34, %v1845_v36 }
 0x2bb   :  { %vm8399_vm12 = vcmp.lt.s32.totalorder %v8398_v19, 0  ;;  %v1850_v35 = vmul.u32 %v1848_v31, %v1845_v36  ;;  %v1851_v10 = vmul.u32 %v1847_v15, %v1846_v29  ;;  %v1610_v30 = vxor.u32 2147483648, %v1609_v46 }
 0x2bc   :  { %v1751_v47 = vsel %vm8399_vm12, 0, %v8398_v19  ;;  %v1852_v24 = vmul.u32 %v1848_v31, %v1846_v29  ;;  %v1875_v19 = vshll.u32 %v1872_v0, 16  ;;  %v1874_v41 = vmul.u32 %v1870_v6, %v1846_v29 }
 0x2bd   :  { %v1752_v5 = vsub.s32 32, %v1751_v47  ;;  %v1756_v40 = vsub.s32 4294967266, %v1751_v47  ;;  %v1753_v22 = vshll.u32 %v1744_v55, %v1751_v47  ;;  %v1849_v55 = vmul.u32 %v1847_v15, %v1845_v36  ;;  %v1354_v36 = vld [vmem:[#allocation9 + $0x650] sm:$0xff] }
 0x2be   :  { %v1853_v61 = vshll.u32 %v1850_v35, 16  ;;  %v1855_v26 = vshll.u32 %v1851_v10, 16  ;;  %v8403_v47 = vadd.s32 4294967169, %v1954_v25  ;;  %v1611_v21 = vsel %vm1490_vm14, %v1610_v30, %v1609_v46 }
 0x2bf   :  { %v1754_v54 = vshrl.u32 %v1736_v52, %v1752_v5  ;;  %v1757_v43 = vadd.s32 127, %v1756_v40  ;;  %v1854_v5 = vshrl.u32 %v1850_v35, 16  ;;  %vm1879_vm2 = vc.u32 %v1871_v48, %v1875_v19 }
 0x2c0   :  { %vm1857_vm13 = vc.u32 %v1849_v55, %v1853_v61  ;;  %v1859_v17 = vadd.s32 %v1853_v61, %v1849_v55  ;;  %v1877_v3 = vshll.u32 %v1873_v57, 16  ;;  %v1833_v6 = vsel %vm1831_vm5, %v9699_v23, 2102212464 }
 0x2c1   :  { %v1755_v8 = vor.u32 %v1754_v54, %v1753_v22  ;;  %v1758_v37 = vshll.u32 %v1757_v43, 23  ;;  %v1858_v11 = vsel %vm1857_vm13, 1, %v8689_v13  ;;  %v1880_v22 = vsel %vm1879_vm2, 1, %v8689_v13 }
 0x2c2   :  { %v1860_v52 = vadd.s32 %v1858_v11, %v1852_v24  ;;  %vm1861_vm15 = vc.u32 %v1859_v17, %v1855_v26  ;;  %v1881_v54 = vadd.s32 %v1875_v19, %v1871_v48  ;;  %v1882_v46 = vadd.s32 %v1880_v22, %v1874_v41 }
 0x2c3   :  { %v1759_v7 = vor.u32 4788187, %v1758_v37  ;;  %v1762_v16 = vcvt.s32.f32 %v1755_v8  ;;  %v1862_v38 = vsel %vm1861_vm15, 1, %v8689_v13  ;;  %v1812_v43 = vshrl.u32 %v8683_v56, %v9672_v49 }
 0x2c4   :  { %v1864_v40 = vadd.s32 %v1862_v38, %v1860_v52  ;;  %vm1883_vm4 = vc.u32 %v1881_v54, %v1877_v3  ;;  %v9757_v15 = vsel %vm9745_vm3, %v9516_v2, %v1611_v21  ;;  %v1856_v44 = vshrl.u32 %v1851_v10, 16  ;;  %v1342_v38 = vld [vmem:[#allocation9 + $0x5f0] sm:$0xff] }
 0x2c5   :  { %v1760_v50 = vand.u32 2147483647, %v1759_v7  ;;  %v1884_v31 = vsel %vm1883_vm4, 1, %v8689_v13  ;;  %v1960_v8 = vadd.s32 1, %v8403_v47  ;;  %v1832_v49 = vsel %vm1828_vm0, %v1812_v43, %v9693_v63  ;;  %2138 = vmatpush.msrb.mxu1 %v1342_v38  ;;  %v1308_v43 = vld [vmem:[#allocation9 + $0x4e0] sm:$0xff]  ;;  %v1302_v38 = vld [vmem:[#allocation9 + $0x4b0] sm:$0xff] }
 0x2c6   :  { %v1865_v29 = vadd.s32 %v1864_v40, %v1854_v5  ;;  %v1876_v34 = vshrl.u32 %v1872_v0, 16  ;;  %v1886_v37 = vadd.s32 %v1884_v31, %v1882_v46  ;;  %v1834_v35 = vsel %vm1830_vm7, %v9695_v28, %v1833_v6  ;;  %v1310_v5 = vld [vmem:[#allocation9 + $0x4f0] sm:$0xff]  ;;  %v1340_v6 = vld [vmem:[#allocation9 + $0x5e0] sm:$0xff] }
 0x2c7   :  { %v1763_v45 = vmul.f32 %v1762_v16, %v1760_v50  ;;  %vm1961_vm8 = vcmp.gt.s32.totalorder %v1960_v8, 0  ;;  %v9773_v10 = vmul.f32 %v9757_v15, %v9757_v15  ;;  %v1878_v30 = vshrl.u32 %v1873_v57, 16  ;;  %2118 = vmatpush.msrb.mxu0 %v1310_v5  ;;  %2139 = vmatpush.msrb.mxu1 %v1340_v6 }
 0x2c8   :  { %v9769_v25 = vadd.s32 %v1865_v29, %v1856_v44  ;;  %v1887_v7 = vadd.s32 %v1886_v37, %v1876_v34  ;;  %v1612_v63 = vsub.s32 4, %v9637_v60  ;;  %v9782_v55 = vadd.s32 %v1881_v54, %v1877_v3 }
 0x2c9   :  { %v1764_v9 = vxor.u32 2147483648, %v1763_v45  ;;  %v1962_v28 = vsel %vm1961_vm8, %v1960_v8, 0  ;;  %v1835_v16 = vsel %vm1829_vm9, %v1832_v49, %v1834_v35  ;;  %v1950_v57 = vand.u32 2147483647, %v9718_v20  ;;  %2119 = vmatpush.msrb.mxu0 %v1308_v43  ;;  %v1306_v35 = vld [vmem:[#allocation9 + $0x4d0] sm:$0xff] }
 0x2ca   :  { %v1888_v24 = vadd.s32 %v1887_v7, %v1878_v30  ;;  %vm1891_vm11 = vc.u32 %v9769_v25, %v9782_v55  ;;  %v1964_v42 = vand.u32 31, %v1962_v28  ;;  %v1624_v19 = vmul.f32 -0.00019511016, %v9773_v10  ;;  %v1338_v30 = vld [vmem:[#allocation9 + $0x5d0] sm:$0xff] }
 0x2cb   :  { %v1765_v23 = vsel %vm1644_vm6, %v1764_v9, %v1763_v45  ;;  %v1889_v17 = vmul.u32 %v9716_v33, %v1835_v16  ;;  %v9805_v39 = vsel %vm1490_vm14, %v1612_v63, %v9637_v60  ;;  %v1957_v47 = vand.u32 8388607, %v1950_v57  ;;  %2120 = vmatpush.msrb.mxu0 %v1306_v35  ;;  %2140 = vmatpush.msrb.mxu1 %v1338_v30 }
 0x2cc   :  { %v9787_v61 = vsel %vm9778_vm10, %v9520_v32, %v1765_v23  ;;  %v1892_v50 = vadd.s32 1, %v1888_v24  ;;  %v9800_v11 = vsub.s32 32, %v1964_v42  ;;  %v1617_v21 = vmul.f32 -0.001358992, %v9773_v10 }
 0x2cd   :  { %v9797_v26 = vmul.f32 %v9787_v61, %v9787_v61  ;;  %v1625_v41 = vadd.f32 0.008332121, %v1624_v19  ;;  %v1967_v40 = vshll.u32 %v8683_v56, %v1964_v42  ;;  %v1970_v9 = vshll.u32 %v13439_v58, %v1964_v42 }
 0x2ce   :  { %v1893_v48 = vsel %vm1891_vm11, %v1892_v50, %v1888_v24  ;;  %v1968_v52 = vshrl.u32 %v13439_v58, %v9800_v11  ;;  %v1971_v33 = vshrl.u32 %v13437_v62, %v9800_v11  ;;  %v1974_v60 = vshrl.u32 %v13435_v1, %v9800_v11 }
 0x2cf   :  { %v1894_v45 = vadd.s32 %v1893_v48, %v1889_v17  ;;  %v1977_v3 = vshrl.u32 %v13433_v4, %v9800_v11  ;;  %v1771_v22 = vmul.f32 -0.001358992, %v9797_v26  ;;  %v1976_v46 = vshll.u32 %v13435_v1, %v1964_v42  ;;  %v1304_v48 = vld [vmem:[#allocation9 + $0x4c0] sm:$0xff] }
 0x2d0   :  { %v1778_v29 = vmul.f32 -0.00019511016, %v9797_v26  ;;  %v9823_v44 = vshrl.u32 %v1962_v28, 5  ;;  %v9825_v31 = vor.u32 %v1968_v52, %v1967_v40  ;;  %v1973_v8 = vshll.u32 %v13437_v62, %v1964_v42  ;;  %v1336_v52 = vld [vmem:[#allocation9 + $0x5c0] sm:$0xff]  ;;  %2121 = vmatpush.msrb.mxu0 %v1304_v48 }
 0x2d1   :  { %v1895_v54 = vadd.s32 536870912, %v1894_v45  ;;  %v9830_v34 = vor.u32 %v1971_v33, %v1970_v9  ;;  %v1978_v37 = vor.u32 %v1977_v3, %v1976_v46  ;;  %v1980_v23 = vshrl.u32 %v13449_v51, %v9800_v11  ;;  %2141 = vmatpush.msrb.mxu1 %v1336_v52  ;;  %v1332_v9 = vld [vmem:[#allocation9 + $0x5a0] sm:$0xff] }
 0x2d2   :  { %v1618_v7 = vadd.f32 0.041655596, %v1617_v21  ;;  %v1958_v63 = vor.u32 8388608, %v1957_v47  ;;  %v9834_v28 = vor.u32 %v1974_v60, %v1973_v8  ;;  %v1979_v16 = vshll.u32 %v13433_v4, %v1964_v42  ;;  %2122 = vmatpush.msrb.mxu0 %v1302_v38  ;;  %v1372_v38 = vld [vmem:[#allocation9 + $0x6e0] sm:$0xff] }
 0x2d3   :  { %v9828_v49 = vshrl.u32 %v1895_v54, 30  ;;  %v1626_v24 = vmul.f32 %v1625_v41, %v9773_v10  ;;  %v1766_v19 = vsub.s32 4, %v9670_v14  ;;  %v1772_v50 = vadd.f32 0.041655596, %v1771_v22  ;;  %v1334_v41 = vld [vmem:[#allocation9 + $0x5b0] sm:$0xff]  ;;  %v1300_v54 = vld [vmem:[#allocation9 + $0x4a0] sm:$0xff] }
 0x2d4   :  { %v1779_v33 = vadd.f32 0.008332121, %v1778_v29  ;;  %v1981_v5 = vor.u32 %v1980_v23, %v1979_v16  ;;  %vm1982_vm0 = vcmp.lt.s32.totalorder %v9823_v44, 1  ;;  %vm1985_vm5 = vcmp.lt.s32.totalorder %v9823_v44, 4  ;;  %2142 = vmatpush.msrb.mxu1 %v1334_v41  ;;  %2123 = vmatpush.msrb.mxu0 %v1300_v54  ;;  %v1374_v16 = vld [vmem:[#allocation9 + $0x6f0] sm:$0xff] }
 0x2d5   :  { %v1897_v17 = vshll.u32 %v9828_v49, 30  ;;  %vm1984_vm7 = vcmp.lt.s32.totalorder %v9823_v44, 3  ;;  %v1990_v42 = vsel %vm1982_vm0, %v9825_v31, %v9830_v34  ;;  %v1991_v21 = vsel %vm1985_vm5, %v1978_v37, 920167782  ;;  %2158 = vmatpush.msrb.mxu2 %v1374_v16 }
 0x2d6   :  { %v1615_v40 = vsel %vm9745_vm3, 0, %v9805_v39  ;;  %v1992_v60 = vsel %vm1984_vm7, %v9834_v28, %v1991_v21  ;;  %vm1983_vm12 = vcmp.lt.s32.totalorder %v9823_v44, 2  ;;  %v9861_v22 = vshll.u32 %v1958_v63, 8  ;;  %2143 = vmatpush.msrb.mxu1 %v1332_v9  ;;  %v1330_v63 = vld [vmem:[#allocation9 + $0x590] sm:$0xff]  ;;  %v1328_v21 = vld [vmem:[#allocation9 + $0x580] sm:$0xff] }
 0x2d7   :  { %v9842_v47 = vsub.s32 %v1894_v45, %v1897_v17  ;;  %v1619_v45 = vmul.f32 %v1618_v7, %v9773_v10  ;;  %v1773_v46 = vmul.f32 %v1772_v50, %v9797_v26  ;;  %v9866_v43 = vsel %vm1983_vm12, %v1990_v42, %v1992_v60  ;;  %v1298_v7 = vld [vmem:[#allocation9 + $0x490] sm:$0xff]  ;;  %v1296_v42 = vld [vmem:[#allocation9 + $0x480] sm:$0xff]  ;;  %2159 = vmatpush.msrb.mxu2 %v1372_v38 }
 0x2d8   :  { %v1994_v6 = vsel %vm1982_vm0, %v9830_v34, %v9834_v28  ;;  %v1995_v29 = vsel %vm1985_vm5, %v1981_v5, 1326507024  ;;  %v1627_v8 = vadd.f32 -0.16666654, %v1626_v24  ;;  %v9877_v23 = vsel %vm1644_vm6, %v1766_v19, %v9670_v14  ;;  %2124 = vmatpush.msrb.mxu0 %v1298_v7  ;;  %v1406_v14 = vld [vmem:[#allocation9 + $0x7f0] sm:$0xff]  ;;  %2144 = vmatpush.msrb.mxu1 %v1330_v63 }
 0x2d9   :  { %vm1899_vm9 = vcmp.lt.s32.totalorder %v9842_v47, 0  ;;  %v1900_v3 = vsub.s32 0, %v9842_v47  ;;  %v1780_v35 = vmul.f32 %v1779_v33, %v9797_v26  ;;  %v9881_v50 = vadd.f32 -0.4999988, %v1619_v45  ;;  %2178 = vmatpush.msrb.mxu3 %v1406_v14  ;;  %v1324_v14 = vld [vmem:[#allocation9 + $0x560] sm:$0xff]  ;;  %v1386_v39 = vld [vmem:[#allocation9 + $0x750] sm:$0xff] }
 0x2da   :  { %v1996_v48 = vsel %vm1984_vm7, %v1978_v37, %v1995_v29  ;;  %v2024_v24 = vshrl.u32 %v9866_v43, 16  ;;  %v1999_v52 = vand.u32 65535, %v9861_v22  ;;  %v2000_v33 = vshrl.u32 %v9861_v22, 16  ;;  %2125 = vmatpush.msrb.mxu0 %v1296_v42  ;;  %2145 = vmatpush.msrb.mxu1 %v1328_v21  ;;  %v1294_v29 = vld [vmem:[#allocation9 + $0x470] sm:$0xff] }
 0x2db   :  { %v1901_v30 = vsel %vm1899_vm9, %v1900_v3, %v9842_v47  ;;  %v1997_v19 = vsel %vm1983_vm12, %v1994_v6, %v1996_v48  ;;  %v2023_v5 = vand.u32 65535, %v9866_v43  ;;  %v9891_v37 = vadd.f32 -0.4999988, %v1773_v46  ;;  %v1404_v3 = vld [vmem:[#allocation9 + $0x7e0] sm:$0xff]  ;;  %v1326_v46 = vld [vmem:[#allocation9 + $0x570] sm:$0xff] }
 0x2dc   :  { %v1902_v17 = vclz %v1901_v30  ;;  %v2001_v45 = vand.u32 65535, %v1997_v19  ;;  %v2002_v60 = vshrl.u32 %v1997_v19, 16  ;;  %v9894_v54 = vmul.f32 %v1627_v8, %v9773_v10  ;;  %2179 = vmatpush.msrb.mxu3 %v1404_v3  ;;  %v1370_v30 = vld [vmem:[#allocation9 + $0x6d0] sm:$0xff]  ;;  %2126 = vmatpush.msrb.mxu0 %v1294_v29  ;;  %v1292_v48 = vld [vmem:[#allocation9 + $0x460] sm:$0xff] }
 0x2dd   :  { %v1781_v9 = vadd.f32 -0.16666654, %v1780_v35  ;;  %v1890_v43 = vadd.s32 %v9782_v55, %v9769_v25  ;;  %v9898_v6 = vmul.u32 %v2024_v24, %v1999_v52  ;;  %v9903_v7 = vsel %vm1985_vm5, %v9834_v28, 2102212464  ;;  %2160 = vmatpush.msrb.mxu2 %v1370_v30  ;;  %v1402_v25 = vld [vmem:[#allocation9 + $0x7d0] sm:$0xff]  ;;  %2146 = vmatpush.msrb.mxu1 %v1326_v46  ;;  %v1368_v19 = vld [vmem:[#allocation9 + $0x6c0] sm:$0xff] }
 0x2de   :  { %v8401_v41 = vadd.s32 4294967294, %v1902_v17  ;;  %v9905_v63 = vmul.u32 %v2002_v60, %v1999_v52  ;;  %v9907_v8 = vmul.u32 %v2001_v45, %v2000_v33  ;;  %v2025_v35 = vmul.u32 %v2023_v5, %v1999_v52  ;;  %2180 = vmatpush.msrb.mxu3 %v1402_v25  ;;  %2127 = vmatpush.msrb.mxu0 %v1292_v48  ;;  %v1400_v3 = vld [vmem:[#allocation9 + $0x7c0] sm:$0xff]  ;;  %v1290_v46 = vld [vmem:[#allocation9 + $0x450] sm:$0xff] }
 0x2df   :  { %v9909_v16 = vmul.u32 %v2023_v5, %v2000_v33  ;;  %v2029_v17 = vshll.u32 %v9898_v6, 16  ;;  %v2003_v21 = vmul.u32 %v2001_v45, %v1999_v52  ;;  %2161 = vmatpush.msrb.mxu2 %v1368_v19  ;;  %v2006_v29 = vmul.u32 %v2002_v60, %v2000_v33  ;;  %2147 = vmatpush.msrb.mxu1 %v1324_v14  ;;  %v1322_v25 = vld [vmem:[#allocation9 + $0x550] sm:$0xff]  ;;  %v1320_v60 = vld [vmem:[#allocation9 + $0x540] sm:$0xff] }
 0x2e0   :  { %vm8402_vm13 = vcmp.lt.s32.totalorder %v8401_v41, 0  ;;  %v2007_v38 = vshll.u32 %v9905_v63, 16  ;;  %v2009_v5 = vshll.u32 %v9907_v8, 16  ;;  %v2028_v30 = vmul.u32 %v2024_v24, %v2000_v33  ;;  %2181 = vmatpush.msrb.mxu3 %v1400_v3  ;;  %2128 = vmatpush.msrb.mxu0 %v1290_v46  ;;  %v1366_v52 = vld [vmem:[#allocation9 + $0x6b0] sm:$0xff]  ;;  %v1288_v33 = vld [vmem:[#allocation9 + $0x440] sm:$0xff] }
 0x2e1   :  { %v1905_v55 = vsel %vm8402_vm13, 0, %v8401_v41  ;;  %v1398_v45 = vld [vmem:[#allocation9 + $0x7b0] sm:$0xff]  ;;  %v2031_v19 = vshll.u32 %v9909_v16, 16  ;;  %vm9917_vm15 = vc.u32 %v2025_v35, %v2029_v17  ;;  %v9921_v24 = vadd.s32 %v2029_v17, %v2025_v35  ;;  %2148 = vmatpush.msrb.mxu1 %v1322_v25  ;;  %2162 = vmatpush.msrb.mxu2 %v1366_v52 }
 0x2e2   :  { %v1906_v28 = vsub.s32 32, %v1905_v55  ;;  %v1910_v42 = vsub.s32 4294967266, %v1905_v55  ;;  %v1907_v41 = vshll.u32 %v9842_v47, %v1905_v55  ;;  %vm2011_vm14 = vc.u32 %v2003_v21, %v2007_v38  ;;  %2182 = vmatpush.msrb.mxu3 %v1398_v45  ;;  %2129 = vmatpush.msrb.mxu0 %v1288_v33  ;;  %v1360_v47 = vld [vmem:[#allocation9 + $0x680] sm:$0xff] }
 0x2e3   :  { %v2013_v62 = vadd.s32 %v2007_v38, %v2003_v21  ;;  %v2012_v48 = vsel %vm2011_vm14, 1, %v8689_v13  ;;  %v1782_v21 = vmul.f32 %v1781_v9, %v9797_v26  ;;  %v2034_v35 = vsel %vm9917_vm15, 1, %v8689_v13  ;;  %2149 = vmatpush.msrb.mxu1 %v1320_v60 }
 0x2e4   :  { %v1908_v4 = vshrl.u32 %v1890_v43, %v1906_v28  ;;  %v1911_v1 = vadd.s32 127, %v1910_v42  ;;  %v1364_v43 = vld [vmem:[#allocation9 + $0x6a0] sm:$0xff]  ;;  %v2014_v28 = vadd.s32 %v2012_v48, %v2006_v29  ;;  %vm9931_vm4 = vc.u32 %v9921_v24, %v2031_v19 }
 0x2e5   :  { %vm2015_vm2 = vc.u32 %v2013_v62, %v2009_v5  ;;  %v1396_v42 = vld [vmem:[#allocation9 + $0x7a0] sm:$0xff]  ;;  %2163 = vmatpush.msrb.mxu2 %v1364_v43  ;;  %v1286_v62 = vld [vmem:[#allocation9 + $0x430] sm:$0xff]  ;;  %v2008_v9 = vshrl.u32 %v9905_v63, 16  ;;  %v2036_v29 = vadd.s32 %v2034_v35, %v2028_v30  ;;  %v1966_v46 = vshrl.u32 %v8683_v56, %v9800_v11 }
 0x2e6   :  { %v1909_v55 = vor.u32 %v1908_v4, %v1907_v41  ;;  %v1912_v14 = vshll.u32 %v1911_v1, 23  ;;  %v2016_v38 = vsel %vm2015_vm2, 1, %v8689_v13  ;;  %v1318_v1 = vld [vmem:[#allocation9 + $0x530] sm:$0xff]  ;;  %2183 = vmatpush.msrb.mxu3 %v1396_v42  ;;  %2130 = vmatpush.msrb.mxu0 %v1286_v62  ;;  %v2010_v25 = vshrl.u32 %v9907_v8, 16  ;;  %v1284_v48 = vld [vmem:[#allocation9 + $0x420] sm:$0xff] }
 0x2e7   :  { %v1362_v4 = vld [vmem:[#allocation9 + $0x690] sm:$0xff]  ;;  %v2018_v41 = vadd.s32 %v2016_v38, %v2014_v28  ;;  %v2030_v52 = vshrl.u32 %v9898_v6, 16  ;;  %v2038_v45 = vsel %vm9931_vm4, 1, %v8689_v13  ;;  %2150 = vmatpush.msrb.mxu1 %v1318_v1  ;;  %v1316_v63 = vld [vmem:[#allocation9 + $0x520] sm:$0xff]  ;;  %v1629_v8 = vadd.f32 1.0, %v9894_v54 }
 0x2e8   :  { %v1913_v3 = vor.u32 4788187, %v1912_v14  ;;  %v1394_v5 = vld [vmem:[#allocation9 + $0x790] sm:$0xff]  ;;  %2164 = vmatpush.msrb.mxu2 %v1362_v4  ;;  %v1916_v33 = vcvt.s32.f32 %v1909_v55  ;;  %v2040_v43 = vadd.s32 %v2038_v45, %v2036_v29  ;;  %2131 = vmatpush.msrb.mxu0 %v1284_v48  ;;  %v1392_v11 = vld [vmem:[#allocation9 + $0x780] sm:$0xff]  ;;  %v1783_v14 = vadd.f32 1.0, %v1782_v21  ;;  %v1309_v29 = vld [vmem:[#allocation9 + $0x4e8] sm:$0xff] }
 0x2e9   :  { %v2019_v60 = vadd.s32 %v2018_v41, %v2008_v9  ;;  %2184 = vmatpush.msrb.mxu3 %v1394_v5  ;;  %v1986_v6 = vsel %vm1982_vm0, %v1966_v46, %v9825_v31  ;;  %v1988_v28 = vsel %vm1984_vm7, %v9830_v34, %v9903_v7  ;;  %2151 = vmatpush.msrb.mxu1 %v1316_v63  ;;  %v1282_v55 = vld [vmem:[#allocation9 + $0x410] sm:$0xff]  ;;  %v2032_v54 = vshrl.u32 %v9909_v16, 16  ;;  %v1280_v1 = vld [vmem:[#allocation9 + $0x400] sm:$0xff]  ;;  %v1311_v16 = vld [vmem:[#allocation9 + $0x4f8] sm:$0xff] }
 0x2ea   :  { %v1914_v30 = vand.u32 2147483647, %v1913_v3  ;;  %2165 = vmatpush.msrb.mxu2 %v1360_v47  ;;  %v1314_v42 = vld [vmem:[#allocation9 + $0x510] sm:$0xff]  ;;  %v2041_v21 = vadd.s32 %v2040_v43, %v2030_v52  ;;  %2132 = vmatpush.msrb.mxu0 %v1282_v55  ;;  %v1621_v31 = vmul.f32 %v9881_v50, %v9773_v10  ;;  %v1775_v34 = vmul.f32 %v9891_v37, %v9797_v26  ;;  %v1312_v4 = vld [vmem:[#allocation9 + $0x500] sm:$0xff]  ;;  %v1341_v5 = vld [vmem:[#allocation9 + $0x5e8] sm:$0xff] }
 0x2eb   :  { %v1358_v38 = vld [vmem:[#allocation9 + $0x670] sm:$0xff]  ;;  %v9951_v17 = vadd.s32 %v2019_v60, %v2010_v25  ;;  %2185 = vmatpush.msrb.mxu3 %v1392_v11  ;;  %v9961_v7 = vadd.s32 %v9921_v24, %v2031_v19  ;;  %2152 = vmatpush.msrb.mxu1 %v1314_v42  ;;  %v1356_v3 = vld [vmem:[#allocation9 + $0x660] sm:$0xff]  ;;  %v9967_v9 = vand.u32 3, %v1615_v40  ;;  %v1989_v26 = vsel %vm1983_vm12, %v1986_v6, %v1988_v28  ;;  %v1343_v19 = vld [vmem:[#allocation9 + $0x5f8] sm:$0xff] }
 0x2ec   :  { %v1917_v35 = vmul.f32 %v1916_v33, %v1914_v30  ;;  %v1390_v62 = vld [vmem:[#allocation9 + $0x770] sm:$0xff]  ;;  %2166 = vmatpush.msrb.mxu2 %v1358_v38  ;;  %v2042_v50 = vadd.s32 %v2041_v21, %v2032_v54  ;;  %2133 = vmatpush.msrb.mxu0 %v1280_v1  ;;  %v1388_v37 = vld [vmem:[#allocation9 + $0x760] sm:$0xff]  ;;  %v9972_v24 = vmul.f32 %v1629_v8, %v9757_v15  ;;  %vm1798_vm3 = vcmp.lt.s32.totalorder %v9644_v18, 0  ;;  %v1307_v63 = vld [vmem:[#allocation9 + $0x4d8] sm:$0xff] }
 0x2ed   :  { %2186 = vmatpush.msrb.mxu3 %v1390_v62  ;;  %v9975_v41 = vmul.f32 %v1783_v14, %v9787_v61  ;;  %vm2045_vm6 = vc.u32 %v9951_v17, %v9961_v7  ;;  %2153 = vmatpush.msrb.mxu1 %v1312_v4  ;;  %v1769_v44 = vsel %vm9778_vm10, 0, %v9877_v23  ;;  %vm9985_vm8 = vcmp.le.f32.partialorder %v1796_v12, 0.7853982  ;;  %v1352_v23 = vld [vmem:[#allocation9 + $0x640] sm:$0xff]  ;;  %v1350_v43 = vld [vmem:[#allocation9 + $0x630] sm:$0xff]  ;;  %v1305_v6 = vld [vmem:[#allocation9 + $0x4c8] sm:$0xff] }
 0x2ee   :  { %v1918_v10 = vxor.u32 2147483648, %v1917_v35  ;;  %2167 = vmatpush.msrb.mxu2 %v1356_v3  ;;  %v2046_v40 = vadd.s32 1, %v2042_v50  ;;  %2198 = vmatpush.msra.mxu0 %v1311_v16  ;;  %v1622_v46 = vadd.f32 1.0, %v1621_v31  ;;  %v9991_v25 = vadd.f32 1.0, %v1775_v34  ;;  %v1384_v52 = vld [vmem:[#allocation9 + $0x740] sm:$0xff]  ;;  %v1382_v11 = vld [vmem:[#allocation9 + $0x730] sm:$0xff] }
 0x2ef   :  { %2187 = vmatpush.msrb.mxu3 %v1388_v37  ;;  %v2043_v12 = vmul.u32 %v9861_v22, %v1989_v26  ;;  %2218 = vmatpush.msra.mxu1 %v1343_v19  ;;  %vm1633_vm10 = vcmp.lt.s32.totalorder %v9967_v9, 2  ;;  %vm1634_vm11 = vcmp.eq.s32.totalorder %v9967_v9, 0  ;;  %v1339_v22 = vld [vmem:[#allocation9 + $0x5d8] sm:$0xff]  ;;  %v1635_v47 = vxor.u32 2147483648, %v9972_v24  ;;  %v1337_v28 = vld [vmem:[#allocation9 + $0x5c8] sm:$0xff]  ;;  %v1348_v54 = vld [vmem:[#allocation9 + $0x620] sm:$0xff] }
 0x2f0   :  { %v1919_v61 = vsel %vm1798_vm3, %v1918_v10, %v1917_v35  ;;  %2168 = vmatpush.msrb.mxu2 %v1354_v36  ;;  %v2047_v48 = vsel %vm2045_vm6, %v2046_v40, %v2042_v50  ;;  %2199 = vmatpush.msra.mxu0 %v1309_v29  ;;  %v1786_v30 = vand.u32 3, %v1769_v44  ;;  %v1789_v33 = vxor.u32 2147483648, %v9975_v41  ;;  %v1380_v21 = vld [vmem:[#allocation9 + $0x720] sm:$0xff]  ;;  %v1303_v34 = vld [vmem:[#allocation9 + $0x4b8] sm:$0xff]  ;;  %v1346_v10 = vld [vmem:[#allocation9 + $0x610] sm:$0xff] }
 0x2f1   :  { %v9996_v0 = vsel %vm9985_vm8, %v9644_v18, %v1919_v61  ;;  %2188 = vmatpush.msrb.mxu3 %v1386_v39  ;;  %v2048_v60 = vadd.s32 %v2047_v48, %v2043_v12  ;;  %2219 = vmatpush.msra.mxu1 %v1341_v5  ;;  %v1638_v55 = vxor.u32 2147483648, %v1622_v46  ;;  %v1792_v42 = vxor.u32 2147483648, %v9991_v25  ;;  %v1335_v1 = vld [vmem:[#allocation9 + $0x5b8] sm:$0xff]  ;;  %v1378_v26 = vld [vmem:[#allocation9 + $0x710] sm:$0xff]  ;;  %v1301_v19 = vld [vmem:[#allocation9 + $0x4a8] sm:$0xff] }
 0x2f2   :  { %v10003_v45 = vmul.f32 %v9996_v0, %v9996_v0  ;;  %2169 = vmatpush.msrb.mxu2 %v1352_v23  ;;  %2200 = vmatpush.msra.mxu0 %v1307_v63  ;;  %v1920_v38 = vsub.s32 4, %v9828_v49  ;;  %v1636_v4 = vsel %vm1634_vm11, %v1622_v46, %v1635_v47  ;;  %vm1637_vm0 = vcmp.eq.s32.totalorder %v9967_v9, 2  ;;  %v1333_v36 = vld [vmem:[#allocation9 + $0x5a8] sm:$0xff]  ;;  %v1344_v40 = vld [vmem:[#allocation9 + $0x600] sm:$0xff]  ;;  %v1331_v23 = vld [vmem:[#allocation9 + $0x598] sm:$0xff] }
 0x2f3   :  { %2189 = vmatpush.msrb.mxu3 %v1384_v52  ;;  %v2049_v35 = vadd.s32 536870912, %v2048_v60  ;;  %2220 = vmatpush.msra.mxu1 %v1339_v22  ;;  %vm1788_vm5 = vcmp.eq.s32.totalorder %v1786_v30, 0  ;;  %vm1787_vm7 = vcmp.lt.s32.totalorder %v1786_v30, 2  ;;  %v1639_v39 = vsel %vm1637_vm0, %v1638_v55, %v9972_v24  ;;  %v1376_v29 = vld [vmem:[#allocation9 + $0x700] sm:$0xff]  ;;  %v1299_v24 = vld [vmem:[#allocation9 + $0x498] sm:$0xff]  ;;  %v1297_v47 = vld [vmem:[#allocation9 + $0x488] sm:$0xff] }
 0x2f4   :  { %v1925_v8 = vmul.f32 -0.001358992, %v10003_v45  ;;  %v1932_v14 = vmul.f32 -0.00019511016, %v10003_v45  ;;  %2170 = vmatpush.msrb.mxu2 %v1350_v43  ;;  %2201 = vmatpush.msra.mxu0 %v1305_v6  ;;  %v1790_v50 = vsel %vm1788_vm5, %v9991_v25, %v1789_v33  ;;  %vm1791_vm9 = vcmp.eq.s32.totalorder %v1786_v30, 2  ;;  %v1375_v48 = vld [vmem:[#allocation9 + $0x6f8] sm:$0xff] }
 0x2f5   :  { %2190 = vmatpush.msrb.mxu3 %v1382_v11  ;;  %v10017_v3 = vshrl.u32 %v2049_v35, 30  ;;  %2221 = vmatpush.msra.mxu1 %v1337_v28  ;;  %v1921_v44 = vsel %vm1798_vm3, %v1920_v38, %v9828_v49  ;;  %v1640_v5 = vsel %vm1633_vm10, %v1636_v4, %v1639_v39  ;;  %v1793_v46 = vsel %vm1791_vm9, %v1792_v42, %v9975_v41  ;;  %v1407_v63 = vld [vmem:[#allocation9 + $0x7f8] sm:$0xff]  ;;  %v1329_v30 = vld [vmem:[#allocation9 + $0x588] sm:$0xff] }
 0x2f6   :  { %v1926_v62 = vadd.f32 0.041655596, %v1925_v8  ;;  %v1933_v31 = vadd.f32 0.008332121, %v1932_v14  ;;  %2171 = vmatpush.msrb.mxu2 %v1348_v54  ;;  %2202 = vmatpush.msra.mxu0 %v1303_v34  ;;  %v1794_v52 = vsel %vm1787_vm7, %v1790_v50, %v1793_v46  ;;  %vm1631_vm12 = vweird.f32 %v9516_v2  ;;  %v1373_v33 = vld [vmem:[#allocation9 + $0x6e8] sm:$0xff]  ;;  %v1327_v14 = vld [vmem:[#allocation9 + $0x578] sm:$0xff] }
 0x2f7   :  { %2191 = vmatpush.msrb.mxu3 %v1380_v21  ;;  %v2051_v61 = vshll.u32 %v10017_v3, 30  ;;  %2222 = vmatpush.msra.mxu1 %v1335_v1  ;;  %v1923_v9 = vsel %vm9985_vm8, 0, %v1921_v44  ;;  %vm1785_vm13 = vweird.f32 %v9520_v32  ;;  %v1405_v2 = vld [vmem:[#allocation9 + $0x7e8] sm:$0xff]  ;;  %v1371_v6 = vld [vmem:[#allocation9 + $0x6d8] sm:$0xff]  ;;  %vm1939_vm6 = vweird.f32 %v9644_v18 }
 0x2f8   :  { %v1927_v37 = vmul.f32 %v1926_v62, %v10003_v45  ;;  %v1934_v16 = vmul.f32 %v1933_v31, %v10003_v45  ;;  %2172 = vmatpush.msrb.mxu2 %v1346_v10  ;;  %2203 = vmatpush.msra.mxu0 %v1301_v19  ;;  %v1795_v15 = vsel %vm1785_vm13, nan, %v1794_v52  ;;  %v1940_v28 = vand.u32 3, %v1923_v9  ;;  %v1403_v32 = vld [vmem:[#allocation9 + $0x7d8] sm:$0xff]  ;;  %v1293_v54 = vld [vmem:[#allocation9 + $0x468] sm:$0xff] }
 0x2f9   :  { %2192 = vmatpush.msrb.mxu3 %v1378_v26  ;;  %v10031_v49 = vsub.s32 %v2048_v60, %v2051_v61  ;;  %2223 = vmatpush.msra.mxu1 %v1333_v36  ;;  %v1641_v60 = vsel %vm1631_vm12, nan, %v1640_v5  ;;  %v1325_v21 = vld [vmem:[#allocation9 + $0x568] sm:$0xff]  ;;  %v2105_v1 = vmul.f32 %v1795_v15, %v1795_v15  ;;  %v1291_v26 = vld [vmem:[#allocation9 + $0x458] sm:$0xff]  ;;  %vm1952_vm8 = vcmp.lt.s32.totalorder %v9718_v20, 0 }
 0x2fa   :  { %v1928_v25 = vadd.f32 -0.4999988, %v1927_v37  ;;  %v1935_v12 = vadd.f32 -0.16666654, %v1934_v16  ;;  %2173 = vmatpush.msrb.mxu2 %v1344_v40  ;;  %2204 = vmatpush.msra.mxu0 %v1299_v24  ;;  %v1369_v62 = vld [vmem:[#allocation9 + $0x6c8] sm:$0xff]  ;;  %v2104_v31 = vmul.f32 %v1641_v60, %v1641_v60  ;;  %v1323_v50 = vld [vmem:[#allocation9 + $0x558] sm:$0xff]  ;;  %v2044_v24 = vadd.s32 %v9961_v7, %v9951_v17 }
 0x2fb   :  { %2193 = vmatpush.msrb.mxu3 %v1376_v29  ;;  %vm2053_vm14 = vcmp.lt.s32.totalorder %v10031_v49, 0  ;;  %v2054_v43 = vsub.s32 0, %v10031_v49  ;;  %2224 = vmatpush.msra.mxu1 %v1331_v23  ;;  %v1401_v34 = vld [vmem:[#allocation9 + $0x7c8] sm:$0xff]  ;;  %v1367_v37 = vld [vmem:[#allocation9 + $0x6b8] sm:$0xff]  ;;  %vm1941_vm15 = vcmp.lt.s32.totalorder %v1940_v28, 2  ;;  %vm1942_vm2 = vcmp.eq.s32.totalorder %v1940_v28, 0 }
 0x2fc   :  { %v1929_v41 = vmul.f32 %v1928_v25, %v10003_v45  ;;  %v1936_v22 = vmul.f32 %v1935_v12, %v10003_v45  ;;  %2238 = vmatpush.msra.mxu2 %v1375_v48  ;;  %2205 = vmatpush.msra.mxu0 %v1297_v47  ;;  %v1295_v45 = vld [vmem:[#allocation9 + $0x478] sm:$0xff]  ;;  %vm1945_vm4 = vcmp.eq.s32.totalorder %v1940_v28, 2  ;;  %v2109_v19 = vsub.f32 1.0, %v2105_v1  ;;  %v1289_v44 = vld [vmem:[#allocation9 + $0x448] sm:$0xff] }
 0x2fd   :  { %2258 = vmatpush.msra.mxu3 %v1407_v63  ;;  %v2055_v55 = vsel %vm2053_vm14, %v2054_v43, %v10031_v49  ;;  %2225 = vmatpush.msra.mxu1 %v1329_v30  ;;  %v1399_v16 = vld [vmem:[#allocation9 + $0x7b8] sm:$0xff]  ;;  %v1321_v61 = vld [vmem:[#allocation9 + $0x548] sm:$0xff]  ;;  %vm10055_vm10 = vcmp.le.f32.partialorder %v1950_v57, 0.7853982  ;;  %vm2093_vm7 = vweird.f32 %v9718_v20 }
 0x2fe   :  { %v1930_v11 = vadd.f32 1.0, %v1929_v41  ;;  %v1937_v8 = vadd.f32 1.0, %v1936_v22  ;;  %2239 = vmatpush.msra.mxu2 %v1373_v33  ;;  %v2056_v35 = vclz %v2055_v55  ;;  %2206 = vmatpush.msra.mxu0 %v1295_v45  ;;  %v1365_v40 = vld [vmem:[#allocation9 + $0x6a8] sm:$0xff]  ;;  %v2113_v12 = vadd.f32 %v2109_v19, %v2105_v1  ;;  %v1287_v48 = vld [vmem:[#allocation9 + $0x438] sm:$0xff]  ;;  %v2286_v1 = vld [vmem:[#allocation8 + $0x140] sm:$0xff] }
 0x2ff   :  { %2259 = vmatpush.msra.mxu3 %v1405_v2  ;;  %2226 = vmatpush.msra.mxu1 %v1327_v14  ;;  %v1397_v25 = vld [vmem:[#allocation9 + $0x7a8] sm:$0xff]  ;;  %v1319_v9 = vld [vmem:[#allocation9 + $0x538] sm:$0xff] }
 0x300   :  { %v1938_v42 = vmul.f32 %v1937_v8, %v9996_v0  ;;  %v1946_v38 = vxor.u32 2147483648, %v1930_v11  ;;  %2240 = vmatpush.msra.mxu2 %v1371_v6  ;;  %v8404_v10 = vadd.s32 4294967294, %v2056_v35  ;;  %2207 = vmatpush.msra.mxu0 %v1293_v54  ;;  %v2108_v0 = vsub.f32 1.0, %v2104_v31  ;;  %v1363_v41 = vld [vmem:[#allocation9 + $0x698] sm:$0xff]  ;;  %v1285_v33 = vld [vmem:[#allocation9 + $0x428] sm:$0xff] }
 0x301   :  { %2260 = vmatpush.msra.mxu3 %v1403_v32  ;;  %2227 = vmatpush.msra.mxu1 %v1325_v21  ;;  %v1395_v18 = vld [vmem:[#allocation9 + $0x798] sm:$0xff]  ;;  %v1317_v17 = vld [vmem:[#allocation9 + $0x528] sm:$0xff] }
 0x302   :  { %v1943_v4 = vxor.u32 2147483648, %v1938_v42  ;;  %2241 = vmatpush.msra.mxu2 %v1369_v62  ;;  %v1947_v39 = vsel %vm1945_vm4, %v1946_v38, %v1938_v42  ;;  %vm8405_vm3 = vcmp.lt.s32.totalorder %v8404_v10, 0  ;;  %2208 = vmatpush.msra.mxu0 %v1291_v26  ;;  %v10043_v29 = vadd.f32 %v2108_v0, %v2104_v31  ;;  %v1361_v7 = vld [vmem:[#allocation9 + $0x688] sm:$0xff]  ;;  %v1283_v15 = vld [vmem:[#allocation9 + $0x418] sm:$0xff] }
 0x303   :  { %2261 = vmatpush.msra.mxu3 %v1401_v34  ;;  %v2059_v46 = vsel %vm8405_vm3, 0, %v8404_v10  ;;  %2228 = vmatpush.msra.mxu1 %v1323_v50  ;;  %v1393_v2 = vld [vmem:[#allocation9 + $0x788] sm:$0xff]  ;;  %v1359_v8 = vld [vmem:[#allocation9 + $0x678] sm:$0xff] }
 0x304   :  { %v1944_v36 = vsel %vm1942_vm2, %v1930_v11, %v1943_v4  ;;  %2242 = vmatpush.msra.mxu2 %v1367_v37  ;;  %v2060_v23 = vsub.s32 32, %v2059_v46  ;;  %v2064_v52 = vsub.s32 4294967266, %v2059_v46  ;;  %2209 = vmatpush.msra.mxu0 %v1289_v44  ;;  %v2061_v22 = vshll.u32 %v10031_v49, %v2059_v46  ;;  %v1315_v49 = vld [vmem:[#allocation9 + $0x518] sm:$0xff]  ;;  %v1281_v6 = vld [vmem:[#allocation9 + $0x408] sm:$0xff]  ;;  %v2282_v37 = vld [vmem:[#allocation8 + $0x40] sm:$0xff] }
 0x305   :  { %v1948_v5 = vsel %vm1941_vm15, %v1944_v36, %v1947_v39  ;;  %2262 = vmatpush.msra.mxu3 %v1399_v16  ;;  %2229 = vmatpush.msra.mxu1 %v1321_v61  ;;  %v1391_v14 = vld [vmem:[#allocation9 + $0x778] sm:$0xff]  ;;  %v1313_v55 = vld [vmem:[#allocation9 + $0x508] sm:$0xff] }
 0x306   :  { %v1949_v63 = vsel %vm1939_vm6, nan, %v1948_v5  ;;  %2243 = vmatpush.msra.mxu2 %v1365_v40  ;;  %v2062_v47 = vshrl.u32 %v2044_v24, %v2060_v23  ;;  %v2065_v30 = vadd.s32 127, %v2064_v52  ;;  %2134 = vmatmul.f32.vlgmr.msrb.gmra.mxu0 %v10043_v29  ;;  %v1357_v32 = vld [vmem:[#allocation9 + $0x668] sm:$0xff]  ;;  %v1355_v54 = vld [vmem:[#allocation9 + $0x658] sm:$0xff] }
 0x307   :  { %2263 = vmatpush.msra.mxu3 %v1397_v25  ;;  %2154 = vmatmul.f32.vlgmr.msrb.gmra.mxu1 %v2113_v12  ;;  %v2106_v11 = vmul.f32 %v1949_v63, %v1949_v63  ;;  %v1389_v35 = vld [vmem:[#allocation9 + $0x768] sm:$0xff]  ;;  %v1387_v31 = vld [vmem:[#allocation9 + $0x758] sm:$0xff]  ;;  %v2074_v25 = vsub.s32 4, %v10017_v3 }
 0x308   :  { %2210 = vmatpush.msra.mxu0 %v1287_v48  ;;  %v2063_v60 = vor.u32 %v2062_v47, %v2061_v22  ;;  %v2066_v43 = vshll.u32 %v2065_v30, 23  ;;  %2230 = vmatpush.msra.mxu1 %v1319_v9  ;;  %v1353_v34 = vld [vmem:[#allocation9 + $0x648] sm:$0xff]  ;;  %v1351_v50 = vld [vmem:[#allocation9 + $0x638] sm:$0xff]  ;;  %v2288_v48 = vld [vmem:[#allocation8 + $0x150] sm:$0xff] }
 0x309   :  { %2244 = vmatpush.msra.mxu2 %v1363_v41  ;;  %2264 = vmatpush.msra.mxu3 %v1395_v18  ;;  %v2110_v28 = vsub.f32 1.0, %v2106_v11  ;;  %v1385_v10 = vld [vmem:[#allocation9 + $0x748] sm:$0xff]  ;;  %v1383_v19 = vld [vmem:[#allocation9 + $0x738] sm:$0xff]  ;;  %v2075_v41 = vsel %vm1952_vm8, %v2074_v25, %v10017_v3  ;;  %v2284_v22 = vld [vmem:[#allocation8 + $0x50] sm:$0xff] }
 0x30a   :  { %2211 = vmatpush.msra.mxu0 %v1285_v33  ;;  %v2067_v45 = vor.u32 4788187, %v2066_v43  ;;  %2231 = vmatpush.msra.mxu1 %v1317_v17  ;;  %v2070_v38 = vcvt.s32.f32 %v2063_v60  ;;  %v2287_v26 = vld [vmem:[#allocation8 + $0x148] sm:$0xff]  ;;  %v1347_v40 = vld [vmem:[#allocation9 + $0x618] sm:$0xff]  ;;  %v2077_v18 = vsel %vm10055_vm10, 0, %v2075_v41 }
 0x30b   :  { %2245 = vmatpush.msra.mxu2 %v1361_v7  ;;  %2265 = vmatpush.msra.mxu3 %v1393_v2  ;;  %v2114_v21 = vadd.f32 %v2110_v28, %v2106_v11  ;;  %v2283_v36 = vld [vmem:[#allocation8 + $0x48] sm:$0xff]  ;;  %v1379_v46 = vld [vmem:[#allocation9 + $0x718] sm:$0xff]  ;;  %v2094_v43 = vand.u32 3, %v2077_v18 }
 0x30c   :  { %2212 = vmatpush.msra.mxu0 %v1283_v15  ;;  %v2068_v42 = vand.u32 2147483647, %v2067_v45  ;;  %2232 = vmatpush.msra.mxu1 %v1315_v49  ;;  %v1349_v44 = vld [vmem:[#allocation9 + $0x628] sm:$0xff] }
 0x30d   :  { %2246 = vmatpush.msra.mxu2 %v1359_v8  ;;  %2266 = vmatpush.msra.mxu3 %v1391_v14  ;;  %v1381_v57 = vld [vmem:[#allocation9 + $0x728] sm:$0xff]  ;;  %vm2096_vm11 = vcmp.eq.s32.totalorder %v2094_v43, 0  ;;  %vm2099_vm0 = vcmp.eq.s32.totalorder %v2094_v43, 2  ;;  %vm2095_vm5 = vcmp.lt.s32.totalorder %v2094_v43, 2 }
 0x30e   :  { %2213 = vmatpush.msra.mxu0 %v1281_v6  ;;  %v2071_v62 = vmul.f32 %v2070_v38, %v2068_v42  ;;  %2233 = vmatpush.msra.mxu1 %v1313_v55  ;;  %v1377_v52 = vld [vmem:[#allocation9 + $0x708] sm:$0xff]  ;;  %v2289_v55 = vld [vmem:[#allocation8 + $0x158] sm:$0xff] }
 0x30f   :  { %2247 = vmatpush.msra.mxu2 %v1357_v32  ;;  %2267 = vmatpush.msra.mxu3 %v1389_v35  ;;  %v2285_v32 = vld [vmem:[#allocation8 + $0x58] sm:$0xff] }
 0x310   :  { %2214 = vmatmul.f32.vlgmr.msra.gmra.mxu0 %v10043_v29  ;;  %v2072_v4 = vxor.u32 2147483648, %v2071_v62  ;;  %2234 = vmatmul.f32.vlgmr.msra.gmra.mxu1 %v2113_v12  ;;  %v1345_v12 = vld [vmem:[#allocation9 + $0x608] sm:$0xff] }
 0x311   :  { %2248 = vmatpush.msra.mxu2 %v1355_v54  ;;  %2268 = vmatpush.msra.mxu3 %v1387_v31 }
 0x312   :  { %2174 = vmatmul.f32.vlgmr.msrb.gmra.mxu2 %v2114_v21  ;;  %v2073_v16 = vsel %vm1952_vm8, %v2072_v4, %v2071_v62  ;;  %2432 = vmatpush.msrb.mxu0 %v2286_v1 }
 0x313   :  { %2249 = vmatpush.msra.mxu2 %v1353_v34  ;;  %v2076_v39 = vsel %vm10055_vm10, %v9718_v20, %v2073_v16  ;;  %2269 = vmatpush.msra.mxu3 %v1385_v10 }
 0x314   :  { %2452 = vmatpush.msrb.mxu1 %v2287_v26  ;;  %v2078_v61 = vmul.f32 %v2076_v39, %v2076_v39  ;;  %2433 = vmatpush.msrb.mxu0 %v2282_v37 }
 0x315   :  { %2250 = vmatpush.msra.mxu2 %v1351_v50  ;;  %2270 = vmatpush.msra.mxu3 %v1383_v19 }
 0x316   :  { %2453 = vmatpush.msrb.mxu1 %v2283_v36  ;;  %v2079_v29 = vmul.f32 -0.001358992, %v2078_v61  ;;  %v2086_v5 = vmul.f32 -0.00019511016, %v2078_v61 }
 0x317   :  { %2251 = vmatpush.msra.mxu2 %v1349_v44  ;;  %2271 = vmatpush.msra.mxu3 %v1381_v57 }
 0x318   :  { %8406 = vmatmul.msk.f32.vlgmr.msrb.gmra.mxu0 %vm394_vm1, %v8933_v27  ;;  %v2080_v24 = vadd.f32 0.041655596, %v2079_v29  ;;  %v2087_v23 = vadd.f32 0.008332121, %v2086_v5  ;;  %8407 = vmatmul.msk.f32.vlgmr.msrb.gmra.mxu1 %vm394_vm1, %v8933_v27 }
 0x319   :  { %2252 = vmatpush.msra.mxu2 %v1347_v40  ;;  %2272 = vmatpush.msra.mxu3 %v1379_v46 }
 0x31a   :  { %v2081_v63 = vmul.f32 %v2080_v24, %v2078_v61  ;;  %v2088_v9 = vmul.f32 %v2087_v23, %v2078_v61 }
 0x31b   :  { %2253 = vmatpush.msra.mxu2 %v1345_v12  ;;  %2273 = vmatpush.msra.mxu3 %v1377_v52 }
 0x31c   :  { %2254 = vmatmul.f32.vlgmr.msra.gmra.mxu2 %v2114_v21  ;;  %v2082_v47 = vadd.f32 -0.4999988, %v2081_v63  ;;  %v2089_v30 = vadd.f32 -0.16666654, %v2088_v9 }
 0x31d   :  { %2472 = vmatpush.msrb.mxu2 %v2288_v48 }
 0x31e   :  { %v2083_v33 = vmul.f32 %v2082_v47, %v2078_v61  ;;  %v2090_v17 = vmul.f32 %v2089_v30, %v2078_v61  ;;  %v13462_v47 = vmov 2131351028  }
 0x31f   :  { %2473 = vmatpush.msrb.mxu2 %v2284_v22 }
 0x320   :  { %v2084_v7 = vadd.f32 1.0, %v2083_v33  ;;  %v2091_v60 = vadd.f32 1.0, %v2090_v17  ;;  %v13463_v33 = vmov 2102212464  }
 0x322   :  { %v2092_v2 = vmul.f32 %v2091_v60, %v2076_v39  ;;  %v2100_v15 = vxor.u32 2147483648, %v2084_v7  ;;  %v13464_v60 = vmov 920167782  }
 0x324   :  { %8408 = vmatmul.msk.f32.vlgmr.msrb.gmra.mxu2 %vm394_vm1, %v8933_v27  ;;  %v2097_v3 = vxor.u32 2147483648, %v2092_v2  ;;  %v2101_v49 = vsel %vm2099_vm0, %v2100_v15, %v2092_v2 }
 0x326   :  { %v2098_v11 = vsel %vm2096_vm11, %v2084_v7, %v2097_v3 }
 0x327   :  { %v2102_v8 = vsel %vm2095_vm5, %v2098_v11, %v2101_v49 }
 0x328   :  { %v2103_v45 = vsel %vm2093_vm7, nan, %v2102_v8 }
 0x329   :  { %v2107_v14 = vmul.f32 %v2103_v45, %v2103_v45 }
 0x32b   :  { %v2111_v6 = vsub.f32 1.0, %v2107_v14 }
 0x32d   :  { %v2115_v28 = vadd.f32 %v2111_v6, %v2107_v14 }
 0x32f   :  { %2194 = vmatmul.f32.vlgmr.msrb.gmra.mxu3 %v2115_v28 }
 0x330   :  { %2492 = vmatpush.msrb.mxu3 %v2289_v55 }
 0x332   :  { %2493 = vmatpush.msrb.mxu3 %v2285_v32 }
 0x337   :  { %2274 = vmatmul.f32.vlgmr.msra.gmra.mxu3 %v2115_v28 }
 0x33f   :  { %8409 = vmatmul.msk.f32.vlgmr.msrb.gmra.mxu3 %vm394_vm1, %v8933_v27 }
 0x383   :  { %v2135_v42 = vpop.f32.mrf.mxu0 }
 0x384   :  { %v2155_v38 = vpop.f32.mrf.mxu1 }
 0x385   :  { %v2156_v35 = vadd.f32 %v2155_v38, %v2135_v42 }
 0x38d   :  { %v2215_v54 = vpop.f32.mrf.mxu0  ;;  %v2235_v21 = vpop.f32.mrf.mxu1 }
 0x38e   :  { %v10079_v20 = vadd.f32 %v2235_v21, %v2215_v54 }
 0x395   :  { %v10081_v62 = vpop.f32.mrf.mxu0  ;;  %v2175_v31 = vpop.f32.mrf.mxu2 }
 0x396   :  { %v2498_v34 = vand.u32 2147483647, %v10081_v62  ;;  %v2501_v1 = vand.u32 2139095040, %v10081_v62  ;;  %v10085_v4 = vpop.f32.mrf.mxu1  ;;  %v10091_v0 = vadd.f32 %v2175_v31, %v2156_v35 }
 0x397   :  { %v2652_v10 = vand.u32 2147483647, %v10085_v4  ;;  %v2655_v26 = vand.u32 2139095040, %v10085_v4 }
 0x398   :  { %v2502_v50 = vshrl.u32 %v2501_v1, 23  ;;  %v2505_v37 = vand.u32 8388607, %v2498_v34 }
 0x399   :  { %v2656_v16 = vshrl.u32 %v2655_v26, 23  ;;  %v2659_v39 = vand.u32 8388607, %v2652_v10 }
 0x39a   :  { %v8410_v19 = vadd.s32 4294967169, %v2502_v50  ;;  %v2506_v36 = vor.u32 8388608, %v2505_v37 }
 0x39b   :  { %v8413_v44 = vadd.s32 4294967169, %v2656_v16  ;;  %v2660_v29 = vor.u32 8388608, %v2659_v39 }
 0x39c   :  { %v2508_v61 = vadd.s32 1, %v8410_v19  ;;  %v10095_v40 = vshll.u32 %v2506_v36, 8 }
 0x39d   :  { %v2662_v57 = vadd.s32 1, %v8413_v44  ;;  %v10100_v52 = vshll.u32 %v2660_v29, 8 }
 0x39e   :  { %vm2509_vm9 = vcmp.gt.s32.totalorder %v2508_v61, 0  ;;  %v2547_v24 = vand.u32 65535, %v10095_v40  ;;  %v2548_v41 = vshrl.u32 %v10095_v40, 16 }
 0x39f   :  { %v2510_v5 = vsel %vm2509_vm9, %v2508_v61, 0  ;;  %vm2663_vm12 = vcmp.gt.s32.totalorder %v2662_v57, 0 }
 0x3a0   :  { %v2512_v46 = vand.u32 31, %v2510_v5  ;;  %v2664_v25 = vsel %vm2663_vm12, %v2662_v57, 0  ;;  %v10102_v48 = vshrl.u32 %v2510_v5, 5 }
 0x3a1   :  { %v10098_v23 = vand.u32 31, %v2664_v25  ;;  %v10147_v57 = vshrl.u32 %v2664_v25, 5 }
 0x3a2   :  { %v2513_v12 = vsub.s32 32, %v2512_v46  ;;  %v2515_v63 = vshll.u32 %v8683_v56, %v2512_v46  ;;  %v2518_v9 = vshll.u32 %v13439_v58, %v2512_v46  ;;  %v2521_v18 = vshll.u32 %v13462_v47, %v2512_v46 }
 0x3a3   :  { %v2524_v7 = vshll.u32 %v13463_v33, %v2512_v46  ;;  %v2527_v2 = vshll.u32 %v13464_v60, %v2512_v46  ;;  %v10116_v8 = vsub.s32 32, %v10098_v23  ;;  %vm2530_vm13 = vcmp.lt.s32.totalorder %v10102_v48, 1 }
 0x3a4   :  { %v2516_v22 = vshrl.u32 %v13439_v58, %v2513_v12  ;;  %v2519_v30 = vshrl.u32 %v13462_v47, %v2513_v12  ;;  %v2522_v17 = vshrl.u32 %v13463_v33, %v2513_v12  ;;  %v2525_v43 = vshrl.u32 %v13464_v60, %v2513_v12 }
 0x3a5   :  { %v2528_v15 = vshrl.u32 %v13449_v51, %v2513_v12  ;;  %vm2531_vm14 = vcmp.lt.s32.totalorder %v10102_v48, 2  ;;  %v2514_v6 = vshrl.u32 %v8683_v56, %v2513_v12  ;;  %vm2533_vm15 = vcmp.lt.s32.totalorder %v10102_v48, 4 }
 0x3a6   :  { %v2517_v3 = vor.u32 %v2516_v22, %v2515_v63  ;;  %v2520_v11 = vor.u32 %v2519_v30, %v2518_v9  ;;  %v2523_v49 = vor.u32 %v2522_v17, %v2521_v18  ;;  %v2526_v45 = vor.u32 %v2525_v43, %v2524_v7 }
 0x3a7   :  { %v2529_v14 = vor.u32 %v2528_v15, %v2527_v2  ;;  %vm2532_vm2 = vcmp.lt.s32.totalorder %v10102_v48, 3  ;;  %v2669_v38 = vshll.u32 %v8683_v56, %v10098_v23  ;;  %v2670_v31 = vshrl.u32 %v13439_v58, %v10116_v8 }
 0x3a8   :  { %v2538_v28 = vsel %vm2530_vm13, %v2517_v3, %v2520_v11  ;;  %v2542_v55 = vsel %vm2530_vm13, %v2520_v11, %v2523_v49  ;;  %v2539_v32 = vsel %vm2533_vm15, %v2526_v45, 920167782  ;;  %v2535_v35 = vsel %vm2533_vm15, %v2523_v49, 2102212464 }
 0x3a9   :  { %v2543_v42 = vsel %vm2533_vm15, %v2529_v14, 1326507024  ;;  %v2540_v54 = vsel %vm2532_vm2, %v2523_v49, %v2539_v32  ;;  %v2672_v50 = vshll.u32 %v13439_v58, %v10098_v23  ;;  %v2673_v37 = vshrl.u32 %v13462_v47, %v10116_v8 }
 0x3aa   :  { %v2544_v21 = vsel %vm2532_vm2, %v2526_v45, %v2543_v42  ;;  %v2541_v1 = vsel %vm2531_vm14, %v2538_v28, %v2540_v54  ;;  %v2534_v44 = vsel %vm2530_vm13, %v2514_v6, %v2517_v3  ;;  %v2536_v61 = vsel %vm2532_vm2, %v2520_v11, %v2535_v35 }
 0x3ab   :  { %v2545_v26 = vsel %vm2531_vm14, %v2542_v55, %v2544_v21  ;;  %v2571_v36 = vand.u32 65535, %v2541_v1  ;;  %v2572_v39 = vshrl.u32 %v2541_v1, 16  ;;  %v10149_v29 = vor.u32 %v2670_v31, %v2669_v38 }
 0x3ac   :  { %v2549_v16 = vand.u32 65535, %v2545_v26  ;;  %v2550_v19 = vshrl.u32 %v2545_v26, 16  ;;  %v10151_v12 = vor.u32 %v2673_v37, %v2672_v50  ;;  %v2676_v63 = vshrl.u32 %v13463_v33, %v10116_v8 }
 0x3ad   :  { %v2574_v22 = vmul.u32 %v2572_v39, %v2547_v24  ;;  %v2575_v30 = vmul.u32 %v2571_v36, %v2548_v41  ;;  %v2675_v18 = vshll.u32 %v13462_v47, %v10098_v23  ;;  %v2573_v43 = vmul.u32 %v2571_v36, %v2547_v24 }
 0x3ae   :  { %v2552_v5 = vmul.u32 %v2550_v19, %v2547_v24  ;;  %v2553_v46 = vmul.u32 %v2549_v16, %v2548_v41  ;;  %v2551_v9 = vmul.u32 %v2549_v16, %v2547_v24  ;;  %v2554_v17 = vmul.u32 %v2550_v19, %v2548_v41 }
 0x3af   :  { %v2576_v25 = vmul.u32 %v2572_v39, %v2548_v41  ;;  %v2577_v11 = vshll.u32 %v2574_v22, 16  ;;  %v2579_v45 = vshll.u32 %v2575_v30, 16  ;;  %v10157_v14 = vor.u32 %v2676_v63, %v2675_v18 }
 0x3b0   :  { %v2555_v7 = vshll.u32 %v2552_v5, 16  ;;  %v2556_v2 = vshrl.u32 %v2552_v5, 16  ;;  %v2557_v15 = vshll.u32 %v2553_v46, 16  ;;  %v2558_v3 = vshrl.u32 %v2553_v46, 16 }
 0x3b1   :  { %vm2581_vm3 = vc.u32 %v2573_v43, %v2577_v11  ;;  %v2583_v28 = vadd.s32 %v2577_v11, %v2573_v43  ;;  %v2679_v55 = vshrl.u32 %v13464_v60, %v10116_v8  ;;  %v2678_v41 = vshll.u32 %v13463_v33, %v10098_v23 }
 0x3b2   :  { %vm2559_vm4 = vc.u32 %v2551_v9, %v2555_v7  ;;  %v2561_v49 = vadd.s32 %v2555_v7, %v2551_v9  ;;  %v2582_v24 = vsel %vm2581_vm3, 1, %v8689_v13  ;;  %v2681_v35 = vshll.u32 %v13464_v60, %v10098_v23 }
 0x3b3   :  { %v2560_v6 = vsel %vm2559_vm4, 1, %v8689_v13  ;;  %v2584_v38 = vadd.s32 %v2582_v24, %v2576_v25  ;;  %vm2585_vm8 = vc.u32 %v2583_v28, %v2579_v45  ;;  %v2680_v31 = vor.u32 %v2679_v55, %v2678_v41 }
 0x3b4   :  { %v2562_v32 = vadd.s32 %v2560_v6, %v2554_v17  ;;  %vm2563_vm6 = vc.u32 %v2561_v49, %v2557_v15  ;;  %v2586_v21 = vsel %vm2585_vm8, 1, %v8689_v13  ;;  %v2682_v1 = vshrl.u32 %v13449_v51, %v10116_v8  ;;  %v2195_v49 = vpop.f32.mrf.mxu3 }
 0x3b5   :  { %v2564_v42 = vsel %vm2563_vm6, 1, %v8689_v13  ;;  %v2578_v26 = vshrl.u32 %v2574_v22, 16  ;;  %v2580_v50 = vshrl.u32 %v2575_v30, 16  ;;  %v10171_v37 = vadd.s32 %v2583_v28, %v2579_v45  ;;  %v2255_v45 = vpop.f32.mrf.mxu2 }
 0x3b6   :  { %v2566_v54 = vadd.s32 %v2564_v42, %v2562_v32  ;;  %v2588_v16 = vadd.s32 %v2586_v21, %v2584_v38  ;;  %v2683_v36 = vor.u32 %v2682_v1, %v2681_v35  ;;  %vm2684_vm10 = vcmp.lt.s32.totalorder %v10147_v57, 1 }
 0x3b7   :  { %vm2687_vm11 = vcmp.lt.s32.totalorder %v10147_v57, 4  ;;  %vm2686_vm0 = vcmp.lt.s32.totalorder %v10147_v57, 3  ;;  %v2692_v23 = vsel %vm2684_vm10, %v10149_v29, %v10151_v12  ;;  %vm2685_vm5 = vcmp.lt.s32.totalorder %v10147_v57, 2 }
 0x3b8   :  { %v2567_v19 = vadd.s32 %v2566_v54, %v2556_v2  ;;  %v2589_v39 = vadd.s32 %v2588_v16, %v2578_v26  ;;  %v2693_v5 = vsel %vm2687_vm11, %v2680_v31, 920167782  ;;  %v2696_v9 = vsel %vm2684_vm10, %v10151_v12, %v10157_v14 }
 0x3b9   :  { %v2694_v63 = vsel %vm2686_vm0, %v10157_v14, %v2693_v5  ;;  %v2537_v22 = vsel %vm2531_vm14, %v2534_v44, %v2536_v61  ;;  %v2697_v17 = vsel %vm2687_vm11, %v2683_v36, 1326507024  ;;  %v2701_v43 = vand.u32 65535, %v10100_v52 }
 0x3ba   :  { %v10182_v46 = vadd.s32 %v2567_v19, %v2558_v3  ;;  %v2590_v30 = vadd.s32 %v2589_v39, %v2580_v50  ;;  %v2695_v18 = vsel %vm2685_vm5, %v2692_v23, %v2694_v63  ;;  %v2698_v7 = vsel %vm2686_vm0, %v2680_v31, %v2697_v17 }
 0x3bb   :  { %v2725_v25 = vand.u32 65535, %v2695_v18  ;;  %v2699_v48 = vsel %vm2685_vm5, %v2696_v9, %v2698_v7  ;;  %v2702_v44 = vshrl.u32 %v10100_v52, 16  ;;  %v2726_v61 = vshrl.u32 %v2695_v18, 16 }
 0x3bc   :  { %vm2593_vm7 = vc.u32 %v10182_v46, %v10171_v37  ;;  %v2594_v2 = vadd.s32 1, %v2590_v30  ;;  %v2591_v15 = vmul.u32 %v10095_v40, %v2537_v22  ;;  %v2703_v3 = vand.u32 65535, %v2699_v48 }
 0x3bd   :  { %v2704_v11 = vshrl.u32 %v2699_v48, 16  ;;  %v2728_v28 = vmul.u32 %v2726_v61, %v2701_v43  ;;  %v2729_v55 = vmul.u32 %v2725_v25, %v2702_v44  ;;  %v2196_v32 = vadd.f32 %v2195_v49, %v10091_v0  ;;  %v2275_v48 = vpop.f32.mrf.mxu3 }
 0x3be   :  { %v2595_v6 = vsel %vm2593_vm7, %v2594_v2, %v2590_v30  ;;  %v2707_v42 = vmul.u32 %v2703_v3, %v2702_v44  ;;  %v2727_v38 = vmul.u32 %v2725_v25, %v2701_v43  ;;  %v2730_v35 = vmul.u32 %v2726_v61, %v2702_v44 }
 0x3bf   :  { %v2596_v24 = vadd.s32 %v2595_v6, %v2591_v15  ;;  %v2706_v41 = vmul.u32 %v2704_v11, %v2701_v43  ;;  %v2731_v54 = vshll.u32 %v2728_v28, 16  ;;  %v2705_v31 = vmul.u32 %v2703_v3, %v2701_v43 }
 0x3c0   :  { %v2708_v1 = vmul.u32 %v2704_v11, %v2702_v44  ;;  %v2711_v40 = vshll.u32 %v2707_v42, 16  ;;  %v2733_v50 = vshll.u32 %v2729_v55, 16  ;;  %v2668_v39 = vshrl.u32 %v8683_v56, %v10116_v8  ;;  %v10226_v44 = vpop.f32.mrf.mxu2 }
 0x3c1   :  { %v2597_v21 = vadd.s32 536870912, %v2596_v24  ;;  %v2709_v26 = vshll.u32 %v2706_v41, 16  ;;  %vm2735_vm9 = vc.u32 %v2727_v38, %v2731_v54  ;;  %v2737_v16 = vadd.s32 %v2731_v54, %v2727_v38 }
 0x3c2   :  { %v2736_v0 = vsel %vm2735_vm9, 1, %v8689_v13  ;;  %v2689_v9 = vsel %vm2687_vm11, %v10157_v14, 2102212464  ;;  %v10221_v17 = vadd.f32 %v2196_v32, %v9564_v59  ;;  %v2256_v8 = vadd.f32 %v2255_v45, %v10079_v20 }
 0x3c3   :  { %v10208_v19 = vshrl.u32 %v2597_v21, 30  ;;  %vm2713_vm12 = vc.u32 %v2705_v31, %v2709_v26  ;;  %v2715_v36 = vadd.s32 %v2709_v26, %v2705_v31  ;;  %v2738_v5 = vadd.s32 %v2736_v0, %v2730_v35 }
 0x3c4   :  { %v2714_v23 = vsel %vm2713_vm12, 1, %v8689_v13  ;;  %vm2739_vm13 = vc.u32 %v2737_v16, %v2733_v50  ;;  %v2710_v43 = vshrl.u32 %v2706_v41, 16  ;;  %v2688_v14 = vsel %vm2684_vm10, %v2668_v39, %v10149_v29 }
 0x3c5   :  { %v2599_v63 = vshll.u32 %v10208_v19, 30  ;;  %v2716_v22 = vadd.s32 %v2714_v23, %v2708_v1  ;;  %vm2717_vm14 = vc.u32 %v2715_v36, %v2711_v40  ;;  %v2740_v18 = vsel %vm2739_vm13, 1, %v8689_v13 }
 0x3c6   :  { %v2718_v30 = vsel %vm2717_vm14, 1, %v8689_v13  ;;  %v2742_v2 = vadd.s32 %v2740_v18, %v2738_v5  ;;  %v2690_v61 = vsel %vm2686_vm0, %v10151_v12, %v2689_v9  ;;  %v2732_v59 = vshrl.u32 %v2728_v28, 16 }
 0x3c7   :  { %v10224_v7 = vsub.s32 %v2596_v24, %v2599_v63  ;;  %v2720_v25 = vadd.s32 %v2718_v30, %v2716_v22  ;;  %v2276_v15 = vadd.f32 %v2275_v48, %v2256_v8  ;;  %v2712_v3 = vshrl.u32 %v2707_v42, 16 }
 0x3c8   :  { %v2734_v49 = vshrl.u32 %v2729_v55, 16  ;;  %v2743_v45 = vadd.s32 %v2742_v2, %v2732_v59  ;;  %v2809_v32 = vand.u32 2139095040, %v10226_v44  ;;  %v2691_v12 = vsel %vm2685_vm5, %v2688_v14, %v2690_v61  ;;  %v10280_v59 = vpop.f32.mrf.mxu3 }
 0x3c9   :  { %vm2601_vm15 = vcmp.lt.s32.totalorder %v10224_v7, 0  ;;  %v2602_v20 = vsub.s32 0, %v10224_v7  ;;  %v2721_v11 = vadd.s32 %v2720_v25, %v2710_v43  ;;  %v10237_v6 = vadd.f32 %v2276_v15, %v9629_v53 }
 0x3ca   :  { %v10245_v24 = vadd.s32 %v2737_v16, %v2733_v50  ;;  %v2744_v41 = vadd.s32 %v2743_v45, %v2734_v49  ;;  %v2810_v38 = vshrl.u32 %v2809_v32, 23  ;;  %v2745_v53 = vmul.u32 %v10100_v52, %v2691_v12 }
 0x3cb   :  { %v2603_v29 = vsel %vm2601_vm15, %v2602_v20, %v10224_v7  ;;  %v10243_v28 = vadd.s32 %v2721_v11, %v2712_v3  ;;  %v2806_v0 = vand.u32 2147483647, %v10226_v44  ;;  %vm2500_vm15 = vcmp.lt.s32.totalorder %v10081_v62, 0 }
 0x3cc   :  { %v2604_v42 = vclz %v2603_v29  ;;  %v2748_v55 = vadd.s32 1, %v2744_v41  ;;  %v8416_v35 = vadd.s32 4294967169, %v2810_v38 }
 0x3cd   :  { %vm2747_vm2 = vc.u32 %v10243_v28, %v10245_v24  ;;  %v2813_v22 = vand.u32 8388607, %v2806_v0 }
 0x3ce   :  { %v2749_v54 = vsel %vm2747_vm2, %v2748_v55, %v2744_v41  ;;  %v2816_v31 = vadd.s32 1, %v8416_v35  ;;  %v8411_v1 = vadd.s32 4294967294, %v2604_v42  ;;  %v2963_v41 = vand.u32 2139095040, %v10280_v59 }
 0x3cf   :  { %v2750_v21 = vadd.s32 %v2749_v54, %v2745_v53  ;;  %v2814_v45 = vor.u32 8388608, %v2813_v22 }
 0x3d0   :  { %vm2817_vm4 = vcmp.gt.s32.totalorder %v2816_v31, 0  ;;  %vm8412_vm3 = vcmp.lt.s32.totalorder %v8411_v1, 0 }
 0x3d1   :  { %v2751_v57 = vadd.s32 536870912, %v2750_v21  ;;  %v2818_v26 = vsel %vm2817_vm4, %v2816_v31, 0  ;;  %v10256_v39 = vsel %vm8412_vm3, 0, %v8411_v1  ;;  %v10303_v54 = vshll.u32 %v2814_v45, 8 }
 0x3d2   :  { %v2820_v50 = vand.u32 31, %v2818_v26  ;;  %v2612_v9 = vsub.s32 4294967266, %v10256_v39  ;;  %v10269_v30 = vshrl.u32 %v2818_v26, 5  ;;  %v2608_v35 = vsub.s32 32, %v10256_v39 }
 0x3d3   :  { %v10250_v40 = vshrl.u32 %v2751_v57, 30  ;;  %v2592_v26 = vadd.s32 %v10171_v37, %v10182_v46  ;;  %v2609_v46 = vshll.u32 %v10224_v7, %v10256_v39  ;;  %v2746_v45 = vadd.s32 %v10245_v24, %v10243_v28 }
 0x3d4   :  { %v10253_v36 = vsub.s32 32, %v2820_v50  ;;  %v2823_v8 = vshll.u32 %v8683_v56, %v2820_v50  ;;  %v2826_v43 = vshll.u32 %v13439_v58, %v2820_v50  ;;  %v2829_v48 = vshll.u32 %v13462_v47, %v2820_v50 }
 0x3d5   :  { %v2753_v16 = vshll.u32 %v10250_v40, 30  ;;  %v2832_v14 = vshll.u32 %v13463_v33, %v2820_v50  ;;  %v2835_v3 = vshll.u32 %v13464_v60, %v2820_v50  ;;  %v2613_v38 = vadd.s32 127, %v2612_v9 }
 0x3d6   :  { %v2824_v5 = vshrl.u32 %v13439_v58, %v10253_v36  ;;  %v2827_v63 = vshrl.u32 %v13462_v47, %v10253_v36  ;;  %v2830_v25 = vshrl.u32 %v13463_v33, %v10253_v36  ;;  %v2833_v61 = vshrl.u32 %v13464_v60, %v10253_v36 }
 0x3d7   :  { %v10258_v52 = vsub.s32 %v2750_v21, %v2753_v16  ;;  %v2836_v11 = vshrl.u32 %v13449_v51, %v10253_v36  ;;  %vm2838_vm10 = vcmp.lt.s32.totalorder %v10269_v30, 1  ;;  %vm2841_vm11 = vcmp.lt.s32.totalorder %v10269_v30, 4 }
 0x3d8   :  { %v10282_v15 = vor.u32 %v2824_v5, %v2823_v8  ;;  %v10284_v20 = vor.u32 %v2827_v63, %v2826_v43  ;;  %v2834_v32 = vor.u32 %v2833_v61, %v2832_v14  ;;  %v10289_v29 = vor.u32 %v2830_v25, %v2829_v48 }
 0x3d9   :  { %vm2755_vm6 = vcmp.lt.s32.totalorder %v10258_v52, 0  ;;  %v2756_v23 = vsub.s32 0, %v10258_v52  ;;  %v2837_v12 = vor.u32 %v2836_v11, %v2835_v3  ;;  %vm2839_vm0 = vcmp.lt.s32.totalorder %v10269_v30, 2 }
 0x3da   :  { %v2846_v55 = vsel %vm2838_vm10, %v10282_v15, %v10284_v20  ;;  %v2847_v53 = vsel %vm2841_vm11, %v2834_v32, 920167782  ;;  %vm2840_vm5 = vcmp.lt.s32.totalorder %v10269_v30, 3  ;;  %v2850_v1 = vsel %vm2838_vm10, %v10284_v20, %v10289_v29 }
 0x3db   :  { %v2757_v18 = vsel %vm2755_vm6, %v2756_v23, %v10258_v52  ;;  %v2848_v31 = vsel %vm2840_vm5, %v10289_v29, %v2847_v53  ;;  %v2851_v57 = vsel %vm2841_vm11, %v2837_v12, 1326507024  ;;  %v2614_v50 = vshll.u32 %v2613_v38, 23 }
 0x3dc   :  { %v2758_v2 = vclz %v2757_v18  ;;  %v2849_v16 = vsel %vm2839_vm0, %v2846_v55, %v2848_v31  ;;  %v2964_v23 = vshrl.u32 %v2963_v41, 23  ;;  %v2852_v5 = vsel %vm2840_vm5, %v2834_v32, %v2851_v57 }
 0x3dd   :  { %v2880_v63 = vshrl.u32 %v2849_v16, 16  ;;  %v2610_v9 = vshrl.u32 %v2592_v26, %v2608_v35  ;;  %v2853_v22 = vsel %vm2839_vm0, %v2850_v1, %v2852_v5  ;;  %v2855_v18 = vand.u32 65535, %v10303_v54 }
 0x3de   :  { %v8414_v49 = vadd.s32 4294967294, %v2758_v2  ;;  %v2856_v43 = vshrl.u32 %v10303_v54, 16  ;;  %v2857_v25 = vand.u32 65535, %v2853_v22  ;;  %v2858_v37 = vshrl.u32 %v2853_v22, 16 }
 0x3df   :  { %v2615_v2 = vor.u32 4788187, %v2614_v50  ;;  %v8419_v14 = vadd.s32 4294967169, %v2964_v23  ;;  %v2882_v11 = vmul.u32 %v2880_v63, %v2855_v18  ;;  %v2879_v32 = vand.u32 65535, %v2849_v16 }
 0x3e0   :  { %vm8415_vm8 = vcmp.lt.s32.totalorder %v8414_v49, 0  ;;  %v2860_v61 = vmul.u32 %v2858_v37, %v2855_v18  ;;  %v2861_v3 = vmul.u32 %v2857_v25, %v2856_v43  ;;  %v2859_v41 = vmul.u32 %v2857_v25, %v2855_v18 }
 0x3e1   :  { %v2761_v42 = vsel %vm8415_vm8, 0, %v8414_v49  ;;  %v2611_v49 = vor.u32 %v2610_v9, %v2609_v46  ;;  %v2960_v55 = vand.u32 2147483647, %v10280_v59  ;;  %v2616_v53 = vand.u32 2147483647, %v2615_v2 }
 0x3e2   :  { %v2766_v21 = vsub.s32 4294967266, %v2761_v42  ;;  %v2762_v48 = vsub.s32 32, %v2761_v42  ;;  %v2863_v38 = vshll.u32 %v2860_v61, 16  ;;  %v2970_v7 = vadd.s32 1, %v8419_v14 }
 0x3e3   :  { %v2865_v39 = vshll.u32 %v2861_v3, 16  ;;  %v2885_v1 = vshll.u32 %v2882_v11, 16  ;;  %v2618_v57 = vcvt.s32.f32 %v2611_v49  ;;  %v2763_v26 = vshll.u32 %v10258_v52, %v2761_v42 }
 0x3e4   :  { %v2767_v8 = vadd.s32 127, %v2766_v21  ;;  %v2764_v35 = vshrl.u32 %v2746_v45, %v2762_v48  ;;  %v2862_v21 = vmul.u32 %v2858_v37, %v2856_v43  ;;  %vm2867_vm7 = vc.u32 %v2859_v41, %v2863_v38 }
 0x3e5   :  { %v2869_v31 = vadd.s32 %v2863_v38, %v2859_v41  ;;  %v2868_v50 = vsel %vm2867_vm7, 1, %v8689_v13  ;;  %v2883_v28 = vmul.u32 %v2879_v32, %v2856_v43  ;;  %v2881_v23 = vmul.u32 %v2879_v32, %v2855_v18 }
 0x3e6   :  { %v2768_v12 = vshll.u32 %v2767_v8, 23  ;;  %v2870_v16 = vadd.s32 %v2868_v50, %v2862_v21  ;;  %v2619_v5 = vmul.f32 %v2618_v57, %v2616_v53  ;;  %v2765_v9 = vor.u32 %v2764_v35, %v2763_v26 }
 0x3e7   :  { %vm2871_vm9 = vc.u32 %v2869_v31, %v2865_v39  ;;  %v2864_v22 = vshrl.u32 %v2860_v61, 16  ;;  %v2884_v37 = vmul.u32 %v2880_v63, %v2856_v43  ;;  %vm2889_vm12 = vc.u32 %v2881_v23, %v2885_v1 }
 0x3e8   :  { %v2769_v24 = vor.u32 4788187, %v2768_v12  ;;  %v2872_v8 = vsel %vm2871_vm9, 1, %v8689_v13  ;;  %v2891_v46 = vadd.s32 %v2885_v1, %v2881_v23  ;;  %v2843_v52 = vsel %vm2841_vm11, %v10289_v29, 2102212464 }
 0x3e9   :  { %v2874_v25 = vadd.s32 %v2872_v8, %v2870_v16  ;;  %v2887_v42 = vshll.u32 %v2883_v28, 16  ;;  %v2890_v2 = vsel %vm2889_vm12, 1, %v8689_v13  ;;  %vm2971_vm13 = vcmp.gt.s32.totalorder %v2970_v7, 0 }
 0x3ea   :  { %v2770_v48 = vand.u32 2147483647, %v2769_v24  ;;  %v2822_v18 = vshrl.u32 %v8683_v56, %v10253_v36  ;;  %v2892_v61 = vadd.s32 %v2890_v2, %v2884_v37  ;;  %v2620_v49 = vxor.u32 2147483648, %v2619_v5 }
 0x3eb   :  { %v2875_v14 = vadd.s32 %v2874_v25, %v2864_v22  ;;  %v2866_v45 = vshrl.u32 %v2861_v3, 16  ;;  %vm2893_vm14 = vc.u32 %v2891_v46, %v2887_v42  ;;  %v2972_v63 = vsel %vm2971_vm13, %v2970_v7, 0 }
 0x3ec   :  { %v2772_v43 = vcvt.s32.f32 %v2765_v9  ;;  %v2842_v32 = vsel %vm2838_vm10, %v2822_v18, %v10282_v15  ;;  %v2844_v29 = vsel %vm2840_vm5, %v10284_v20, %v2843_v52  ;;  %v2894_v12 = vsel %vm2893_vm14, 1, %v8689_v13 }
 0x3ed   :  { %v10345_v41 = vadd.s32 %v2875_v14, %v2866_v45  ;;  %v2886_v36 = vshrl.u32 %v2882_v11, 16  ;;  %v2896_v38 = vadd.s32 %v2894_v12, %v2892_v61  ;;  %v2974_v53 = vand.u32 31, %v2972_v63 }
 0x3ee   :  { %v2773_v3 = vmul.f32 %v2772_v43, %v2770_v48  ;;  %v2888_v35 = vshrl.u32 %v2883_v28, 16  ;;  %v10348_v21 = vadd.s32 %v2891_v46, %v2887_v42  ;;  %v2621_v15 = vsel %vm2500_vm15, %v2620_v49, %v2619_v5 }
 0x3ef   :  { %v2897_v7 = vadd.s32 %v2896_v38, %v2886_v36  ;;  %v10350_v39 = vsub.s32 32, %v2974_v53  ;;  %v2845_v20 = vsel %vm2839_vm0, %v2842_v32, %v2844_v29  ;;  %v2967_v11 = vand.u32 8388607, %v2960_v55 }
 0x3f0   :  { %vm2901_vm2 = vc.u32 %v10345_v41, %v10348_v21  ;;  %v2977_v26 = vshll.u32 %v8683_v56, %v2974_v53  ;;  %v2980_v50 = vshll.u32 %v13439_v58, %v2974_v53  ;;  %v2774_v24 = vxor.u32 2147483648, %v2773_v3 }
 0x3f1   :  { %v2898_v31 = vadd.s32 %v2897_v7, %v2888_v35  ;;  %v2978_v1 = vshrl.u32 %v13439_v58, %v10350_v39  ;;  %v2981_v57 = vshrl.u32 %v13462_v47, %v10350_v39  ;;  %v2984_v30 = vshrl.u32 %v13463_v33, %v10350_v39 }
 0x3f2   :  { %v2987_v28 = vshrl.u32 %v13464_v60, %v10350_v39  ;;  %v2899_v16 = vmul.u32 %v10303_v54, %v2845_v20  ;;  %v2986_v5 = vshll.u32 %v13463_v33, %v2974_v53  ;;  %v10372_v9 = vshrl.u32 %v2972_v63, 5 }
 0x3f3   :  { %v2902_v23 = vadd.s32 1, %v2898_v31  ;;  %v10374_v22 = vor.u32 %v2978_v1, %v2977_v26  ;;  %v10376_v8 = vor.u32 %v2981_v57, %v2980_v50  ;;  %v2983_v25 = vshll.u32 %v13462_v47, %v2974_v53 }
 0x3f4   :  { %v2988_v46 = vor.u32 %v2987_v28, %v2986_v5  ;;  %v2989_v52 = vshll.u32 %v13464_v60, %v2974_v53  ;;  %v2990_v42 = vshrl.u32 %v13449_v51, %v10350_v39  ;;  %v2968_v54 = vor.u32 8388608, %v2967_v11 }
 0x3f5   :  { %v2903_v37 = vsel %vm2901_vm2, %v2902_v23, %v2898_v31  ;;  %v2985_v48 = vor.u32 %v2984_v30, %v2983_v25  ;;  %vm10384_vm4 = vcmp.le.f32.partialorder %v2498_v34, 0.7853982  ;;  %vm2654_vm3 = vcmp.lt.s32.totalorder %v10085_v4, 0 }
 0x3f6   :  { %v2904_v2 = vadd.s32 %v2903_v37, %v2899_v16  ;;  %v2991_v14 = vor.u32 %v2990_v42, %v2989_v52  ;;  %v10392_v61 = vsel %vm10384_vm4, %v10081_v62, %v2621_v15  ;;  %vm2992_vm6 = vcmp.lt.s32.totalorder %v10372_v9, 1 }
 0x3f7   :  { %vm2995_vm8 = vcmp.lt.s32.totalorder %v10372_v9, 4  ;;  %v2775_v45 = vsel %vm2654_vm3, %v2774_v24, %v2773_v3  ;;  %v3000_v34 = vsel %vm2992_vm6, %v10374_v22, %v10376_v8  ;;  %vm2994_vm10 = vcmp.lt.s32.totalorder %v10372_v9, 3 }
 0x3f8   :  { %v2905_v49 = vadd.s32 536870912, %v2904_v2  ;;  %v3001_v63 = vsel %vm2995_vm8, %v2988_v46, 920167782  ;;  %v3005_v43 = vsel %vm2995_vm8, %v2991_v14, 1326507024  ;;  %v3004_v29 = vsel %vm2992_vm6, %v10376_v8, %v2985_v48 }
 0x3f9   :  { %v10412_v12 = vshll.u32 %v2968_v54, 8  ;;  %vm2993_vm11 = vcmp.lt.s32.totalorder %v10372_v9, 2  ;;  %v3002_v36 = vsel %vm2994_vm10, %v2985_v48, %v3001_v63  ;;  %v3006_v38 = vsel %vm2994_vm10, %v2988_v46, %v3005_v43 }
 0x3fa   :  { %v10406_v32 = vshrl.u32 %v2905_v49, 30  ;;  %vm10421_vm0 = vcmp.le.f32.partialorder %v2652_v10, 0.7853982  ;;  %v3003_v35 = vsel %vm2993_vm11, %v3000_v34, %v3002_v36  ;;  %v10430_v7 = vmul.f32 %v10392_v61, %v10392_v61 }
 0x3fb   :  { %v10435_v15 = vsel %vm10421_vm0, %v10085_v4, %v2775_v45  ;;  %v3007_v10 = vsel %vm2993_vm11, %v3004_v29, %v3006_v38  ;;  %v3034_v20 = vshrl.u32 %v3003_v35, 16  ;;  %v3009_v31 = vand.u32 65535, %v10412_v12 }
 0x3fc   :  { %v2907_v3 = vshll.u32 %v10406_v32, 30  ;;  %v3011_v1 = vand.u32 65535, %v3007_v10  ;;  %v3033_v57 = vand.u32 65535, %v3003_v35  ;;  %v3010_v26 = vshrl.u32 %v10412_v12, 16  ;;  %v2352_v35 = vld [vmem:[#allocation9 + $0x9f0] sm:$0xff] }
 0x3fd   :  { %v3012_v50 = vshrl.u32 %v3007_v10, 16  ;;  %v10445_v28 = vmul.u32 %v3034_v20, %v3009_v31  ;;  %v10448_v24 = vmul.f32 -0.00019511016, %v10430_v7  ;;  %v10452_v16 = vmul.f32 %v10435_v15, %v10435_v15  ;;  %3148 = vmatpush.msra.mxu1 %v2352_v35  ;;  %v2346_v35 = vld [vmem:[#allocation9 + $0x9c0] sm:$0xff] }
 0x3fe   :  { %v10439_v11 = vsub.s32 %v2904_v2, %v2907_v3  ;;  %v3015_v5 = vmul.u32 %v3011_v1, %v3010_v26  ;;  %v2900_v25 = vadd.s32 %v10348_v21, %v10345_v41  ;;  %v2976_v46 = vshrl.u32 %v8683_v56, %v10350_v39  ;;  %v2320_v3 = vld [vmem:[#allocation9 + $0x8f0] sm:$0xff] }
 0x3ff   :  { %v3014_v23 = vmul.u32 %v3012_v50, %v3009_v31  ;;  %v10459_v52 = vmul.u32 %v3033_v57, %v3010_v26  ;;  %v2997_v2 = vsel %vm2995_vm8, %v2985_v48, 2102212464  ;;  %v3013_v54 = vmul.u32 %v3011_v1, %v3009_v31  ;;  %3128 = vmatpush.msra.mxu0 %v2320_v3  ;;  %v2314_v3 = vld [vmem:[#allocation9 + $0x8c0] sm:$0xff] }
 0x400   :  { %vm2909_vm5 = vcmp.lt.s32.totalorder %v10439_v11, 0  ;;  %v2910_v30 = vsub.s32 0, %v10439_v11  ;;  %v3016_v49 = vmul.u32 %v3012_v50, %v3010_v26  ;;  %v3019_v45 = vshll.u32 %v3015_v5, 16 }
 0x401   :  { %v3017_v14 = vshll.u32 %v3014_v23, 16  ;;  %v3035_v34 = vmul.u32 %v3033_v57, %v3009_v31  ;;  %v3039_v63 = vshll.u32 %v10445_v28, 16  ;;  %v3038_v21 = vmul.u32 %v3034_v20, %v3010_v26 }
 0x402   :  { %v2911_v37 = vsel %vm2909_vm5, %v2910_v30, %v10439_v11  ;;  %v3041_v39 = vshll.u32 %v10459_v52, 16  ;;  %v3018_v26 = vshrl.u32 %v3014_v23, 16  ;;  %v2318_v30 = vld [vmem:[#allocation9 + $0x8e0] sm:$0xff]  ;;  %v2788_v23 = vmul.f32 -0.00019511016, %v10452_v16 }
 0x403   :  { %v2912_v42 = vclz %v2911_v37  ;;  %vm3021_vm7 = vc.u32 %v3013_v54, %v3017_v14  ;;  %v3023_v41 = vadd.s32 %v3017_v14, %v3013_v54  ;;  %vm3043_vm9 = vc.u32 %v3035_v34, %v3039_v63  ;;  %v2350_v37 = vld [vmem:[#allocation9 + $0x9e0] sm:$0xff]  ;;  %3129 = vmatpush.msra.mxu0 %v2318_v30 }
 0x404   :  { %v3022_v29 = vsel %vm3021_vm7, 1, %v8689_v13  ;;  %v3045_v36 = vadd.s32 %v3039_v63, %v3035_v34  ;;  %v3044_v48 = vsel %vm3043_vm9, 1, %v8689_v13  ;;  %v3020_v54 = vshrl.u32 %v3015_v5, 16  ;;  %3149 = vmatpush.msra.mxu1 %v2350_v37 }
 0x405   :  { %v8417_v43 = vadd.s32 4294967294, %v2912_v42  ;;  %v3024_v38 = vadd.s32 %v3022_v29, %v3016_v49  ;;  %vm3025_vm13 = vc.u32 %v3023_v41, %v3019_v45  ;;  %v3046_v1 = vadd.s32 %v3044_v48, %v3038_v21  ;;  %v2316_v41 = vld [vmem:[#allocation9 + $0x8d0] sm:$0xff] }
 0x406   :  { %v3026_v31 = vsel %vm3025_vm13, 1, %v8689_v13  ;;  %vm3047_vm14 = vc.u32 %v3045_v36, %v3041_v39  ;;  %v3040_v14 = vshrl.u32 %v10445_v28, 16  ;;  %v2348_v21 = vld [vmem:[#allocation9 + $0x9d0] sm:$0xff]  ;;  %v2996_v29 = vsel %vm2992_vm6, %v2976_v46, %v10374_v22  ;;  %3130 = vmatpush.msra.mxu0 %v2316_v41  ;;  %v2306_v41 = vld [vmem:[#allocation9 + $0x880] sm:$0xff] }
 0x407   :  { %vm8418_vm12 = vcmp.lt.s32.totalorder %v8417_v43, 0  ;;  %v3028_v50 = vadd.s32 %v3026_v31, %v3024_v38  ;;  %v3048_v49 = vsel %vm3047_vm14, 1, %v8689_v13  ;;  %v3042_v28 = vshrl.u32 %v10459_v52, 16  ;;  %3150 = vmatpush.msra.mxu1 %v2348_v21  ;;  %v2344_v31 = vld [vmem:[#allocation9 + $0x9b0] sm:$0xff]  ;;  %v2338_v21 = vld [vmem:[#allocation9 + $0x980] sm:$0xff] }
 0x408   :  { %v2915_v10 = vsel %vm8418_vm12, 0, %v8417_v43  ;;  %v3050_v43 = vadd.s32 %v3048_v49, %v3046_v1  ;;  %3131 = vmatpush.msra.mxu0 %v2314_v3  ;;  %v2635_v22 = vadd.f32 0.008332121, %v10448_v24  ;;  %v2627_v1 = vmul.f32 -0.001358992, %v10430_v7 }
 0x409   :  { %v2916_v20 = vsub.s32 32, %v2915_v10  ;;  %v2920_v57 = vsub.s32 4294967266, %v2915_v10  ;;  %v2917_v42 = vshll.u32 %v10439_v11, %v2915_v10  ;;  %v3029_v63 = vadd.s32 %v3028_v50, %v3018_v26  ;;  %3151 = vmatpush.msra.mxu1 %v2346_v35  ;;  %v2310_v26 = vld [vmem:[#allocation9 + $0x8a0] sm:$0xff] }
 0x40a   :  { %v2998_v11 = vsel %vm2994_vm10, %v10376_v8, %v2997_v2  ;;  %v3051_v48 = vadd.s32 %v3050_v43, %v3040_v14  ;;  %v10481_v10 = vadd.s32 %v3045_v36, %v3041_v39  ;;  %v2312_v2 = vld [vmem:[#allocation9 + $0x8b0] sm:$0xff]  ;;  %v2342_v50 = vld [vmem:[#allocation9 + $0x9a0] sm:$0xff]  ;;  %v2636_v30 = vmul.f32 %v2635_v22, %v10430_v7 }
 0x40b   :  { %v2918_v45 = vshrl.u32 %v2900_v25, %v2916_v20  ;;  %v2921_v34 = vadd.s32 127, %v2920_v57  ;;  %v10479_v38 = vadd.s32 %v3029_v63, %v3020_v54  ;;  %v2999_v8 = vsel %vm2993_vm11, %v2996_v29, %v2998_v11  ;;  %3132 = vmatpush.msra.mxu0 %v2312_v2  ;;  %3152 = vmatpush.msra.mxu1 %v2344_v31  ;;  %v2308_v54 = vld [vmem:[#allocation9 + $0x890] sm:$0xff] }
 0x40c   :  { %v3052_v52 = vadd.s32 %v3051_v48, %v3042_v28  ;;  %v2781_v20 = vmul.f32 -0.001358992, %v10452_v16  ;;  %v2789_v57 = vadd.f32 0.008332121, %v2788_v23  ;;  %v3053_v9 = vmul.u32 %v10412_v12, %v2999_v8  ;;  %v2340_v14 = vld [vmem:[#allocation9 + $0x990] sm:$0xff]  ;;  %v2334_v8 = vld [vmem:[#allocation9 + $0x960] sm:$0xff] }
 0x40d   :  { %v2919_v5 = vor.u32 %v2918_v45, %v2917_v42  ;;  %v2922_v25 = vshll.u32 %v2921_v34, 23  ;;  %vm3055_vm2 = vc.u32 %v10479_v38, %v10481_v10  ;;  %3133 = vmatpush.msra.mxu0 %v2310_v26  ;;  %3153 = vmatpush.msra.mxu1 %v2342_v50  ;;  %v2628_v49 = vadd.f32 0.041655596, %v2627_v1  ;;  %v2304_v28 = vld [vmem:[#allocation9 + $0x870] sm:$0xff] }
 0x40e   :  { %v3056_v24 = vadd.s32 1, %v3052_v52  ;;  %v2790_v45 = vmul.f32 %v2789_v57, %v10452_v16  ;;  %v2782_v63 = vadd.f32 0.041655596, %v2781_v20  ;;  %vm2808_vm6 = vcmp.lt.s32.totalorder %v10226_v44, 0  ;;  %v2416_v1 = vld [vmem:[#allocation9 + $0xbf0] sm:$0xff] }
 0x40f   :  { %v2923_v46 = vor.u32 4788187, %v2922_v25  ;;  %v2926_v36 = vcvt.s32.f32 %v2919_v5  ;;  %3134 = vmatpush.msra.mxu0 %v2308_v54  ;;  %3154 = vmatpush.msra.mxu1 %v2340_v14  ;;  %v2637_v23 = vadd.f32 -0.16666654, %v2636_v30  ;;  %vm10496_vm8 = vcmp.le.f32.partialorder %v2806_v0, 0.7853982 }
 0x410   :  { %v3057_v42 = vsel %vm3055_vm2, %v3056_v24, %v3052_v52  ;;  %v2336_v5 = vld [vmem:[#allocation9 + $0x970] sm:$0xff]  ;;  %v2629_v25 = vmul.f32 %v2628_v49, %v10430_v7  ;;  %v2791_v48 = vadd.f32 -0.16666654, %v2790_v45  ;;  %v2783_v0 = vmul.f32 %v2782_v63, %v10452_v16  ;;  %3188 = vmatpush.msra.mxu3 %v2416_v1  ;;  %v2382_v30 = vld [vmem:[#allocation9 + $0xae0] sm:$0xff] }
 0x411   :  { %v2924_v39 = vand.u32 2147483647, %v2923_v46  ;;  %v3058_v34 = vadd.s32 %v3057_v42, %v3053_v9  ;;  %3135 = vmatpush.msra.mxu0 %v2306_v41  ;;  %3155 = vmatpush.msra.mxu1 %v2338_v21  ;;  %v2302_v46 = vld [vmem:[#allocation9 + $0x860] sm:$0xff]  ;;  %v2384_v52 = vld [vmem:[#allocation9 + $0xaf0] sm:$0xff]  ;;  %v2622_v2 = vsub.s32 4, %v10208_v19  ;;  %v2638_v20 = vmul.f32 %v2637_v23, %v10430_v7 }
 0x412   :  { %v2776_v57 = vsub.s32 4, %v10250_v40  ;;  %3168 = vmatpush.msra.mxu2 %v2384_v52  ;;  %v2332_v24 = vld [vmem:[#allocation9 + $0x950] sm:$0xff]  ;;  %v2630_v26 = vadd.f32 -0.4999988, %v2629_v25  ;;  %v2792_v50 = vmul.f32 %v2791_v48, %v10452_v16  ;;  %v2784_v42 = vadd.f32 -0.4999988, %v2783_v0 }
 0x413   :  { %v2927_v37 = vmul.f32 %v2926_v36, %v2924_v39  ;;  %v3059_v12 = vadd.s32 536870912, %v3058_v34  ;;  %3136 = vmatpush.msra.mxu0 %v2304_v28  ;;  %3156 = vmatpush.msra.mxu1 %v2336_v5  ;;  %v2300_v36 = vld [vmem:[#allocation9 + $0x850] sm:$0xff]  ;;  %v2298_v14 = vld [vmem:[#allocation9 + $0x840] sm:$0xff]  ;;  %v2623_v49 = vsel %vm2500_vm15, %v2622_v2, %v10208_v19  ;;  %v2639_v41 = vadd.f32 1.0, %v2638_v20 }
 0x414   :  { %3169 = vmatpush.msra.mxu2 %v2382_v30  ;;  %v2380_v63 = vld [vmem:[#allocation9 + $0xad0] sm:$0xff]  ;;  %v2777_v21 = vsel %vm2654_vm3, %v2776_v57, %v10250_v40  ;;  %v2378_v19 = vld [vmem:[#allocation9 + $0xac0] sm:$0xff]  ;;  %v2631_v28 = vmul.f32 %v2630_v26, %v10430_v7  ;;  %v2793_v5 = vadd.f32 1.0, %v2792_v50  ;;  %v2625_v40 = vsel %vm10384_vm4, 0, %v2623_v49 }
 0x415   :  { %v2928_v43 = vxor.u32 2147483648, %v2927_v37  ;;  %v10508_v35 = vshrl.u32 %v3059_v12, 30  ;;  %3137 = vmatpush.msra.mxu0 %v2302_v46  ;;  %3157 = vmatpush.msra.mxu1 %v2334_v8  ;;  %v2296_v23 = vld [vmem:[#allocation9 + $0x830] sm:$0xff]  ;;  %v2410_v48 = vld [vmem:[#allocation9 + $0xbc0] sm:$0xff]  ;;  %v2779_v7 = vsel %vm10421_vm0, 0, %v2777_v21  ;;  %v2785_v2 = vmul.f32 %v2784_v42, %v10452_v16 }
 0x416   :  { %3170 = vmatpush.msra.mxu2 %v2380_v63  ;;  %v2294_v8 = vld [vmem:[#allocation9 + $0x820] sm:$0xff]  ;;  %v2408_v1 = vld [vmem:[#allocation9 + $0xbb0] sm:$0xff]  ;;  %v10543_v20 = vmul.f32 %v2639_v41, %v10392_v61  ;;  %v10545_v26 = vadd.f32 1.0, %v2631_v28  ;;  %v10547_v53 = vand.u32 3, %v2625_v40  ;;  %v10550_v16 = vmul.f32 %v2793_v5, %v10435_v15  ;;  %v2321_v15 = vld [vmem:[#allocation9 + $0x8f8] sm:$0xff] }
 0x417   :  { %v2929_v11 = vsel %vm2808_vm6, %v2928_v43, %v2927_v37  ;;  %v3061_v31 = vshll.u32 %v10508_v35, 30  ;;  %3138 = vmatpush.msra.mxu0 %v2300_v36  ;;  %3158 = vmatpush.msra.mxu1 %v2332_v24  ;;  %v2414_v37 = vld [vmem:[#allocation9 + $0xbe0] sm:$0xff]  ;;  %v2412_v43 = vld [vmem:[#allocation9 + $0xbd0] sm:$0xff]  ;;  %v3054_v41 = vadd.s32 %v10481_v10, %v10479_v38  ;;  %v2319_v28 = vld [vmem:[#allocation9 + $0x8e8] sm:$0xff]  ;;  %vm2641_vm9 = vweird.f32 %v10081_v62 }
 0x418   :  { %v10506_v3 = vsel %vm10496_vm8, %v10226_v44, %v2929_v11  ;;  %3189 = vmatpush.msra.mxu3 %v2414_v37  ;;  %v2328_v11 = vld [vmem:[#allocation9 + $0x930] sm:$0xff]  ;;  %3171 = vmatpush.msra.mxu2 %v2378_v19  ;;  %v2326_v52 = vld [vmem:[#allocation9 + $0x920] sm:$0xff]  ;;  %v2645_v63 = vxor.u32 2147483648, %v10543_v20  ;;  %v2351_v5 = vld [vmem:[#allocation9 + $0x9e8] sm:$0xff]  ;;  %vm2644_vm4 = vcmp.eq.s32.totalorder %v10547_v53, 0  ;;  %vm2643_vm3 = vcmp.lt.s32.totalorder %v10547_v53, 2 }
 0x419   :  { %v10513_v22 = vmul.f32 %v10506_v3, %v10506_v3  ;;  %v10521_v9 = vsub.s32 %v3058_v34, %v3061_v31  ;;  %3139 = vmatpush.msra.mxu0 %v2298_v14  ;;  %v2330_v34 = vld [vmem:[#allocation9 + $0x940] sm:$0xff]  ;;  %v2376_v31 = vld [vmem:[#allocation9 + $0xab0] sm:$0xff]  ;;  %v10554_v14 = vand.u32 3, %v2779_v7  ;;  %v2317_v7 = vld [vmem:[#allocation9 + $0x8d8] sm:$0xff]  ;;  %vm2647_vm0 = vcmp.eq.s32.totalorder %v10547_v53, 2 }
 0x41a   :  { %3159 = vmatpush.msra.mxu1 %v2330_v34  ;;  %3190 = vmatpush.msra.mxu3 %v2412_v43  ;;  %v2324_v36 = vld [vmem:[#allocation9 + $0x910] sm:$0xff]  ;;  %v2374_v24 = vld [vmem:[#allocation9 + $0xaa0] sm:$0xff]  ;;  %v2353_v34 = vld [vmem:[#allocation9 + $0x9f8] sm:$0xff]  ;;  %vm2795_vm12 = vweird.f32 %v10085_v4  ;;  %vm2962_vm13 = vcmp.lt.s32.totalorder %v10280_v59, 0  ;;  %vm10595_vm14 = vcmp.le.f32.partialorder %v2960_v55, 0.7853982 }
 0x41b   :  { %v2942_v39 = vmul.f32 -0.00019511016, %v10513_v22  ;;  %vm3063_vm10 = vcmp.lt.s32.totalorder %v10521_v9, 0  ;;  %v3064_v45 = vsub.s32 0, %v10521_v9  ;;  %v2935_v12 = vmul.f32 -0.001358992, %v10513_v22  ;;  %3140 = vmatpush.msra.mxu0 %v2296_v23  ;;  %3172 = vmatpush.msra.mxu2 %v2376_v31 }
 0x41c   :  { %3160 = vmatpush.msra.mxu1 %v2328_v11  ;;  %3191 = vmatpush.msra.mxu3 %v2410_v48  ;;  %v2406_v50 = vld [vmem:[#allocation9 + $0xba0] sm:$0xff]  ;;  %v2372_v42 = vld [vmem:[#allocation9 + $0xa90] sm:$0xff]  ;;  %v2799_v11 = vxor.u32 2147483648, %v10550_v16  ;;  %v2646_v31 = vsel %vm2644_vm4, %v10545_v26, %v2645_v63  ;;  %vm2798_vm11 = vcmp.eq.s32.totalorder %v10554_v14, 0  ;;  %vm2797_vm5 = vcmp.lt.s32.totalorder %v10554_v14, 2  ;;  %v2303_v55 = vld [vmem:[#allocation9 + $0x868] sm:$0xff] }
 0x41d   :  { %v2943_v54 = vadd.f32 0.008332121, %v2942_v39  ;;  %v3065_v25 = vsel %vm3063_vm10, %v3064_v45, %v10521_v9  ;;  %3141 = vmatpush.msra.mxu0 %v2294_v8  ;;  %v2936_v18 = vadd.f32 0.041655596, %v2935_v12  ;;  %v2292_v39 = vld [vmem:[#allocation9 + $0x810] sm:$0xff]  ;;  %3173 = vmatpush.msra.mxu2 %v2374_v24  ;;  %v2290_v61 = vld [vmem:[#allocation9 + $0x800] sm:$0xff]  ;;  %vm2949_vm10 = vweird.f32 %v10226_v44 }
 0x41e   :  { %v3066_v46 = vclz %v3065_v25  ;;  %3161 = vmatpush.msra.mxu1 %v2326_v52  ;;  %3192 = vmatpush.msra.mxu3 %v2408_v1  ;;  %v2322_v37 = vld [vmem:[#allocation9 + $0x900] sm:$0xff]  ;;  %v2404_v45 = vld [vmem:[#allocation9 + $0xb90] sm:$0xff]  ;;  %v2648_v25 = vxor.u32 2147483648, %v10545_v26  ;;  %v2315_v24 = vld [vmem:[#allocation9 + $0x8c8] sm:$0xff]  ;;  %vm2801_vm7 = vcmp.eq.s32.totalorder %v10554_v14, 2 }
 0x41f   :  { %v2944_v0 = vmul.f32 %v2943_v54, %v10513_v22  ;;  %3142 = vmatpush.msra.mxu0 %v2292_v39  ;;  %v10552_v54 = vadd.f32 1.0, %v2785_v2  ;;  %v2937_v43 = vmul.f32 %v2936_v18, %v10513_v22  ;;  %3174 = vmatpush.msra.mxu2 %v2372_v42  ;;  %v2370_v12 = vld [vmem:[#allocation9 + $0xa80] sm:$0xff]  ;;  %v2368_v38 = vld [vmem:[#allocation9 + $0xa70] sm:$0xff]  ;;  %v2349_v2 = vld [vmem:[#allocation9 + $0x9d8] sm:$0xff] }
 0x420   :  { %v8420_v57 = vadd.s32 4294967294, %v3066_v46  ;;  %3162 = vmatpush.msra.mxu1 %v2324_v36  ;;  %3193 = vmatpush.msra.mxu3 %v2406_v50  ;;  %v2402_v23 = vld [vmem:[#allocation9 + $0xb80] sm:$0xff]  ;;  %v2400_v10 = vld [vmem:[#allocation9 + $0xb70] sm:$0xff]  ;;  %v2930_v46 = vsub.s32 4, %v10406_v32  ;;  %v2347_v50 = vld [vmem:[#allocation9 + $0x9c8] sm:$0xff]  ;;  %v2649_v26 = vsel %vm2647_vm0, %v2648_v25, %v10543_v20 }
 0x421   :  { %v2945_v30 = vadd.f32 -0.16666654, %v2944_v0  ;;  %3143 = vmatpush.msra.mxu0 %v2290_v61  ;;  %3175 = vmatpush.msra.mxu2 %v2370_v12  ;;  %v2802_v0 = vxor.u32 2147483648, %v10552_v54  ;;  %v2938_v1 = vadd.f32 -0.4999988, %v2937_v43  ;;  %v2366_v18 = vld [vmem:[#allocation9 + $0xa60] sm:$0xff] }
 0x422   :  { %vm8421_vm15 = vcmp.lt.s32.totalorder %v8420_v57, 0  ;;  %3163 = vmatpush.msra.mxu1 %v2322_v37  ;;  %3194 = vmatpush.msra.mxu3 %v2404_v45  ;;  %v2396_v37 = vld [vmem:[#allocation9 + $0xb50] sm:$0xff]  ;;  %v2313_v42 = vld [vmem:[#allocation9 + $0x8b8] sm:$0xff]  ;;  %v2931_v45 = vsel %vm2808_vm6, %v2930_v46, %v10406_v32  ;;  %v2394_v43 = vld [vmem:[#allocation9 + $0xb40] sm:$0xff] }
 0x423   :  { %v3069_v49 = vsel %vm8421_vm15, 0, %v8420_v57  ;;  %3208 = vmatpush.msrb.mxu0 %v2321_v15  ;;  %v2946_v48 = vmul.f32 %v2945_v30, %v10513_v22  ;;  %3176 = vmatpush.msra.mxu2 %v2368_v38  ;;  %v2398_v57 = vld [vmem:[#allocation9 + $0xb60] sm:$0xff]  ;;  %v2364_v30 = vld [vmem:[#allocation9 + $0xa50] sm:$0xff]  ;;  %v2345_v20 = vld [vmem:[#allocation9 + $0x9b8] sm:$0xff]  ;;  %v2939_v63 = vmul.f32 %v2938_v1, %v10513_v22 }
 0x424   :  { %v3070_v21 = vsub.s32 32, %v3069_v49  ;;  %v3074_v19 = vsub.s32 4294967266, %v3069_v49  ;;  %3228 = vmatpush.msrb.mxu1 %v2353_v34  ;;  %v3071_v8 = vshll.u32 %v10521_v9, %v3069_v49  ;;  %3195 = vmatpush.msra.mxu3 %v2402_v23  ;;  %v2800_v9 = vsel %vm2798_vm11, %v10552_v54, %v2799_v11  ;;  %v2362_v34 = vld [vmem:[#allocation9 + $0xa40] sm:$0xff]  ;;  %v2360_v32 = vld [vmem:[#allocation9 + $0xa30] sm:$0xff]  ;;  %v2337_v1 = vld [vmem:[#allocation9 + $0x978] sm:$0xff] }
 0x425   :  { %3209 = vmatpush.msrb.mxu0 %v2319_v28  ;;  %v2947_v61 = vadd.f32 1.0, %v2946_v48  ;;  %3177 = vmatpush.msra.mxu2 %v2366_v18  ;;  %v2650_v54 = vsel %vm2643_vm3, %v2646_v31, %v2649_v26  ;;  %v2803_v49 = vsel %vm2801_vm7, %v2802_v0, %v10550_v16  ;;  %v2933_v23 = vsel %vm10496_vm8, 0, %v2931_v45  ;;  %v2392_v11 = vld [vmem:[#allocation9 + $0xb30] sm:$0xff]  ;;  %v2358_v25 = vld [vmem:[#allocation9 + $0xa20] sm:$0xff]  ;;  %v2333_v45 = vld [vmem:[#allocation9 + $0x958] sm:$0xff] }
 0x426   :  { %v3072_v40 = vshrl.u32 %v3054_v41, %v3070_v21  ;;  %v3075_v52 = vadd.s32 127, %v3074_v19  ;;  %3229 = vmatpush.msrb.mxu1 %v2351_v5  ;;  %3196 = vmatpush.msra.mxu3 %v2400_v10  ;;  %v2804_v14 = vsel %vm2797_vm5, %v2800_v9, %v2803_v49  ;;  %v2311_v41 = vld [vmem:[#allocation9 + $0x8a8] sm:$0xff]  ;;  %v2651_v12 = vsel %vm2641_vm9, nan, %v2650_v54  ;;  %v2309_v19 = vld [vmem:[#allocation9 + $0x898] sm:$0xff]  ;;  %v2390_v4 = vld [vmem:[#allocation9 + $0xb20] sm:$0xff] }
 0x427   :  { %3210 = vmatpush.msrb.mxu0 %v2317_v7  ;;  %3178 = vmatpush.msra.mxu2 %v2364_v30  ;;  %v2343_v21 = vld [vmem:[#allocation9 + $0x9a8] sm:$0xff]  ;;  %v10589_v22 = vmul.f32 %v2947_v61, %v10506_v3  ;;  %v2805_v62 = vsel %vm2795_vm12, nan, %v2804_v14  ;;  %v2341_v5 = vld [vmem:[#allocation9 + $0x998] sm:$0xff]  ;;  %v2940_v48 = vadd.f32 1.0, %v2939_v63  ;;  %v2950_v29 = vand.u32 3, %v2933_v23  ;;  %v2356_v10 = vld [vmem:[#allocation9 + $0xa10] sm:$0xff] }
 0x428   :  { %v3073_v39 = vor.u32 %v3072_v40, %v3071_v8  ;;  %v3076_v36 = vshll.u32 %v3075_v52, 23  ;;  %3230 = vmatpush.msrb.mxu1 %v2349_v2  ;;  %3197 = vmatpush.msra.mxu3 %v2398_v57  ;;  %v2307_v40 = vld [vmem:[#allocation9 + $0x888] sm:$0xff]  ;;  %v3114_v0 = vmul.f32 %v2651_v12, %v2651_v12  ;;  %v2388_v8 = vld [vmem:[#allocation9 + $0xb10] sm:$0xff]  ;;  %v2305_v52 = vld [vmem:[#allocation9 + $0x878] sm:$0xff]  ;;  %v3115_v7 = vmul.f32 %v2805_v62, %v2805_v62 }
 0x429   :  { %3211 = vmatpush.msrb.mxu0 %v2315_v24  ;;  %3179 = vmatpush.msra.mxu2 %v2362_v34  ;;  %v2339_v3 = vld [vmem:[#allocation9 + $0x988] sm:$0xff]  ;;  %v2953_v46 = vxor.u32 2147483648, %v10589_v22  ;;  %v2354_v18 = vld [vmem:[#allocation9 + $0xa00] sm:$0xff]  ;;  %v2956_v57 = vxor.u32 2147483648, %v2940_v48  ;;  %vm2952_vm2 = vcmp.eq.s32.totalorder %v2950_v29, 0  ;;  %vm2955_vm6 = vcmp.eq.s32.totalorder %v2950_v29, 2 }
 0x42a   :  { %v3077_v15 = vor.u32 4788187, %v3076_v36  ;;  %3231 = vmatpush.msrb.mxu1 %v2347_v50  ;;  %v3080_v16 = vcvt.s32.f32 %v3073_v39  ;;  %3198 = vmatpush.msra.mxu3 %v2396_v37  ;;  %v2386_v39 = vld [vmem:[#allocation9 + $0xb00] sm:$0xff]  ;;  %v2335_v24 = vld [vmem:[#allocation9 + $0x968] sm:$0xff]  ;;  %v2385_v50 = vld [vmem:[#allocation9 + $0xaf8] sm:$0xff]  ;;  %v3118_v30 = vsub.f32 1.0, %v3114_v0  ;;  %vm3103_vm11 = vweird.f32 %v10280_v59 }
 0x42b   :  { %3212 = vmatpush.msrb.mxu0 %v2313_v42  ;;  %3180 = vmatpush.msra.mxu2 %v2360_v32  ;;  %v2954_v26 = vsel %vm2952_vm2, %v2940_v48, %v2953_v46  ;;  %v2417_v61 = vld [vmem:[#allocation9 + $0xbf8] sm:$0xff]  ;;  %v3119_v42 = vsub.f32 1.0, %v3115_v7  ;;  %vm2951_vm8 = vcmp.lt.s32.totalorder %v2950_v29, 2  ;;  %v3084_v34 = vsub.s32 4, %v10508_v35  ;;  %v2415_v14 = vld [vmem:[#allocation9 + $0xbe8] sm:$0xff] }
 0x42c   :  { %v3078_v53 = vand.u32 2147483647, %v3077_v15  ;;  %3232 = vmatpush.msrb.mxu1 %v2345_v20  ;;  %3199 = vmatpush.msra.mxu3 %v2394_v43  ;;  %v2301_v37 = vld [vmem:[#allocation9 + $0x858] sm:$0xff]  ;;  %v2383_v15 = vld [vmem:[#allocation9 + $0xae8] sm:$0xff]  ;;  %v2957_v20 = vsel %vm2955_vm6, %v2956_v57, %v10589_v22  ;;  %v10610_v32 = vadd.f32 %v3118_v30, %v3114_v0 }
 0x42d   :  { %3213 = vmatpush.msrb.mxu0 %v2311_v41  ;;  %3181 = vmatpush.msra.mxu2 %v2358_v25  ;;  %v2299_v63 = vld [vmem:[#allocation9 + $0x848] sm:$0xff]  ;;  %v2958_v43 = vsel %vm2951_vm8, %v2954_v26, %v2957_v20  ;;  %v2413_v12 = vld [vmem:[#allocation9 + $0xbd8] sm:$0xff]  ;;  %v10612_v23 = vadd.f32 %v3119_v42, %v3115_v7  ;;  %v3296_v42 = vld [vmem:[#allocation8 + $0x160] sm:$0xff] }
 0x42e   :  { %v3081_v28 = vmul.f32 %v3080_v16, %v3078_v53  ;;  %3233 = vmatpush.msrb.mxu1 %v2343_v21  ;;  %3200 = vmatpush.msra.mxu3 %v2392_v11  ;;  %v2331_v16 = vld [vmem:[#allocation9 + $0x948] sm:$0xff]  ;;  %v2381_v21 = vld [vmem:[#allocation9 + $0xad8] sm:$0xff]  ;;  %v2959_v62 = vsel %vm2949_vm10, nan, %v2958_v43  ;;  %v3292_v20 = vld [vmem:[#allocation8 + $0x60] sm:$0xff] }
 0x42f   :  { %3214 = vmatpush.msrb.mxu0 %v2309_v19  ;;  %3182 = vmatpush.msra.mxu2 %v2356_v10  ;;  %v2297_v19 = vld [vmem:[#allocation9 + $0x838] sm:$0xff]  ;;  %v2379_v25 = vld [vmem:[#allocation9 + $0xac8] sm:$0xff]  ;;  %v3116_v7 = vmul.f32 %v2959_v62, %v2959_v62 }
 0x430   :  { %v3082_v38 = vxor.u32 2147483648, %v3081_v28  ;;  %3234 = vmatpush.msrb.mxu1 %v2341_v5  ;;  %3201 = vmatpush.msra.mxu3 %v2390_v4  ;;  %v2329_v5 = vld [vmem:[#allocation9 + $0x938] sm:$0xff]  ;;  %v2411_v44 = vld [vmem:[#allocation9 + $0xbc8] sm:$0xff] }
 0x431   :  { %3215 = vmatpush.msrb.mxu0 %v2307_v40  ;;  %3183 = vmatpush.msra.mxu2 %v2354_v18  ;;  %v2295_v40 = vld [vmem:[#allocation9 + $0x828] sm:$0xff]  ;;  %v2409_v0 = vld [vmem:[#allocation9 + $0xbb8] sm:$0xff]  ;;  %v3120_v26 = vsub.f32 1.0, %v3116_v7 }
 0x432   :  { %v3083_v31 = vsel %vm2962_vm13, %v3082_v38, %v3081_v28  ;;  %3235 = vmatpush.msrb.mxu1 %v2339_v3  ;;  %3202 = vmatpush.msra.mxu3 %v2388_v8  ;;  %v3085_v28 = vsel %vm2962_vm13, %v3084_v34, %v10508_v35  ;;  %v2327_v29 = vld [vmem:[#allocation9 + $0x928] sm:$0xff]  ;;  %v2377_v38 = vld [vmem:[#allocation9 + $0xab8] sm:$0xff] }
 0x433   :  { %v10604_v9 = vsel %vm10595_vm14, %v10280_v59, %v3083_v31  ;;  %3216 = vmatpush.msrb.mxu0 %v2305_v52  ;;  %3248 = vmatpush.msrb.mxu2 %v2385_v50  ;;  %v3087_v3 = vsel %vm10595_vm14, 0, %v3085_v28  ;;  %v2293_v46 = vld [vmem:[#allocation9 + $0x818] sm:$0xff]  ;;  %v2375_v52 = vld [vmem:[#allocation9 + $0xaa8] sm:$0xff]  ;;  %v3124_v43 = vadd.f32 %v3120_v26, %v3116_v7 }
 0x434   :  { %v3088_v36 = vmul.f32 %v10604_v9, %v10604_v9  ;;  %3236 = vmatpush.msrb.mxu1 %v2337_v1  ;;  %3203 = vmatpush.msra.mxu3 %v2386_v39  ;;  %v2325_v8 = vld [vmem:[#allocation9 + $0x918] sm:$0xff]  ;;  %v2407_v18 = vld [vmem:[#allocation9 + $0xba8] sm:$0xff]  ;;  %v3104_v39 = vand.u32 3, %v3087_v3 }
 0x435   :  { %3217 = vmatpush.msrb.mxu0 %v2303_v55  ;;  %3249 = vmatpush.msrb.mxu2 %v2383_v15  ;;  %v2291_v57 = vld [vmem:[#allocation9 + $0x808] sm:$0xff]  ;;  %v2373_v55 = vld [vmem:[#allocation9 + $0xa98] sm:$0xff] }
 0x436   :  { %v3089_v54 = vmul.f32 -0.001358992, %v3088_v36  ;;  %v3096_v49 = vmul.f32 -0.00019511016, %v3088_v36  ;;  %3237 = vmatpush.msrb.mxu1 %v2335_v24  ;;  %3268 = vmatpush.msrb.mxu3 %v2417_v61  ;;  %v2323_v2 = vld [vmem:[#allocation9 + $0x908] sm:$0xff]  ;;  %v2405_v50 = vld [vmem:[#allocation9 + $0xb98] sm:$0xff] }
 0x437   :  { %3218 = vmatpush.msrb.mxu0 %v2301_v37  ;;  %3250 = vmatpush.msrb.mxu2 %v2381_v21  ;;  %v2371_v30 = vld [vmem:[#allocation9 + $0xa88] sm:$0xff]  ;;  %vm3106_vm15 = vcmp.eq.s32.totalorder %v3104_v39, 0  ;;  %vm3109_vm4 = vcmp.eq.s32.totalorder %v3104_v39, 2  ;;  %vm3105_vm3 = vcmp.lt.s32.totalorder %v3104_v39, 2  ;;  %v2401_v15 = vld [vmem:[#allocation9 + $0xb78] sm:$0xff] }
 0x438   :  { %v3090_v41 = vadd.f32 0.041655596, %v3089_v54  ;;  %v3097_v53 = vadd.f32 0.008332121, %v3096_v49  ;;  %3238 = vmatpush.msrb.mxu1 %v2333_v45  ;;  %3269 = vmatpush.msrb.mxu3 %v2415_v14  ;;  %v2403_v37 = vld [vmem:[#allocation9 + $0xb88] sm:$0xff]  ;;  %v2369_v54 = vld [vmem:[#allocation9 + $0xa78] sm:$0xff] }
 0x439   :  { %3219 = vmatpush.msrb.mxu0 %v2299_v63  ;;  %3164 = vmatmul.f32.vlgmr.msra.gmra.mxu1 %v10612_v23  ;;  %v2367_v14 = vld [vmem:[#allocation9 + $0xa68] sm:$0xff] }
 0x43a   :  { %v3091_v22 = vmul.f32 %v3090_v41, %v3088_v36  ;;  %v3098_v11 = vmul.f32 %v3097_v53, %v3088_v36  ;;  %3239 = vmatpush.msrb.mxu1 %v2331_v16  ;;  %3270 = vmatpush.msrb.mxu3 %v2413_v12  ;;  %v3293_v63 = vld [vmem:[#allocation8 + $0x68] sm:$0xff]  ;;  %v2365_v16 = vld [vmem:[#allocation9 + $0xa58] sm:$0xff] }
 0x43b   :  { %3144 = vmatmul.f32.vlgmr.msra.gmra.mxu0 %v10610_v32  ;;  %3251 = vmatpush.msrb.mxu2 %v2379_v25  ;;  %v2399_v53 = vld [vmem:[#allocation9 + $0xb68] sm:$0xff]  ;;  %v2389_v25 = vld [vmem:[#allocation9 + $0xb18] sm:$0xff] }
 0x43c   :  { %v3092_v48 = vadd.f32 -0.4999988, %v3091_v22  ;;  %v3099_v4 = vadd.f32 -0.16666654, %v3098_v11  ;;  %3220 = vmatpush.msrb.mxu0 %v2297_v19  ;;  %3240 = vmatpush.msrb.mxu1 %v2329_v5  ;;  %v2363_v12 = vld [vmem:[#allocation9 + $0xa48] sm:$0xff]  ;;  %v2361_v11 = vld [vmem:[#allocation9 + $0xa38] sm:$0xff] }
 0x43d   :  { %3271 = vmatpush.msrb.mxu3 %v2411_v44  ;;  %3252 = vmatpush.msrb.mxu2 %v2377_v38  ;;  %v2393_v19 = vld [vmem:[#allocation9 + $0xb38] sm:$0xff]  ;;  %v2359_v62 = vld [vmem:[#allocation9 + $0xa28] sm:$0xff]  ;;  %v3298_v44 = vld [vmem:[#allocation8 + $0x170] sm:$0xff] }
 0x43e   :  { %v3093_v35 = vmul.f32 %v3092_v48, %v3088_v36  ;;  %v3100_v10 = vmul.f32 %v3099_v4, %v3088_v36  ;;  %3221 = vmatpush.msrb.mxu0 %v2295_v40  ;;  %3241 = vmatpush.msrb.mxu1 %v2327_v29  ;;  %v2391_v28 = vld [vmem:[#allocation9 + $0xb28] sm:$0xff]  ;;  %v2357_v5 = vld [vmem:[#allocation9 + $0xa18] sm:$0xff]  ;;  %v3294_v29 = vld [vmem:[#allocation8 + $0x70] sm:$0xff] }
 0x43f   :  { %3272 = vmatpush.msrb.mxu3 %v2409_v0  ;;  %3253 = vmatpush.msrb.mxu2 %v2375_v52  ;;  %v2355_v48 = vld [vmem:[#allocation9 + $0xa08] sm:$0xff]  ;;  %v3299_v40 = vld [vmem:[#allocation8 + $0x178] sm:$0xff] }
 0x440   :  { %v3094_v31 = vadd.f32 1.0, %v3093_v35  ;;  %v3101_v1 = vadd.f32 1.0, %v3100_v10  ;;  %3222 = vmatpush.msrb.mxu0 %v2293_v46  ;;  %3242 = vmatpush.msrb.mxu1 %v2325_v8  ;;  %v2387_v4 = vld [vmem:[#allocation9 + $0xb08] sm:$0xff]  ;;  %v3295_v38 = vld [vmem:[#allocation8 + $0x78] sm:$0xff] }
 0x441   :  { %3273 = vmatpush.msrb.mxu3 %v2407_v18  ;;  %3254 = vmatpush.msrb.mxu2 %v2373_v55 }
 0x442   :  { %v3102_v36 = vmul.f32 %v3101_v1, %v10604_v9  ;;  %v3110_v24 = vxor.u32 2147483648, %v3094_v31  ;;  %3223 = vmatpush.msrb.mxu0 %v2291_v57  ;;  %3243 = vmatpush.msrb.mxu1 %v2323_v2  ;;  %v3297_v9 = vld [vmem:[#allocation8 + $0x168] sm:$0xff] }
 0x443   :  { %3274 = vmatpush.msrb.mxu3 %v2405_v50  ;;  %3224 = vmatmul.f32.vlgmr.msrb.gmra.mxu0 %v10610_v32  ;;  %v2397_v32 = vld [vmem:[#allocation9 + $0xb58] sm:$0xff] }
 0x444   :  { %v3107_v61 = vxor.u32 2147483648, %v3102_v36  ;;  %v3111_v45 = vsel %vm3109_vm4, %v3110_v24, %v3102_v36  ;;  %3244 = vmatmul.f32.vlgmr.msrb.gmra.mxu1 %v10612_v23  ;;  %3255 = vmatpush.msrb.mxu2 %v2371_v30  ;;  %v2395_v23 = vld [vmem:[#allocation9 + $0xb48] sm:$0xff] }
 0x445   :  { %3275 = vmatpush.msrb.mxu3 %v2403_v37  ;;  %3442 = vmatpush.msra.mxu0 %v3296_v42 }
 0x446   :  { %v3108_v49 = vsel %vm3106_vm15, %v3094_v31, %v3107_v61  ;;  %3256 = vmatpush.msrb.mxu2 %v2369_v54  ;;  %3462 = vmatpush.msra.mxu1 %v3297_v9 }
 0x447   :  { %v3112_v34 = vsel %vm3105_vm3, %v3108_v49, %v3111_v45  ;;  %3276 = vmatpush.msrb.mxu3 %v2401_v15  ;;  %3443 = vmatpush.msra.mxu0 %v3292_v20 }
 0x448   :  { %v3113_v41 = vsel %vm3103_vm11, nan, %v3112_v34  ;;  %3257 = vmatpush.msrb.mxu2 %v2367_v14  ;;  %3463 = vmatpush.msra.mxu1 %v3293_v63 }
 0x449   :  { %v3117_v21 = vmul.f32 %v3113_v41, %v3113_v41  ;;  %3277 = vmatpush.msrb.mxu3 %v2399_v53  ;;  %3184 = vmatmul.f32.vlgmr.msra.gmra.mxu2 %v3124_v43 }
 0x44a   :  { %3258 = vmatpush.msrb.mxu2 %v2365_v16 }
 0x44b   :  { %v3121_v59 = vsub.f32 1.0, %v3117_v21  ;;  %3278 = vmatpush.msrb.mxu3 %v2397_v32  ;;  %8422 = vmatmul.msk.f32.vlgmr.msra.gmra.mxu0 %vm394_vm1, %v8933_v27 }
 0x44c   :  { %8423 = vmatmul.msk.f32.vlgmr.msra.gmra.mxu1 %vm394_vm1, %v8933_v27  ;;  %3259 = vmatpush.msrb.mxu2 %v2363_v12 }
 0x44d   :  { %v3125_v22 = vadd.f32 %v3121_v59, %v3117_v21  ;;  %3279 = vmatpush.msrb.mxu3 %v2395_v23 }
 0x44e   :  { %3260 = vmatpush.msrb.mxu2 %v2361_v11 }
 0x44f   :  { %3204 = vmatmul.f32.vlgmr.msra.gmra.mxu3 %v3125_v22 }
 0x450   :  { %3280 = vmatpush.msrb.mxu3 %v2393_v19  ;;  %3261 = vmatpush.msrb.mxu2 %v2359_v62 }
 0x452   :  { %3281 = vmatpush.msrb.mxu3 %v2391_v28  ;;  %3262 = vmatpush.msrb.mxu2 %v2357_v5 }
 0x454   :  { %3282 = vmatpush.msrb.mxu3 %v2389_v25  ;;  %3263 = vmatpush.msrb.mxu2 %v2355_v48 }
 0x455   :  { %3264 = vmatmul.f32.vlgmr.msrb.gmra.mxu2 %v3124_v43 }
 0x456   :  { %3283 = vmatpush.msrb.mxu3 %v2387_v4  ;;  %3482 = vmatpush.msra.mxu2 %v3298_v44 }
 0x457   :  { %3284 = vmatmul.f32.vlgmr.msrb.gmra.mxu3 %v3125_v22 }
 0x458   :  { %3502 = vmatpush.msra.mxu3 %v3299_v40  ;;  %3483 = vmatpush.msra.mxu2 %v3294_v29 }
 0x45a   :  { %3503 = vmatpush.msra.mxu3 %v3295_v38 }
 0x45d   :  { %8424 = vmatmul.msk.f32.vlgmr.msra.gmra.mxu2 %vm394_vm1, %v8933_v27 }
 0x45f   :  { %8425 = vmatmul.msk.f32.vlgmr.msra.gmra.mxu3 %vm394_vm1, %v8933_v27 }
 0x4b6   :  { %v3165_v35 = vpop.f32.mrf.mxu1 }
 0x4b8   :  { %v3145_v3 = vpop.f32.mrf.mxu0 }
 0x4b9   :  { %v3166_v10 = vadd.f32 %v3165_v35, %v3145_v3 }
 0x4c0   :  { %v3225_v0 = vpop.f32.mrf.mxu0 }
 0x4c1   :  { %v3245_v46 = vpop.f32.mrf.mxu1 }
 0x4c2   :  { %v10634_v8 = vadd.f32 %v3245_v46, %v3225_v0 }
 0x4c8   :  { %v10636_v52 = vpop.f32.mrf.mxu0 }
 0x4c9   :  { %v3508_v7 = vand.u32 2147483647, %v10636_v52  ;;  %v3511_v31 = vand.u32 2139095040, %v10636_v52  ;;  %v10640_v1 = vpop.f32.mrf.mxu1 }
 0x4ca   :  { %v3662_v18 = vand.u32 2147483647, %v10640_v1  ;;  %v3665_v57 = vand.u32 2139095040, %v10640_v1 }
 0x4cb   :  { %v3512_v39 = vshrl.u32 %v3511_v31, 23  ;;  %v3515_v2 = vand.u32 8388607, %v3508_v7 }
 0x4cc   :  { %v3666_v55 = vshrl.u32 %v3665_v57, 23  ;;  %v3669_v50 = vand.u32 8388607, %v3662_v18  ;;  %v3185_v30 = vpop.f32.mrf.mxu2 }
 0x4cd   :  { %v8426_v36 = vadd.s32 4294967169, %v3512_v39  ;;  %v3516_v24 = vor.u32 8388608, %v3515_v2  ;;  %v3186_v61 = vadd.f32 %v3185_v30, %v3166_v10 }
 0x4ce   :  { %v8429_v26 = vadd.s32 4294967169, %v3666_v55  ;;  %v3670_v9 = vor.u32 8388608, %v3669_v50 }
 0x4cf   :  { %v3518_v37 = vadd.s32 1, %v8426_v36  ;;  %v10648_v54 = vshll.u32 %v3516_v24, 8 }
 0x4d0   :  { %v3672_v42 = vadd.s32 1, %v8429_v26  ;;  %v10655_v41 = vshll.u32 %v3670_v9, 8 }
 0x4d1   :  { %vm3519_vm0 = vcmp.gt.s32.totalorder %v3518_v37, 0  ;;  %v3557_v63 = vand.u32 65535, %v10648_v54  ;;  %v3558_v32 = vshrl.u32 %v10648_v54, 16 }
 0x4d2   :  { %v3520_v49 = vsel %vm3519_vm0, %v3518_v37, 0  ;;  %vm3673_vm5 = vcmp.gt.s32.totalorder %v3672_v42, 0  ;;  %v3205_v45 = vpop.f32.mrf.mxu3 }
 0x4d3   :  { %v3522_v15 = vand.u32 31, %v3520_v49  ;;  %v3674_v20 = vsel %vm3673_vm5, %v3672_v42, 0  ;;  %v10650_v34 = vadd.f32 %v3205_v45, %v3186_v61  ;;  %v10657_v53 = vshrl.u32 %v3520_v49, 5 }
 0x4d4   :  { %v10653_v43 = vand.u32 31, %v3674_v20  ;;  %v10702_v9 = vshrl.u32 %v3674_v20, 5 }
 0x4d5   :  { %v3523_v14 = vsub.s32 32, %v3522_v15  ;;  %v3525_v16 = vshll.u32 %v8683_v56, %v3522_v15  ;;  %v3528_v21 = vshll.u32 %v13439_v58, %v3522_v15  ;;  %v3531_v23 = vshll.u32 %v13462_v47, %v3522_v15 }
 0x4d6   :  { %v3534_v11 = vshll.u32 %v13463_v33, %v3522_v15  ;;  %v3537_v62 = vshll.u32 %v13464_v60, %v3522_v15  ;;  %v10671_v4 = vsub.s32 32, %v10653_v43  ;;  %vm3540_vm7 = vcmp.lt.s32.totalorder %v10657_v53, 1 }
 0x4d7   :  { %v3526_v12 = vshrl.u32 %v13439_v58, %v3523_v14  ;;  %v3529_v59 = vshrl.u32 %v13462_v47, %v3523_v14  ;;  %v3532_v22 = vshrl.u32 %v13463_v33, %v3523_v14  ;;  %v3535_v19 = vshrl.u32 %v13464_v60, %v3523_v14 }
 0x4d8   :  { %v3538_v28 = vshrl.u32 %v13449_v51, %v3523_v14  ;;  %vm3541_vm9 = vcmp.lt.s32.totalorder %v10657_v53, 2  ;;  %v3524_v29 = vshrl.u32 %v8683_v56, %v3523_v14  ;;  %vm3543_vm12 = vcmp.lt.s32.totalorder %v10657_v53, 4 }
 0x4d9   :  { %v3527_v5 = vor.u32 %v3526_v12, %v3525_v16  ;;  %v3530_v25 = vor.u32 %v3529_v59, %v3528_v21  ;;  %v3533_v48 = vor.u32 %v3532_v22, %v3531_v23  ;;  %v3536_v44 = vor.u32 %v3535_v19, %v3534_v11 }
 0x4da   :  { %v3539_v40 = vor.u32 %v3538_v28, %v3537_v62  ;;  %vm3542_vm13 = vcmp.lt.s32.totalorder %v10657_v53, 3  ;;  %v3679_v0 = vshll.u32 %v8683_v56, %v10653_v43  ;;  %v3680_v39 = vshrl.u32 %v13439_v58, %v10671_v4 }
 0x4db   :  { %v3548_v38 = vsel %vm3540_vm7, %v3527_v5, %v3530_v25  ;;  %v3552_v3 = vsel %vm3540_vm7, %v3530_v25, %v3533_v48  ;;  %v3549_v35 = vsel %vm3543_vm12, %v3536_v44, 920167782  ;;  %v3545_v46 = vsel %vm3543_vm12, %v3533_v48, 2102212464 }
 0x4dc   :  { %v3553_v10 = vsel %vm3543_vm12, %v3539_v40, 1326507024  ;;  %v3550_v31 = vsel %vm3542_vm13, %v3533_v48, %v3549_v35  ;;  %v3682_v36 = vshll.u32 %v13439_v58, %v10653_v43  ;;  %v3683_v24 = vshrl.u32 %v13462_v47, %v10671_v4 }
 0x4dd   :  { %v3554_v57 = vsel %vm3542_vm13, %v3536_v44, %v3553_v10  ;;  %v3551_v2 = vsel %vm3541_vm9, %v3548_v38, %v3550_v31  ;;  %v3544_v37 = vsel %vm3540_vm7, %v3524_v29, %v3527_v5  ;;  %v3546_v42 = vsel %vm3542_vm13, %v3530_v25, %v3545_v46 }
 0x4de   :  { %v3555_v55 = vsel %vm3541_vm9, %v3552_v3, %v3554_v57  ;;  %v3581_v26 = vand.u32 65535, %v3551_v2  ;;  %v3582_v61 = vshrl.u32 %v3551_v2, 16  ;;  %v10704_v49 = vor.u32 %v3680_v39, %v3679_v0 }
 0x4df   :  { %v3559_v50 = vand.u32 65535, %v3555_v55  ;;  %v3560_v30 = vshrl.u32 %v3555_v55, 16  ;;  %v10706_v14 = vor.u32 %v3683_v24, %v3682_v36  ;;  %v3686_v16 = vshrl.u32 %v13463_v33, %v10671_v4 }
 0x4e0   :  { %v3584_v12 = vmul.u32 %v3582_v61, %v3557_v63  ;;  %v3585_v59 = vmul.u32 %v3581_v26, %v3558_v32  ;;  %v3685_v23 = vshll.u32 %v13462_v47, %v10653_v43  ;;  %v3583_v19 = vmul.u32 %v3581_v26, %v3557_v63 }
 0x4e1   :  { %v3562_v45 = vmul.u32 %v3560_v30, %v3557_v63  ;;  %v3563_v15 = vmul.u32 %v3559_v50, %v3558_v32  ;;  %v3561_v21 = vmul.u32 %v3559_v50, %v3557_v63  ;;  %v3564_v22 = vmul.u32 %v3560_v30, %v3558_v32 }
 0x4e2   :  { %v3586_v20 = vmul.u32 %v3582_v61, %v3558_v32  ;;  %v3587_v25 = vshll.u32 %v3584_v12, 16  ;;  %v3589_v44 = vshll.u32 %v3585_v59, 16  ;;  %v10712_v40 = vor.u32 %v3686_v16, %v3685_v23 }
 0x4e3   :  { %v3565_v11 = vshll.u32 %v3562_v45, 16  ;;  %v3566_v62 = vshrl.u32 %v3562_v45, 16  ;;  %v3567_v28 = vshll.u32 %v3563_v15, 16  ;;  %v3568_v5 = vshrl.u32 %v3563_v15, 16 }
 0x4e4   :  { %vm3591_vm2 = vc.u32 %v3583_v19, %v3587_v25  ;;  %v3593_v38 = vadd.s32 %v3587_v25, %v3583_v19  ;;  %v3689_v3 = vshrl.u32 %v13464_v60, %v10671_v4  ;;  %v3688_v32 = vshll.u32 %v13463_v33, %v10653_v43 }
 0x4e5   :  { %vm3569_vm14 = vc.u32 %v3561_v21, %v3565_v11  ;;  %v3571_v48 = vadd.s32 %v3565_v11, %v3561_v21  ;;  %v3592_v63 = vsel %vm3591_vm2, 1, %v8689_v13  ;;  %v3691_v46 = vshll.u32 %v13464_v60, %v10653_v43 }
 0x4e6   :  { %v3570_v29 = vsel %vm3569_vm14, 1, %v8689_v13  ;;  %v3594_v0 = vadd.s32 %v3592_v63, %v3586_v20  ;;  %vm3595_vm8 = vc.u32 %v3593_v38, %v3589_v44  ;;  %v3690_v39 = vor.u32 %v3689_v3, %v3688_v32 }
 0x4e7   :  { %v3572_v35 = vadd.s32 %v3570_v29, %v3564_v22  ;;  %vm3573_vm6 = vc.u32 %v3571_v48, %v3567_v28  ;;  %v3596_v57 = vsel %vm3595_vm8, 1, %v8689_v13  ;;  %v3692_v2 = vshrl.u32 %v13449_v51, %v10671_v4  ;;  %v3265_v48 = vpop.f32.mrf.mxu2 }
 0x4e8   :  { %v3574_v10 = vsel %vm3573_vm6, 1, %v8689_v13  ;;  %v3588_v55 = vshrl.u32 %v3584_v12, 16  ;;  %v3590_v36 = vshrl.u32 %v3585_v59, 16  ;;  %v10726_v24 = vadd.s32 %v3593_v38, %v3589_v44 }
 0x4e9   :  { %v3576_v31 = vadd.s32 %v3574_v10, %v3572_v35  ;;  %v3598_v50 = vadd.s32 %v3596_v57, %v3594_v0  ;;  %v3693_v26 = vor.u32 %v3692_v2, %v3691_v46  ;;  %vm3694_vm10 = vcmp.lt.s32.totalorder %v10702_v9, 1 }
 0x4ea   :  { %vm3697_vm15 = vcmp.lt.s32.totalorder %v10702_v9, 4  ;;  %vm3696_vm4 = vcmp.lt.s32.totalorder %v10702_v9, 3  ;;  %v3702_v43 = vsel %vm3694_vm10, %v10704_v49, %v10706_v14  ;;  %vm3695_vm3 = vcmp.lt.s32.totalorder %v10702_v9, 2 }
 0x4eb   :  { %v3577_v30 = vadd.s32 %v3576_v31, %v3566_v62  ;;  %v3599_v61 = vadd.s32 %v3598_v50, %v3588_v55  ;;  %v3703_v45 = vsel %vm3697_vm15, %v3690_v39, 920167782  ;;  %v3706_v21 = vsel %vm3694_vm10, %v10706_v14, %v10712_v40 }
 0x4ec   :  { %v3704_v16 = vsel %vm3696_vm4, %v10712_v40, %v3703_v45  ;;  %v3547_v12 = vsel %vm3541_vm9, %v3544_v37, %v3546_v42  ;;  %v3707_v22 = vsel %vm3697_vm15, %v3693_v26, 1326507024  ;;  %v3711_v19 = vand.u32 65535, %v10655_v41 }
 0x4ed   :  { %v10737_v15 = vadd.s32 %v3577_v30, %v3568_v5  ;;  %v3600_v59 = vadd.s32 %v3599_v61, %v3590_v36  ;;  %v3705_v23 = vsel %vm3695_vm3, %v3702_v43, %v3704_v16  ;;  %v3708_v11 = vsel %vm3696_vm4, %v3690_v39, %v3707_v22 }
 0x4ee   :  { %v3735_v20 = vand.u32 65535, %v3705_v23  ;;  %v3709_v53 = vsel %vm3695_vm3, %v3706_v21, %v3708_v11  ;;  %v3712_v37 = vshrl.u32 %v10655_v41, 16  ;;  %v3736_v42 = vshrl.u32 %v3705_v23, 16 }
 0x4ef   :  { %vm3603_vm11 = vc.u32 %v10737_v15, %v10726_v24  ;;  %v3604_v62 = vadd.s32 1, %v3600_v59  ;;  %v3601_v28 = vmul.u32 %v10648_v54, %v3547_v12  ;;  %v3713_v5 = vand.u32 65535, %v3709_v53 }
 0x4f0   :  { %v3714_v25 = vshrl.u32 %v3709_v53, 16  ;;  %v3738_v29 = vmul.u32 %v3736_v42, %v3711_v19  ;;  %v3739_v38 = vmul.u32 %v3735_v20, %v3712_v37  ;;  %v10764_v3 = vadd.f32 %v10650_v34, %v10221_v17 }
 0x4f1   :  { %v3605_v44 = vsel %vm3603_vm11, %v3604_v62, %v3600_v59  ;;  %v3717_v32 = vmul.u32 %v3713_v5, %v3712_v37  ;;  %v3737_v10 = vmul.u32 %v3735_v20, %v3711_v19  ;;  %v3740_v0 = vmul.u32 %v3736_v42, %v3712_v37  ;;  %v3285_v20 = vpop.f32.mrf.mxu3  ;;  %v10779_v62 = vpop.f32.mrf.mxu2 }
 0x4f2   :  { %v3606_v35 = vadd.s32 %v3605_v44, %v3601_v28  ;;  %v3716_v63 = vmul.u32 %v3714_v25, %v3711_v19  ;;  %v3741_v46 = vshll.u32 %v3738_v29, 16  ;;  %v3715_v57 = vmul.u32 %v3713_v5, %v3711_v19 }
 0x4f3   :  { %v3718_v39 = vmul.u32 %v3714_v25, %v3712_v37  ;;  %v3721_v2 = vshll.u32 %v3717_v32, 16  ;;  %v3743_v55 = vshll.u32 %v3739_v38, 16  ;;  %v3699_v43 = vsel %vm3697_vm15, %v10712_v40, 2102212464 }
 0x4f4   :  { %v3607_v31 = vadd.s32 536870912, %v3606_v35  ;;  %v3719_v54 = vshll.u32 %v3716_v63, 16  ;;  %vm3745_vm0 = vc.u32 %v3737_v10, %v3741_v46  ;;  %v3747_v36 = vadd.s32 %v3741_v46, %v3737_v10 }
 0x4f5   :  { %v3746_v17 = vsel %vm3745_vm0, 1, %v8689_v13  ;;  %v3678_v16 = vshrl.u32 %v8683_v56, %v10671_v4  ;;  %v3266_v59 = vadd.f32 %v3265_v48, %v10634_v8  ;;  %v3720_v22 = vshrl.u32 %v3716_v63, 16 }
 0x4f6   :  { %v10766_v50 = vshrl.u32 %v3607_v31, 30  ;;  %vm3723_vm5 = vc.u32 %v3715_v57, %v3719_v54  ;;  %v3725_v30 = vadd.s32 %v3719_v54, %v3715_v57  ;;  %v3748_v26 = vadd.s32 %v3746_v17, %v3740_v0 }
 0x4f7   :  { %v3724_v34 = vsel %vm3723_vm5, 1, %v8689_v13  ;;  %vm3749_vm7 = vc.u32 %v3747_v36, %v3743_v55  ;;  %v3698_v40 = vsel %vm3694_vm10, %v3678_v16, %v10704_v49  ;;  %v3700_v4 = vsel %vm3696_vm4, %v10706_v14, %v3699_v43 }
 0x4f8   :  { %v3609_v61 = vshll.u32 %v10766_v50, 30  ;;  %v3726_v45 = vadd.s32 %v3724_v34, %v3718_v39  ;;  %vm3727_vm9 = vc.u32 %v3725_v30, %v3721_v2  ;;  %v3750_v12 = vsel %vm3749_vm7, 1, %v8689_v13 }
 0x4f9   :  { %v3728_v21 = vsel %vm3727_vm9, 1, %v8689_v13  ;;  %v3752_v19 = vadd.s32 %v3750_v12, %v3748_v26  ;;  %v3742_v53 = vshrl.u32 %v3738_v29, 16  ;;  %v3286_v37 = vadd.f32 %v3285_v20, %v3266_v59 }
 0x4fa   :  { %v3610_v23 = vsub.s32 %v3606_v35, %v3609_v61  ;;  %v3730_v11 = vadd.s32 %v3728_v21, %v3726_v45  ;;  %v3722_v8 = vshrl.u32 %v3717_v32, 16  ;;  %v3744_v5 = vshrl.u32 %v3739_v38, 16 }
 0x4fb   :  { %v3753_v25 = vadd.s32 %v3752_v19, %v3742_v53  ;;  %v10788_v48 = vadd.f32 %v3286_v37, %v10237_v6  ;;  %v3819_v44 = vand.u32 2139095040, %v10779_v62  ;;  %v3701_v49 = vsel %vm3695_vm3, %v3698_v40, %v3700_v4 }
 0x4fc   :  { %vm3611_vm12 = vcmp.lt.s32.totalorder %v3610_v23, 0  ;;  %v3612_v42 = vsub.s32 0, %v3610_v23  ;;  %v3731_v28 = vadd.s32 %v3730_v11, %v3720_v22  ;;  %v10793_v63 = vadd.s32 %v3747_v36, %v3743_v55  ;;  %v3318_v22 = vld [vmem:[#allocation9 + $0xc90] sm:$0xff] }
 0x4fd   :  { %v3754_v10 = vadd.s32 %v3753_v25, %v3744_v5  ;;  %v3820_v0 = vshrl.u32 %v3819_v44, 23  ;;  %v3755_v6 = vmul.u32 %v10655_v41, %v3701_v49  ;;  %v3602_v54 = vadd.s32 %v10726_v24, %v10737_v15 }
 0x4fe   :  { %v3613_v35 = vsel %vm3611_vm12, %v3612_v42, %v3610_v23  ;;  %v10795_v29 = vadd.s32 %v3731_v28, %v3722_v8  ;;  %v3632_v36 = vsub.s32 4, %v10766_v50  ;;  %v3816_v17 = vand.u32 2147483647, %v10779_v62 }
 0x4ff   :  { %v3614_v14 = vclz %v3613_v35  ;;  %v3758_v38 = vadd.s32 1, %v3754_v10  ;;  %v8432_v46 = vadd.s32 4294967169, %v3820_v0  ;;  %vm3510_vm6 = vcmp.lt.s32.totalorder %v10636_v52, 0  ;;  %v10837_v35 = vpop.f32.mrf.mxu3 }
 0x500   :  { %vm3757_vm13 = vc.u32 %v10795_v29, %v10793_v63  ;;  %v10810_v24 = vsel %vm3510_vm6, %v3632_v36, %v10766_v50  ;;  %vm10819_vm8 = vcmp.le.f32.partialorder %v3508_v7, 0.7853982  ;;  %v3973_v36 = vand.u32 2139095040, %v10837_v35 }
 0x501   :  { %v8427_v32 = vadd.s32 4294967294, %v3614_v14  ;;  %v3759_v31 = vsel %vm3757_vm13, %v3758_v38, %v3754_v10  ;;  %v3826_v39 = vadd.s32 1, %v8432_v46  ;;  %v3635_v50 = vsel %vm10819_vm8, 0, %v10810_v24 }
 0x502   :  { %v3760_v9 = vadd.s32 %v3759_v31, %v3755_v6  ;;  %vm3664_vm5 = vcmp.lt.s32.totalorder %v10640_v1, 0  ;;  %vm10901_vm7 = vcmp.le.f32.partialorder %v3662_v18, 0.7853982 }
 0x503   :  { %vm8428_vm14 = vcmp.lt.s32.totalorder %v8427_v32, 0  ;;  %vm3827_vm2 = vcmp.gt.s32.totalorder %v3826_v39, 0 }
 0x504   :  { %v3617_v57 = vsel %vm8428_vm14, 0, %v8427_v32  ;;  %v3761_v30 = vadd.s32 536870912, %v3760_v9  ;;  %v3828_v61 = vsel %vm3827_vm2, %v3826_v39, 0  ;;  %v3970_v39 = vand.u32 2147483647, %v10837_v35 }
 0x505   :  { %v3618_v2 = vsub.s32 32, %v3617_v57  ;;  %v3622_v55 = vsub.s32 4294967266, %v3617_v57  ;;  %v3619_v34 = vshll.u32 %v3610_v23, %v3617_v57  ;;  %v3830_v45 = vand.u32 31, %v3828_v61 }
 0x506   :  { %v10804_v43 = vshrl.u32 %v3761_v30, 30  ;;  %v3823_v23 = vand.u32 8388607, %v3816_v17  ;;  %v10830_v42 = vshrl.u32 %v3828_v61, 5 }
 0x507   :  { %v3620_v26 = vshrl.u32 %v3602_v54, %v3618_v2  ;;  %v3623_v41 = vadd.s32 127, %v3622_v55  ;;  %v10813_v12 = vsub.s32 32, %v3830_v45  ;;  %v3833_v8 = vshll.u32 %v8683_v56, %v3830_v45 }
 0x508   :  { %v3763_v15 = vshll.u32 %v10804_v43, 30  ;;  %v3824_v7 = vor.u32 8388608, %v3823_v23  ;;  %v3836_v5 = vshll.u32 %v13439_v58, %v3830_v45  ;;  %v3839_v25 = vshll.u32 %v13462_v47, %v3830_v45 }
 0x509   :  { %v3621_v16 = vor.u32 %v3620_v26, %v3619_v34  ;;  %v3624_v21 = vshll.u32 %v3623_v41, 23  ;;  %v3834_v4 = vshrl.u32 %v13439_v58, %v10813_v12  ;;  %v3837_v53 = vshrl.u32 %v13462_v47, %v10813_v12 }
 0x50a   :  { %v3764_v11 = vsub.s32 %v3760_v9, %v3763_v15  ;;  %v3840_v44 = vshrl.u32 %v13463_v33, %v10813_v12  ;;  %v3842_v10 = vshll.u32 %v13463_v33, %v3830_v45  ;;  %v3843_v0 = vshrl.u32 %v13464_v60, %v10813_v12 }
 0x50b   :  { %v3625_v59 = vor.u32 4788187, %v3624_v21  ;;  %v3628_v20 = vcvt.s32.f32 %v3621_v16  ;;  %v10842_v32 = vor.u32 %v3834_v4, %v3833_v8  ;;  %v10844_v38 = vor.u32 %v3837_v53, %v3836_v5 }
 0x50c   :  { %vm3765_vm10 = vcmp.lt.s32.totalorder %v3764_v11, 0  ;;  %v3766_v40 = vsub.s32 0, %v3764_v11  ;;  %v3845_v6 = vshll.u32 %v13464_v60, %v3830_v45  ;;  %v3846_v46 = vshrl.u32 %v13449_v51, %v10813_v12 }
 0x50d   :  { %v3626_v19 = vand.u32 2147483647, %v3625_v59  ;;  %v3844_v9 = vor.u32 %v3843_v0, %v3842_v10  ;;  %v3841_v2 = vor.u32 %v3840_v44, %v3839_v25  ;;  %vm3848_vm4 = vcmp.lt.s32.totalorder %v10830_v42, 1 }
 0x50e   :  { %v3767_v28 = vsel %vm3765_vm10, %v3766_v40, %v3764_v11  ;;  %v3847_v55 = vor.u32 %v3846_v46, %v3845_v6  ;;  %vm3851_vm3 = vcmp.lt.s32.totalorder %v10830_v42, 4  ;;  %v3756_v34 = vadd.s32 %v10793_v63, %v10795_v29 }
 0x50f   :  { %v3629_v37 = vmul.f32 %v3628_v20, %v3626_v19  ;;  %v3768_v14 = vclz %v3767_v28  ;;  %v3856_v41 = vsel %vm3848_vm4, %v10842_v32, %v10844_v38  ;;  %v3857_v61 = vsel %vm3851_vm3, %v3844_v9, 920167782 }
 0x510   :  { %vm3849_vm11 = vcmp.lt.s32.totalorder %v10830_v42, 2  ;;  %vm3850_vm0 = vcmp.lt.s32.totalorder %v10830_v42, 3  ;;  %v10874_v16 = vshll.u32 %v3824_v7, 8  ;;  %v3860_v29 = vsel %vm3848_vm4, %v10844_v38, %v3841_v2 }
 0x511   :  { %v3630_v49 = vxor.u32 2147483648, %v3629_v37  ;;  %v8430_v57 = vadd.s32 4294967294, %v3768_v14  ;;  %v3858_v63 = vsel %vm3850_vm0, %v3841_v2, %v3857_v61  ;;  %v3861_v15 = vsel %vm3851_vm3, %v3847_v55, 1326507024 }
 0x512   :  { %v3859_v19 = vsel %vm3849_vm11, %v3856_v41, %v3858_v63  ;;  %v3974_v20 = vshrl.u32 %v3973_v36, 23  ;;  %v3862_v53 = vsel %vm3850_vm0, %v3844_v9, %v3861_v15  ;;  %v3865_v28 = vand.u32 65535, %v10874_v16 }
 0x513   :  { %v3631_v31 = vsel %vm3510_vm6, %v3630_v49, %v3629_v37  ;;  %vm8431_vm15 = vcmp.lt.s32.totalorder %v8430_v57, 0  ;;  %v3890_v37 = vshrl.u32 %v3859_v19, 16  ;;  %v3863_v8 = vsel %vm3849_vm11, %v3860_v29, %v3862_v53  ;;  %v3330_v53 = vld [vmem:[#allocation9 + $0xcf0] sm:$0xff] }
 0x514   :  { %v10855_v54 = vsel %vm10819_vm8, %v10636_v52, %v3631_v31  ;;  %v3771_v26 = vsel %vm8431_vm15, 0, %v8430_v57  ;;  %v3866_v5 = vshrl.u32 %v10874_v16, 16  ;;  %v3867_v49 = vand.u32 65535, %v3863_v8  ;;  %4138 = vmatpush.msrb.mxu0 %v3330_v53 }
 0x515   :  { %v10860_v30 = vmul.f32 %v10855_v54, %v10855_v54  ;;  %v3772_v45 = vsub.s32 32, %v3771_v26  ;;  %v3776_v21 = vsub.s32 4294967266, %v3771_v26  ;;  %v3773_v40 = vshll.u32 %v3764_v11, %v3771_v26 }
 0x516   :  { %v3868_v14 = vshrl.u32 %v3863_v8, 16  ;;  %v3786_v11 = vsub.s32 4, %v10804_v43  ;;  %v8435_v0 = vadd.s32 4294967169, %v3974_v20  ;;  %v10897_v6 = vand.u32 8388607, %v3970_v39 }
 0x517   :  { %v3644_v59 = vmul.f32 -0.00019511016, %v10860_v30  ;;  %v3774_v23 = vshrl.u32 %v3756_v34, %v3772_v45  ;;  %v3777_v4 = vadd.s32 127, %v3776_v21  ;;  %v3637_v7 = vmul.f32 -0.001358992, %v10860_v30 }
 0x518   :  { %v3870_v57 = vmul.u32 %v3868_v14, %v3865_v28  ;;  %v10905_v9 = vmul.u32 %v3867_v49, %v3866_v5  ;;  %v10907_v55 = vmul.u32 %v3890_v37, %v3865_v28  ;;  %v3832_v34 = vshrl.u32 %v8683_v56, %v10813_v12 }
 0x519   :  { %v3775_v25 = vor.u32 %v3774_v23, %v3773_v40  ;;  %v3778_v44 = vshll.u32 %v3777_v4, 23  ;;  %v3645_v10 = vadd.f32 0.008332121, %v3644_v59  ;;  %v3638_v36 = vadd.f32 0.041655596, %v3637_v7 }
 0x51a   :  { %v3853_v26 = vsel %vm3851_vm3, %v3841_v2, 2102212464  ;;  %v3889_v41 = vand.u32 65535, %v3859_v19  ;;  %v3869_v18 = vmul.u32 %v3867_v49, %v3865_v28  ;;  %v3873_v21 = vshll.u32 %v3870_v57, 16 }
 0x51b   :  { %v3779_v31 = vor.u32 4788187, %v3778_v44  ;;  %v3782_v45 = vcvt.s32.f32 %v3775_v25  ;;  %v3646_v63 = vmul.f32 %v3645_v10, %v10860_v30  ;;  %v3852_v29 = vsel %vm3848_vm4, %v3832_v34, %v10842_v32  ;;  %v3362_v32 = vld [vmem:[#allocation9 + $0xdf0] sm:$0xff] }
 0x51c   :  { %v3872_v15 = vmul.u32 %v3868_v14, %v3866_v5  ;;  %v3875_v59 = vshll.u32 %v10905_v9, 16  ;;  %vm3877_vm9 = vc.u32 %v3869_v18, %v3873_v21  ;;  %v3879_v12 = vadd.s32 %v3873_v21, %v3869_v18  ;;  %4158 = vmatpush.msrb.mxu1 %v3362_v32 }
 0x51d   :  { %v3780_v61 = vand.u32 2147483647, %v3779_v31  ;;  %v3895_v20 = vshll.u32 %v10907_v55, 16  ;;  %v3639_v2 = vmul.f32 %v3638_v36, %v10860_v30  ;;  %v3854_v19 = vsel %vm3850_vm0, %v10844_v38, %v3853_v26  ;;  %v3328_v31 = vld [vmem:[#allocation9 + $0xce0] sm:$0xff] }
 0x51e   :  { %v3878_v40 = vsel %vm3877_vm9, 1, %v8689_v13  ;;  %v10924_v4 = vmul.u32 %v3889_v41, %v3866_v5  ;;  %vm3881_vm12 = vc.u32 %v3879_v12, %v3875_v59  ;;  %v3891_v25 = vmul.u32 %v3889_v41, %v3865_v28  ;;  %v3360_v36 = vld [vmem:[#allocation9 + $0xde0] sm:$0xff]  ;;  %4139 = vmatpush.msrb.mxu0 %v3328_v31 }
 0x51f   :  { %v3783_v23 = vmul.f32 %v3782_v45, %v3780_v61  ;;  %v3880_v8 = vadd.s32 %v3878_v40, %v3872_v15  ;;  %v3647_v44 = vadd.f32 -0.16666654, %v3646_v63  ;;  %v3874_v49 = vshrl.u32 %v3870_v57, 16  ;;  %4159 = vmatpush.msrb.mxu1 %v3360_v36 }
 0x520   :  { %v3882_v14 = vsel %vm3881_vm12, 1, %v8689_v13  ;;  %v3894_v10 = vmul.u32 %v3890_v37, %v3866_v5  ;;  %vm3899_vm13 = vc.u32 %v3891_v25, %v3895_v20  ;;  %v3901_v26 = vadd.s32 %v3895_v20, %v3891_v25  ;;  %v3326_v37 = vld [vmem:[#allocation9 + $0xcd0] sm:$0xff] }
 0x521   :  { %v3784_v7 = vxor.u32 2147483648, %v3783_v23  ;;  %v3884_v34 = vadd.s32 %v3882_v14, %v3880_v8  ;;  %v3897_v41 = vshll.u32 %v10924_v4, 16  ;;  %v3900_v57 = vsel %vm3899_vm13, 1, %v8689_v13  ;;  %v3358_v5 = vld [vmem:[#allocation9 + $0xdd0] sm:$0xff]  ;;  %4140 = vmatpush.msrb.mxu0 %v3326_v37 }
 0x522   :  { %v3980_v61 = vadd.s32 1, %v8435_v0  ;;  %v3640_v45 = vadd.f32 -0.4999988, %v3639_v2  ;;  %v3902_v63 = vadd.s32 %v3900_v57, %v3894_v10  ;;  %v3648_v15 = vmul.f32 %v3647_v44, %v10860_v30  ;;  %4160 = vmatpush.msrb.mxu1 %v3358_v5  ;;  %v3324_v0 = vld [vmem:[#allocation9 + $0xcc0] sm:$0xff]  ;;  %v3354_v8 = vld [vmem:[#allocation9 + $0xdb0] sm:$0xff] }
 0x523   :  { %v3785_v38 = vsel %vm3664_vm5, %v3784_v7, %v3783_v23  ;;  %v3885_v21 = vadd.s32 %v3884_v34, %v3874_v49  ;;  %v10944_v59 = vsel %vm3664_vm5, %v3786_v11, %v10804_v43  ;;  %vm3903_vm14 = vc.u32 %v3901_v26, %v3897_v41  ;;  %v3356_v23 = vld [vmem:[#allocation9 + $0xdc0] sm:$0xff]  ;;  %4141 = vmatpush.msrb.mxu0 %v3324_v0  ;;  %v3322_v7 = vld [vmem:[#allocation9 + $0xcb0] sm:$0xff] }
 0x524   :  { %v10932_v28 = vsel %vm10901_vm7, %v10640_v1, %v3785_v38  ;;  %vm3981_vm2 = vcmp.gt.s32.totalorder %v3980_v61, 0  ;;  %v3876_v2 = vshrl.u32 %v10905_v9, 16  ;;  %v3904_v40 = vsel %vm3903_vm14, 1, %v8689_v13  ;;  %4161 = vmatpush.msrb.mxu1 %v3356_v23  ;;  %v3316_v5 = vld [vmem:[#allocation9 + $0xc80] sm:$0xff] }
 0x525   :  { %v10938_v18 = vmul.f32 %v10932_v28, %v10932_v28  ;;  %v3855_v53 = vsel %vm3849_vm11, %v3852_v29, %v3854_v19  ;;  %v3896_v43 = vshrl.u32 %v10907_v55, 16  ;;  %v3906_v11 = vadd.s32 %v3904_v40, %v3902_v63  ;;  %4142 = vmatpush.msrb.mxu0 %v3322_v7  ;;  %v3320_v29 = vld [vmem:[#allocation9 + $0xca0] sm:$0xff] }
 0x526   :  { %v3982_v32 = vsel %vm3981_vm2, %v3980_v61, 0  ;;  %v3641_v25 = vmul.f32 %v3640_v45, %v10860_v30  ;;  %v10954_v14 = vadd.s32 %v3885_v21, %v3876_v2  ;;  %v3649_v9 = vadd.f32 1.0, %v3648_v15  ;;  %4162 = vmatpush.msrb.mxu1 %v3354_v8  ;;  %v3352_v55 = vld [vmem:[#allocation9 + $0xda0] sm:$0xff]  ;;  %v3350_v61 = vld [vmem:[#allocation9 + $0xd90] sm:$0xff] }
 0x527   :  { %v3791_v12 = vmul.f32 -0.001358992, %v10938_v18  ;;  %v3798_v20 = vmul.f32 -0.00019511016, %v10938_v18  ;;  %v3898_v10 = vshrl.u32 %v10924_v4, 16  ;;  %v3907_v31 = vadd.s32 %v3906_v11, %v3896_v43  ;;  %4143 = vmatpush.msrb.mxu0 %v3320_v29  ;;  %v3348_v45 = vld [vmem:[#allocation9 + $0xd80] sm:$0xff] }
 0x528   :  { %v3984_v42 = vand.u32 31, %v3982_v32  ;;  %v10961_v19 = vand.u32 3, %v3635_v50  ;;  %v10964_v36 = vadd.s32 %v3901_v26, %v3897_v41  ;;  %v3789_v4 = vsel %vm10901_vm7, 0, %v10944_v59  ;;  %4163 = vmatpush.msrb.mxu1 %v3352_v55 }
 0x529   :  { %v3792_v44 = vadd.f32 0.041655596, %v3791_v12  ;;  %v3799_v49 = vadd.f32 0.008332121, %v3798_v20  ;;  %v3908_v38 = vadd.s32 %v3907_v31, %v3898_v10  ;;  %v3978_v34 = vor.u32 8388608, %v10897_v6  ;;  %4144 = vmatpush.msrb.mxu0 %v3318_v22  ;;  %v3314_v12 = vld [vmem:[#allocation9 + $0xc70] sm:$0xff] }
 0x52a   :  { %v10970_v57 = vsub.s32 32, %v3984_v42  ;;  %v10972_v24 = vadd.f32 1.0, %v3641_v25  ;;  %v3909_v26 = vmul.u32 %v10874_v16, %v3855_v53  ;;  %vm3911_vm6 = vc.u32 %v10954_v14, %v10964_v36  ;;  %4164 = vmatpush.msrb.mxu1 %v3350_v61  ;;  %v3346_v20 = vld [vmem:[#allocation9 + $0xd70] sm:$0xff]  ;;  %v3312_v25 = vld [vmem:[#allocation9 + $0xc60] sm:$0xff] }
 0x52b   :  { %v3800_v30 = vmul.f32 %v3799_v49, %v10938_v18  ;;  %v3793_v50 = vmul.f32 %v3792_v44, %v10938_v18  ;;  %v10979_v46 = vmul.f32 %v3649_v9, %v10855_v54  ;;  %v3912_v41 = vadd.s32 1, %v3908_v38  ;;  %4145 = vmatpush.msrb.mxu0 %v3316_v5  ;;  %v3344_v44 = vld [vmem:[#allocation9 + $0xd60] sm:$0xff]  ;;  %v3342_v22 = vld [vmem:[#allocation9 + $0xd50] sm:$0xff] }
 0x52c   :  { %v3988_v6 = vshrl.u32 %v13439_v58, %v10970_v57  ;;  %v3991_v37 = vshrl.u32 %v13462_v47, %v10970_v57  ;;  %vm3654_vm8 = vcmp.eq.s32.totalorder %v10961_v19, 0  ;;  %v3987_v21 = vshll.u32 %v8683_v56, %v3984_v42  ;;  %4165 = vmatpush.msrb.mxu1 %v3348_v45 }
 0x52d   :  { %v3801_v16 = vadd.f32 -0.16666654, %v3800_v30  ;;  %v3994_v63 = vshrl.u32 %v13463_v33, %v10970_v57  ;;  %v3997_v54 = vshrl.u32 %v13464_v60, %v10970_v57  ;;  %v3913_v15 = vsel %vm3911_vm6, %v3912_v41, %v3908_v38  ;;  %4146 = vmatpush.msrb.mxu0 %v3314_v12  ;;  %v3340_v41 = vld [vmem:[#allocation9 + $0xd40] sm:$0xff] }
 0x52e   :  { %v10991_v59 = vshrl.u32 %v3982_v32, 5  ;;  %v3990_v0 = vshll.u32 %v13439_v58, %v3984_v42  ;;  %v3996_v23 = vshll.u32 %v13463_v33, %v3984_v42  ;;  %v3794_v2 = vadd.f32 -0.4999988, %v3793_v50  ;;  %4166 = vmatpush.msrb.mxu1 %v3346_v20 }
 0x52f   :  { %v3914_v40 = vadd.s32 %v3913_v15, %v3909_v26  ;;  %v10995_v53 = vor.u32 %v3988_v6, %v3987_v21  ;;  %v3993_v43 = vshll.u32 %v13462_v47, %v3984_v42  ;;  %v3999_v32 = vshll.u32 %v13464_v60, %v3984_v42  ;;  %4147 = vmatpush.msrb.mxu0 %v3312_v25  ;;  %v3310_v42 = vld [vmem:[#allocation9 + $0xc50] sm:$0xff]  ;;  %v3336_v25 = vld [vmem:[#allocation9 + $0xd20] sm:$0xff] }
 0x530   :  { %v10998_v11 = vor.u32 %v3991_v37, %v3990_v0  ;;  %v3998_v7 = vor.u32 %v3997_v54, %v3996_v23  ;;  %v4000_v8 = vshrl.u32 %v13449_v51, %v10970_v57  ;;  %v3802_v49 = vmul.f32 %v3801_v16, %v10938_v18  ;;  %4167 = vmatpush.msrb.mxu1 %v3344_v44  ;;  %v3338_v54 = vld [vmem:[#allocation9 + $0xd30] sm:$0xff]  ;;  %v3392_v44 = vld [vmem:[#allocation9 + $0xee0] sm:$0xff] }
 0x531   :  { %v11004_v9 = vand.u32 3, %v3789_v4  ;;  %v3915_v10 = vadd.s32 536870912, %v3914_v40  ;;  %v3995_v31 = vor.u32 %v3994_v63, %v3993_v43  ;;  %v3655_v29 = vxor.u32 2147483648, %v10979_v46  ;;  %4148 = vmatpush.msrb.mxu0 %v3310_v42  ;;  %v3306_v63 = vld [vmem:[#allocation9 + $0xc30] sm:$0xff] }
 0x532   :  { %v3658_v55 = vxor.u32 2147483648, %v10972_v24  ;;  %v4001_v30 = vor.u32 %v4000_v8, %v3999_v32  ;;  %v11008_v38 = vshll.u32 %v3978_v34, 8  ;;  %v3795_v61 = vmul.f32 %v3794_v2, %v10938_v18  ;;  %4168 = vmatpush.msrb.mxu1 %v3342_v22  ;;  %v3308_v18 = vld [vmem:[#allocation9 + $0xc40] sm:$0xff]  ;;  %v3394_v15 = vld [vmem:[#allocation9 + $0xef0] sm:$0xff] }
 0x533   :  { %v11011_v50 = vshrl.u32 %v3915_v10, 30  ;;  %vm4002_vm10 = vcmp.lt.s32.totalorder %v10991_v59, 1  ;;  %vm4005_vm15 = vcmp.lt.s32.totalorder %v10991_v59, 4  ;;  %v3803_v6 = vadd.f32 1.0, %v3802_v49  ;;  %4149 = vmatpush.msrb.mxu0 %v3308_v18  ;;  %4178 = vmatpush.msrb.mxu2 %v3394_v15  ;;  %v3426_v2 = vld [vmem:[#allocation9 + $0xff0] sm:$0xff] }
 0x534   :  { %v4010_v4 = vsel %vm4002_vm10, %v10995_v53, %v10998_v11  ;;  %v4011_v34 = vsel %vm4005_vm15, %v3998_v7, 920167782  ;;  %v4015_v26 = vsel %vm4005_vm15, %v4001_v30, 1326507024  ;;  %vm4004_vm4 = vcmp.lt.s32.totalorder %v10991_v59, 3  ;;  %4169 = vmatpush.msrb.mxu1 %v3340_v41  ;;  %4198 = vmatpush.msrb.mxu3 %v3426_v2  ;;  %v3424_v30 = vld [vmem:[#allocation9 + $0xfe0] sm:$0xff] }
 0x535   :  { %v3917_v37 = vshll.u32 %v11011_v50, 30  ;;  %v4014_v5 = vsel %vm4002_vm10, %v10998_v11, %v3995_v31  ;;  %v11031_v45 = vsel %vm3654_vm8, %v10972_v24, %v3655_v29  ;;  %vm4003_vm3 = vcmp.lt.s32.totalorder %v10991_v59, 2  ;;  %4150 = vmatpush.msrb.mxu0 %v3306_v63  ;;  %4179 = vmatpush.msrb.mxu2 %v3392_v44  ;;  %v3388_v63 = vld [vmem:[#allocation9 + $0xec0] sm:$0xff]  ;;  %v3374_v59 = vld [vmem:[#allocation9 + $0xe50] sm:$0xff] }
 0x536   :  { %v4012_v16 = vsel %vm4004_vm4, %v3995_v31, %v4011_v34  ;;  %v4016_v21 = vsel %vm4004_vm4, %v3998_v7, %v4015_v26  ;;  %v11038_v0 = vadd.f32 1.0, %v3795_v61  ;;  %v4019_v20 = vand.u32 65535, %v11008_v38  ;;  %4170 = vmatpush.msrb.mxu1 %v3338_v54  ;;  %4199 = vmatpush.msrb.mxu3 %v3424_v30  ;;  %v3334_v34 = vld [vmem:[#allocation9 + $0xd10] sm:$0xff]  ;;  %v3420_v2 = vld [vmem:[#allocation9 + $0xfc0] sm:$0xff] }
 0x537   :  { %v11040_v23 = vsub.s32 %v3914_v40, %v3917_v37  ;;  %v11044_v12 = vsel %vm4003_vm3, %v4010_v4, %v4012_v16  ;;  %v4017_v43 = vsel %vm4003_vm3, %v4014_v5, %v4016_v21  ;;  %v4020_v7 = vshrl.u32 %v11008_v38, 16  ;;  %v3304_v40 = vld [vmem:[#allocation9 + $0xc20] sm:$0xff]  ;;  %v3390_v26 = vld [vmem:[#allocation9 + $0xed0] sm:$0xff] }
 0x538   :  { %v4043_v32 = vand.u32 65535, %v11044_v12  ;;  %v4044_v8 = vshrl.u32 %v11044_v12, 16  ;;  %v11053_v49 = vmul.f32 %v3803_v6, %v10932_v28  ;;  %vm3808_vm11 = vcmp.eq.s32.totalorder %v11004_v9, 0  ;;  %4151 = vmatpush.msrb.mxu0 %v3304_v40  ;;  %4171 = vmatpush.msrb.mxu1 %v3336_v25  ;;  %v3302_v28 = vld [vmem:[#allocation9 + $0xc10] sm:$0xff]  ;;  %v3363_v40 = vld [vmem:[#allocation9 + $0xdf8] sm:$0xff] }
 0x539   :  { %vm3919_vm0 = vcmp.lt.s32.totalorder %v11040_v23, 0  ;;  %v3920_v10 = vsub.s32 0, %v11040_v23  ;;  %v4021_v29 = vand.u32 65535, %v4017_v43  ;;  %v3986_v42 = vshrl.u32 %v8683_v56, %v10970_v57  ;;  %4180 = vmatpush.msrb.mxu2 %v3390_v26  ;;  %v3384_v26 = vld [vmem:[#allocation9 + $0xea0] sm:$0xff] }
 0x53a   :  { %v4007_v22 = vsel %vm4005_vm15, %v3995_v31, 2102212464  ;;  %v4022_v61 = vshrl.u32 %v4017_v43, 16  ;;  %v11062_v4 = vmul.u32 %v4044_v8, %v4019_v20  ;;  %v3812_v18 = vxor.u32 2147483648, %v11038_v0  ;;  %4152 = vmatpush.msrb.mxu0 %v3302_v28  ;;  %v3422_v31 = vld [vmem:[#allocation9 + $0xfd0] sm:$0xff]  ;;  %4172 = vmatpush.msrb.mxu1 %v3334_v34  ;;  %v3331_v43 = vld [vmem:[#allocation9 + $0xcf8] sm:$0xff] }
 0x53b   :  { %v11067_v41 = vadd.s32 %v10964_v36, %v10954_v14  ;;  %v3921_v57 = vsel %vm3919_vm0, %v3920_v10, %v11040_v23  ;;  %v11072_v6 = vmul.u32 %v4043_v32, %v4020_v7  ;;  %v11077_v5 = vsel %vm4002_vm10, %v3986_v42, %v10995_v53  ;;  %4200 = vmatpush.msrb.mxu3 %v3422_v31  ;;  %v3300_v14 = vld [vmem:[#allocation9 + $0xc00] sm:$0xff]  ;;  %v3386_v42 = vld [vmem:[#allocation9 + $0xeb0] sm:$0xff] }
 0x53c   :  { %v3922_v37 = vclz %v3921_v57  ;;  %v11079_v16 = vmul.u32 %v4022_v61, %v4019_v20  ;;  %v11081_v21 = vmul.u32 %v4021_v29, %v4020_v7  ;;  %v3332_v36 = vld [vmem:[#allocation9 + $0xd00] sm:$0xff]  ;;  %vm3657_vm5 = vcmp.eq.s32.totalorder %v10961_v19, 2  ;;  %4153 = vmatpush.msrb.mxu0 %v3300_v14  ;;  %4181 = vmatpush.msrb.mxu2 %v3388_v63  ;;  %v3418_v28 = vld [vmem:[#allocation9 + $0xfb0] sm:$0xff]  ;;  %v3327_v14 = vld [vmem:[#allocation9 + $0xcd8] sm:$0xff] }
 0x53d   :  { %v3809_v54 = vxor.u32 2147483648, %v11053_v49  ;;  %v11088_v15 = vsel %vm4004_vm4, %v10998_v11, %v4007_v22  ;;  %v4045_v53 = vmul.u32 %v4043_v32, %v4019_v20  ;;  %v4049_v12 = vshll.u32 %v11062_v4, 16  ;;  %4173 = vmatpush.msrb.mxu1 %v3332_v36  ;;  %4201 = vmatpush.msrb.mxu3 %v3420_v2  ;;  %v3416_v57 = vld [vmem:[#allocation9 + $0xfa0] sm:$0xff]  ;;  %v3359_v36 = vld [vmem:[#allocation9 + $0xdd8] sm:$0xff] }
 0x53e   :  { %v8433_v25 = vadd.s32 4294967294, %v3922_v37  ;;  %v4023_v44 = vmul.u32 %v4021_v29, %v4019_v20  ;;  %v4026_v10 = vmul.u32 %v4022_v61, %v4020_v7  ;;  %v4027_v30 = vshll.u32 %v11079_v16, 16  ;;  %4218 = vmatpush.msra.mxu0 %v3331_v43  ;;  %v3329_v20 = vld [vmem:[#allocation9 + $0xce8] sm:$0xff]  ;;  %4182 = vmatpush.msrb.mxu2 %v3386_v42 }
 0x53f   :  { %vm3653_vm7 = vcmp.lt.s32.totalorder %v10961_v19, 2  ;;  %vm3807_vm9 = vcmp.lt.s32.totalorder %v11004_v9, 2  ;;  %v4029_v11 = vshll.u32 %v11081_v21, 16  ;;  %v4048_v32 = vmul.u32 %v4044_v8, %v4020_v7  ;;  %4238 = vmatpush.msra.mxu1 %v3363_v40  ;;  %v3361_v29 = vld [vmem:[#allocation9 + $0xde8] sm:$0xff]  ;;  %4202 = vmatpush.msrb.mxu3 %v3418_v28 }
 0x540   :  { %v4051_v22 = vshll.u32 %v11072_v6, 16  ;;  %vm4053_vm12 = vc.u32 %v4045_v53, %v4049_v12  ;;  %vm8434_vm13 = vcmp.lt.s32.totalorder %v8433_v25, 0  ;;  %vm4031_vm14 = vc.u32 %v4023_v44, %v4027_v30  ;;  %4219 = vmatpush.msra.mxu0 %v3329_v20  ;;  %4183 = vmatpush.msrb.mxu2 %v3384_v26  ;;  %v3355_v26 = vld [vmem:[#allocation9 + $0xdb8] sm:$0xff] }
 0x541   :  { %v4033_v61 = vadd.s32 %v4027_v30, %v4023_v44  ;;  %v4054_v34 = vsel %vm4053_vm12, 1, %v8689_v13  ;;  %v3925_v31 = vsel %vm8434_vm13, 0, %v8433_v25  ;;  %v4032_v37 = vsel %vm4031_vm14, 1, %v8689_v13  ;;  %4239 = vmatpush.msra.mxu1 %v3361_v29  ;;  %4203 = vmatpush.msrb.mxu3 %v3416_v57  ;;  %v3382_v44 = vld [vmem:[#allocation9 + $0xe90] sm:$0xff] }
 0x542   :  { %v11098_v7 = vadd.s32 %v4049_v12, %v4045_v53  ;;  %v4056_v8 = vadd.s32 %v4054_v34, %v4048_v32  ;;  %v3810_v63 = vsel %vm3808_vm11, %v11038_v0, %v3809_v54  ;;  %v3926_v2 = vsub.s32 32, %v3925_v31  ;;  %v3414_v25 = vld [vmem:[#allocation9 + $0xf90] sm:$0xff]  ;;  %4220 = vmatpush.msra.mxu0 %v3327_v14  ;;  %v3325_v12 = vld [vmem:[#allocation9 + $0xcc8] sm:$0xff]  ;;  %4184 = vmatpush.msrb.mxu2 %v3382_v44  ;;  %v3380_v32 = vld [vmem:[#allocation9 + $0xe80] sm:$0xff] }
 0x543   :  { %v3930_v43 = vsub.s32 4294967266, %v3925_v31  ;;  %v4034_v40 = vadd.s32 %v4032_v37, %v4026_v10  ;;  %vm3811_vm2 = vcmp.eq.s32.totalorder %v11004_v9, 2  ;;  %v3927_v53 = vshll.u32 %v11040_v23, %v3925_v31  ;;  %4240 = vmatpush.msra.mxu1 %v3359_v36  ;;  %v3357_v54 = vld [vmem:[#allocation9 + $0xdc8] sm:$0xff]  ;;  %4204 = vmatpush.msrb.mxu3 %v3414_v25  ;;  %v3412_v23 = vld [vmem:[#allocation9 + $0xf80] sm:$0xff]  ;;  %v3323_v34 = vld [vmem:[#allocation9 + $0xcb8] sm:$0xff] }
 0x544   :  { %vm4035_vm6 = vc.u32 %v4033_v61, %v4029_v11  ;;  %vm4057_vm8 = vc.u32 %v11098_v7, %v4051_v22  ;;  %v3928_v30 = vshrl.u32 %v11067_v41, %v3926_v2  ;;  %v4028_v11 = vshrl.u32 %v11079_v16, 16  ;;  %4221 = vmatpush.msra.mxu0 %v3325_v12  ;;  %4185 = vmatpush.msrb.mxu2 %v3380_v32  ;;  %v3410_v37 = vld [vmem:[#allocation9 + $0xf70] sm:$0xff]  ;;  %v3376_v2 = vld [vmem:[#allocation9 + $0xe60] sm:$0xff]  ;;  %v3319_v9 = vld [vmem:[#allocation9 + $0xc98] sm:$0xff] }
 0x545   :  { %v3931_v10 = vadd.s32 127, %v3930_v43  ;;  %v4036_v42 = vsel %vm4035_vm6, 1, %v8689_v13  ;;  %v4058_v28 = vsel %vm4057_vm8, 1, %v8689_v13  ;;  %v4050_v29 = vshrl.u32 %v11062_v4, 16  ;;  %4241 = vmatpush.msra.mxu1 %v3357_v54  ;;  %4205 = vmatpush.msrb.mxu3 %v3412_v23  ;;  %v3378_v4 = vld [vmem:[#allocation9 + $0xe70] sm:$0xff]  ;;  %v3408_v43 = vld [vmem:[#allocation9 + $0xf60] sm:$0xff] }
 0x546   :  { %v4038_v20 = vadd.s32 %v4036_v42, %v4034_v40  ;;  %v4060_v61 = vadd.s32 %v4058_v28, %v4056_v8  ;;  %v3659_v41 = vsel %vm3657_vm5, %v3658_v55, %v10979_v46  ;;  %v3813_v16 = vsel %vm3811_vm2, %v3812_v18, %v11053_v49  ;;  %4222 = vmatpush.msra.mxu0 %v3323_v34  ;;  %v3321_v46 = vld [vmem:[#allocation9 + $0xca8] sm:$0xff]  ;;  %v3347_v42 = vld [vmem:[#allocation9 + $0xd78] sm:$0xff]  ;;  %v3370_v23 = vld [vmem:[#allocation9 + $0xe30] sm:$0xff] }
 0x547   :  { %v3929_v57 = vor.u32 %v3928_v30, %v3927_v53  ;;  %v3932_v31 = vshll.u32 %v3931_v10, 23  ;;  %v4030_v8 = vshrl.u32 %v11081_v21, 16  ;;  %v4052_v24 = vshrl.u32 %v11072_v6, 16  ;;  %4242 = vmatpush.msra.mxu1 %v3355_v26  ;;  %v3353_v55 = vld [vmem:[#allocation9 + $0xda8] sm:$0xff]  ;;  %4186 = vmatpush.msrb.mxu2 %v3378_v4  ;;  %v3372_v30 = vld [vmem:[#allocation9 + $0xe40] sm:$0xff]  ;;  %v3311_v4 = vld [vmem:[#allocation9 + $0xc58] sm:$0xff] }
 0x548   :  { %v4039_v14 = vadd.s32 %v4038_v20, %v4028_v11  ;;  %v4061_v36 = vadd.s32 %v4060_v61, %v4050_v29  ;;  %v3660_v0 = vsel %vm3653_vm7, %v11031_v45, %v3659_v41  ;;  %v3814_v49 = vsel %vm3807_vm9, %v3810_v63, %v3813_v16  ;;  %4206 = vmatpush.msrb.mxu3 %v3410_v37  ;;  %v3351_v63 = vld [vmem:[#allocation9 + $0xd98] sm:$0xff]  ;;  %v3404_v10 = vld [vmem:[#allocation9 + $0xf40] sm:$0xff]  ;;  %v3402_v11 = vld [vmem:[#allocation9 + $0xf30] sm:$0xff] }
 0x549   :  { %v3933_v18 = vor.u32 4788187, %v3932_v31  ;;  %v4009_v21 = vsel %vm4003_vm3, %v11077_v5, %v11088_v15  ;;  %v11139_v19 = vadd.s32 %v11098_v7, %v4051_v22  ;;  %4223 = vmatpush.msra.mxu0 %v3321_v46  ;;  %4243 = vmatpush.msra.mxu1 %v3353_v55  ;;  %v3936_v25 = vcvt.s32.f32 %v3929_v57  ;;  %v3406_v5 = vld [vmem:[#allocation9 + $0xf50] sm:$0xff]  ;;  %v3317_v15 = vld [vmem:[#allocation9 + $0xc88] sm:$0xff]  ;;  %v3368_v16 = vld [vmem:[#allocation9 + $0xe20] sm:$0xff] }
 0x54a   :  { %v11134_v40 = vadd.s32 %v4039_v14, %v4030_v8  ;;  %v4062_v45 = vadd.s32 %v4061_v36, %v4052_v24  ;;  %4187 = vmatpush.msrb.mxu2 %v3376_v2  ;;  %4207 = vmatpush.msrb.mxu3 %v3408_v43  ;;  %vm3651_vm10 = vweird.f32 %v10636_v52  ;;  %vm3805_vm15 = vweird.f32 %v10640_v1  ;;  %v3349_v22 = vld [vmem:[#allocation9 + $0xd88] sm:$0xff]  ;;  %v3315_v1 = vld [vmem:[#allocation9 + $0xc78] sm:$0xff]  ;;  %v3400_v57 = vld [vmem:[#allocation9 + $0xf20] sm:$0xff] }
 0x54b   :  { %v3934_v44 = vand.u32 2147483647, %v3933_v18  ;;  %4224 = vmatpush.msra.mxu0 %v3319_v9  ;;  %4244 = vmatpush.msra.mxu1 %v3351_v63  ;;  %v3661_v7 = vsel %vm3651_vm10, nan, %v3660_v0  ;;  %v3815_v53 = vsel %vm3805_vm15, nan, %v3814_v49  ;;  %v4063_v54 = vmul.u32 %v11008_v38, %v4009_v21  ;;  %v3313_v38 = vld [vmem:[#allocation9 + $0xc68] sm:$0xff]  ;;  %v3366_v36 = vld [vmem:[#allocation9 + $0xe10] sm:$0xff] }
 0x54c   :  { %vm4065_vm4 = vc.u32 %v11134_v40, %v11139_v19  ;;  %v4066_v6 = vadd.s32 1, %v4062_v45  ;;  %4188 = vmatpush.msrb.mxu2 %v3374_v59  ;;  %4208 = vmatpush.msrb.mxu3 %v3406_v5  ;;  %vm3818_vm3 = vcmp.lt.s32.totalorder %v10779_v62, 0  ;;  %v3345_v20 = vld [vmem:[#allocation9 + $0xd68] sm:$0xff]  ;;  %v4124_v29 = vmul.f32 %v3661_v7, %v3661_v7  ;;  %v3398_v46 = vld [vmem:[#allocation9 + $0xf10] sm:$0xff]  ;;  %v3364_v9 = vld [vmem:[#allocation9 + $0xe00] sm:$0xff] }
 0x54d   :  { %v3937_v12 = vmul.f32 %v3936_v25, %v3934_v44  ;;  %4225 = vmatpush.msra.mxu0 %v3317_v15  ;;  %4245 = vmatpush.msra.mxu1 %v3349_v22  ;;  %v4125_v61 = vmul.f32 %v3815_v53, %v3815_v53  ;;  %vm11149_vm11 = vcmp.le.f32.partialorder %v3816_v17, 0.7853982  ;;  %v3343_v17 = vld [vmem:[#allocation9 + $0xd58] sm:$0xff]  ;;  %v3940_v55 = vsub.s32 4, %v11011_v50  ;;  %v3309_v0 = vld [vmem:[#allocation9 + $0xc48] sm:$0xff]  ;;  %v3396_v63 = vld [vmem:[#allocation9 + $0xf00] sm:$0xff] }
 0x54e   :  { %v4067_v52 = vsel %vm4065_vm4, %v4066_v6, %v4062_v45  ;;  %4189 = vmatpush.msrb.mxu2 %v3372_v30  ;;  %4209 = vmatpush.msrb.mxu3 %v3404_v10  ;;  %v4128_v37 = vsub.f32 1.0, %v4124_v29  ;;  %v3341_v49 = vld [vmem:[#allocation9 + $0xd48] sm:$0xff]  ;;  %v3307_v44 = vld [vmem:[#allocation9 + $0xc38] sm:$0xff]  ;;  %vm3959_vm13 = vweird.f32 %v10779_v62  ;;  %vm3972_vm14 = vcmp.lt.s32.totalorder %v10837_v35, 0 }
 0x54f   :  { %v3938_v28 = vxor.u32 2147483648, %v3937_v12  ;;  %v4068_v32 = vadd.s32 %v4067_v52, %v4063_v54  ;;  %4226 = vmatpush.msra.mxu0 %v3315_v1  ;;  %4246 = vmatpush.msra.mxu1 %v3347_v42  ;;  %v4129_v8 = vsub.f32 1.0, %v4125_v61  ;;  %v3339_v6 = vld [vmem:[#allocation9 + $0xd38] sm:$0xff]  ;;  %v3941_v22 = vsel %vm3818_vm3, %v3940_v55, %v11011_v50  ;;  %v3305_v53 = vld [vmem:[#allocation9 + $0xc28] sm:$0xff] }
 0x550   :  { %4190 = vmatpush.msrb.mxu2 %v3370_v23  ;;  %4210 = vmatpush.msrb.mxu3 %v3402_v11  ;;  %v11165_v18 = vadd.f32 %v4128_v37, %v4124_v29  ;;  %v3395_v15 = vld [vmem:[#allocation9 + $0xef8] sm:$0xff]  ;;  %v3393_v52 = vld [vmem:[#allocation9 + $0xee8] sm:$0xff]  ;;  %vm11196_vm2 = vcmp.le.f32.partialorder %v3970_v39, 0.7853982  ;;  %vm4113_vm15 = vweird.f32 %v10837_v35 }
 0x551   :  { %v3939_v26 = vsel %vm3818_vm3, %v3938_v28, %v3937_v12  ;;  %v4069_v41 = vadd.s32 536870912, %v4068_v32  ;;  %4227 = vmatpush.msra.mxu0 %v3313_v38  ;;  %4247 = vmatpush.msra.mxu1 %v3345_v20  ;;  %v11167_v21 = vadd.f32 %v4129_v8, %v4125_v61  ;;  %v3427_v7 = vld [vmem:[#allocation9 + $0xff8] sm:$0xff]  ;;  %v3337_v12 = vld [vmem:[#allocation9 + $0xd28] sm:$0xff]  ;;  %v3943_v20 = vsel %vm11149_vm11, 0, %v3941_v22 }
 0x552   :  { %v11158_v31 = vsel %vm11149_vm11, %v10779_v62, %v3939_v26  ;;  %4191 = vmatpush.msrb.mxu2 %v3368_v16  ;;  %4211 = vmatpush.msrb.mxu3 %v3400_v57  ;;  %v3425_v1 = vld [vmem:[#allocation9 + $0xfe8] sm:$0xff]  ;;  %v3303_v42 = vld [vmem:[#allocation9 + $0xc18] sm:$0xff] }
 0x553   :  { %v3944_v14 = vmul.f32 %v11158_v31, %v11158_v31  ;;  %v11162_v24 = vshrl.u32 %v4069_v41, 30  ;;  %4228 = vmatpush.msra.mxu0 %v3311_v4  ;;  %4248 = vmatpush.msra.mxu1 %v3343_v17  ;;  %v3335_v28 = vld [vmem:[#allocation9 + $0xd18] sm:$0xff]  ;;  %v3301_v61 = vld [vmem:[#allocation9 + $0xc08] sm:$0xff] }
 0x554   :  { %4192 = vmatpush.msrb.mxu2 %v3366_v36  ;;  %4212 = vmatpush.msrb.mxu3 %v3398_v46  ;;  %v3391_v11 = vld [vmem:[#allocation9 + $0xed8] sm:$0xff]  ;;  %v3333_v26 = vld [vmem:[#allocation9 + $0xd08] sm:$0xff]  ;;  %v3960_v36 = vand.u32 3, %v3943_v20 }
 0x555   :  { %v3945_v2 = vmul.f32 -0.001358992, %v3944_v14  ;;  %v3952_v43 = vmul.f32 -0.00019511016, %v3944_v14  ;;  %v4071_v45 = vshll.u32 %v11162_v24, 30  ;;  %4229 = vmatpush.msra.mxu0 %v3309_v0  ;;  %4249 = vmatpush.msra.mxu1 %v3341_v49  ;;  %v3423_v38 = vld [vmem:[#allocation9 + $0xfd8] sm:$0xff] }
 0x556   :  { %4154 = vmatmul.f32.vlgmr.msrb.gmra.mxu0 %v11165_v18  ;;  %4174 = vmatmul.f32.vlgmr.msrb.gmra.mxu1 %v11167_v21  ;;  %v3389_v57 = vld [vmem:[#allocation9 + $0xec8] sm:$0xff]  ;;  %v3387_v34 = vld [vmem:[#allocation9 + $0xeb8] sm:$0xff]  ;;  %vm3962_vm7 = vcmp.eq.s32.totalorder %v3960_v36, 0  ;;  %vm3965_vm9 = vcmp.eq.s32.totalorder %v3960_v36, 2  ;;  %vm3961_vm12 = vcmp.lt.s32.totalorder %v3960_v36, 2 }
 0x557   :  { %v3946_v25 = vadd.f32 0.041655596, %v3945_v2  ;;  %v3953_v59 = vadd.f32 0.008332121, %v3952_v43  ;;  %v11170_v5 = vsub.s32 %v4068_v32, %v4071_v45  ;;  %4193 = vmatpush.msrb.mxu2 %v3364_v9  ;;  %4213 = vmatpush.msrb.mxu3 %v3396_v63  ;;  %v3421_v4 = vld [vmem:[#allocation9 + $0xfc8] sm:$0xff]  ;;  %v3419_v46 = vld [vmem:[#allocation9 + $0xfb8] sm:$0xff]  ;;  %v4064_v43 = vadd.s32 %v11139_v19, %v11134_v40 }
 0x558   :  { %4230 = vmatpush.msra.mxu0 %v3307_v44  ;;  %4250 = vmatpush.msra.mxu1 %v3339_v6  ;;  %v3385_v49 = vld [vmem:[#allocation9 + $0xea8] sm:$0xff]  ;;  %v4306_v63 = vld [vmem:[#allocation8 + $0x180] sm:$0xff] }
 0x559   :  { %v3947_v54 = vmul.f32 %v3946_v25, %v3944_v14  ;;  %v3954_v30 = vmul.f32 %v3953_v59, %v3944_v14  ;;  %vm4073_vm0 = vcmp.lt.s32.totalorder %v11170_v5, 0  ;;  %v4074_v10 = vsub.s32 0, %v11170_v5  ;;  %4258 = vmatpush.msra.mxu2 %v3395_v15  ;;  %4278 = vmatpush.msra.mxu3 %v3427_v7  ;;  %v3417_v2 = vld [vmem:[#allocation9 + $0xfa8] sm:$0xff]  ;;  %v3383_v25 = vld [vmem:[#allocation9 + $0xe98] sm:$0xff]  ;;  %v4302_v15 = vld [vmem:[#allocation8 + $0x80] sm:$0xff] }
 0x55a   :  { %4231 = vmatpush.msra.mxu0 %v3305_v53  ;;  %4251 = vmatpush.msra.mxu1 %v3337_v12  ;;  %v4307_v59 = vld [vmem:[#allocation8 + $0x188] sm:$0xff] }
 0x55b   :  { %v3948_v50 = vadd.f32 -0.4999988, %v3947_v54  ;;  %v3955_v32 = vadd.f32 -0.16666654, %v3954_v30  ;;  %v4075_v23 = vsel %vm4073_vm0, %v4074_v10, %v11170_v5  ;;  %4259 = vmatpush.msra.mxu2 %v3393_v52  ;;  %4279 = vmatpush.msra.mxu3 %v3425_v1  ;;  %v3381_v22 = vld [vmem:[#allocation9 + $0xe88] sm:$0xff]  ;;  %v3379_v10 = vld [vmem:[#allocation9 + $0xe78] sm:$0xff] }
 0x55c   :  { %v4076_v29 = vclz %v4075_v23  ;;  %4232 = vmatpush.msra.mxu0 %v3303_v42  ;;  %4252 = vmatpush.msra.mxu1 %v3335_v28  ;;  %v3413_v7 = vld [vmem:[#allocation9 + $0xf88] sm:$0xff]  ;;  %v3411_v52 = vld [vmem:[#allocation9 + $0xf78] sm:$0xff] }
 0x55d   :  { %v3949_v41 = vmul.f32 %v3948_v50, %v3944_v14  ;;  %v3956_v16 = vmul.f32 %v3955_v32, %v3944_v14  ;;  %4260 = vmatpush.msra.mxu2 %v3391_v11  ;;  %4280 = vmatpush.msra.mxu3 %v3423_v38  ;;  %v4303_v53 = vld [vmem:[#allocation8 + $0x88] sm:$0xff]  ;;  %v3375_v11 = vld [vmem:[#allocation9 + $0xe58] sm:$0xff] }
 0x55e   :  { %v8436_v17 = vadd.s32 4294967294, %v4076_v29  ;;  %4233 = vmatpush.msra.mxu0 %v3301_v61  ;;  %4253 = vmatpush.msra.mxu1 %v3333_v26  ;;  %v3377_v62 = vld [vmem:[#allocation9 + $0xe68] sm:$0xff]  ;;  %v3407_v38 = vld [vmem:[#allocation9 + $0xf58] sm:$0xff] }
 0x55f   :  { %v3950_v37 = vadd.f32 1.0, %v3949_v41  ;;  %v3957_v8 = vadd.f32 1.0, %v3956_v16  ;;  %4261 = vmatpush.msra.mxu2 %v3389_v57  ;;  %4281 = vmatpush.msra.mxu3 %v3421_v4  ;;  %v3409_v28 = vld [vmem:[#allocation9 + $0xf68] sm:$0xff]  ;;  %v3371_v16 = vld [vmem:[#allocation9 + $0xe38] sm:$0xff] }
 0x560   :  { %vm8437_vm5 = vcmp.lt.s32.totalorder %v8436_v17, 0  ;;  %4234 = vmatmul.f32.vlgmr.msra.gmra.mxu0 %v11165_v18  ;;  %4254 = vmatmul.f32.vlgmr.msra.gmra.mxu1 %v11167_v21  ;;  %v3373_v61 = vld [vmem:[#allocation9 + $0xe48] sm:$0xff]  ;;  %v3403_v57 = vld [vmem:[#allocation9 + $0xf38] sm:$0xff] }
 0x561   :  { %v3958_v55 = vmul.f32 %v3957_v8, %v11158_v31  ;;  %v3966_v14 = vxor.u32 2147483648, %v3950_v37  ;;  %v4079_v0 = vsel %vm8437_vm5, 0, %v8436_v17  ;;  %4262 = vmatpush.msra.mxu2 %v3387_v34  ;;  %4282 = vmatpush.msra.mxu3 %v3419_v46  ;;  %v3415_v31 = vld [vmem:[#allocation9 + $0xf98] sm:$0xff]  ;;  %v3405_v26 = vld [vmem:[#allocation9 + $0xf48] sm:$0xff] }
 0x562   :  { %v4080_v45 = vsub.s32 32, %v4079_v0  ;;  %v4084_v9 = vsub.s32 4294967266, %v4079_v0  ;;  %4452 = vmatpush.msrb.mxu0 %v4306_v63  ;;  %v4081_v18 = vshll.u32 %v11170_v5, %v4079_v0  ;;  %4472 = vmatpush.msrb.mxu1 %v4307_v59  ;;  %v3369_v8 = vld [vmem:[#allocation9 + $0xe28] sm:$0xff]  ;;  %v3367_v46 = vld [vmem:[#allocation9 + $0xe18] sm:$0xff]  ;;  %v4094_v0 = vsub.s32 4, %v11162_v24 }
 0x563   :  { %v3963_v44 = vxor.u32 2147483648, %v3958_v55  ;;  %4263 = vmatpush.msra.mxu2 %v3385_v49  ;;  %4283 = vmatpush.msra.mxu3 %v3417_v2  ;;  %v3967_v19 = vsel %vm3965_vm9, %v3966_v14, %v3958_v55  ;;  %v3401_v36 = vld [vmem:[#allocation9 + $0xf28] sm:$0xff]  ;;  %v3399_v55 = vld [vmem:[#allocation9 + $0xf18] sm:$0xff] }
 0x564   :  { %v4082_v21 = vshrl.u32 %v4064_v43, %v4080_v45  ;;  %v4085_v6 = vadd.s32 127, %v4084_v9  ;;  %4453 = vmatpush.msrb.mxu0 %v4302_v15  ;;  %4473 = vmatpush.msrb.mxu1 %v4303_v53  ;;  %v3365_v49 = vld [vmem:[#allocation9 + $0xe08] sm:$0xff]  ;;  %v4308_v9 = vld [vmem:[#allocation8 + $0x190] sm:$0xff] }
 0x565   :  { %v3964_v40 = vsel %vm3962_vm7, %v3950_v37, %v3963_v44  ;;  %4264 = vmatpush.msra.mxu2 %v3383_v25  ;;  %4284 = vmatpush.msra.mxu3 %v3415_v31  ;;  %v3397_v2 = vld [vmem:[#allocation9 + $0xf08] sm:$0xff]  ;;  %v4095_v25 = vsel %vm3972_vm14, %v4094_v0, %v11162_v24  ;;  %v4304_v31 = vld [vmem:[#allocation8 + $0x90] sm:$0xff] }
 0x566   :  { %v3968_v12 = vsel %vm3961_vm12, %v3964_v40, %v3967_v19  ;;  %v4083_v54 = vor.u32 %v4082_v21, %v4081_v18  ;;  %v4086_v30 = vshll.u32 %v4085_v6, 23  ;;  %v4097_v21 = vsel %vm11196_vm2, 0, %v4095_v25 }
 0x567   :  { %v3969_v5 = vsel %vm3959_vm13, nan, %v3968_v12  ;;  %4265 = vmatpush.msra.mxu2 %v3381_v22  ;;  %4285 = vmatpush.msra.mxu3 %v3413_v7  ;;  %v4114_v22 = vand.u32 3, %v4097_v21 }
 0x568   :  { %v4087_v1 = vor.u32 4788187, %v4086_v30  ;;  %v4126_v42 = vmul.f32 %v3969_v5, %v3969_v5  ;;  %8438 = vmatmul.msk.f32.vlgmr.msrb.gmra.mxu0 %vm394_vm1, %v8933_v27  ;;  %8439 = vmatmul.msk.f32.vlgmr.msrb.gmra.mxu1 %vm394_vm1, %v8933_v27  ;;  %v4090_v32 = vcvt.s32.f32 %v4083_v54 }
 0x569   :  { %4266 = vmatpush.msra.mxu2 %v3379_v10  ;;  %4286 = vmatpush.msra.mxu3 %v3411_v52  ;;  %vm4116_vm6 = vcmp.eq.s32.totalorder %v4114_v22, 0  ;;  %vm4119_vm8 = vcmp.eq.s32.totalorder %v4114_v22, 2  ;;  %vm4115_vm10 = vcmp.lt.s32.totalorder %v4114_v22, 2 }
 0x56a   :  { %v4088_v50 = vand.u32 2147483647, %v4087_v1  ;;  %v4130_v23 = vsub.f32 1.0, %v4126_v42 }
 0x56b   :  { %4267 = vmatpush.msra.mxu2 %v3377_v62  ;;  %4287 = vmatpush.msra.mxu3 %v3409_v28  ;;  %v4305_v62 = vld [vmem:[#allocation8 + $0x98] sm:$0xff] }
 0x56c   :  { %v4091_v20 = vmul.f32 %v4090_v32, %v4088_v50  ;;  %v4134_v29 = vadd.f32 %v4130_v23, %v4126_v42  ;;  %v4309_v42 = vld [vmem:[#allocation8 + $0x198] sm:$0xff] }
 0x56d   :  { %4268 = vmatpush.msra.mxu2 %v3375_v11  ;;  %4288 = vmatpush.msra.mxu3 %v3407_v38 }
 0x56e   :  { %v4092_v41 = vxor.u32 2147483648, %v4091_v20  ;;  %4194 = vmatmul.f32.vlgmr.msrb.gmra.mxu2 %v4134_v29 }
 0x56f   :  { %4269 = vmatpush.msra.mxu2 %v3373_v61  ;;  %4289 = vmatpush.msra.mxu3 %v3405_v26 }
 0x570   :  { %v4093_v17 = vsel %vm3972_vm14, %v4092_v41, %v4091_v20 }
 0x571   :  { %v4096_v37 = vsel %vm11196_vm2, %v10837_v35, %v4093_v17  ;;  %4270 = vmatpush.msra.mxu2 %v3371_v16  ;;  %4290 = vmatpush.msra.mxu3 %v3403_v57 }
 0x572   :  { %v4098_v34 = vmul.f32 %v4096_v37, %v4096_v37 }
 0x573   :  { %4271 = vmatpush.msra.mxu2 %v3369_v8  ;;  %4291 = vmatpush.msra.mxu3 %v3401_v36 }
 0x574   :  { %v4099_v39 = vmul.f32 -0.001358992, %v4098_v34  ;;  %v4106_v14 = vmul.f32 -0.00019511016, %v4098_v34 }
 0x575   :  { %4272 = vmatpush.msra.mxu2 %v3367_v46  ;;  %4292 = vmatpush.msra.mxu3 %v3399_v55 }
 0x576   :  { %v4100_v43 = vadd.f32 0.041655596, %v4099_v39  ;;  %v4107_v45 = vadd.f32 0.008332121, %v4106_v14 }
 0x577   :  { %4273 = vmatpush.msra.mxu2 %v3365_v49  ;;  %4293 = vmatpush.msra.mxu3 %v3397_v2 }
 0x578   :  { %v4101_v63 = vmul.f32 %v4100_v43, %v4098_v34  ;;  %v4108_v44 = vmul.f32 %v4107_v45, %v4098_v34  ;;  %4274 = vmatmul.f32.vlgmr.msra.gmra.mxu2 %v4134_v29 }
 0x579   :  { %4492 = vmatpush.msrb.mxu2 %v4308_v9 }
 0x57a   :  { %v4102_v59 = vadd.f32 -0.4999988, %v4101_v63  ;;  %v4109_v18 = vadd.f32 -0.16666654, %v4108_v44 }
 0x57b   :  { %4493 = vmatpush.msrb.mxu2 %v4304_v31 }
 0x57c   :  { %v4103_v6 = vmul.f32 %v4102_v59, %v4098_v34  ;;  %v4110_v15 = vmul.f32 %v4109_v18, %v4098_v34 }
 0x57e   :  { %v4104_v40 = vadd.f32 1.0, %v4103_v6  ;;  %v4111_v19 = vadd.f32 1.0, %v4110_v15 }
 0x580   :  { %v4112_v7 = vmul.f32 %v4111_v19, %v4096_v37  ;;  %v4120_v53 = vxor.u32 2147483648, %v4104_v40  ;;  %8440 = vmatmul.msk.f32.vlgmr.msrb.gmra.mxu2 %vm394_vm1, %v8933_v27 }
 0x582   :  { %v4117_v24 = vxor.u32 2147483648, %v4112_v7  ;;  %v4121_v54 = vsel %vm4119_vm8, %v4120_v53, %v4112_v7 }
 0x584   :  { %v4118_v12 = vsel %vm4116_vm6, %v4104_v40, %v4117_v24 }
 0x585   :  { %v4122_v30 = vsel %vm4115_vm10, %v4118_v12, %v4121_v54 }
 0x586   :  { %v4123_v5 = vsel %vm4113_vm15, nan, %v4122_v30 }
 0x587   :  { %v4127_v10 = vmul.f32 %v4123_v5, %v4123_v5 }
 0x589   :  { %v4131_v52 = vsub.f32 1.0, %v4127_v10 }
 0x58b   :  { %v4135_v1 = vadd.f32 %v4131_v52, %v4127_v10 }
 0x58d   :  { %4214 = vmatmul.f32.vlgmr.msrb.gmra.mxu3 %v4135_v1 }
 0x58e   :  { %4512 = vmatpush.msrb.mxu3 %v4309_v42 }
 0x590   :  { %4513 = vmatpush.msrb.mxu3 %v4305_v62 }
 0x595   :  { %4294 = vmatmul.f32.vlgmr.msra.gmra.mxu3 %v4135_v1 }
 0x59d   :  { %8441 = vmatmul.msk.f32.vlgmr.msrb.gmra.mxu3 %vm394_vm1, %v8933_v27 }
 0x5d3   :  { %v4155_v28 = vpop.f32.mrf.mxu0  ;;  %v4175_v50 = vpop.f32.mrf.mxu1 }
 0x5d4   :  { %v11216_v32 = vadd.f32 %v4175_v50, %v4155_v28 }
 0x5dd   :  { %v4235_v23 = vpop.f32.mrf.mxu0  ;;  %v4255_v35 = vpop.f32.mrf.mxu1 }
 0x5de   :  { %v11218_v11 = vadd.f32 %v4255_v35, %v4235_v23 }
 0x5e5   :  { %v11220_v38 = vpop.f32.mrf.mxu0  ;;  %v11222_v20 = vpop.f32.mrf.mxu1 }
 0x5e6   :  { %v4518_v29 = vand.u32 2147483647, %v11220_v38  ;;  %v4521_v61 = vand.u32 2139095040, %v11220_v38  ;;  %v4672_v26 = vand.u32 2147483647, %v11222_v20  ;;  %v4675_v41 = vand.u32 2139095040, %v11222_v20 }
 0x5e8   :  { %v4522_v16 = vshrl.u32 %v4521_v61, 23  ;;  %v4525_v57 = vand.u32 8388607, %v4518_v29  ;;  %v4676_v4 = vshrl.u32 %v4675_v41, 23  ;;  %v4679_v8 = vand.u32 8388607, %v4672_v26 }
 0x5ea   :  { %v8442_v17 = vadd.s32 4294967169, %v4522_v16  ;;  %v4526_v37 = vor.u32 8388608, %v4525_v57  ;;  %v8445_v36 = vadd.s32 4294967169, %v4676_v4  ;;  %v4680_v39 = vor.u32 8388608, %v4679_v8 }
 0x5ec   :  { %v4528_v34 = vadd.s32 1, %v8442_v17  ;;  %v4682_v46 = vadd.s32 1, %v8445_v36  ;;  %v11232_v55 = vshll.u32 %v4526_v37, 8  ;;  %v11237_v9 = vshll.u32 %v4680_v39, 8 }
 0x5ee   :  { %vm4529_vm4 = vcmp.gt.s32.totalorder %v4528_v34, 0  ;;  %vm4683_vm3 = vcmp.gt.s32.totalorder %v4682_v46, 0  ;;  %v4567_v43 = vand.u32 65535, %v11232_v55  ;;  %v4568_v31 = vshrl.u32 %v11232_v55, 16 }
 0x5ef   :  { %v4530_v14 = vsel %vm4529_vm4, %v4528_v34, 0  ;;  %v4684_v49 = vsel %vm4683_vm3, %v4682_v46, 0 }
 0x5f0   :  { %v4532_v0 = vand.u32 31, %v4530_v14  ;;  %v11235_v45 = vand.u32 31, %v4684_v49  ;;  %v11239_v63 = vshrl.u32 %v4530_v14, 5  ;;  %v11284_v46 = vshrl.u32 %v4684_v49, 5 }
 0x5f2   :  { %v4533_v2 = vsub.s32 32, %v4532_v0  ;;  %v4535_v44 = vshll.u32 %v8683_v56, %v4532_v0  ;;  %v4538_v25 = vshll.u32 %v13439_v58, %v4532_v0  ;;  %v4541_v21 = vshll.u32 %v13462_v47, %v4532_v0 }
 0x5f3   :  { %v4544_v15 = vshll.u32 %v13463_v33, %v4532_v0  ;;  %v4547_v19 = vshll.u32 %v13464_v60, %v4532_v0  ;;  %v11253_v12 = vsub.s32 32, %v11235_v45  ;;  %vm4550_vm11 = vcmp.lt.s32.totalorder %v11239_v63, 1 }
 0x5f4   :  { %v4536_v59 = vshrl.u32 %v13439_v58, %v4533_v2  ;;  %v4539_v18 = vshrl.u32 %v13462_v47, %v4533_v2  ;;  %v4542_v6 = vshrl.u32 %v13463_v33, %v4533_v2  ;;  %v4545_v40 = vshrl.u32 %v13464_v60, %v4533_v2 }
 0x5f5   :  { %v4548_v22 = vshrl.u32 %v13449_v51, %v4533_v2  ;;  %vm4551_vm0 = vcmp.lt.s32.totalorder %v11239_v63, 2  ;;  %v4534_v5 = vshrl.u32 %v8683_v56, %v4533_v2  ;;  %vm4553_vm5 = vcmp.lt.s32.totalorder %v11239_v63, 4 }
 0x5f6   :  { %v4537_v7 = vor.u32 %v4536_v59, %v4535_v44  ;;  %v4540_v53 = vor.u32 %v4539_v18, %v4538_v25  ;;  %v4543_v24 = vor.u32 %v4542_v6, %v4541_v21  ;;  %v4546_v54 = vor.u32 %v4545_v40, %v4544_v15 }
 0x5f7   :  { %v4549_v30 = vor.u32 %v4548_v22, %v4547_v19  ;;  %vm4552_vm7 = vcmp.lt.s32.totalorder %v11239_v63, 3  ;;  %v4689_v62 = vshll.u32 %v8683_v56, %v11235_v45  ;;  %v4690_v35 = vshrl.u32 %v13439_v58, %v11253_v12 }
 0x5f8   :  { %v4558_v10 = vsel %vm4550_vm11, %v4537_v7, %v4540_v53  ;;  %v4562_v52 = vsel %vm4550_vm11, %v4540_v53, %v4543_v24  ;;  %v4559_v1 = vsel %vm4553_vm5, %v4546_v54, 920167782  ;;  %v4555_v28 = vsel %vm4553_vm5, %v4543_v24, 2102212464 }
 0x5f9   :  { %v4563_v42 = vsel %vm4553_vm5, %v4549_v30, 1326507024  ;;  %v4560_v50 = vsel %vm4552_vm7, %v4543_v24, %v4559_v1  ;;  %v4692_v16 = vshll.u32 %v13439_v58, %v11235_v45  ;;  %v4693_v57 = vshrl.u32 %v13462_v47, %v11253_v12 }
 0x5fa   :  { %v4564_v23 = vsel %vm4552_vm7, %v4546_v54, %v4563_v42  ;;  %v4561_v61 = vsel %vm4551_vm0, %v4558_v10, %v4560_v50  ;;  %v4554_v36 = vsel %vm4550_vm11, %v4534_v5, %v4537_v7  ;;  %v4556_v34 = vsel %vm4552_vm7, %v4540_v53, %v4555_v28 }
 0x5fb   :  { %v4565_v41 = vsel %vm4551_vm0, %v4562_v52, %v4564_v23  ;;  %v4591_v37 = vand.u32 65535, %v4561_v61  ;;  %v4592_v8 = vshrl.u32 %v4561_v61, 16  ;;  %v11286_v39 = vor.u32 %v4690_v35, %v4689_v62 }
 0x5fc   :  { %v4569_v4 = vand.u32 65535, %v4565_v41  ;;  %v4570_v17 = vshrl.u32 %v4565_v41, 16  ;;  %v11288_v2 = vor.u32 %v4693_v57, %v4692_v16  ;;  %v4696_v44 = vshrl.u32 %v13463_v33, %v11253_v12  ;;  %v4195_v41 = vpop.f32.mrf.mxu2 }
 0x5fd   :  { %v4594_v59 = vmul.u32 %v4592_v8, %v4567_v43  ;;  %v4595_v18 = vmul.u32 %v4591_v37, %v4568_v31  ;;  %v4695_v21 = vshll.u32 %v13462_v47, %v11235_v45  ;;  %v4593_v40 = vmul.u32 %v4591_v37, %v4567_v43 }
 0x5fe   :  { %v4572_v14 = vmul.u32 %v4570_v17, %v4567_v43  ;;  %v4573_v0 = vmul.u32 %v4569_v4, %v4568_v31  ;;  %v4571_v25 = vmul.u32 %v4569_v4, %v4567_v43  ;;  %v4574_v6 = vmul.u32 %v4570_v17, %v4568_v31 }
 0x5ff   :  { %v4596_v49 = vmul.u32 %v4592_v8, %v4568_v31  ;;  %v4597_v53 = vshll.u32 %v4594_v59, 16  ;;  %v4599_v54 = vshll.u32 %v4595_v18, 16  ;;  %v11294_v30 = vor.u32 %v4696_v44, %v4695_v21 }
 0x600   :  { %v4575_v15 = vshll.u32 %v4572_v14, 16  ;;  %v4576_v19 = vshrl.u32 %v4572_v14, 16  ;;  %v4577_v22 = vshll.u32 %v4573_v0, 16  ;;  %v4578_v7 = vshrl.u32 %v4573_v0, 16 }
 0x601   :  { %vm4601_vm12 = vc.u32 %v4593_v40, %v4597_v53  ;;  %v4603_v10 = vadd.s32 %v4597_v53, %v4593_v40  ;;  %v4699_v52 = vshrl.u32 %v13464_v60, %v11253_v12  ;;  %v4698_v31 = vshll.u32 %v13463_v33, %v11235_v45 }
 0x602   :  { %vm4579_vm9 = vc.u32 %v4571_v25, %v4575_v15  ;;  %v4581_v24 = vadd.s32 %v4575_v15, %v4571_v25  ;;  %v4602_v43 = vsel %vm4601_vm12, 1, %v8689_v13  ;;  %v4701_v28 = vshll.u32 %v13464_v60, %v11235_v45 }
 0x603   :  { %v4580_v5 = vsel %vm4579_vm9, 1, %v8689_v13  ;;  %v4604_v62 = vadd.s32 %v4602_v43, %v4596_v49  ;;  %vm4605_vm14 = vc.u32 %v4603_v10, %v4599_v54  ;;  %v4700_v35 = vor.u32 %v4699_v52, %v4698_v31 }
 0x604   :  { %v4582_v1 = vadd.s32 %v4580_v5, %v4574_v6  ;;  %vm4583_vm13 = vc.u32 %v4581_v24, %v4577_v22  ;;  %v4606_v23 = vsel %vm4605_vm14, 1, %v8689_v13  ;;  %v4702_v61 = vshrl.u32 %v13449_v51, %v11253_v12 }
 0x605   :  { %v4584_v42 = vsel %vm4583_vm13, 1, %v8689_v13  ;;  %v4598_v16 = vshrl.u32 %v4594_v59, 16  ;;  %v4600_v57 = vshrl.u32 %v4595_v18, 16  ;;  %v11308_v4 = vadd.s32 %v4603_v10, %v4599_v54 }
 0x606   :  { %v4586_v50 = vadd.s32 %v4584_v42, %v4582_v1  ;;  %v4608_v17 = vadd.s32 %v4606_v23, %v4604_v62  ;;  %v4703_v8 = vor.u32 %v4702_v61, %v4701_v28  ;;  %vm4704_vm2 = vcmp.lt.s32.totalorder %v11284_v46, 1  ;;  %v4275_v62 = vpop.f32.mrf.mxu2 }
 0x607   :  { %vm4707_vm6 = vcmp.lt.s32.totalorder %v11284_v46, 4  ;;  %vm4706_vm8 = vcmp.lt.s32.totalorder %v11284_v46, 3  ;;  %v4712_v14 = vsel %vm4704_vm2, %v11286_v39, %v11288_v2  ;;  %vm4705_vm10 = vcmp.lt.s32.totalorder %v11284_v46, 2 }
 0x608   :  { %v4587_v37 = vadd.s32 %v4586_v50, %v4576_v19  ;;  %v4609_v45 = vadd.s32 %v4608_v17, %v4598_v16  ;;  %v4713_v0 = vsel %vm4707_vm6, %v4700_v35, 920167782  ;;  %v4716_v59 = vsel %vm4704_vm2, %v11288_v2, %v11294_v30 }
 0x609   :  { %v4714_v25 = vsel %vm4706_vm8, %v11294_v30, %v4713_v0  ;;  %v4557_v18 = vsel %vm4551_vm0, %v4554_v36, %v4556_v34  ;;  %v4717_v15 = vsel %vm4707_vm6, %v4703_v8, 1326507024  ;;  %v4721_v49 = vand.u32 65535, %v11237_v9 }
 0x60a   :  { %v11319_v44 = vadd.s32 %v4587_v37, %v4578_v7  ;;  %v4610_v21 = vadd.s32 %v4609_v45, %v4600_v57  ;;  %v4715_v6 = vsel %vm4705_vm10, %v4712_v14, %v4714_v25  ;;  %v4718_v40 = vsel %vm4706_vm8, %v4700_v35, %v4717_v15 }
 0x60b   :  { %v4745_v19 = vand.u32 65535, %v4715_v6  ;;  %v4719_v63 = vsel %vm4705_vm10, %v4716_v59, %v4718_v40  ;;  %v4722_v36 = vshrl.u32 %v11237_v9, 16  ;;  %v4746_v34 = vshrl.u32 %v4715_v6, 16 }
 0x60c   :  { %vm4613_vm15 = vc.u32 %v11319_v44, %v11308_v4  ;;  %v4614_v22 = vadd.s32 1, %v4610_v21  ;;  %v4611_v7 = vmul.u32 %v11232_v55, %v4557_v18  ;;  %v4723_v53 = vand.u32 65535, %v4719_v63 }
 0x60d   :  { %v4724_v24 = vshrl.u32 %v4719_v63, 16  ;;  %v4748_v5 = vmul.u32 %v4746_v34, %v4721_v49  ;;  %v4749_v10 = vmul.u32 %v4745_v19, %v4722_v36  ;;  %v4196_v52 = vadd.f32 %v4195_v41, %v11216_v32 }
 0x60e   :  { %v4615_v54 = vsel %vm4613_vm15, %v4614_v22, %v4610_v21  ;;  %v4727_v42 = vmul.u32 %v4723_v53, %v4722_v36  ;;  %v4688_v28 = vshrl.u32 %v8683_v56, %v11253_v12  ;;  %v4747_v50 = vmul.u32 %v4745_v19, %v4721_v49 }
 0x60f   :  { %v4616_v43 = vadd.s32 %v4615_v54, %v4611_v7  ;;  %v4726_v31 = vmul.u32 %v4724_v24, %v4721_v49  ;;  %v4750_v23 = vmul.u32 %v4746_v34, %v4722_v36  ;;  %v4751_v35 = vshll.u32 %v4748_v5, 16 }
 0x610   :  { %v4215_v1 = vpop.f32.mrf.mxu3  ;;  %v4725_v55 = vmul.u32 %v4723_v53, %v4721_v49  ;;  %v4728_v16 = vmul.u32 %v4724_v24, %v4722_v36  ;;  %v4731_v17 = vshll.u32 %v4727_v42, 16  ;;  %v4753_v37 = vshll.u32 %v4749_v10, 16  ;;  %v11371_v24 = vpop.f32.mrf.mxu2 }
 0x611   :  { %v4617_v61 = vadd.s32 536870912, %v4616_v43  ;;  %v4729_v57 = vshll.u32 %v4726_v31, 16  ;;  %vm4755_vm4 = vc.u32 %v4747_v50, %v4751_v35  ;;  %v4757_v8 = vadd.s32 %v4751_v35, %v4747_v50 }
 0x612   :  { %v4756_v45 = vsel %vm4755_vm4, 1, %v8689_v13  ;;  %v4708_v12 = vsel %vm4704_vm2, %v4688_v28, %v11286_v39  ;;  %v4709_v59 = vsel %vm4707_vm6, %v11294_v30, 2102212464  ;;  %v4216_v15 = vadd.f32 %v4215_v1, %v4196_v52 }
 0x613   :  { %v11347_v32 = vshrl.u32 %v4617_v61, 30  ;;  %vm4733_vm3 = vc.u32 %v4725_v55, %v4729_v57  ;;  %v4735_v41 = vadd.s32 %v4729_v57, %v4725_v55  ;;  %v4758_v0 = vadd.s32 %v4756_v45, %v4750_v23 }
 0x614   :  { %v4734_v14 = vsel %vm4733_vm3, 1, %v8689_v13  ;;  %vm4759_vm11 = vc.u32 %v4757_v8, %v4753_v37  ;;  %v4276_v40 = vadd.f32 %v4275_v62, %v11218_v11  ;;  %v4730_v49 = vshrl.u32 %v4726_v31, 16 }
 0x615   :  { %v4619_v25 = vshll.u32 %v11347_v32, 30  ;;  %v4736_v18 = vadd.s32 %v4734_v14, %v4728_v16  ;;  %vm4737_vm0 = vc.u32 %v4735_v41, %v4731_v17  ;;  %v4760_v6 = vsel %vm4759_vm11, 1, %v8689_v13 }
 0x616   :  { %v4738_v21 = vsel %vm4737_vm0, 1, %v8689_v13  ;;  %v4762_v22 = vadd.s32 %v4760_v6, %v4758_v0  ;;  %v4710_v36 = vsel %vm4706_vm8, %v11288_v2, %v4709_v59  ;;  %v4752_v30 = vshrl.u32 %v4748_v5, 16 }
 0x617   :  { %v11361_v39 = vsub.s32 %v4616_v43, %v4619_v25  ;;  %v4740_v19 = vadd.s32 %v4738_v21, %v4736_v18  ;;  %v11367_v34 = vadd.f32 %v4216_v15, %v10764_v3  ;;  %v4732_v54 = vshrl.u32 %v4727_v42, 16 }
 0x618   :  { %v4295_v63 = vpop.f32.mrf.mxu3  ;;  %v4754_v52 = vshrl.u32 %v4749_v10, 16  ;;  %v4763_v1 = vadd.s32 %v4762_v22, %v4752_v30  ;;  %v4711_v3 = vsel %vm4705_vm10, %v4708_v12, %v4710_v36  ;;  %v11379_v5 = vadd.s32 %v4757_v8, %v4753_v37 }
 0x619   :  { %v4296_v7 = vadd.f32 %v4295_v63, %v4276_v40  ;;  %vm4621_vm5 = vcmp.lt.s32.totalorder %v11361_v39, 0  ;;  %v4622_v53 = vsub.s32 0, %v11361_v39  ;;  %v4741_v11 = vadd.s32 %v4740_v19, %v4730_v49 }
 0x61a   :  { %v4764_v28 = vadd.s32 %v4763_v1, %v4754_v52  ;;  %v4829_v50 = vand.u32 2139095040, %v11371_v24  ;;  %v4826_v37 = vand.u32 2147483647, %v11371_v24  ;;  %v4612_v21 = vadd.s32 %v11308_v4, %v11319_v44 }
 0x61b   :  { %v11374_v43 = vadd.f32 %v4296_v7, %v10788_v48  ;;  %v4623_v2 = vsel %vm4621_vm5, %v4622_v53, %v11361_v39  ;;  %v11381_v62 = vadd.s32 %v4741_v11, %v4732_v54  ;;  %v4765_v48 = vmul.u32 %v11237_v9, %v4711_v3 }
 0x61c   :  { %v4624_v31 = vclz %v4623_v2  ;;  %v4768_v10 = vadd.s32 1, %v4764_v28  ;;  %v4830_v42 = vshrl.u32 %v4829_v50, 23  ;;  %v4833_v9 = vand.u32 8388607, %v4826_v37 }
 0x61d   :  { %vm4767_vm7 = vc.u32 %v11381_v62, %v11379_v5  ;;  %vm4520_vm15 = vcmp.lt.s32.totalorder %v11220_v38, 0  ;;  %vm11460_vm4 = vcmp.le.f32.partialorder %v4518_v29, 0.7853982 }
 0x61e   :  { %v8443_v23 = vadd.s32 4294967294, %v4624_v31  ;;  %v4769_v35 = vsel %vm4767_vm7, %v4768_v10, %v4764_v28  ;;  %v8448_v55 = vadd.s32 4294967169, %v4830_v42  ;;  %v4834_v15 = vor.u32 8388608, %v4833_v9 }
 0x61f   :  { %v4770_v61 = vadd.s32 %v4769_v35, %v4765_v48  ;;  %vm11485_vm7 = vcmp.le.f32.partialorder %v4672_v26, 0.7853982 }
 0x620   :  { %vm8444_vm9 = vcmp.lt.s32.totalorder %v8443_v23, 0  ;;  %v4836_v57 = vadd.s32 1, %v8448_v55  ;;  %v11424_v50 = vpop.f32.mrf.mxu3 }
 0x621   :  { %v4627_v46 = vsel %vm8444_vm9, 0, %v8443_v23  ;;  %v4771_v16 = vadd.s32 536870912, %v4770_v61 }
 0x622   :  { %v4632_v17 = vsub.s32 4294967266, %v4627_v46  ;;  %vm4837_vm12 = vcmp.gt.s32.totalorder %v4836_v57, 0  ;;  %v4628_v59 = vsub.s32 32, %v4627_v46  ;;  %v4629_v40 = vshll.u32 %v11361_v39, %v4627_v46 }
 0x623   :  { %v11388_v8 = vshrl.u32 %v4771_v16, 30  ;;  %v4838_v41 = vsel %vm4837_vm12, %v4836_v57, 0  ;;  %v4983_v46 = vand.u32 2139095040, %v11424_v50  ;;  %v11435_v57 = vshll.u32 %v4834_v15, 8 }
 0x624   :  { %v4840_v12 = vand.u32 31, %v4838_v41  ;;  %v4633_v14 = vadd.s32 127, %v4632_v17  ;;  %v4630_v63 = vshrl.u32 %v4612_v21, %v4628_v59  ;;  %v11407_v30 = vshrl.u32 %v4838_v41, 5 }
 0x625   :  { %v4773_v45 = vshll.u32 %v11388_v8, 30  ;;  %v4766_v21 = vadd.s32 %v11379_v5, %v11381_v62  ;;  %vm4674_vm12 = vcmp.lt.s32.totalorder %v11222_v20, 0 }
 0x626   :  { %v11395_v25 = vsub.s32 32, %v4840_v12  ;;  %v4634_v6 = vshll.u32 %v4633_v14, 23  ;;  %v4843_v7 = vshll.u32 %v8683_v56, %v4840_v12  ;;  %v4846_v4 = vshll.u32 %v13439_v58, %v4840_v12 }
 0x627   :  { %v11393_v0 = vsub.s32 %v4770_v61, %v4773_v45  ;;  %v4852_v39 = vshll.u32 %v13463_v33, %v4840_v12  ;;  %v4849_v52 = vshll.u32 %v13462_v47, %v4840_v12  ;;  %v4855_v28 = vshll.u32 %v13464_v60, %v4840_v12 }
 0x628   :  { %v4844_v19 = vshrl.u32 %v13439_v58, %v11395_v25  ;;  %v4847_v22 = vshrl.u32 %v13462_v47, %v11395_v25  ;;  %v4850_v44 = vshrl.u32 %v13463_v33, %v11395_v25  ;;  %v4853_v53 = vshrl.u32 %v13464_v60, %v11395_v25 }
 0x629   :  { %vm4775_vm13 = vcmp.lt.s32.totalorder %v11393_v0, 0  ;;  %v4776_v18 = vsub.s32 0, %v11393_v0  ;;  %v4635_v11 = vor.u32 4788187, %v4634_v6  ;;  %v4856_v1 = vshrl.u32 %v13449_v51, %v11395_v25 }
 0x62a   :  { %v11419_v2 = vor.u32 %v4844_v19, %v4843_v7  ;;  %v11421_v3 = vor.u32 %v4847_v22, %v4846_v4  ;;  %v4854_v31 = vor.u32 %v4853_v53, %v4852_v39  ;;  %v4631_v23 = vor.u32 %v4630_v63, %v4629_v40 }
 0x62b   :  { %v4777_v49 = vsel %vm4775_vm13, %v4776_v18, %v11393_v0  ;;  %v4851_v48 = vor.u32 %v4850_v44, %v4849_v52  ;;  %v4857_v42 = vor.u32 %v4856_v1, %v4855_v28  ;;  %v4636_v35 = vand.u32 2147483647, %v4635_v11 }
 0x62c   :  { %v4778_v36 = vclz %v4777_v49  ;;  %vm4858_vm2 = vcmp.lt.s32.totalorder %v11407_v30, 1  ;;  %vm4861_vm6 = vcmp.lt.s32.totalorder %v11407_v30, 4  ;;  %v4638_v17 = vcvt.s32.f32 %v4631_v23 }
 0x62d   :  { %v4866_v55 = vsel %vm4858_vm2, %v11419_v2, %v11421_v3  ;;  %v4867_v16 = vsel %vm4861_vm6, %v4854_v31, 920167782  ;;  %vm4859_vm8 = vcmp.lt.s32.totalorder %v11407_v30, 2  ;;  %vm4860_vm10 = vcmp.lt.s32.totalorder %v11407_v30, 3 }
 0x62e   :  { %v8446_v54 = vadd.s32 4294967294, %v4778_v36  ;;  %v4868_v12 = vsel %vm4860_vm10, %v4851_v48, %v4867_v16  ;;  %v4870_v14 = vsel %vm4858_vm2, %v11421_v3, %v4851_v48  ;;  %v4871_v9 = vsel %vm4861_vm6, %v4857_v42, 1326507024 }
 0x62f   :  { %v4639_v59 = vmul.f32 %v4638_v17, %v4636_v35  ;;  %v4869_v18 = vsel %vm4859_vm8, %v4866_v55, %v4868_v12  ;;  %v4872_v15 = vsel %vm4860_vm10, %v4854_v31, %v4871_v9  ;;  %v4875_v19 = vand.u32 65535, %v11435_v57 }
 0x630   :  { %vm8447_vm14 = vcmp.lt.s32.totalorder %v8446_v54, 0  ;;  %v4900_v40 = vshrl.u32 %v4869_v18, 16  ;;  %v4873_v49 = vsel %vm4859_vm8, %v4870_v14, %v4872_v15  ;;  %v4984_v22 = vshrl.u32 %v4983_v46, 23 }
 0x631   :  { %v4781_v10 = vsel %vm8447_vm14, 0, %v8446_v54  ;;  %v4876_v36 = vshrl.u32 %v11435_v57, 16  ;;  %v4877_v7 = vand.u32 65535, %v4873_v49  ;;  %v4878_v4 = vshrl.u32 %v4873_v49, 16 }
 0x632   :  { %v4786_v61 = vsub.s32 4294967266, %v4781_v10  ;;  %v4782_v41 = vsub.s32 32, %v4781_v10  ;;  %v4640_v44 = vxor.u32 2147483648, %v4639_v59  ;;  %v4902_v53 = vmul.u32 %v4900_v40, %v4875_v19 }
 0x633   :  { %v4783_v5 = vshll.u32 %v11393_v0, %v4781_v10  ;;  %v4880_v62 = vmul.u32 %v4878_v4, %v4875_v19  ;;  %v4881_v11 = vmul.u32 %v4877_v7, %v4876_v36  ;;  %v4899_v54 = vand.u32 65535, %v4869_v18 }
 0x634   :  { %v4787_v45 = vadd.s32 127, %v4786_v61  ;;  %v4784_v63 = vshrl.u32 %v4766_v21, %v4782_v41  ;;  %v8451_v52 = vadd.s32 4294967169, %v4984_v22  ;;  %v4879_v28 = vmul.u32 %v4877_v7, %v4875_v19 }
 0x635   :  { %v4883_v23 = vshll.u32 %v4880_v62, 16  ;;  %v4641_v42 = vsel %vm4520_vm15, %v4640_v44, %v4639_v59  ;;  %v4905_v0 = vshll.u32 %v4902_v53, 16  ;;  %v4980_v10 = vand.u32 2147483647, %v11424_v50 }
 0x636   :  { %v4788_v6 = vshll.u32 %v4787_v45, 23  ;;  %v4785_v31 = vor.u32 %v4784_v63, %v4783_v5  ;;  %v4882_v46 = vmul.u32 %v4878_v4, %v4876_v36  ;;  %v4885_v61 = vshll.u32 %v4881_v11, 16 }
 0x637   :  { %vm4887_vm3 = vc.u32 %v4879_v28, %v4883_v23  ;;  %v4889_v55 = vadd.s32 %v4883_v23, %v4879_v28  ;;  %v4901_v29 = vmul.u32 %v4899_v54, %v4875_v19  ;;  %v4903_v17 = vmul.u32 %v4899_v54, %v4876_v36 }
 0x638   :  { %v4789_v39 = vor.u32 4788187, %v4788_v6  ;;  %v4888_v16 = vsel %vm4887_vm3, 1, %v8689_v13  ;;  %v4990_v41 = vadd.s32 1, %v8451_v52  ;;  %v11471_v45 = vsel %vm11460_vm4, %v11220_v38, %v4641_v42 }
 0x639   :  { %v4792_v12 = vcvt.s32.f32 %v4785_v31  ;;  %v4890_v14 = vadd.s32 %v4888_v16, %v4882_v46  ;;  %vm4891_vm11 = vc.u32 %v4889_v55, %v4885_v61  ;;  %v4863_v9 = vsel %vm4861_vm6, %v4851_v48, 2102212464 }
 0x63a   :  { %v4790_v35 = vand.u32 2147483647, %v4789_v39  ;;  %v4892_v59 = vsel %vm4891_vm11, 1, %v8689_v13  ;;  %v4904_v18 = vmul.u32 %v4900_v40, %v4876_v36  ;;  %vm4909_vm0 = vc.u32 %v4901_v29, %v4905_v0 }
 0x63b   :  { %v4884_v6 = vshrl.u32 %v4880_v62, 16  ;;  %v4894_v15 = vadd.s32 %v4892_v59, %v4890_v14  ;;  %v4910_v49 = vsel %vm4909_vm0, 1, %v8689_v13  ;;  %v4907_v19 = vshll.u32 %v4903_v17, 16 }
 0x63c   :  { %v4793_v21 = vmul.f32 %v4792_v12, %v4790_v35  ;;  %v4911_v22 = vadd.s32 %v4905_v0, %v4901_v29  ;;  %v4912_v63 = vadd.s32 %v4910_v49, %v4904_v18  ;;  %vm4991_vm5 = vcmp.gt.s32.totalorder %v4990_v41, 0 }
 0x63d   :  { %v11479_v7 = vmul.f32 %v11471_v45, %v11471_v45  ;;  %v4842_v48 = vshrl.u32 %v8683_v56, %v11395_v25  ;;  %v4895_v4 = vadd.s32 %v4894_v15, %v4884_v6  ;;  %v4992_v44 = vsel %vm4991_vm5, %v4990_v41, 0 }
 0x63e   :  { %v4886_v36 = vshrl.u32 %v4881_v11, 16  ;;  %vm4913_vm9 = vc.u32 %v4911_v22, %v4907_v19  ;;  %v4994_v39 = vand.u32 31, %v4992_v44  ;;  %v4794_v5 = vxor.u32 2147483648, %v4793_v21 }
 0x63f   :  { %v4862_v62 = vsel %vm4858_vm2, %v4842_v48, %v11419_v2  ;;  %v4864_v25 = vsel %vm4860_vm10, %v11421_v3, %v4863_v9  ;;  %v4914_v54 = vsel %vm4913_vm9, 1, %v8689_v13  ;;  %v4906_v26 = vshrl.u32 %v4902_v53, 16 }
 0x640   :  { %v11496_v52 = vadd.s32 %v4895_v4, %v4886_v36  ;;  %v4916_v31 = vadd.s32 %v4914_v54, %v4912_v63  ;;  %v11498_v28 = vsub.s32 32, %v4994_v39  ;;  %v4654_v11 = vmul.f32 -0.00019511016, %v11479_v7  ;;  %v4340_v54 = vld [vmem:[#allocation9 + $0x10f0] sm:$0xff] }
 0x641   :  { %v4908_v23 = vshrl.u32 %v4903_v17, 16  ;;  %v4987_v2 = vand.u32 8388607, %v4980_v10  ;;  %v11504_v42 = vadd.s32 %v4911_v22, %v4907_v19  ;;  %v4795_v0 = vsel %vm4674_vm12, %v4794_v5, %v4793_v21  ;;  %5148 = vmatpush.msra.mxu0 %v4340_v54  ;;  %v4332_v54 = vld [vmem:[#allocation9 + $0x10b0] sm:$0xff] }
 0x642   :  { %v4917_v35 = vadd.s32 %v4916_v31, %v4906_v26  ;;  %v4998_v3 = vshrl.u32 %v13439_v58, %v11498_v28  ;;  %v5001_v53 = vshrl.u32 %v13462_v47, %v11498_v28  ;;  %v4865_v46 = vsel %vm4859_vm8, %v4862_v62, %v4864_v25  ;;  %v4372_v26 = vld [vmem:[#allocation9 + $0x11f0] sm:$0xff] }
 0x643   :  { %v4997_v61 = vshll.u32 %v8683_v56, %v4994_v39  ;;  %v5004_v55 = vshrl.u32 %v13463_v33, %v11498_v28  ;;  %vm4921_vm13 = vc.u32 %v11496_v52, %v11504_v42  ;;  %v11519_v29 = vshrl.u32 %v4992_v44, 5  ;;  %5168 = vmatpush.msra.mxu1 %v4372_v26  ;;  %v4364_v26 = vld [vmem:[#allocation9 + $0x11b0] sm:$0xff] }
 0x644   :  { %v4918_v16 = vadd.s32 %v4917_v35, %v4908_v23  ;;  %v5000_v17 = vshll.u32 %v13439_v58, %v4994_v39  ;;  %v5003_v12 = vshll.u32 %v13462_v47, %v4994_v39  ;;  %v5006_v30 = vshll.u32 %v13463_v33, %v4994_v39 }
 0x645   :  { %v11522_v41 = vor.u32 %v4998_v3, %v4997_v61  ;;  %v5007_v14 = vshrl.u32 %v13464_v60, %v11498_v28  ;;  %v5009_v18 = vshll.u32 %v13464_v60, %v4994_v39  ;;  %v5010_v21 = vshrl.u32 %v13449_v51, %v11498_v28 }
 0x646   :  { %v4922_v9 = vadd.s32 1, %v4918_v16  ;;  %v11528_v59 = vor.u32 %v5001_v53, %v5000_v17  ;;  %v11536_v6 = vsel %vm11485_vm7, %v11222_v20, %v4795_v0  ;;  %v4919_v15 = vmul.u32 %v11435_v57, %v4865_v46  ;;  %v4338_v53 = vld [vmem:[#allocation9 + $0x10e0] sm:$0xff] }
 0x647   :  { %v11539_v49 = vor.u32 %v5004_v55, %v5003_v12  ;;  %v5008_v19 = vor.u32 %v5007_v14, %v5006_v30  ;;  %v4988_v63 = vor.u32 8388608, %v4987_v2  ;;  %v5011_v48 = vor.u32 %v5010_v21, %v5009_v18  ;;  %v4370_v0 = vld [vmem:[#allocation9 + $0x11e0] sm:$0xff]  ;;  %5149 = vmatpush.msra.mxu0 %v4338_v53  ;;  %v4336_v30 = vld [vmem:[#allocation9 + $0x10d0] sm:$0xff] }
 0x648   :  { %v4923_v22 = vsel %vm4921_vm13, %v4922_v9, %v4918_v16  ;;  %vm5012_vm14 = vcmp.lt.s32.totalorder %v11519_v29, 1  ;;  %vm5015_vm2 = vcmp.lt.s32.totalorder %v11519_v29, 4  ;;  %v4647_v44 = vmul.f32 -0.001358992, %v11479_v7  ;;  %5169 = vmatpush.msra.mxu1 %v4370_v0  ;;  %v4368_v14 = vld [vmem:[#allocation9 + $0x11d0] sm:$0xff] }
 0x649   :  { %v4924_v4 = vadd.s32 %v4923_v22, %v4919_v15  ;;  %v11546_v36 = vmul.f32 %v11536_v6, %v11536_v6  ;;  %v5020_v57 = vsel %vm5012_vm14, %v11522_v41, %v11528_v59  ;;  %v5021_v39 = vsel %vm5015_vm2, %v5008_v19, 920167782  ;;  %5150 = vmatpush.msra.mxu0 %v4336_v30 }
 0x64a   :  { %v4655_v5 = vadd.f32 0.008332121, %v4654_v11  ;;  %vm5014_vm6 = vcmp.lt.s32.totalorder %v11519_v29, 3  ;;  %v5024_v25 = vsel %vm5012_vm14, %v11528_v59, %v11539_v49  ;;  %vm5013_vm8 = vcmp.lt.s32.totalorder %v11519_v29, 2  ;;  %5170 = vmatpush.msra.mxu1 %v4368_v14 }
 0x64b   :  { %v4925_v62 = vadd.s32 536870912, %v4924_v4  ;;  %v5022_v31 = vsel %vm5014_vm6, %v11539_v49, %v5021_v39  ;;  %v5025_v23 = vsel %vm5015_vm2, %v5011_v48, 1326507024  ;;  %v11565_v11 = vshll.u32 %v4988_v63, 8  ;;  %v4334_v48 = vld [vmem:[#allocation9 + $0x10c0] sm:$0xff] }
 0x64c   :  { %v11571_v35 = vsel %vm5013_vm8, %v5020_v57, %v5022_v31  ;;  %v5026_v3 = vsel %vm5014_vm6, %v5008_v19, %v5025_v23  ;;  %v4648_v46 = vadd.f32 0.041655596, %v4647_v44  ;;  %v4808_v61 = vmul.f32 -0.00019511016, %v11546_v36  ;;  %v4366_v44 = vld [vmem:[#allocation9 + $0x11c0] sm:$0xff]  ;;  %5151 = vmatpush.msra.mxu0 %v4334_v48 }
 0x64d   :  { %v11567_v2 = vshrl.u32 %v4925_v62, 30  ;;  %v5027_v55 = vsel %vm5013_vm8, %v5024_v25, %v5026_v3  ;;  %v5030_v17 = vshrl.u32 %v11565_v11, 16  ;;  %v4656_v9 = vmul.f32 %v4655_v5, %v11479_v7  ;;  %5171 = vmatpush.msra.mxu1 %v4366_v44 }
 0x64e   :  { %v5031_v12 = vand.u32 65535, %v5027_v55  ;;  %v5029_v18 = vand.u32 65535, %v11565_v11  ;;  %v5032_v21 = vshrl.u32 %v5027_v55, 16  ;;  %v5054_v15 = vshrl.u32 %v11571_v35, 16  ;;  %5152 = vmatpush.msra.mxu0 %v4332_v54  ;;  %v4330_v55 = vld [vmem:[#allocation9 + $0x10a0] sm:$0xff] }
 0x64f   :  { %v4927_v16 = vshll.u32 %v11567_v2, 30  ;;  %v4801_v19 = vmul.f32 -0.001358992, %v11546_v36  ;;  %v4642_v57 = vsub.s32 4, %v11347_v32  ;;  %v5053_v5 = vand.u32 65535, %v11571_v35  ;;  %5172 = vmatpush.msra.mxu1 %v4364_v26 }
 0x650   :  { %v11586_v63 = vmul.u32 %v5031_v12, %v5030_v17  ;;  %v5034_v39 = vmul.u32 %v5032_v21, %v5029_v18  ;;  %v11591_v62 = vmul.f32 %v4648_v46, %v11479_v7  ;;  %v4809_v25 = vadd.f32 0.008332121, %v4808_v61  ;;  %5153 = vmatpush.msra.mxu0 %v4330_v55  ;;  %v4358_v55 = vld [vmem:[#allocation9 + $0x1180] sm:$0xff] }
 0x651   :  { %v11584_v22 = vsub.s32 %v4924_v4, %v4927_v16  ;;  %v11595_v31 = vadd.f32 -0.16666654, %v4656_v9  ;;  %v5033_v23 = vmul.u32 %v5031_v12, %v5029_v18  ;;  %v11597_v53 = vmul.u32 %v5054_v15, %v5029_v18  ;;  %v4362_v16 = vld [vmem:[#allocation9 + $0x11a0] sm:$0xff] }
 0x652   :  { %v5037_v3 = vshll.u32 %v5034_v39, 16  ;;  %v11599_v35 = vadd.f32 0.041655596, %v4801_v19  ;;  %v5036_v46 = vmul.u32 %v5032_v21, %v5030_v17  ;;  %v5039_v61 = vshll.u32 %v11586_v63, 16  ;;  %5173 = vmatpush.msra.mxu1 %v4362_v16  ;;  %v4360_v21 = vld [vmem:[#allocation9 + $0x1190] sm:$0xff] }
 0x653   :  { %vm4929_vm10 = vcmp.lt.s32.totalorder %v11584_v22, 0  ;;  %v4930_v4 = vsub.s32 0, %v11584_v22  ;;  %v11603_v9 = vmul.u32 %v5053_v5, %v5030_v17  ;;  %v4810_v12 = vmul.f32 %v4809_v25, %v11546_v36  ;;  %v4326_v25 = vld [vmem:[#allocation9 + $0x1080] sm:$0xff] }
 0x654   :  { %vm5041_vm3 = vc.u32 %v5033_v23, %v5037_v3  ;;  %v5043_v14 = vadd.s32 %v5037_v3, %v5033_v23  ;;  %v5055_v19 = vmul.u32 %v5053_v5, %v5029_v18  ;;  %v5059_v44 = vshll.u32 %v11597_v53, 16  ;;  %5174 = vmatpush.msra.mxu1 %v4360_v21  ;;  %v4354_v21 = vld [vmem:[#allocation9 + $0x1160] sm:$0xff] }
 0x655   :  { %v4931_v0 = vsel %vm4929_vm10, %v4930_v4, %v11584_v22  ;;  %v5042_v48 = vsel %vm5041_vm3, 1, %v8689_v13  ;;  %v4328_v4 = vld [vmem:[#allocation9 + $0x1090] sm:$0xff]  ;;  %v5058_v58 = vmul.u32 %v5054_v15, %v5030_v17  ;;  %v5061_v3 = vshll.u32 %v11603_v9, 16 }
 0x656   :  { %v4932_v30 = vclz %v4931_v0  ;;  %v5044_v26 = vadd.s32 %v5042_v48, %v5036_v46  ;;  %vm5045_vm11 = vc.u32 %v5043_v14, %v5039_v61  ;;  %5154 = vmatpush.msra.mxu0 %v4328_v4  ;;  %vm5063_vm0 = vc.u32 %v5055_v19, %v5059_v44  ;;  %5175 = vmatpush.msra.mxu1 %v4358_v55  ;;  %v4324_v61 = vld [vmem:[#allocation9 + $0x1070] sm:$0xff] }
 0x657   :  { %v5046_v23 = vsel %vm5045_vm11, 1, %v8689_v13  ;;  %v5065_v0 = vadd.s32 %v5059_v44, %v5055_v19  ;;  %v5038_v18 = vshrl.u32 %v5034_v39, 16  ;;  %v5064_v16 = vsel %vm5063_vm0, 1, %v8689_v13  ;;  %v4320_v55 = vld [vmem:[#allocation9 + $0x1050] sm:$0xff] }
 0x658   :  { %v8449_v54 = vadd.s32 4294967294, %v4932_v30  ;;  %v5048_v5 = vadd.s32 %v5046_v23, %v5044_v26  ;;  %5155 = vmatpush.msra.mxu0 %v4326_v25  ;;  %v4920_v17 = vadd.s32 %v11504_v42, %v11496_v52  ;;  %v5066_v46 = vadd.s32 %v5064_v16, %v5058_v58  ;;  %v4356_v30 = vld [vmem:[#allocation9 + $0x1170] sm:$0xff]  ;;  %v4322_v42 = vld [vmem:[#allocation9 + $0x1060] sm:$0xff] }
 0x659   :  { %vm5067_vm9 = vc.u32 %v5065_v0, %v5061_v3  ;;  %v5017_v19 = vsel %vm5015_vm2, %v11539_v49, 2102212464  ;;  %5176 = vmatpush.msra.mxu1 %v4356_v30  ;;  %v4996_v44 = vshrl.u32 %v8683_v56, %v11498_v28  ;;  %v5040_v4 = vshrl.u32 %v11586_v63, 16 }
 0x65a   :  { %vm8450_vm5 = vcmp.lt.s32.totalorder %v8449_v54, 0  ;;  %v5049_v39 = vadd.s32 %v5048_v5, %v5038_v18  ;;  %5156 = vmatpush.msra.mxu0 %v4324_v61  ;;  %v5060_v52 = vshrl.u32 %v11597_v53, 16  ;;  %v5068_v58 = vsel %vm5067_vm9, 1, %v8689_v13  ;;  %v4352_v18 = vld [vmem:[#allocation9 + $0x1150] sm:$0xff] }
 0x65b   :  { %v4935_v15 = vsel %vm8450_vm5, 0, %v8449_v54  ;;  %v5070_v25 = vadd.s32 %v5068_v58, %v5066_v46  ;;  %5177 = vmatpush.msra.mxu1 %v4354_v21  ;;  %v4811_v49 = vadd.f32 -0.16666654, %v4810_v12  ;;  %v5016_v28 = vsel %vm5012_vm14, %v4996_v44, %v11522_v41  ;;  %v4350_v46 = vld [vmem:[#allocation9 + $0x1140] sm:$0xff] }
 0x65c   :  { %v4936_v14 = vsub.s32 32, %v4935_v15  ;;  %v4940_v48 = vsub.s32 4294967266, %v4935_v15  ;;  %v4937_v54 = vshll.u32 %v11584_v22, %v4935_v15  ;;  %5157 = vmatpush.msra.mxu0 %v4322_v42  ;;  %v5018_v63 = vsel %vm5014_vm6, %v11528_v59, %v5017_v19  ;;  %v4318_v59 = vld [vmem:[#allocation9 + $0x1040] sm:$0xff] }
 0x65d   :  { %v11628_v53 = vadd.s32 %v5049_v39, %v5040_v4  ;;  %v5062_v16 = vshrl.u32 %v11603_v9, 16  ;;  %5178 = vmatpush.msra.mxu1 %v4352_v18  ;;  %v4658_v12 = vmul.f32 %v11595_v31, %v11479_v7  ;;  %v4803_v41 = vmul.f32 %v11599_v35, %v11546_v36  ;;  %v4314_v4 = vld [vmem:[#allocation9 + $0x1020] sm:$0xff] }
 0x65e   :  { %v4938_v26 = vshrl.u32 %v4920_v17, %v4936_v14  ;;  %v4941_v23 = vadd.s32 127, %v4940_v48  ;;  %v5071_v17 = vadd.s32 %v5070_v25, %v5060_v52  ;;  %5158 = vmatpush.msra.mxu0 %v4320_v55  ;;  %v11635_v15 = vadd.s32 %v5065_v0, %v5061_v3  ;;  %v4316_v3 = vld [vmem:[#allocation9 + $0x1030] sm:$0xff]  ;;  %v4346_v52 = vld [vmem:[#allocation9 + $0x1120] sm:$0xff] }
 0x65f   :  { %v4643_v61 = vsel %vm4520_vm15, %v4642_v57, %v11347_v32  ;;  %v5019_v30 = vsel %vm5013_vm8, %v5016_v28, %v5018_v63  ;;  %5179 = vmatpush.msra.mxu1 %v4350_v46  ;;  %v4650_v31 = vadd.f32 -0.4999988, %v11591_v62  ;;  %v4796_v35 = vsub.s32 4, %v11388_v8  ;;  %v4348_v0 = vld [vmem:[#allocation9 + $0x1130] sm:$0xff]  ;;  %v4310_v55 = vld [vmem:[#allocation9 + $0x1000] sm:$0xff] }
 0x660   :  { %v4939_v5 = vor.u32 %v4938_v26, %v4937_v54  ;;  %v4942_v22 = vshll.u32 %v4941_v23, 23  ;;  %v5072_v14 = vadd.s32 %v5071_v17, %v5062_v16  ;;  %5159 = vmatpush.msra.mxu0 %v4318_v59  ;;  %vm5075_vm13 = vc.u32 %v11628_v53, %v11635_v15  ;;  %v4312_v26 = vld [vmem:[#allocation9 + $0x1010] sm:$0xff]  ;;  %v4342_v18 = vld [vmem:[#allocation9 + $0x1100] sm:$0xff]  ;;  %v4341_v16 = vld [vmem:[#allocation9 + $0x10f8] sm:$0xff] }
 0x661   :  { %v4812_v48 = vmul.f32 %v4811_v49, %v11546_v36  ;;  %5180 = vmatpush.msra.mxu1 %v4348_v0  ;;  %v4645_v29 = vsel %vm11460_vm4, 0, %v4643_v61  ;;  %v4659_v39 = vadd.f32 1.0, %v4658_v12  ;;  %v4804_v44 = vadd.f32 -0.4999988, %v4803_v41  ;;  %v4344_v23 = vld [vmem:[#allocation9 + $0x1110] sm:$0xff]  ;;  %v4373_v17 = vld [vmem:[#allocation9 + $0x11f8] sm:$0xff] }
 0x662   :  { %v4943_v9 = vor.u32 4788187, %v4942_v22  ;;  %v4946_v32 = vcvt.s32.f32 %v4939_v5  ;;  %v5076_v57 = vadd.s32 1, %v5072_v14  ;;  %5160 = vmatpush.msra.mxu0 %v4316_v3  ;;  %v5073_v62 = vmul.u32 %v11565_v11, %v5019_v30  ;;  %v4434_v59 = vld [vmem:[#allocation9 + $0x13e0] sm:$0xff]  ;;  %v4371_v30 = vld [vmem:[#allocation9 + $0x11e8] sm:$0xff]  ;;  %v4432_v0 = vld [vmem:[#allocation9 + $0x13d0] sm:$0xff] }
 0x663   :  { %5181 = vmatpush.msra.mxu1 %v4346_v52  ;;  %v4651_v21 = vmul.f32 %v4650_v31, %v11479_v7  ;;  %v4797_v1 = vsel %vm4674_vm12, %v4796_v35, %v11388_v8  ;;  %v11659_v25 = vand.u32 3, %v4645_v29  ;;  %v4813_v11 = vadd.f32 1.0, %v4812_v48  ;;  %v4404_v8 = vld [vmem:[#allocation9 + $0x12f0] sm:$0xff]  ;;  %v4327_v22 = vld [vmem:[#allocation9 + $0x1088] sm:$0xff] }
 0x664   :  { %v4944_v19 = vand.u32 2147483647, %v4943_v9  ;;  %v5077_v42 = vsel %vm5075_vm13, %v5076_v57, %v5072_v14  ;;  %5161 = vmatpush.msra.mxu0 %v4314_v4  ;;  %v11662_v28 = vmul.f32 %v4659_v39, %v11471_v45  ;;  %v4805_v63 = vmul.f32 %v4804_v44, %v11546_v36  ;;  %v4436_v36 = vld [vmem:[#allocation9 + $0x13f0] sm:$0xff]  ;;  %5188 = vmatpush.msra.mxu2 %v4404_v8  ;;  %v4339_v9 = vld [vmem:[#allocation9 + $0x10e8] sm:$0xff]  ;;  %v4369_v57 = vld [vmem:[#allocation9 + $0x11d8] sm:$0xff] }
 0x665   :  { %v5078_v54 = vadd.s32 %v5077_v42, %v5073_v62  ;;  %5182 = vmatpush.msra.mxu1 %v4344_v23  ;;  %vm4828_vm15 = vcmp.lt.s32.totalorder %v11371_v24, 0  ;;  %v4799_v5 = vsel %vm11485_vm7, 0, %v4797_v1  ;;  %vm11670_vm4 = vcmp.le.f32.partialorder %v4826_v37, 0.7853982  ;;  %5208 = vmatpush.msra.mxu3 %v4436_v36  ;;  %v4402_v37 = vld [vmem:[#allocation9 + $0x12e0] sm:$0xff]  ;;  %v4396_v23 = vld [vmem:[#allocation9 + $0x12b0] sm:$0xff] }
 0x666   :  { %v4947_v58 = vmul.f32 %v4946_v32, %v4944_v19  ;;  %5162 = vmatpush.msra.mxu0 %v4312_v26  ;;  %v4652_v12 = vadd.f32 1.0, %v4651_v21  ;;  %vm4663_vm7 = vcmp.lt.s32.totalorder %v11659_v25, 2  ;;  %vm4664_vm12 = vcmp.eq.s32.totalorder %v11659_v25, 0  ;;  %5189 = vmatpush.msra.mxu2 %v4402_v37  ;;  %v4337_v32 = vld [vmem:[#allocation9 + $0x10d8] sm:$0xff]  ;;  %v4398_v62 = vld [vmem:[#allocation9 + $0x12c0] sm:$0xff]  ;;  %v4335_v21 = vld [vmem:[#allocation9 + $0x10c8] sm:$0xff] }
 0x667   :  { %v5079_v7 = vadd.s32 536870912, %v5078_v54  ;;  %5183 = vmatpush.msra.mxu1 %v4342_v18  ;;  %v11686_v46 = vmul.f32 %v4813_v11, %v11536_v6  ;;  %v4665_v14 = vxor.u32 2147483648, %v11662_v28  ;;  %v11693_v31 = vadd.f32 1.0, %v4805_v63  ;;  %5209 = vmatpush.msra.mxu3 %v4434_v59  ;;  %v4400_v6 = vld [vmem:[#allocation9 + $0x12d0] sm:$0xff]  ;;  %v4430_v4 = vld [vmem:[#allocation9 + $0x13c0] sm:$0xff]  ;;  %v4365_v18 = vld [vmem:[#allocation9 + $0x11b8] sm:$0xff] }
 0x668   :  { %v4948_v49 = vxor.u32 2147483648, %v4947_v58  ;;  %5163 = vmatpush.msra.mxu0 %v4310_v55  ;;  %v11695_v35 = vand.u32 3, %v4799_v5  ;;  %vm4667_vm14 = vcmp.eq.s32.totalorder %v11659_v25, 2  ;;  %v4668_v29 = vxor.u32 2147483648, %v4652_v12  ;;  %5190 = vmatpush.msra.mxu2 %v4400_v6  ;;  %v4428_v11 = vld [vmem:[#allocation9 + $0x13b0] sm:$0xff]  ;;  %v4333_v55 = vld [vmem:[#allocation9 + $0x10b8] sm:$0xff] }
 0x669   :  { %v11681_v41 = vshrl.u32 %v5079_v7, 30  ;;  %5248 = vmatpush.msrb.mxu1 %v4373_v17  ;;  %v4950_v39 = vsub.s32 4, %v11567_v2  ;;  %5210 = vmatpush.msra.mxu3 %v4432_v0  ;;  %v4819_v52 = vxor.u32 2147483648, %v11686_v46  ;;  %v4822_v1 = vxor.u32 2147483648, %v11693_v31  ;;  %v4394_v36 = vld [vmem:[#allocation9 + $0x12a0] sm:$0xff]  ;;  %v4329_v25 = vld [vmem:[#allocation9 + $0x1098] sm:$0xff] }
 0x66a   :  { %v4949_v45 = vsel %vm4828_vm15, %v4948_v49, %v4947_v58  ;;  %5228 = vmatpush.msrb.mxu0 %v4341_v16  ;;  %5191 = vmatpush.msra.mxu2 %v4398_v62  ;;  %v4666_v49 = vsel %vm4664_vm12, %v4652_v12, %v4665_v14  ;;  %vm4818_vm6 = vcmp.eq.s32.totalorder %v11695_v35, 0  ;;  %v4669_v8 = vsel %vm4667_vm14, %v4668_v29, %v11662_v28  ;;  %v4426_v16 = vld [vmem:[#allocation9 + $0x13a0] sm:$0xff]  ;;  %v4331_v28 = vld [vmem:[#allocation9 + $0x10a8] sm:$0xff]  ;;  %v4392_v14 = vld [vmem:[#allocation9 + $0x1290] sm:$0xff] }
 0x66b   :  { %v11679_v40 = vsel %vm11670_vm4, %v11371_v24, %v4949_v45  ;;  %v5081_v3 = vshll.u32 %v11681_v41, 30  ;;  %5249 = vmatpush.msrb.mxu1 %v4371_v30  ;;  %5211 = vmatpush.msra.mxu3 %v4430_v4  ;;  %vm4821_vm8 = vcmp.eq.s32.totalorder %v11695_v35, 2  ;;  %v4951_v5 = vsel %vm4828_vm15, %v4950_v39, %v11567_v2  ;;  %v4359_v39 = vld [vmem:[#allocation9 + $0x1188] sm:$0xff] }
 0x66c   :  { %v11690_v61 = vmul.f32 %v11679_v40, %v11679_v40  ;;  %5229 = vmatpush.msrb.mxu0 %v4339_v9  ;;  %5192 = vmatpush.msra.mxu2 %v4396_v23  ;;  %v4820_v17 = vsel %vm4818_vm6, %v11693_v31, %v4819_v52  ;;  %v4363_v9 = vld [vmem:[#allocation9 + $0x11a8] sm:$0xff]  ;;  %v4670_v2 = vsel %vm4663_vm7, %v4666_v49, %v4669_v8  ;;  %vm4817_vm10 = vcmp.lt.s32.totalorder %v11695_v35, 2  ;;  %v4424_v31 = vld [vmem:[#allocation9 + $0x1390] sm:$0xff]  ;;  %v4422_v35 = vld [vmem:[#allocation9 + $0x1380] sm:$0xff] }
 0x66d   :  { %v11702_v44 = vsub.s32 %v5078_v54, %v5081_v3  ;;  %5250 = vmatpush.msrb.mxu1 %v4369_v57  ;;  %v4367_v54 = vld [vmem:[#allocation9 + $0x11c8] sm:$0xff]  ;;  %5212 = vmatpush.msra.mxu3 %v4428_v11  ;;  %v4823_v30 = vsel %vm4821_vm8, %v4822_v1, %v11686_v46  ;;  %v4953_v3 = vsel %vm11670_vm4, 0, %v4951_v5  ;;  %v4390_v46 = vld [vmem:[#allocation9 + $0x1280] sm:$0xff]  ;;  %vm4661_vm3 = vweird.f32 %v11220_v38  ;;  %v4388_v52 = vld [vmem:[#allocation9 + $0x1270] sm:$0xff] }
 0x66e   :  { %v4955_v48 = vmul.f32 -0.001358992, %v11690_v61  ;;  %v4962_v19 = vmul.f32 -0.00019511016, %v11690_v61  ;;  %5230 = vmatpush.msrb.mxu0 %v4337_v32  ;;  %5193 = vmatpush.msra.mxu2 %v4394_v36  ;;  %v4824_v32 = vsel %vm4817_vm10, %v4820_v17, %v4823_v30  ;;  %vm4815_vm0 = vweird.f32 %v11222_v20  ;;  %v4386_v20 = vld [vmem:[#allocation9 + $0x1260] sm:$0xff]  ;;  %v4384_v8 = vld [vmem:[#allocation9 + $0x1250] sm:$0xff] }
 0x66f   :  { %vm5083_vm2 = vcmp.lt.s32.totalorder %v11702_v44, 0  ;;  %v5084_v26 = vsub.s32 0, %v11702_v44  ;;  %5251 = vmatpush.msrb.mxu1 %v4367_v54  ;;  %5213 = vmatpush.msra.mxu3 %v4426_v16  ;;  %v4970_v62 = vand.u32 3, %v4953_v3  ;;  %v5074_v38 = vadd.s32 %v11635_v15, %v11628_v53  ;;  %v4357_v54 = vld [vmem:[#allocation9 + $0x1178] sm:$0xff]  ;;  %v4418_v11 = vld [vmem:[#allocation9 + $0x1360] sm:$0xff]  ;;  %v4416_v5 = vld [vmem:[#allocation9 + $0x1350] sm:$0xff] }
 0x670   :  { %v4956_v58 = vadd.f32 0.041655596, %v4955_v48  ;;  %v4963_v42 = vadd.f32 0.008332121, %v4962_v19  ;;  %5231 = vmatpush.msrb.mxu0 %v4335_v21  ;;  %v4361_v19 = vld [vmem:[#allocation9 + $0x1198] sm:$0xff]  ;;  %5194 = vmatpush.msra.mxu2 %v4392_v14  ;;  %v4351_v14 = vld [vmem:[#allocation9 + $0x1148] sm:$0xff]  ;;  %vm4969_vm15 = vweird.f32 %v11371_v24  ;;  %vm5123_vm6 = vweird.f32 %v11424_v50 }
 0x671   :  { %v5085_v45 = vsel %vm5083_vm2, %v5084_v26, %v11702_v44  ;;  %5252 = vmatpush.msrb.mxu1 %v4365_v18  ;;  %5214 = vmatpush.msra.mxu3 %v4424_v31  ;;  %v4325_v26 = vld [vmem:[#allocation9 + $0x1078] sm:$0xff]  ;;  %vm4972_vm5 = vcmp.eq.s32.totalorder %v4970_v62, 0  ;;  %vm4975_vm9 = vcmp.eq.s32.totalorder %v4970_v62, 2  ;;  %vm4971_vm13 = vcmp.lt.s32.totalorder %v4970_v62, 2 }
 0x672   :  { %v4957_v63 = vmul.f32 %v4956_v58, %v11690_v61  ;;  %v4964_v7 = vmul.f32 %v4963_v42, %v11690_v61  ;;  %v5086_v59 = vclz %v5085_v45  ;;  %5232 = vmatpush.msrb.mxu0 %v4333_v55  ;;  %5195 = vmatpush.msra.mxu2 %v4390_v46  ;;  %v4420_v58 = vld [vmem:[#allocation9 + $0x1370] sm:$0xff]  ;;  %v4825_v42 = vsel %vm4815_vm0, nan, %v4824_v32  ;;  %v4323_v55 = vld [vmem:[#allocation9 + $0x1068] sm:$0xff]  ;;  %v4321_v16 = vld [vmem:[#allocation9 + $0x1058] sm:$0xff] }
 0x673   :  { %5253 = vmatpush.msrb.mxu1 %v4363_v9  ;;  %5215 = vmatpush.msra.mxu3 %v4422_v35  ;;  %v5135_v45 = vmul.f32 %v4825_v42, %v4825_v42  ;;  %v4353_v17 = vld [vmem:[#allocation9 + $0x1158] sm:$0xff]  ;;  %v4414_v9 = vld [vmem:[#allocation9 + $0x1340] sm:$0xff]  ;;  %vm4982_vm4 = vcmp.lt.s32.totalorder %v11424_v50, 0  ;;  %vm11747_vm7 = vcmp.le.f32.partialorder %v4980_v10, 0.7853982 }
 0x674   :  { %v4958_v12 = vadd.f32 -0.4999988, %v4957_v63  ;;  %v4965_v37 = vadd.f32 -0.16666654, %v4964_v7  ;;  %v8452_v48 = vadd.s32 4294967294, %v5086_v59  ;;  %5233 = vmatpush.msrb.mxu0 %v4331_v28  ;;  %5196 = vmatpush.msra.mxu2 %v4388_v52  ;;  %v4382_v28 = vld [vmem:[#allocation9 + $0x1240] sm:$0xff] }
 0x675   :  { %5254 = vmatpush.msrb.mxu1 %v4361_v19  ;;  %5216 = vmatpush.msra.mxu3 %v4420_v58  ;;  %v4317_v19 = vld [vmem:[#allocation9 + $0x1038] sm:$0xff]  ;;  %v4408_v52 = vld [vmem:[#allocation9 + $0x1310] sm:$0xff] }
 0x676   :  { %v4959_v6 = vmul.f32 %v4958_v12, %v11690_v61  ;;  %v4966_v0 = vmul.f32 %v4965_v37, %v11690_v61  ;;  %vm8453_vm11 = vcmp.lt.s32.totalorder %v8452_v48, 0  ;;  %5234 = vmatpush.msrb.mxu0 %v4329_v25  ;;  %v4671_v61 = vsel %vm4661_vm3, nan, %v4670_v2  ;;  %5197 = vmatpush.msra.mxu2 %v4386_v20  ;;  %v4412_v25 = vld [vmem:[#allocation9 + $0x1330] sm:$0xff]  ;;  %v4349_v32 = vld [vmem:[#allocation9 + $0x1138] sm:$0xff] }
 0x677   :  { %v5089_v4 = vsel %vm8453_vm11, 0, %v8452_v48  ;;  %5255 = vmatpush.msrb.mxu1 %v4359_v39  ;;  %v5134_v18 = vmul.f32 %v4671_v61, %v4671_v61  ;;  %5217 = vmatpush.msra.mxu3 %v4418_v11  ;;  %v5139_v2 = vsub.f32 1.0, %v5135_v45  ;;  %v4380_v48 = vld [vmem:[#allocation9 + $0x1230] sm:$0xff]  ;;  %v4315_v39 = vld [vmem:[#allocation9 + $0x1028] sm:$0xff]  ;;  %v4313_v24 = vld [vmem:[#allocation9 + $0x1018] sm:$0xff] }
 0x678   :  { %v4960_v57 = vadd.f32 1.0, %v4959_v6  ;;  %v4967_v29 = vadd.f32 1.0, %v4966_v0  ;;  %v5090_v1 = vsub.s32 32, %v5089_v4  ;;  %5235 = vmatpush.msrb.mxu0 %v4327_v22  ;;  %v5094_v23 = vsub.s32 4294967266, %v5089_v4  ;;  %5198 = vmatpush.msra.mxu2 %v4384_v8  ;;  %v4347_v61 = vld [vmem:[#allocation9 + $0x1128] sm:$0xff]  ;;  %v4345_v58 = vld [vmem:[#allocation9 + $0x1118] sm:$0xff] }
 0x679   :  { %5256 = vmatpush.msrb.mxu1 %v4357_v54  ;;  %v5091_v53 = vshll.u32 %v11702_v44, %v5089_v4  ;;  %v5138_v12 = vsub.f32 1.0, %v5134_v18  ;;  %5218 = vmatpush.msra.mxu3 %v4416_v5  ;;  %v4319_v44 = vld [vmem:[#allocation9 + $0x1048] sm:$0xff]  ;;  %v5143_v0 = vadd.f32 %v5139_v2, %v5135_v45  ;;  %v4376_v4 = vld [vmem:[#allocation9 + $0x1210] sm:$0xff]  ;;  %v4405_v11 = vld [vmem:[#allocation9 + $0x12f8] sm:$0xff] }
 0x67a   :  { %v4968_v21 = vmul.f32 %v4967_v29, %v11679_v40  ;;  %v4976_v63 = vxor.u32 2147483648, %v4960_v57  ;;  %v5092_v7 = vshrl.u32 %v5074_v38, %v5090_v1  ;;  %5236 = vmatpush.msrb.mxu0 %v4325_v26  ;;  %v4355_v40 = vld [vmem:[#allocation9 + $0x1168] sm:$0xff]  ;;  %v5095_v15 = vadd.s32 127, %v5094_v23  ;;  %5199 = vmatpush.msra.mxu2 %v4382_v28  ;;  %v4410_v29 = vld [vmem:[#allocation9 + $0x1320] sm:$0xff]  ;;  %v4401_v5 = vld [vmem:[#allocation9 + $0x12d8] sm:$0xff] }
 0x67b   :  { %5257 = vmatpush.msrb.mxu1 %v4355_v40  ;;  %v11740_v31 = vadd.f32 %v5138_v12, %v5134_v18  ;;  %5219 = vmatpush.msra.mxu3 %v4414_v9  ;;  %v4406_v38 = vld [vmem:[#allocation9 + $0x1300] sm:$0xff]  ;;  %v4311_v26 = vld [vmem:[#allocation9 + $0x1008] sm:$0xff]  ;;  %v4433_v45 = vld [vmem:[#allocation9 + $0x13d8] sm:$0xff] }
 0x67c   :  { %v4973_v49 = vxor.u32 2147483648, %v4968_v21  ;;  %5237 = vmatpush.msrb.mxu0 %v4323_v55  ;;  %v5093_v37 = vor.u32 %v5092_v7, %v5091_v53  ;;  %v5096_v59 = vshll.u32 %v5095_v15, 23  ;;  %v4977_v30 = vsel %vm4975_vm9, %v4976_v63, %v4968_v21  ;;  %5184 = vmatmul.f32.vlgmr.msra.gmra.mxu1 %v5143_v0  ;;  %v4374_v21 = vld [vmem:[#allocation9 + $0x1200] sm:$0xff]  ;;  %v4343_v54 = vld [vmem:[#allocation9 + $0x1108] sm:$0xff] }
 0x67d   :  { %5258 = vmatpush.msrb.mxu1 %v4353_v17  ;;  %5164 = vmatmul.f32.vlgmr.msra.gmra.mxu0 %v11740_v31  ;;  %v4403_v7 = vld [vmem:[#allocation9 + $0x12e8] sm:$0xff]  ;;  %v5316_v18 = vld [vmem:[#allocation8 + $0x1a0] sm:$0xff] }
 0x67e   :  { %v4974_v36 = vsel %vm4972_vm5, %v4960_v57, %v4973_v49  ;;  %5238 = vmatpush.msrb.mxu0 %v4321_v16  ;;  %v5097_v6 = vor.u32 4788187, %v5096_v59  ;;  %v5100_v35 = vcvt.s32.f32 %v5093_v37  ;;  %v4378_v57 = vld [vmem:[#allocation9 + $0x1220] sm:$0xff]  ;;  %5200 = vmatpush.msra.mxu2 %v4380_v48  ;;  %v4437_v49 = vld [vmem:[#allocation9 + $0x13f8] sm:$0xff]  ;;  %v4435_v55 = vld [vmem:[#allocation9 + $0x13e8] sm:$0xff] }
 0x67f   :  { %v4978_v3 = vsel %vm4971_vm13, %v4974_v36, %v4977_v30  ;;  %5259 = vmatpush.msrb.mxu1 %v4351_v14  ;;  %5220 = vmatpush.msra.mxu3 %v4412_v25  ;;  %v5317_v53 = vld [vmem:[#allocation8 + $0x1a8] sm:$0xff]  ;;  %v5104_v36 = vsub.s32 4, %v11681_v41  ;;  %v5312_v16 = vld [vmem:[#allocation8 + $0xa0] sm:$0xff]  ;;  %v4397_v30 = vld [vmem:[#allocation9 + $0x12b8] sm:$0xff] }
 0x680   :  { %5239 = vmatpush.msrb.mxu0 %v4319_v44  ;;  %v5098_v46 = vand.u32 2147483647, %v5097_v6  ;;  %v4979_v22 = vsel %vm4969_vm15, nan, %v4978_v3  ;;  %5201 = vmatpush.msra.mxu2 %v4378_v57  ;;  %v5313_v17 = vld [vmem:[#allocation8 + $0xa8] sm:$0xff]  ;;  %v4429_v14 = vld [vmem:[#allocation9 + $0x13b8] sm:$0xff] }
 0x681   :  { %5260 = vmatpush.msrb.mxu1 %v4349_v32  ;;  %5221 = vmatpush.msra.mxu3 %v4410_v29  ;;  %v5136_v1 = vmul.f32 %v4979_v22, %v4979_v22  ;;  %v4399_v59 = vld [vmem:[#allocation9 + $0x12c8] sm:$0xff] }
 0x682   :  { %v5101_v62 = vmul.f32 %v5100_v35, %v5098_v46  ;;  %5240 = vmatpush.msrb.mxu0 %v4317_v19  ;;  %5202 = vmatpush.msra.mxu2 %v4376_v4  ;;  %v4431_v28 = vld [vmem:[#allocation9 + $0x13c8] sm:$0xff]  ;;  %v4425_v46 = vld [vmem:[#allocation9 + $0x1398] sm:$0xff] }
 0x683   :  { %5261 = vmatpush.msrb.mxu1 %v4347_v61  ;;  %5222 = vmatpush.msra.mxu3 %v4408_v52  ;;  %v5140_v40 = vsub.f32 1.0, %v5136_v1  ;;  %v4427_v48 = vld [vmem:[#allocation9 + $0x13a8] sm:$0xff]  ;;  %v4389_v4 = vld [vmem:[#allocation9 + $0x1278] sm:$0xff] }
 0x684   :  { %v5102_v42 = vxor.u32 2147483648, %v5101_v62  ;;  %5241 = vmatpush.msrb.mxu0 %v4315_v39  ;;  %5203 = vmatpush.msra.mxu2 %v4374_v21  ;;  %v4391_v29 = vld [vmem:[#allocation9 + $0x1288] sm:$0xff]  ;;  %v4421_v52 = vld [vmem:[#allocation9 + $0x1378] sm:$0xff] }
 0x685   :  { %5262 = vmatpush.msrb.mxu1 %v4345_v58  ;;  %5223 = vmatpush.msra.mxu3 %v4406_v38  ;;  %v11762_v9 = vadd.f32 %v5140_v40, %v5136_v1  ;;  %v4423_v22 = vld [vmem:[#allocation9 + $0x1388] sm:$0xff]  ;;  %v4385_v1 = vld [vmem:[#allocation9 + $0x1258] sm:$0xff] }
 0x686   :  { %v5103_v20 = vsel %vm4982_vm4, %v5102_v42, %v5101_v62  ;;  %5242 = vmatpush.msrb.mxu0 %v4313_v24  ;;  %5268 = vmatpush.msrb.mxu2 %v4405_v11  ;;  %v4387_v58 = vld [vmem:[#allocation9 + $0x1268] sm:$0xff] }
 0x687   :  { %v11756_v63 = vsel %vm11747_vm7, %v11424_v50, %v5103_v20  ;;  %5263 = vmatpush.msrb.mxu1 %v4343_v54  ;;  %5288 = vmatpush.msrb.mxu3 %v4437_v49  ;;  %v4419_v42 = vld [vmem:[#allocation9 + $0x1368] sm:$0xff]  ;;  %v4377_v50 = vld [vmem:[#allocation9 + $0x1218] sm:$0xff] }
 0x688   :  { %v5108_v10 = vmul.f32 %v11756_v63, %v11756_v63  ;;  %5243 = vmatpush.msrb.mxu0 %v4311_v26  ;;  %5264 = vmatmul.f32.vlgmr.msrb.gmra.mxu1 %v5143_v0  ;;  %v4395_v0 = vld [vmem:[#allocation9 + $0x12a8] sm:$0xff]  ;;  %v4417_v26 = vld [vmem:[#allocation9 + $0x1358] sm:$0xff] }
 0x689   :  { %5244 = vmatmul.f32.vlgmr.msrb.gmra.mxu0 %v11740_v31  ;;  %5269 = vmatpush.msrb.mxu2 %v4403_v7  ;;  %v5105_v31 = vsel %vm4982_vm4, %v5104_v36, %v11681_v41  ;;  %v4393_v41 = vld [vmem:[#allocation9 + $0x1298] sm:$0xff]  ;;  %v4383_v20 = vld [vmem:[#allocation9 + $0x1248] sm:$0xff]  ;;  %v5314_v36 = vld [vmem:[#allocation8 + $0xb0] sm:$0xff] }
 0x68a   :  { %v5109_v15 = vmul.f32 -0.001358992, %v5108_v10  ;;  %v5116_v8 = vmul.f32 -0.00019511016, %v5108_v10  ;;  %5289 = vmatpush.msrb.mxu3 %v4435_v55  ;;  %5462 = vmatpush.msra.mxu0 %v5316_v18  ;;  %v5107_v25 = vsel %vm11747_vm7, 0, %v5105_v31  ;;  %v4415_v11 = vld [vmem:[#allocation9 + $0x1348] sm:$0xff] }
 0x68b   :  { %5482 = vmatpush.msra.mxu1 %v5317_v53  ;;  %5270 = vmatpush.msrb.mxu2 %v4401_v5  ;;  %v5124_v39 = vand.u32 3, %v5107_v25  ;;  %v4379_v55 = vld [vmem:[#allocation9 + $0x1228] sm:$0xff]  ;;  %v4409_v53 = vld [vmem:[#allocation9 + $0x1318] sm:$0xff]  ;;  %v5318_v5 = vld [vmem:[#allocation8 + $0x1b0] sm:$0xff] }
 0x68c   :  { %v5110_v12 = vadd.f32 0.041655596, %v5109_v15  ;;  %v5117_v37 = vadd.f32 0.008332121, %v5116_v8  ;;  %5290 = vmatpush.msrb.mxu3 %v4433_v45  ;;  %5463 = vmatpush.msra.mxu0 %v5312_v16  ;;  %v4411_v18 = vld [vmem:[#allocation9 + $0x1328] sm:$0xff]  ;;  %v5319_v45 = vld [vmem:[#allocation8 + $0x1b8] sm:$0xff] }
 0x68d   :  { %5483 = vmatpush.msra.mxu1 %v5313_v17  ;;  %5271 = vmatpush.msrb.mxu2 %v4399_v59  ;;  %vm5126_vm12 = vcmp.eq.s32.totalorder %v5124_v39, 0  ;;  %vm5129_vm14 = vcmp.eq.s32.totalorder %v5124_v39, 2  ;;  %vm5125_vm2 = vcmp.lt.s32.totalorder %v5124_v39, 2  ;;  %v4375_v15 = vld [vmem:[#allocation9 + $0x1208] sm:$0xff]  ;;  %v5315_v16 = vld [vmem:[#allocation8 + $0xb8] sm:$0xff] }
 0x68e   :  { %v5111_v44 = vmul.f32 %v5110_v12, %v5108_v10  ;;  %v5118_v2 = vmul.f32 %v5117_v37, %v5108_v10  ;;  %5291 = vmatpush.msrb.mxu3 %v4431_v28  ;;  %5204 = vmatmul.f32.vlgmr.msra.gmra.mxu2 %v11762_v9  ;;  %v4407_v8 = vld [vmem:[#allocation9 + $0x1308] sm:$0xff] }
 0x68f   :  { %5272 = vmatpush.msrb.mxu2 %v4397_v30 }
 0x690   :  { %v5112_v3 = vadd.f32 -0.4999988, %v5111_v44  ;;  %v5119_v6 = vadd.f32 -0.16666654, %v5118_v2  ;;  %5292 = vmatpush.msrb.mxu3 %v4429_v14  ;;  %8455 = vmatmul.msk.f32.vlgmr.msra.gmra.mxu1 %vm394_vm1, %v8933_v27 }
 0x691   :  { %8454 = vmatmul.msk.f32.vlgmr.msra.gmra.mxu0 %vm394_vm1, %v8933_v27  ;;  %5273 = vmatpush.msrb.mxu2 %v4395_v0 }
 0x692   :  { %v5113_v19 = vmul.f32 %v5112_v3, %v5108_v10  ;;  %v5120_v32 = vmul.f32 %v5119_v6, %v5108_v10  ;;  %5293 = vmatpush.msrb.mxu3 %v4427_v48  ;;  %v4413_v10 = vld [vmem:[#allocation9 + $0x1338] sm:$0xff] }
 0x693   :  { %5274 = vmatpush.msrb.mxu2 %v4393_v41 }
 0x694   :  { %v5114_v35 = vadd.f32 1.0, %v5113_v19  ;;  %v5121_v57 = vadd.f32 1.0, %v5120_v32  ;;  %5294 = vmatpush.msrb.mxu3 %v4425_v46 }
 0x695   :  { %5275 = vmatpush.msrb.mxu2 %v4391_v29 }
 0x696   :  { %v5122_v61 = vmul.f32 %v5121_v57, %v11756_v63  ;;  %v5130_v62 = vxor.u32 2147483648, %v5114_v35  ;;  %5295 = vmatpush.msrb.mxu3 %v4423_v22  ;;  %v4381_v63 = vld [vmem:[#allocation9 + $0x1238] sm:$0xff] }
 0x697   :  { %5276 = vmatpush.msrb.mxu2 %v4389_v4 }
 0x698   :  { %v5127_v24 = vxor.u32 2147483648, %v5122_v61  ;;  %5296 = vmatpush.msrb.mxu3 %v4421_v52  ;;  %v5131_v38 = vsel %vm5129_vm14, %v5130_v62, %v5122_v61 }
 0x699   :  { %5277 = vmatpush.msrb.mxu2 %v4387_v58 }
 0x69a   :  { %v5128_v21 = vsel %vm5126_vm12, %v5114_v35, %v5127_v24  ;;  %5297 = vmatpush.msrb.mxu3 %v4419_v42 }
 0x69b   :  { %v5132_v54 = vsel %vm5125_vm2, %v5128_v21, %v5131_v38  ;;  %5278 = vmatpush.msrb.mxu2 %v4385_v1  ;;  %v13489_v21 = vmov 2475754826  }
 0x69c   :  { %v5133_v23 = vsel %vm5123_vm6, nan, %v5132_v54  ;;  %5298 = vmatpush.msrb.mxu3 %v4417_v26 }
 0x69d   :  { %v5137_v49 = vmul.f32 %v5133_v23, %v5133_v23  ;;  %5279 = vmatpush.msrb.mxu2 %v4383_v20 }
 0x69e   :  { %5299 = vmatpush.msrb.mxu3 %v4415_v11 }
 0x69f   :  { %v5141_v7 = vsub.f32 1.0, %v5137_v49  ;;  %5280 = vmatpush.msrb.mxu2 %v4381_v63 }
 0x6a0   :  { %5300 = vmatpush.msrb.mxu3 %v4413_v10 }
 0x6a1   :  { %v5145_v40 = vadd.f32 %v5141_v7, %v5137_v49  ;;  %5281 = vmatpush.msrb.mxu2 %v4379_v55 }
 0x6a2   :  { %5301 = vmatpush.msrb.mxu3 %v4411_v18 }
 0x6a3   :  { %5224 = vmatmul.f32.vlgmr.msra.gmra.mxu3 %v5145_v40  ;;  %5282 = vmatpush.msrb.mxu2 %v4377_v50 }
 0x6a4   :  { %5302 = vmatpush.msrb.mxu3 %v4409_v53 }
 0x6a5   :  { %5283 = vmatpush.msrb.mxu2 %v4375_v15 }
 0x6a6   :  { %5303 = vmatpush.msrb.mxu3 %v4407_v8  ;;  %5284 = vmatmul.f32.vlgmr.msrb.gmra.mxu2 %v11762_v9 }
 0x6a7   :  { %5502 = vmatpush.msra.mxu2 %v5318_v5 }
 0x6a8   :  { %5522 = vmatpush.msra.mxu3 %v5319_v45 }
 0x6a9   :  { %5503 = vmatpush.msra.mxu2 %v5314_v36 }
 0x6aa   :  { %5523 = vmatpush.msra.mxu3 %v5315_v16 }
 0x6ab   :  { %5304 = vmatmul.f32.vlgmr.msrb.gmra.mxu3 %v5145_v40 }
 0x6ae   :  { %8456 = vmatmul.msk.f32.vlgmr.msra.gmra.mxu2 %vm394_vm1, %v8933_v27 }
 0x6b3   :  { %8457 = vmatmul.msk.f32.vlgmr.msra.gmra.mxu3 %vm394_vm1, %v8933_v27 }
 0x6f9   :  { %v5185_v12 = vpop.f32.mrf.mxu1 }
 0x6fa   :  { %v5165_v17 = vpop.f32.mrf.mxu0 }
 0x6fb   :  { %v11781_v37 = vadd.f32 %v5185_v12, %v5165_v17 }
 0x705   :  { %v5265_v28 = vpop.f32.mrf.mxu1 }
 0x706   :  { %v5245_v59 = vpop.f32.mrf.mxu0 }
 0x707   :  { %v11783_v9 = vadd.f32 %v5265_v28, %v5245_v59 }
 0x70d   :  { %v11787_v2 = vpop.f32.mrf.mxu1 }
 0x70e   :  { %v11785_v44 = vpop.f32.mrf.mxu0  ;;  %v5682_v31 = vand.u32 2147483647, %v11787_v2  ;;  %v5685_v3 = vand.u32 2139095040, %v11787_v2 }
 0x70f   :  { %v5528_v30 = vand.u32 2147483647, %v11785_v44  ;;  %v5531_v14 = vand.u32 2139095040, %v11785_v44 }
 0x710   :  { %v5686_v48 = vshrl.u32 %v5685_v3, 23  ;;  %v5689_v32 = vand.u32 8388607, %v5682_v31 }
 0x711   :  { %v5532_v6 = vshrl.u32 %v5531_v14, 23  ;;  %v5535_v0 = vand.u32 8388607, %v5528_v30 }
 0x712   :  { %v8461_v41 = vadd.s32 4294967169, %v5686_v48  ;;  %v5690_v29 = vor.u32 8388608, %v5689_v32 }
 0x713   :  { %v8458_v25 = vadd.s32 4294967169, %v5532_v6  ;;  %v5536_v19 = vor.u32 8388608, %v5535_v0 }
 0x714   :  { %v5692_v35 = vadd.s32 1, %v8461_v41  ;;  %v11802_v24 = vshll.u32 %v5690_v29, 8 }
 0x715   :  { %v5538_v46 = vadd.s32 1, %v8458_v25  ;;  %v11797_v57 = vshll.u32 %v5536_v19, 8 }
 0x716   :  { %vm5693_vm10 = vcmp.gt.s32.totalorder %v5692_v35, 0 }
 0x717   :  { %vm5539_vm8 = vcmp.gt.s32.totalorder %v5538_v46, 0  ;;  %v5694_v61 = vsel %vm5693_vm10, %v5692_v35, 0  ;;  %v5577_v4 = vand.u32 65535, %v11797_v57  ;;  %v5578_v1 = vshrl.u32 %v11797_v57, 16 }
 0x718   :  { %v5540_v22 = vsel %vm5539_vm8, %v5538_v46, 0  ;;  %v11800_v52 = vand.u32 31, %v5694_v61  ;;  %v11849_v35 = vshrl.u32 %v5694_v61, 5 }
 0x719   :  { %v5542_v39 = vand.u32 31, %v5540_v22  ;;  %v11804_v58 = vshrl.u32 %v5540_v22, 5 }
 0x71a   :  { %v11818_v18 = vsub.s32 32, %v11800_v52  ;;  %v5699_v16 = vshll.u32 %v8683_v56, %v11800_v52  ;;  %v5702_v6 = vshll.u32 %v13489_v21, %v11800_v52  ;;  %vm5714_vm7 = vcmp.lt.s32.totalorder %v11849_v35, 1 }
 0x71b   :  { %v5543_v62 = vsub.s32 32, %v5542_v39  ;;  %v5545_v42 = vshll.u32 %v8683_v56, %v5542_v39  ;;  %v5548_v38 = vshll.u32 %v13489_v21, %v5542_v39  ;;  %v5551_v23 = vshll.u32 %v13462_v47, %v5542_v39 }
 0x71c   :  { %v5554_v11 = vshll.u32 %v13463_v33, %v5542_v39  ;;  %v5557_v63 = vshll.u32 %v13464_v60, %v5542_v39  ;;  %vm5560_vm3 = vcmp.lt.s32.totalorder %v11804_v58, 1  ;;  %vm5561_vm11 = vcmp.lt.s32.totalorder %v11804_v58, 2 }
 0x71d   :  { %v5546_v26 = vshrl.u32 %v13489_v21, %v5543_v62  ;;  %v5549_v54 = vshrl.u32 %v13462_v47, %v5543_v62  ;;  %v5552_v20 = vshrl.u32 %v13463_v33, %v5543_v62  ;;  %v5555_v49 = vshrl.u32 %v13464_v60, %v5543_v62 }
 0x71e   :  { %v5558_v10 = vshrl.u32 %v13449_v51, %v5543_v62  ;;  %v5544_v15 = vshrl.u32 %v8683_v56, %v5543_v62  ;;  %vm5563_vm0 = vcmp.lt.s32.totalorder %v11804_v58, 4  ;;  %vm5562_vm5 = vcmp.lt.s32.totalorder %v11804_v58, 3 }
 0x71f   :  { %v5547_v7 = vor.u32 %v5546_v26, %v5545_v42  ;;  %v5550_v55 = vor.u32 %v5549_v54, %v5548_v38  ;;  %v5553_v40 = vor.u32 %v5552_v20, %v5551_v23  ;;  %v5556_v50 = vor.u32 %v5555_v49, %v5554_v11 }
 0x720   :  { %v5559_v53 = vor.u32 %v5558_v10, %v5557_v63  ;;  %v5700_v28 = vshrl.u32 %v13489_v21, %v11818_v18  ;;  %v5703_v0 = vshrl.u32 %v13462_v47, %v11818_v18  ;;  %v5706_v42 = vshrl.u32 %v13463_v33, %v11818_v18 }
 0x721   :  { %v5568_v8 = vsel %vm5560_vm3, %v5547_v7, %v5550_v55  ;;  %v5572_v5 = vsel %vm5560_vm3, %v5550_v55, %v5553_v40  ;;  %v5569_v45 = vsel %vm5563_vm0, %v5556_v50, 920167782  ;;  %v5565_v17 = vsel %vm5563_vm0, %v5553_v40, 2102212464 }
 0x722   :  { %v5573_v36 = vsel %vm5563_vm0, %v5559_v53, 1326507024  ;;  %v5570_v12 = vsel %vm5562_vm5, %v5553_v40, %v5569_v45  ;;  %v5564_v41 = vsel %vm5560_vm3, %v5544_v15, %v5547_v7  ;;  %v5566_v46 = vsel %vm5562_vm5, %v5550_v55, %v5565_v17 }
 0x723   :  { %v5574_v59 = vsel %vm5562_vm5, %v5556_v50, %v5573_v36  ;;  %v5571_v14 = vsel %vm5561_vm11, %v5568_v8, %v5570_v12  ;;  %v11851_v29 = vor.u32 %v5700_v28, %v5699_v16  ;;  %v11853_v62 = vor.u32 %v5703_v0, %v5702_v6 }
 0x724   :  { %v5575_v3 = vsel %vm5561_vm11, %v5572_v5, %v5574_v59  ;;  %v5601_v19 = vand.u32 65535, %v5571_v14  ;;  %v5602_v32 = vshrl.u32 %v5571_v14, 16  ;;  %v5705_v23 = vshll.u32 %v13462_v47, %v11800_v52 }
 0x725   :  { %v5579_v48 = vand.u32 65535, %v5575_v3  ;;  %v5580_v25 = vshrl.u32 %v5575_v3, 16  ;;  %v5709_v5 = vshrl.u32 %v13464_v60, %v11818_v18  ;;  %v5711_v17 = vshll.u32 %v13464_v60, %v11800_v52  ;;  %v5205_v3 = vpop.f32.mrf.mxu2 }
 0x726   :  { %v5604_v26 = vmul.u32 %v5602_v32, %v5577_v4  ;;  %v5605_v54 = vmul.u32 %v5601_v19, %v5578_v1  ;;  %v5603_v49 = vmul.u32 %v5601_v19, %v5577_v4  ;;  %v5606_v61 = vmul.u32 %v5602_v32, %v5578_v1 }
 0x727   :  { %v5582_v22 = vmul.u32 %v5580_v25, %v5577_v4  ;;  %v5583_v39 = vmul.u32 %v5579_v48, %v5578_v1  ;;  %v5581_v38 = vmul.u32 %v5579_v48, %v5577_v4  ;;  %v5584_v20 = vmul.u32 %v5580_v25, %v5578_v1 }
 0x728   :  { %v5607_v55 = vshll.u32 %v5604_v26, 16  ;;  %v5609_v50 = vshll.u32 %v5605_v54, 16  ;;  %v11859_v53 = vor.u32 %v5706_v42, %v5705_v23  ;;  %v5708_v1 = vshll.u32 %v13463_v33, %v11800_v52 }
 0x729   :  { %v5585_v11 = vshll.u32 %v5582_v22, 16  ;;  %v5586_v63 = vshrl.u32 %v5582_v22, 16  ;;  %v5587_v10 = vshll.u32 %v5583_v39, 16  ;;  %v5588_v7 = vshrl.u32 %v5583_v39, 16 }
 0x72a   :  { %vm5611_vm13 = vc.u32 %v5603_v49, %v5607_v55  ;;  %v5613_v8 = vadd.s32 %v5607_v55, %v5603_v49  ;;  %v5710_v28 = vor.u32 %v5709_v5, %v5708_v1  ;;  %v5712_v14 = vshrl.u32 %v13449_v51, %v11818_v18 }
 0x72b   :  { %vm5589_vm9 = vc.u32 %v5581_v38, %v5585_v11  ;;  %v5591_v40 = vadd.s32 %v5585_v11, %v5581_v38  ;;  %v5612_v4 = vsel %vm5611_vm13, 1, %v8689_v13  ;;  %v5608_v6 = vshrl.u32 %v5604_v26, 16 }
 0x72c   :  { %v5590_v15 = vsel %vm5589_vm9, 1, %v8689_v13  ;;  %v5614_v16 = vadd.s32 %v5612_v4, %v5606_v61  ;;  %vm5615_vm4 = vc.u32 %v5613_v8, %v5609_v50  ;;  %v5610_v0 = vshrl.u32 %v5605_v54, 16 }
 0x72d   :  { %v5592_v45 = vadd.s32 %v5590_v15, %v5584_v20  ;;  %vm5593_vm15 = vc.u32 %v5591_v40, %v5587_v10  ;;  %v5616_v59 = vsel %vm5615_vm4, 1, %v8689_v13  ;;  %v11873_v48 = vadd.s32 %v5613_v8, %v5609_v50  ;;  %v5225_v50 = vpop.f32.mrf.mxu3 }
 0x72e   :  { %v5594_v36 = vsel %vm5593_vm15, 1, %v8689_v13  ;;  %v5618_v25 = vadd.s32 %v5616_v59, %v5614_v16  ;;  %v5713_v32 = vor.u32 %v5712_v14, %v5711_v17  ;;  %vm5717_vm12 = vcmp.lt.s32.totalorder %v11849_v35, 4  ;;  %v5285_v16 = vpop.f32.mrf.mxu2 }
 0x72f   :  { %v5596_v12 = vadd.s32 %v5594_v36, %v5592_v45  ;;  %vm5716_vm14 = vcmp.lt.s32.totalorder %v11849_v35, 3  ;;  %v5722_v22 = vsel %vm5714_vm7, %v11851_v29, %v11853_v62  ;;  %v5723_v39 = vsel %vm5717_vm12, %v5710_v28, 920167782 }
 0x730   :  { %v5619_v52 = vadd.s32 %v5618_v25, %v5608_v6  ;;  %vm5715_vm2 = vcmp.lt.s32.totalorder %v11849_v35, 2  ;;  %v5724_v38 = vsel %vm5716_vm14, %v11859_v53, %v5723_v39  ;;  %v5726_v26 = vsel %vm5714_vm7, %v11853_v62, %v11859_v53 }
 0x731   :  { %v5597_v19 = vadd.s32 %v5596_v12, %v5586_v63  ;;  %v5567_v54 = vsel %vm5561_vm11, %v5564_v41, %v5566_v46  ;;  %v5725_v20 = vsel %vm5715_vm2, %v5722_v22, %v5724_v38  ;;  %v5727_v11 = vsel %vm5717_vm12, %v5713_v32, 1326507024 }
 0x732   :  { %v5620_v23 = vadd.s32 %v5619_v52, %v5610_v0  ;;  %v5728_v49 = vsel %vm5716_vm14, %v5710_v28, %v5727_v11  ;;  %v5731_v61 = vand.u32 65535, %v11802_v24  ;;  %v5755_v63 = vand.u32 65535, %v5725_v20 }
 0x733   :  { %v11884_v42 = vadd.s32 %v5597_v19, %v5588_v7  ;;  %v5729_v58 = vsel %vm5715_vm2, %v5726_v26, %v5728_v49  ;;  %v5732_v41 = vshrl.u32 %v11802_v24, 16  ;;  %v5756_v46 = vshrl.u32 %v5725_v20, 16 }
 0x734   :  { %v5624_v10 = vadd.s32 1, %v5620_v23  ;;  %v5621_v7 = vmul.u32 %v11797_v57, %v5567_v54  ;;  %v5733_v55 = vand.u32 65535, %v5729_v58  ;;  %v5734_v40 = vshrl.u32 %v5729_v58, 16 }
 0x735   :  { %vm5623_vm6 = vc.u32 %v11884_v42, %v11873_v48  ;;  %v5758_v8 = vmul.u32 %v5756_v46, %v5731_v61  ;;  %v5759_v5 = vmul.u32 %v5755_v63, %v5732_v41  ;;  %v5206_v45 = vadd.f32 %v5205_v3, %v11781_v37  ;;  %v5305_v58 = vpop.f32.mrf.mxu3 }
 0x736   :  { %v5625_v15 = vsel %vm5623_vm6, %v5624_v10, %v5620_v23  ;;  %v5736_v1 = vmul.u32 %v5734_v40, %v5731_v61  ;;  %v5737_v36 = vmul.u32 %v5733_v55, %v5732_v41  ;;  %v5698_v17 = vshrl.u32 %v8683_v56, %v11818_v18 }
 0x737   :  { %v5626_v4 = vadd.s32 %v5625_v15, %v5621_v7  ;;  %v5757_v12 = vmul.u32 %v5755_v63, %v5731_v61  ;;  %v5760_v59 = vmul.u32 %v5756_v46, %v5732_v41  ;;  %v5761_v28 = vshll.u32 %v5758_v8, 16 }
 0x738   :  { %v5735_v57 = vmul.u32 %v5733_v55, %v5731_v61  ;;  %v5738_v6 = vmul.u32 %v5734_v40, %v5732_v41  ;;  %v5739_v0 = vshll.u32 %v5736_v1, 16  ;;  %v5741_v25 = vshll.u32 %v5737_v36, 16 }
 0x739   :  { %v5627_v14 = vadd.s32 536870912, %v5626_v4  ;;  %v5763_v19 = vshll.u32 %v5759_v5, 16  ;;  %vm5765_vm8 = vc.u32 %v5757_v12, %v5761_v28  ;;  %v5767_v32 = vadd.s32 %v5761_v28, %v5757_v12 }
 0x73a   :  { %vm5743_vm10 = vc.u32 %v5735_v57, %v5739_v0  ;;  %v5745_v37 = vadd.s32 %v5739_v0, %v5735_v57  ;;  %v5766_v3 = vsel %vm5765_vm8, 1, %v8689_v13  ;;  %v5718_v18 = vsel %vm5714_vm7, %v5698_v17, %v11851_v29 }
 0x73b   :  { %v11912_v52 = vshrl.u32 %v5627_v14, 30  ;;  %v5744_v22 = vsel %vm5743_vm10, 1, %v8689_v13  ;;  %v5768_v39 = vadd.s32 %v5766_v3, %v5760_v59  ;;  %vm5769_vm3 = vc.u32 %v5767_v32, %v5763_v19 }
 0x73c   :  { %v5719_v26 = vsel %vm5717_vm12, %v11859_v53, 2102212464  ;;  %v5746_v54 = vadd.s32 %v5744_v22, %v5738_v6  ;;  %vm5747_vm11 = vc.u32 %v5745_v37, %v5741_v25  ;;  %v5770_v20 = vsel %vm5769_vm3, 1, %v8689_v13 }
 0x73d   :  { %v5629_v38 = vshll.u32 %v11912_v52, 30  ;;  %v5748_v23 = vsel %vm5747_vm11, 1, %v8689_v13  ;;  %v5226_v11 = vadd.f32 %v5225_v50, %v5206_v45  ;;  %v5286_v49 = vadd.f32 %v5285_v16, %v11783_v9  ;;  %v11932_v50 = vpop.f32.mrf.mxu2 }
 0x73e   :  { %v5740_v61 = vshrl.u32 %v5736_v1, 16  ;;  %v5750_v63 = vadd.s32 %v5748_v23, %v5746_v54  ;;  %v5772_v10 = vadd.s32 %v5770_v20, %v5768_v39  ;;  %v5720_v41 = vsel %vm5716_vm14, %v11853_v62, %v5719_v26 }
 0x73f   :  { %v5630_v29 = vsub.s32 %v5626_v4, %v5629_v38  ;;  %v5762_v46 = vshrl.u32 %v5758_v8, 16  ;;  %v11930_v53 = vadd.f32 %v5226_v11, %v11367_v34  ;;  %v5306_v7 = vadd.f32 %v5305_v58, %v5286_v49  ;;  %v11951_v11 = vpop.f32.mrf.mxu3 }
 0x740   :  { %v5751_v40 = vadd.s32 %v5750_v63, %v5740_v61  ;;  %v5742_v9 = vshrl.u32 %v5737_v36, 16  ;;  %v5764_v15 = vshrl.u32 %v5759_v5, 16  ;;  %v5721_v62 = vsel %vm5715_vm2, %v5718_v18, %v5720_v41 }
 0x741   :  { %vm5631_vm0 = vcmp.lt.s32.totalorder %v5630_v29, 0  ;;  %v5632_v55 = vsub.s32 0, %v5630_v29  ;;  %v5773_v45 = vadd.s32 %v5772_v10, %v5762_v46  ;;  %v11935_v4 = vadd.f32 %v5306_v7, %v11374_v43 }
 0x742   :  { %v5771_v8 = vadd.s32 %v5767_v32, %v5763_v19  ;;  %v5752_v34 = vadd.s32 %v5751_v40, %v5742_v9  ;;  %v5839_v12 = vand.u32 2139095040, %v11932_v50  ;;  %v5775_v36 = vmul.u32 %v11802_v24, %v5721_v62 }
 0x743   :  { %v5633_v1 = vsel %vm5631_vm0, %v5632_v55, %v5630_v29  ;;  %v5774_v17 = vadd.s32 %v5773_v45, %v5764_v15  ;;  %v5836_v32 = vand.u32 2147483647, %v11932_v50  ;;  %v5622_v39 = vadd.s32 %v11873_v48, %v11884_v42 }
 0x744   :  { %v5634_v16 = vclz %v5633_v1  ;;  %vm5777_vm5 = vc.u32 %v5752_v34, %v5771_v8  ;;  %v5840_v5 = vshrl.u32 %v5839_v12, 23  ;;  %v5993_v42 = vand.u32 2139095040, %v11951_v11 }
 0x745   :  { %v5778_v28 = vadd.s32 1, %v5774_v17  ;;  %v5843_v26 = vand.u32 8388607, %v5836_v32  ;;  %vm5530_vm6 = vcmp.lt.s32.totalorder %v11785_v44, 0  ;;  %vm12011_vm8 = vcmp.le.f32.partialorder %v5528_v30, 0.7853982 }
 0x746   :  { %v8459_v59 = vadd.s32 4294967294, %v5634_v16  ;;  %v8464_v6 = vadd.s32 4294967169, %v5840_v5  ;;  %vm5684_vm10 = vcmp.lt.s32.totalorder %v11787_v2, 0  ;;  %vm12023_vm3 = vcmp.le.f32.partialorder %v5682_v31, 0.7853982 }
 0x747   :  { %v5779_v14 = vsel %vm5777_vm5, %v5778_v28, %v5774_v17  ;;  %v5844_v10 = vor.u32 8388608, %v5843_v26 }
 0x748   :  { %vm8460_vm9 = vcmp.lt.s32.totalorder %v8459_v59, 0  ;;  %v5780_v57 = vadd.s32 %v5779_v14, %v5775_v36  ;;  %v5846_v25 = vadd.s32 1, %v8464_v6  ;;  %v5776_v14 = vadd.s32 %v5771_v8, %v5752_v34 }
 0x749   :  { %v5637_v43 = vsel %vm8460_vm9, 0, %v8459_v59  ;;  %v5994_v34 = vshrl.u32 %v5993_v42, 23 }
 0x74a   :  { %v5642_v0 = vsub.s32 4294967266, %v5637_v43  ;;  %v5781_v35 = vadd.s32 536870912, %v5780_v57  ;;  %vm5847_vm13 = vcmp.gt.s32.totalorder %v5846_v25, 0  ;;  %v5638_v3 = vsub.s32 32, %v5637_v43 }
 0x74b   :  { %v5848_v18 = vsel %vm5847_vm13, %v5846_v25, 0  ;;  %v5639_v61 = vshll.u32 %v5630_v29, %v5637_v43 }
 0x74c   :  { %v5643_v19 = vadd.s32 127, %v5642_v0  ;;  %v11942_v37 = vshrl.u32 %v5781_v35, 30  ;;  %v5850_v24 = vand.u32 31, %v5848_v18  ;;  %v5640_v20 = vshrl.u32 %v5622_v39, %v5638_v3 }
 0x74d   :  { %v11958_v55 = vshrl.u32 %v5848_v18, 5  ;;  %v11977_v0 = vshll.u32 %v5844_v10, 8 }
 0x74e   :  { %v5783_v22 = vshll.u32 %v11942_v37, 30  ;;  %v5644_v38 = vshll.u32 %v5643_v19, 23  ;;  %v11949_v23 = vsub.s32 32, %v5850_v24  ;;  %v5641_v46 = vor.u32 %v5640_v20, %v5639_v61 }
 0x74f   :  { %v5853_v40 = vshll.u32 %v8683_v56, %v5850_v24  ;;  %v5856_v9 = vshll.u32 %v13489_v21, %v5850_v24  ;;  %v5862_v15 = vshll.u32 %v13463_v33, %v5850_v24  ;;  %v5859_v16 = vshll.u32 %v13462_v47, %v5850_v24 }
 0x750   :  { %v5784_v54 = vsub.s32 %v5780_v57, %v5783_v22  ;;  %v5645_v63 = vor.u32 4788187, %v5644_v38  ;;  %v5854_v41 = vshrl.u32 %v13489_v21, %v11949_v23  ;;  %v5857_v48 = vshrl.u32 %v13462_v47, %v11949_v23 }
 0x751   :  { %v5860_v29 = vshrl.u32 %v13463_v33, %v11949_v23  ;;  %v5863_v45 = vshrl.u32 %v13464_v60, %v11949_v23  ;;  %v5866_v17 = vshrl.u32 %v13449_v51, %v11949_v23  ;;  %v5865_v36 = vshll.u32 %v13464_v60, %v5850_v24 }
 0x752   :  { %vm5785_vm15 = vcmp.lt.s32.totalorder %v5784_v54, 0  ;;  %v5786_v49 = vsub.s32 0, %v5784_v54  ;;  %v5646_v1 = vand.u32 2147483647, %v5645_v63  ;;  %v11970_v12 = vor.u32 %v5854_v41, %v5853_v40 }
 0x753   :  { %v11972_v59 = vor.u32 %v5857_v48, %v5856_v9  ;;  %v5864_v28 = vor.u32 %v5863_v45, %v5862_v15  ;;  %v5648_v5 = vcvt.s32.f32 %v5641_v46  ;;  %v11975_v57 = vor.u32 %v5860_v29, %v5859_v16 }
 0x754   :  { %v5787_v58 = vsel %vm5785_vm15, %v5786_v49, %v5784_v54  ;;  %v5867_v6 = vor.u32 %v5866_v17, %v5865_v36  ;;  %vm5868_vm7 = vcmp.lt.s32.totalorder %v11958_v55, 1  ;;  %vm5871_vm12 = vcmp.lt.s32.totalorder %v11958_v55, 4 }
 0x755   :  { %v5788_v7 = vclz %v5787_v58  ;;  %v5649_v35 = vmul.f32 %v5648_v5, %v5646_v1  ;;  %v5876_v3 = vsel %vm5868_vm7, %v11970_v12, %v11972_v59  ;;  %v5877_v8 = vsel %vm5871_vm12, %v5864_v28, 920167782 }
 0x756   :  { %vm5869_vm14 = vcmp.lt.s32.totalorder %v11958_v55, 2  ;;  %vm5870_vm2 = vcmp.lt.s32.totalorder %v11958_v55, 3  ;;  %v5880_v38 = vsel %vm5868_vm7, %v11972_v59, %v11975_v57  ;;  %v5881_v26 = vsel %vm5871_vm12, %v5867_v6, 1326507024 }
 0x757   :  { %v8462_v62 = vadd.s32 4294967294, %v5788_v7  ;;  %v5878_v39 = vsel %vm5870_vm2, %v11975_v57, %v5877_v8  ;;  %v5650_v20 = vxor.u32 2147483648, %v5649_v35  ;;  %v5882_v63 = vsel %vm5870_vm2, %v5864_v28, %v5881_v26 }
 0x758   :  { %v5883_v58 = vsel %vm5869_vm14, %v5880_v38, %v5882_v63  ;;  %v5885_v41 = vand.u32 65535, %v11977_v0  ;;  %v8467_v48 = vadd.s32 4294967169, %v5994_v34  ;;  %v5886_v46 = vshrl.u32 %v11977_v0, 16 }
 0x759   :  { %vm8463_vm4 = vcmp.lt.s32.totalorder %v8462_v62, 0  ;;  %v5887_v7 = vand.u32 65535, %v5883_v58  ;;  %v5888_v40 = vshrl.u32 %v5883_v58, 16  ;;  %v5651_v9 = vsel %vm5530_vm6, %v5650_v20, %v5649_v35 }
 0x75a   :  { %v5791_v43 = vsel %vm8463_vm4, 0, %v8462_v62  ;;  %v6000_v17 = vadd.s32 1, %v8467_v48  ;;  %v5990_v38 = vand.u32 2147483647, %v11951_v11  ;;  %v5873_v26 = vsel %vm5871_vm12, %v11975_v57, 2102212464 }
 0x75b   :  { %v5792_v25 = vsub.s32 32, %v5791_v43  ;;  %v5796_v19 = vsub.s32 4294967266, %v5791_v43  ;;  %v5793_v18 = vshll.u32 %v5784_v54, %v5791_v43  ;;  %v5879_v54 = vsel %vm5869_vm14, %v5876_v3, %v5878_v39 }
 0x75c   :  { %v5910_v10 = vshrl.u32 %v5879_v54, 16  ;;  %v5890_v1 = vmul.u32 %v5888_v40, %v5885_v41  ;;  %v5891_v62 = vmul.u32 %v5887_v7, %v5886_v46  ;;  %v5909_v16 = vand.u32 65535, %v5879_v54 }
 0x75d   :  { %v5794_v22 = vshrl.u32 %v5776_v14, %v5792_v25  ;;  %v5797_v24 = vadd.s32 127, %v5796_v19  ;;  %v5889_v5 = vmul.u32 %v5887_v7, %v5885_v41  ;;  %v12018_v43 = vsel %vm12011_vm8, %v11785_v44, %v5651_v9 }
 0x75e   :  { %v5912_v29 = vmul.u32 %v5910_v10, %v5885_v41  ;;  %v5893_v14 = vshll.u32 %v5890_v1, 16  ;;  %v5892_v30 = vmul.u32 %v5888_v40, %v5886_v46  ;;  %v5895_v25 = vshll.u32 %v5891_v62, 16 }
 0x75f   :  { %v5795_v49 = vor.u32 %v5794_v22, %v5793_v18  ;;  %v5798_v61 = vshll.u32 %v5797_v24, 23  ;;  %v5911_v8 = vmul.u32 %v5909_v16, %v5885_v41  ;;  %v5913_v34 = vmul.u32 %v5909_v16, %v5886_v46 }
 0x760   :  { %v5915_v6 = vshll.u32 %v5912_v29, 16  ;;  %vm5897_vm11 = vc.u32 %v5889_v5, %v5893_v14  ;;  %v5899_v19 = vadd.s32 %v5893_v14, %v5889_v5  ;;  %vm6001_vm0 = vcmp.gt.s32.totalorder %v6000_v17, 0 }
 0x761   :  { %v5799_v42 = vor.u32 4788187, %v5798_v61  ;;  %v5802_v45 = vcvt.s32.f32 %v5795_v49  ;;  %v5898_v3 = vsel %vm5897_vm11, 1, %v8689_v13  ;;  %v12030_v18 = vmul.f32 %v12018_v43, %v12018_v43 }
 0x762   :  { %v5900_v24 = vadd.s32 %v5898_v3, %v5892_v30  ;;  %vm5901_vm5 = vc.u32 %v5899_v19, %v5895_v25  ;;  %v5914_v39 = vmul.u32 %v5910_v10, %v5886_v46  ;;  %vm5919_vm9 = vc.u32 %v5911_v8, %v5915_v6 }
 0x763   :  { %v5800_v15 = vand.u32 2147483647, %v5799_v42  ;;  %v5902_v31 = vsel %vm5901_vm5, 1, %v8689_v13  ;;  %v5894_v20 = vshrl.u32 %v5890_v1, 16  ;;  %v5920_v49 = vsel %vm5919_vm9, 1, %v8689_v13 }
 0x764   :  { %v5904_v54 = vadd.s32 %v5902_v31, %v5900_v24  ;;  %v5917_v61 = vshll.u32 %v5913_v34, 16  ;;  %v5921_v63 = vadd.s32 %v5915_v6, %v5911_v8  ;;  %v5922_v58 = vadd.s32 %v5920_v49, %v5914_v39 }
 0x765   :  { %v5803_v36 = vmul.f32 %v5802_v45, %v5800_v15  ;;  %v6002_v41 = vsel %vm6001_vm0, %v6000_v17, 0  ;;  %v5664_v48 = vmul.f32 -0.00019511016, %v12030_v18  ;;  %v5852_v42 = vshrl.u32 %v8683_v56, %v11949_v23 }
 0x766   :  { %v5905_v46 = vadd.s32 %v5904_v54, %v5894_v20  ;;  %v5896_v7 = vshrl.u32 %v5891_v62, 16  ;;  %vm5923_vm13 = vc.u32 %v5921_v63, %v5917_v61  ;;  %v12046_v57 = vand.u32 8388607, %v5990_v38  ;;  %v5382_v20 = vld [vmem:[#allocation9 + $0x15f0] sm:$0xff] }
 0x767   :  { %v5804_v22 = vxor.u32 2147483648, %v5803_v36  ;;  %v6004_v40 = vand.u32 31, %v6002_v41  ;;  %v5872_v9 = vsel %vm5868_vm7, %v5852_v42, %v11970_v12  ;;  %v5874_v15 = vsel %vm5870_vm2, %v11972_v59, %v5873_v26  ;;  %v5350_v26 = vld [vmem:[#allocation9 + $0x14f0] sm:$0xff]  ;;  %6178 = vmatpush.msrb.mxu1 %v5382_v20  ;;  %v5348_v42 = vld [vmem:[#allocation9 + $0x14e0] sm:$0xff] }
 0x768   :  { %v5916_v45 = vshrl.u32 %v5912_v29, 16  ;;  %v5924_v1 = vsel %vm5923_vm13, 1, %v8689_v13  ;;  %v12060_v62 = vadd.s32 %v5905_v46, %v5896_v7  ;;  %v5665_v12 = vadd.f32 0.008332121, %v5664_v48  ;;  %6158 = vmatpush.msrb.mxu0 %v5350_v26  ;;  %v5380_v46 = vld [vmem:[#allocation9 + $0x15e0] sm:$0xff]  ;;  %v5374_v26 = vld [vmem:[#allocation9 + $0x15b0] sm:$0xff] }
 0x769   :  { %v5805_v10 = vsel %vm5684_vm10, %v5804_v22, %v5803_v36  ;;  %v5926_v16 = vadd.s32 %v5924_v1, %v5922_v58  ;;  %v12062_v17 = vsub.s32 32, %v6004_v40  ;;  %v5657_v36 = vmul.f32 -0.001358992, %v12030_v18  ;;  %6179 = vmatpush.msrb.mxu1 %v5380_v46  ;;  %v5340_v46 = vld [vmem:[#allocation9 + $0x14a0] sm:$0xff] }
 0x76a   :  { %v12058_v23 = vsel %vm12023_vm3, %v11787_v2, %v5805_v10  ;;  %v5918_v5 = vshrl.u32 %v5913_v34, 16  ;;  %v12065_v14 = vadd.s32 %v5921_v63, %v5917_v61  ;;  %v5875_v25 = vsel %vm5869_vm14, %v5872_v9, %v5874_v15  ;;  %6159 = vmatpush.msrb.mxu0 %v5348_v42 }
 0x76b   :  { %v5927_v59 = vadd.s32 %v5926_v16, %v5916_v45  ;;  %v6008_v29 = vshrl.u32 %v13489_v21, %v12062_v17  ;;  %v6011_v6 = vshrl.u32 %v13462_v47, %v12062_v17  ;;  %v12073_v30 = vmul.f32 %v12058_v23, %v12058_v23 }
 0x76c   :  { %v6007_v19 = vshll.u32 %v8683_v56, %v6004_v40  ;;  %v6014_v3 = vshrl.u32 %v13463_v33, %v12062_v17  ;;  %vm5931_vm15 = vc.u32 %v12060_v62, %v12065_v14  ;;  %v12082_v34 = vshrl.u32 %v6002_v41, 5 }
 0x76d   :  { %v5928_v8 = vadd.s32 %v5927_v59, %v5918_v5  ;;  %v6010_v22 = vshll.u32 %v13489_v21, %v6004_v40  ;;  %v6013_v31 = vshll.u32 %v13462_v47, %v6004_v40  ;;  %v6016_v55 = vshll.u32 %v13463_v33, %v6004_v40 }
 0x76e   :  { %v12085_v24 = vor.u32 %v6008_v29, %v6007_v19  ;;  %v6017_v39 = vshrl.u32 %v13464_v60, %v12062_v17  ;;  %v6019_v61 = vshll.u32 %v13464_v60, %v6004_v40  ;;  %v6020_v63 = vshrl.u32 %v13449_v51, %v12062_v17  ;;  %v5344_v29 = vld [vmem:[#allocation9 + $0x14c0] sm:$0xff] }
 0x76f   :  { %v5932_v54 = vadd.s32 1, %v5928_v8  ;;  %v12091_v49 = vor.u32 %v6011_v6, %v6010_v22  ;;  %v5929_v58 = vmul.u32 %v11977_v0, %v5875_v25  ;;  %v5998_v41 = vor.u32 8388608, %v12046_v57  ;;  %v5346_v0 = vld [vmem:[#allocation9 + $0x14d0] sm:$0xff]  ;;  %v5376_v6 = vld [vmem:[#allocation9 + $0x15c0] sm:$0xff] }
 0x770   :  { %v12098_v48 = vor.u32 %v6014_v3, %v6013_v31  ;;  %v6018_v10 = vor.u32 %v6017_v39, %v6016_v55  ;;  %v6021_v9 = vor.u32 %v6020_v63, %v6019_v61  ;;  %v5658_v40 = vadd.f32 0.041655596, %v5657_v36  ;;  %v5378_v57 = vld [vmem:[#allocation9 + $0x15d0] sm:$0xff]  ;;  %6160 = vmatpush.msrb.mxu0 %v5346_v0 }
 0x771   :  { %v5933_v7 = vsel %vm5931_vm15, %v5932_v54, %v5928_v8  ;;  %vm6022_vm4 = vcmp.lt.s32.totalorder %v12082_v34, 1  ;;  %vm6025_vm7 = vcmp.lt.s32.totalorder %v12082_v34, 4  ;;  %v5666_v45 = vmul.f32 %v5665_v12, %v12030_v18  ;;  %6180 = vmatpush.msrb.mxu1 %v5378_v57  ;;  %v5342_v39 = vld [vmem:[#allocation9 + $0x14b0] sm:$0xff] }
 0x772   :  { %v5934_v15 = vadd.s32 %v5933_v7, %v5929_v58  ;;  %v5818_v1 = vmul.f32 -0.00019511016, %v12073_v30  ;;  %v6030_v16 = vsel %vm6022_vm4, %v12085_v24, %v12091_v49  ;;  %v6031_v5 = vsel %vm6025_vm7, %v6018_v10, 920167782  ;;  %6161 = vmatpush.msrb.mxu0 %v5344_v29  ;;  %v5372_v7 = vld [vmem:[#allocation9 + $0x15a0] sm:$0xff] }
 0x773   :  { %vm6024_vm12 = vcmp.lt.s32.totalorder %v12082_v34, 3  ;;  %v6034_v12 = vsel %vm6022_vm4, %v12091_v49, %v12098_v48  ;;  %v12118_v59 = vshll.u32 %v5998_v41, 8  ;;  %v5652_v25 = vsub.s32 4, %v11912_v52  ;;  %6181 = vmatpush.msrb.mxu1 %v5376_v6 }
 0x774   :  { %v5935_v36 = vadd.s32 536870912, %v5934_v15  ;;  %vm6023_vm14 = vcmp.lt.s32.totalorder %v12082_v34, 2  ;;  %v6032_v19 = vsel %vm6024_vm12, %v12098_v48, %v6031_v5  ;;  %v6035_v3 = vsel %vm6025_vm7, %v6021_v9, 1326507024  ;;  %6162 = vmatpush.msrb.mxu0 %v5342_v39  ;;  %v5370_v5 = vld [vmem:[#allocation9 + $0x1590] sm:$0xff] }
 0x775   :  { %v5659_v8 = vmul.f32 %v5658_v40, %v12030_v18  ;;  %v6033_v31 = vsel %vm6023_vm14, %v6030_v16, %v6032_v19  ;;  %v6036_v55 = vsel %vm6024_vm12, %v6018_v10, %v6035_v3  ;;  %v5667_v20 = vadd.f32 -0.16666654, %v5666_v45  ;;  %6182 = vmatpush.msrb.mxu1 %v5374_v26  ;;  %v5338_v16 = vld [vmem:[#allocation9 + $0x1490] sm:$0xff] }
 0x776   :  { %v12128_v22 = vshrl.u32 %v5935_v36, 30  ;;  %v5811_v54 = vmul.f32 -0.001358992, %v12073_v30  ;;  %v5819_v61 = vadd.f32 0.008332121, %v5818_v1  ;;  %v6037_v63 = vsel %vm6023_vm14, %v6034_v12, %v6036_v55  ;;  %6163 = vmatpush.msrb.mxu0 %v5340_v46  ;;  %v5366_v46 = vld [vmem:[#allocation9 + $0x1570] sm:$0xff] }
 0x777   :  { %v6040_v41 = vshrl.u32 %v12118_v59, 16  ;;  %v6041_v42 = vand.u32 65535, %v6037_v63  ;;  %v6039_v10 = vand.u32 65535, %v12118_v59  ;;  %v6042_v9 = vshrl.u32 %v6037_v63, 16  ;;  %6183 = vmatpush.msrb.mxu1 %v5372_v7 }
 0x778   :  { %v5937_v58 = vshll.u32 %v12128_v22, 30  ;;  %v6063_v40 = vand.u32 65535, %v6033_v31  ;;  %v6064_v0 = vshrl.u32 %v6033_v31, 16  ;;  %v12143_v57 = vsel %vm5530_vm6, %v5652_v25, %v11912_v52  ;;  %6164 = vmatpush.msrb.mxu0 %v5338_v16  ;;  %v5368_v25 = vld [vmem:[#allocation9 + $0x1580] sm:$0xff] }
 0x779   :  { %v12147_v1 = vmul.u32 %v6041_v42, %v6040_v41  ;;  %v12149_v36 = vadd.f32 -0.4999988, %v5659_v8  ;;  %v5806_v12 = vsub.s32 4, %v11942_v37  ;;  %v6044_v29 = vmul.u32 %v6042_v9, %v6039_v10  ;;  %6184 = vmatpush.msrb.mxu1 %v5370_v5 }
 0x77a   :  { %v12145_v45 = vsub.s32 %v5934_v15, %v5937_v58  ;;  %v12152_v6 = vmul.u32 %v6064_v0, %v6039_v10  ;;  %v5812_v19 = vadd.f32 0.041655596, %v5811_v54  ;;  %v5820_v3 = vmul.f32 %v5819_v61, %v12073_v30  ;;  %v5336_v15 = vld [vmem:[#allocation9 + $0x1480] sm:$0xff]  ;;  %v5334_v58 = vld [vmem:[#allocation9 + $0x1470] sm:$0xff] }
 0x77b   :  { %v12158_v31 = vmul.f32 %v5667_v20, %v12030_v18  ;;  %v6043_v8 = vmul.u32 %v6041_v42, %v6039_v10  ;;  %v6047_v55 = vshll.u32 %v6044_v29, 16  ;;  %v6065_v39 = vmul.u32 %v6063_v40, %v6039_v10  ;;  %6165 = vmatpush.msrb.mxu0 %v5336_v15  ;;  %6185 = vmatpush.msrb.mxu1 %v5368_v25  ;;  %v5364_v15 = vld [vmem:[#allocation9 + $0x1560] sm:$0xff] }
 0x77c   :  { %vm5939_vm2 = vcmp.lt.s32.totalorder %v12145_v45, 0  ;;  %v5940_v52 = vsub.s32 0, %v12145_v45  ;;  %v6046_v63 = vmul.u32 %v6042_v9, %v6040_v41  ;;  %v6049_v54 = vshll.u32 %v12147_v1, 16  ;;  %v5332_v9 = vld [vmem:[#allocation9 + $0x1460] sm:$0xff] }
 0x77d   :  { %v12162_v61 = vmul.u32 %v6063_v40, %v6040_v41  ;;  %vm6051_vm6 = vc.u32 %v6043_v8, %v6047_v55  ;;  %v6053_v16 = vadd.s32 %v6047_v55, %v6043_v8  ;;  %v6069_v20 = vshll.u32 %v12152_v6, 16  ;;  %6166 = vmatpush.msrb.mxu0 %v5334_v58  ;;  %6186 = vmatpush.msrb.mxu1 %v5366_v46 }
 0x77e   :  { %v5941_v26 = vsel %vm5939_vm2, %v5940_v52, %v12145_v45  ;;  %v5813_v42 = vmul.f32 %v5812_v19, %v12073_v30  ;;  %v5821_v10 = vadd.f32 -0.16666654, %v5820_v3  ;;  %v6052_v5 = vsel %vm6051_vm6, 1, %v8689_v13  ;;  %v5330_v19 = vld [vmem:[#allocation9 + $0x1450] sm:$0xff] }
 0x77f   :  { %v5942_v7 = vclz %v5941_v26  ;;  %v6068_v52 = vmul.u32 %v6064_v0, %v6040_v41  ;;  %v6054_v40 = vadd.s32 %v6052_v5, %v6046_v63  ;;  %vm6055_vm11 = vc.u32 %v6053_v16, %v6049_v54  ;;  %6167 = vmatpush.msrb.mxu0 %v5332_v9  ;;  %6187 = vmatpush.msrb.mxu1 %v5364_v15  ;;  %v5362_v3 = vld [vmem:[#allocation9 + $0x1550] sm:$0xff]  ;;  %v5328_v16 = vld [vmem:[#allocation9 + $0x1440] sm:$0xff] }
 0x780   :  { %vm6073_vm0 = vc.u32 %v6065_v39, %v6069_v20  ;;  %v6056_v8 = vsel %vm6055_vm11, 1, %v8689_v13  ;;  %v6071_v55 = vshll.u32 %v12162_v61, 16  ;;  %v6075_v58 = vadd.s32 %v6069_v20, %v6065_v39  ;;  %v5360_v5 = vld [vmem:[#allocation9 + $0x1540] sm:$0xff]  ;;  %v5326_v15 = vld [vmem:[#allocation9 + $0x1430] sm:$0xff] }
 0x781   :  { %v8465_v25 = vadd.s32 4294967294, %v5942_v7  ;;  %v6074_v26 = vsel %vm6073_vm0, 1, %v8689_v13  ;;  %v6048_v46 = vshrl.u32 %v6044_v29, 16  ;;  %v6058_v41 = vadd.s32 %v6056_v8, %v6054_v40  ;;  %6168 = vmatpush.msrb.mxu0 %v5330_v19  ;;  %6188 = vmatpush.msrb.mxu1 %v5362_v3  ;;  %v5324_v3 = vld [vmem:[#allocation9 + $0x1420] sm:$0xff] }
 0x782   :  { %v6076_v0 = vadd.s32 %v6074_v26, %v6068_v52  ;;  %v5930_v63 = vadd.s32 %v12065_v14, %v12060_v62  ;;  %v6006_v7 = vshrl.u32 %v8683_v56, %v12062_v17  ;;  %vm6077_vm9 = vc.u32 %v6075_v58, %v6071_v55 }
 0x783   :  { %vm8466_vm5 = vcmp.lt.s32.totalorder %v8465_v25, 0  ;;  %v6027_v29 = vsel %vm6025_vm7, %v12098_v48, 2102212464  ;;  %v6059_v20 = vadd.s32 %v6058_v41, %v6048_v46  ;;  %6169 = vmatpush.msrb.mxu0 %v5328_v16  ;;  %6189 = vmatpush.msrb.mxu1 %v5360_v5  ;;  %v5822_v52 = vmul.f32 %v5821_v10, %v12073_v30  ;;  %v5356_v46 = vld [vmem:[#allocation9 + $0x1520] sm:$0xff] }
 0x784   :  { %v5945_v54 = vsel %vm8466_vm5, 0, %v8465_v25  ;;  %v6050_v62 = vshrl.u32 %v12147_v1, 16  ;;  %v6070_v14 = vshrl.u32 %v12152_v6, 16  ;;  %v6078_v17 = vsel %vm6077_vm9, 1, %v8689_v13  ;;  %v5358_v25 = vld [vmem:[#allocation9 + $0x1530] sm:$0xff] }
 0x785   :  { %v5946_v9 = vsub.s32 32, %v5945_v54  ;;  %v5950_v39 = vsub.s32 4294967266, %v5945_v54  ;;  %v5947_v40 = vshll.u32 %v12145_v45, %v5945_v54  ;;  %v6080_v19 = vadd.s32 %v6078_v17, %v6076_v0  ;;  %6170 = vmatpush.msrb.mxu0 %v5326_v15  ;;  %6190 = vmatpush.msrb.mxu1 %v5358_v25  ;;  %v5349_v17 = vld [vmem:[#allocation9 + $0x14e8] sm:$0xff] }
 0x786   :  { %v5814_v48 = vadd.f32 -0.4999988, %v5813_v42  ;;  %v6026_v10 = vsel %vm6022_vm4, %v6006_v7, %v12085_v24  ;;  %v6028_v1 = vsel %vm6024_vm12, %v12091_v49, %v6027_v29  ;;  %v12188_v6 = vadd.s32 %v6059_v20, %v6050_v62  ;;  %v5322_v24 = vld [vmem:[#allocation9 + $0x1410] sm:$0xff]  ;;  %v5351_v20 = vld [vmem:[#allocation9 + $0x14f8] sm:$0xff] }
 0x787   :  { %v5948_v8 = vshrl.u32 %v5930_v63, %v5946_v9  ;;  %v5951_v26 = vadd.s32 127, %v5950_v39  ;;  %v6072_v63 = vshrl.u32 %v12162_v61, 16  ;;  %v6081_v0 = vadd.s32 %v6080_v19, %v6070_v14  ;;  %6171 = vmatpush.msrb.mxu0 %v5324_v3  ;;  %6191 = vmatpush.msrb.mxu1 %v5356_v46  ;;  %v5354_v7 = vld [vmem:[#allocation9 + $0x1510] sm:$0xff] }
 0x788   :  { %v5669_v42 = vadd.f32 1.0, %v12158_v31  ;;  %v5823_v54 = vadd.f32 1.0, %v5822_v52  ;;  %v12192_v16 = vadd.s32 %v6075_v58, %v6071_v55  ;;  %v5807_v49 = vsel %vm5684_vm10, %v5806_v12, %v11942_v37  ;;  %v5320_v37 = vld [vmem:[#allocation9 + $0x1400] sm:$0xff]  ;;  %v5383_v52 = vld [vmem:[#allocation9 + $0x15f8] sm:$0xff] }
 0x789   :  { %v5949_v41 = vor.u32 %v5948_v8, %v5947_v40  ;;  %v5952_v45 = vshll.u32 %v5951_v26, 23  ;;  %v6029_v61 = vsel %vm6023_vm14, %v6026_v10, %v6028_v1  ;;  %v6082_v9 = vadd.s32 %v6081_v0, %v6072_v63  ;;  %6172 = vmatpush.msrb.mxu0 %v5322_v24  ;;  %6192 = vmatpush.msrb.mxu1 %v5354_v7  ;;  %v5352_v12 = vld [vmem:[#allocation9 + $0x1500] sm:$0xff]  ;;  %v5347_v8 = vld [vmem:[#allocation9 + $0x14d8] sm:$0xff]  ;;  %v5414_v10 = vld [vmem:[#allocation9 + $0x16f0] sm:$0xff] }
 0x78a   :  { %v5655_v31 = vsel %vm12011_vm8, 0, %v12143_v57  ;;  %v5661_v55 = vmul.f32 %v12149_v36, %v12030_v18  ;;  %v5815_v58 = vmul.f32 %v5814_v48, %v12073_v30  ;;  %vm6085_vm13 = vc.u32 %v12188_v6, %v12192_v16  ;;  %v5446_v1 = vld [vmem:[#allocation9 + $0x17f0] sm:$0xff]  ;;  %6198 = vmatpush.msrb.mxu2 %v5414_v10  ;;  %v5444_v24 = vld [vmem:[#allocation9 + $0x17e0] sm:$0xff] }
 0x78b   :  { %v5953_v5 = vor.u32 4788187, %v5952_v45  ;;  %v5956_v34 = vcvt.s32.f32 %v5949_v41  ;;  %v6086_v29 = vadd.s32 1, %v6082_v9  ;;  %6173 = vmatpush.msrb.mxu0 %v5320_v37  ;;  %6193 = vmatpush.msrb.mxu1 %v5352_v12  ;;  %v12210_v28 = vmul.f32 %v5669_v42, %v12018_v43  ;;  %v5381_v43 = vld [vmem:[#allocation9 + $0x15e8] sm:$0xff]  ;;  %v5442_v37 = vld [vmem:[#allocation9 + $0x17d0] sm:$0xff]  ;;  %v5436_v10 = vld [vmem:[#allocation9 + $0x17a0] sm:$0xff] }
 0x78c   :  { %v5809_v18 = vsel %vm12023_vm3, 0, %v5807_v49  ;;  %v12215_v30 = vmul.f32 %v5823_v54, %v12058_v23  ;;  %v6083_v57 = vmul.u32 %v12118_v59, %v6029_v61  ;;  %v12218_v36 = vand.u32 3, %v5655_v31  ;;  %v5379_v59 = vld [vmem:[#allocation9 + $0x15d8] sm:$0xff]  ;;  %6218 = vmatpush.msrb.mxu3 %v5446_v1  ;;  %v5345_v41 = vld [vmem:[#allocation9 + $0x14c8] sm:$0xff] }
 0x78d   :  { %v5954_v39 = vand.u32 2147483647, %v5953_v5  ;;  %6238 = vmatpush.msra.mxu0 %v5351_v20  ;;  %6258 = vmatpush.msra.mxu1 %v5383_v52  ;;  %v6087_v14 = vsel %vm6085_vm13, %v6086_v29, %v6082_v9  ;;  %v5662_v15 = vadd.f32 1.0, %v5661_v55  ;;  %v5816_v25 = vadd.f32 1.0, %v5815_v58  ;;  %v5377_v45 = vld [vmem:[#allocation9 + $0x15c8] sm:$0xff]  ;;  %v5343_v49 = vld [vmem:[#allocation9 + $0x14b8] sm:$0xff] }
 0x78e   :  { %v6088_v35 = vadd.s32 %v6087_v14, %v6083_v57  ;;  %v5826_v23 = vand.u32 3, %v5809_v18  ;;  %v5675_v26 = vxor.u32 2147483648, %v12210_v28  ;;  %v5829_v19 = vxor.u32 2147483648, %v12215_v30  ;;  %6219 = vmatpush.msrb.mxu3 %v5444_v24  ;;  %v5375_v5 = vld [vmem:[#allocation9 + $0x15b8] sm:$0xff]  ;;  %v5410_v58 = vld [vmem:[#allocation9 + $0x16d0] sm:$0xff]  ;;  %v5373_v29 = vld [vmem:[#allocation9 + $0x15a8] sm:$0xff] }
 0x78f   :  { %v5957_v62 = vmul.f32 %v5956_v34, %v5954_v39  ;;  %6239 = vmatpush.msra.mxu0 %v5349_v17  ;;  %6259 = vmatpush.msra.mxu1 %v5381_v43  ;;  %vm5838_vm8 = vcmp.lt.s32.totalorder %v11932_v50, 0  ;;  %vm5673_vm10 = vcmp.lt.s32.totalorder %v12218_v36, 2  ;;  %vm5674_vm3 = vcmp.eq.s32.totalorder %v12218_v36, 0  ;;  %v5341_v34 = vld [vmem:[#allocation9 + $0x14a8] sm:$0xff]  ;;  %v5408_v57 = vld [vmem:[#allocation9 + $0x16c0] sm:$0xff] }
 0x790   :  { %v6089_v48 = vadd.s32 536870912, %v6088_v35  ;;  %vm12230_vm15 = vcmp.le.f32.partialorder %v5836_v32, 0.7853982  ;;  %v5678_v63 = vxor.u32 2147483648, %v5662_v15  ;;  %v5832_v0 = vxor.u32 2147483648, %v5816_v25  ;;  %v5412_v32 = vld [vmem:[#allocation9 + $0x16e0] sm:$0xff]  ;;  %6220 = vmatpush.msrb.mxu3 %v5442_v37 }
 0x791   :  { %v5958_v40 = vxor.u32 2147483648, %v5957_v62  ;;  %6240 = vmatpush.msra.mxu0 %v5347_v8  ;;  %6260 = vmatpush.msra.mxu1 %v5379_v59  ;;  %vm5677_vm4 = vcmp.eq.s32.totalorder %v12218_v36, 2  ;;  %vm5828_vm7 = vcmp.eq.s32.totalorder %v5826_v23, 0  ;;  %vm5831_vm12 = vcmp.eq.s32.totalorder %v5826_v23, 2  ;;  %v5369_v59 = vld [vmem:[#allocation9 + $0x1588] sm:$0xff] }
 0x792   :  { %v12241_v54 = vshrl.u32 %v6089_v48, 30  ;;  %6199 = vmatpush.msrb.mxu2 %v5412_v32  ;;  %v5676_v61 = vsel %vm5674_vm3, %v5662_v15, %v5675_v26  ;;  %v5830_v9 = vsel %vm5828_vm7, %v5816_v25, %v5829_v19  ;;  %v5960_v31 = vsub.s32 4, %v12128_v22  ;;  %v5339_v25 = vld [vmem:[#allocation9 + $0x1498] sm:$0xff]  ;;  %v5434_v32 = vld [vmem:[#allocation9 + $0x1790] sm:$0xff] }
 0x793   :  { %v5959_v46 = vsel %vm5838_vm8, %v5958_v40, %v5957_v62  ;;  %6241 = vmatpush.msra.mxu0 %v5345_v41  ;;  %6261 = vmatpush.msra.mxu1 %v5377_v45  ;;  %v5679_v20 = vsel %vm5677_vm4, %v5678_v63, %v12210_v28  ;;  %vm5827_vm14 = vcmp.lt.s32.totalorder %v5826_v23, 2  ;;  %v5833_v52 = vsel %vm5831_vm12, %v5832_v0, %v12215_v30  ;;  %v5440_v62 = vld [vmem:[#allocation9 + $0x17c0] sm:$0xff]  ;;  %v5371_v30 = vld [vmem:[#allocation9 + $0x1598] sm:$0xff]  ;;  %v5438_v23 = vld [vmem:[#allocation9 + $0x17b0] sm:$0xff] }
 0x794   :  { %v12239_v42 = vsel %vm12230_vm15, %v11932_v50, %v5959_v46  ;;  %v6091_v55 = vshll.u32 %v12241_v54, 30  ;;  %6200 = vmatpush.msrb.mxu2 %v5410_v58  ;;  %v5680_v14 = vsel %vm5673_vm10, %v5676_v61, %v5679_v20  ;;  %v5834_v17 = vsel %vm5827_vm14, %v5830_v9, %v5833_v52  ;;  %6221 = vmatpush.msrb.mxu3 %v5440_v62  ;;  %v5335_v41 = vld [vmem:[#allocation9 + $0x1478] sm:$0xff]  ;;  %v5402_v0 = vld [vmem:[#allocation9 + $0x1690] sm:$0xff]  ;;  %v5333_v61 = vld [vmem:[#allocation9 + $0x1468] sm:$0xff] }
 0x795   :  { %v12246_v7 = vmul.f32 %v12239_v42, %v12239_v42  ;;  %6242 = vmatpush.msra.mxu0 %v5343_v49  ;;  %6262 = vmatpush.msra.mxu1 %v5375_v5  ;;  %vm5671_vm2 = vweird.f32 %v11785_v44  ;;  %vm5825_vm11 = vweird.f32 %v11787_v2  ;;  %v5961_v36 = vsel %vm5838_vm8, %v5960_v31, %v12128_v22  ;;  %v5337_v44 = vld [vmem:[#allocation9 + $0x1488] sm:$0xff]  ;;  %v5404_v2 = vld [vmem:[#allocation9 + $0x16a0] sm:$0xff]  ;;  %v5367_v45 = vld [vmem:[#allocation9 + $0x1578] sm:$0xff] }
 0x796   :  { %v12259_v18 = vsub.s32 %v6088_v35, %v6091_v55  ;;  %6201 = vmatpush.msrb.mxu2 %v5408_v57  ;;  %v5406_v35 = vld [vmem:[#allocation9 + $0x16b0] sm:$0xff]  ;;  %v5681_v26 = vsel %vm5671_vm2, nan, %v5680_v14  ;;  %v5835_v19 = vsel %vm5825_vm11, nan, %v5834_v17  ;;  %6222 = vmatpush.msrb.mxu3 %v5438_v23  ;;  %v5963_v63 = vsel %vm12230_vm15, 0, %v5961_v36  ;;  %v5365_v9 = vld [vmem:[#allocation9 + $0x1568] sm:$0xff]  ;;  %v5400_v55 = vld [vmem:[#allocation9 + $0x1680] sm:$0xff] }
 0x797   :  { %v5965_v12 = vmul.f32 -0.001358992, %v12246_v7  ;;  %v5972_v39 = vmul.f32 -0.00019511016, %v12246_v7  ;;  %6243 = vmatpush.msra.mxu0 %v5341_v34  ;;  %6263 = vmatpush.msra.mxu1 %v5373_v29  ;;  %v6144_v31 = vmul.f32 %v5681_v26, %v5681_v26  ;;  %v5432_v58 = vld [vmem:[#allocation9 + $0x1780] sm:$0xff]  ;;  %v6145_v3 = vmul.f32 %v5835_v19, %v5835_v19  ;;  %v5363_v34 = vld [vmem:[#allocation9 + $0x1558] sm:$0xff] }
 0x798   :  { %vm6093_vm6 = vcmp.lt.s32.totalorder %v12259_v18, 0  ;;  %v6094_v28 = vsub.s32 0, %v12259_v18  ;;  %6202 = vmatpush.msrb.mxu2 %v5406_v35  ;;  %6223 = vmatpush.msrb.mxu3 %v5436_v10  ;;  %v5398_v52 = vld [vmem:[#allocation9 + $0x1670] sm:$0xff]  ;;  %v5396_v36 = vld [vmem:[#allocation9 + $0x1660] sm:$0xff]  ;;  %v5325_v10 = vld [vmem:[#allocation9 + $0x1428] sm:$0xff]  ;;  %vm5979_vm8 = vweird.f32 %v11932_v50  ;;  %vm5992_vm10 = vcmp.lt.s32.totalorder %v11951_v11, 0 }
 0x799   :  { %v5966_v43 = vadd.f32 0.041655596, %v5965_v12  ;;  %v5973_v15 = vadd.f32 0.008332121, %v5972_v39  ;;  %6244 = vmatpush.msra.mxu0 %v5339_v25  ;;  %6264 = vmatpush.msra.mxu1 %v5371_v30  ;;  %v5331_v39 = vld [vmem:[#allocation9 + $0x1458] sm:$0xff]  ;;  %v6148_v29 = vsub.f32 1.0, %v6144_v31  ;;  %vm6133_vm12 = vweird.f32 %v11951_v11 }
 0x79a   :  { %v6095_v48 = vsel %vm6093_vm6, %v6094_v28, %v12259_v18  ;;  %6203 = vmatpush.msrb.mxu2 %v5404_v2  ;;  %6224 = vmatpush.msrb.mxu3 %v5434_v32  ;;  %v5430_v57 = vld [vmem:[#allocation9 + $0x1770] sm:$0xff]  ;;  %v6149_v62 = vsub.f32 1.0, %v6145_v3  ;;  %v5329_v25 = vld [vmem:[#allocation9 + $0x1448] sm:$0xff]  ;;  %v5355_v32 = vld [vmem:[#allocation9 + $0x1518] sm:$0xff]  ;;  %vm12295_vm3 = vcmp.le.f32.partialorder %v5990_v38, 0.7853982 }
 0x79b   :  { %v5967_v40 = vmul.f32 %v5966_v43, %v12246_v7  ;;  %v5974_v8 = vmul.f32 %v5973_v15, %v12246_v7  ;;  %6245 = vmatpush.msra.mxu0 %v5337_v44  ;;  %v6096_v46 = vclz %v6095_v48  ;;  %6265 = vmatpush.msra.mxu1 %v5369_v59  ;;  %v6084_v43 = vadd.s32 %v12192_v16, %v12188_v6  ;;  %v5361_v28 = vld [vmem:[#allocation9 + $0x1548] sm:$0xff]  ;;  %v5327_v44 = vld [vmem:[#allocation9 + $0x1438] sm:$0xff]  ;;  %v5394_v26 = vld [vmem:[#allocation9 + $0x1650] sm:$0xff] }
 0x79c   :  { %6204 = vmatpush.msrb.mxu2 %v5402_v0  ;;  %6225 = vmatpush.msrb.mxu3 %v5432_v58  ;;  %v12282_v35 = vadd.f32 %v6148_v29, %v6144_v31  ;;  %v12284_v23 = vadd.f32 %v6149_v62, %v6145_v3  ;;  %v5359_v6 = vld [vmem:[#allocation9 + $0x1538] sm:$0xff]  ;;  %v5426_v19 = vld [vmem:[#allocation9 + $0x1750] sm:$0xff]  ;;  %v5353_v50 = vld [vmem:[#allocation9 + $0x1508] sm:$0xff] }
 0x79d   :  { %v5968_v1 = vadd.f32 -0.4999988, %v5967_v40  ;;  %v5975_v22 = vadd.f32 -0.16666654, %v5974_v8  ;;  %6246 = vmatpush.msra.mxu0 %v5335_v41  ;;  %v8468_v5 = vadd.s32 4294967294, %v6096_v46  ;;  %6266 = vmatpush.msra.mxu1 %v5367_v45  ;;  %v5428_v40 = vld [vmem:[#allocation9 + $0x1760] sm:$0xff] }
 0x79e   :  { %6205 = vmatpush.msrb.mxu2 %v5400_v55  ;;  %6226 = vmatpush.msrb.mxu3 %v5430_v57  ;;  %v5424_v45 = vld [vmem:[#allocation9 + $0x1740] sm:$0xff]  ;;  %v5415_v62 = vld [vmem:[#allocation9 + $0x16f8] sm:$0xff] }
 0x79f   :  { %v5969_v24 = vmul.f32 %v5968_v1, %v12246_v7  ;;  %v5976_v49 = vmul.f32 %v5975_v22, %v12246_v7  ;;  %6247 = vmatpush.msra.mxu0 %v5333_v61  ;;  %vm8469_vm0 = vcmp.lt.s32.totalorder %v8468_v5, 0  ;;  %6267 = vmatpush.msra.mxu1 %v5365_v9  ;;  %v5980_v7 = vand.u32 3, %v5963_v63  ;;  %v5357_v1 = vld [vmem:[#allocation9 + $0x1528] sm:$0xff]  ;;  %v5323_v63 = vld [vmem:[#allocation9 + $0x1418] sm:$0xff]  ;;  %v5388_v31 = vld [vmem:[#allocation9 + $0x1620] sm:$0xff] }
 0x7a0   :  { %v6099_v20 = vsel %vm8469_vm0, 0, %v8468_v5  ;;  %6206 = vmatpush.msrb.mxu2 %v5398_v52  ;;  %6174 = vmatmul.f32.vlgmr.msrb.gmra.mxu0 %v12282_v35  ;;  %v5422_v5 = vld [vmem:[#allocation9 + $0x1730] sm:$0xff]  ;;  %v5321_v61 = vld [vmem:[#allocation9 + $0x1408] sm:$0xff]  ;;  %v5420_v3 = vld [vmem:[#allocation9 + $0x1720] sm:$0xff] }
 0x7a1   :  { %v5970_v37 = vadd.f32 1.0, %v5969_v24  ;;  %v5977_v12 = vadd.f32 1.0, %v5976_v49  ;;  %6248 = vmatpush.msra.mxu0 %v5331_v39  ;;  %v6100_v15 = vsub.s32 32, %v6099_v20  ;;  %6268 = vmatpush.msra.mxu1 %v5363_v34  ;;  %v6104_v30 = vsub.s32 4294967266, %v6099_v20  ;;  %v5390_v24 = vld [vmem:[#allocation9 + $0x1630] sm:$0xff]  ;;  %v6326_v34 = vld [vmem:[#allocation8 + $0x1c0] sm:$0xff] }
 0x7a2   :  { %6207 = vmatpush.msrb.mxu2 %v5396_v36  ;;  %vm5982_vm5 = vcmp.eq.s32.totalorder %v5980_v7, 0  ;;  %vm5985_vm9 = vcmp.eq.s32.totalorder %v5980_v7, 2  ;;  %v6101_v16 = vshll.u32 %v12259_v18, %v6099_v20  ;;  %6194 = vmatmul.f32.vlgmr.msrb.gmra.mxu1 %v12284_v23  ;;  %vm5981_vm13 = vcmp.lt.s32.totalorder %v5980_v7, 2  ;;  %v5392_v18 = vld [vmem:[#allocation9 + $0x1640] sm:$0xff]  ;;  %v5418_v39 = vld [vmem:[#allocation9 + $0x1710] sm:$0xff]  ;;  %v6327_v20 = vld [vmem:[#allocation8 + $0x1c8] sm:$0xff] }
 0x7a3   :  { %v5978_v14 = vmul.f32 %v5977_v12, %v12239_v42  ;;  %v5986_v17 = vxor.u32 2147483648, %v5970_v37  ;;  %6249 = vmatpush.msra.mxu0 %v5329_v25  ;;  %v6102_v42 = vshrl.u32 %v6084_v43, %v6100_v15  ;;  %6269 = vmatpush.msra.mxu1 %v5361_v28  ;;  %v6105_v59 = vadd.s32 127, %v6104_v30  ;;  %v5384_v7 = vld [vmem:[#allocation9 + $0x1600] sm:$0xff]  ;;  %v5413_v25 = vld [vmem:[#allocation9 + $0x16e8] sm:$0xff]  ;;  %v5411_v36 = vld [vmem:[#allocation9 + $0x16d8] sm:$0xff] }
 0x7a4   :  { %6227 = vmatpush.msrb.mxu3 %v5428_v40  ;;  %6208 = vmatpush.msrb.mxu2 %v5394_v26  ;;  %v5416_v57 = vld [vmem:[#allocation9 + $0x1700] sm:$0xff]  ;;  %v6323_v28 = vld [vmem:[#allocation8 + $0xc8] sm:$0xff]  ;;  %v5443_v40 = vld [vmem:[#allocation9 + $0x17d8] sm:$0xff] }
 0x7a5   :  { %v5983_v8 = vxor.u32 2147483648, %v5978_v14  ;;  %v5987_v2 = vsel %vm5985_vm9, %v5986_v17, %v5978_v14  ;;  %6250 = vmatpush.msra.mxu0 %v5327_v44  ;;  %v6103_v46 = vor.u32 %v6102_v42, %v6101_v16  ;;  %v6106_v41 = vshll.u32 %v6105_v59, 23  ;;  %6270 = vmatpush.msra.mxu1 %v5359_v6  ;;  %v5447_v14 = vld [vmem:[#allocation9 + $0x17f8] sm:$0xff]  ;;  %v6322_v17 = vld [vmem:[#allocation8 + $0xc0] sm:$0xff]  ;;  %v5409_v44 = vld [vmem:[#allocation9 + $0x16c8] sm:$0xff] }
 0x7a6   :  { %6228 = vmatpush.msrb.mxu3 %v5426_v19  ;;  %6209 = vmatpush.msrb.mxu2 %v5392_v18  ;;  %v6114_v6 = vsub.s32 4, %v12241_v54  ;;  %v5441_v16 = vld [vmem:[#allocation9 + $0x17c8] sm:$0xff]  ;;  %v5407_v19 = vld [vmem:[#allocation9 + $0x16b8] sm:$0xff] }
 0x7a7   :  { %v5984_v48 = vsel %vm5982_vm5, %v5970_v37, %v5983_v8  ;;  %6251 = vmatpush.msra.mxu0 %v5325_v10  ;;  %v6107_v49 = vor.u32 4788187, %v6106_v41  ;;  %6271 = vmatpush.msra.mxu1 %v5357_v1  ;;  %v6110_v58 = vcvt.s32.f32 %v6103_v46  ;;  %v5386_v37 = vld [vmem:[#allocation9 + $0x1610] sm:$0xff]  ;;  %v5405_v1 = vld [vmem:[#allocation9 + $0x16a8] sm:$0xff]  ;;  %v5423_v43 = vld [vmem:[#allocation9 + $0x1738] sm:$0xff] }
 0x7a8   :  { %v5988_v22 = vsel %vm5981_vm13, %v5984_v48, %v5987_v2  ;;  %6229 = vmatpush.msrb.mxu3 %v5424_v45  ;;  %6210 = vmatpush.msrb.mxu2 %v5390_v24  ;;  %v5439_v48 = vld [vmem:[#allocation9 + $0x17b8] sm:$0xff]  ;;  %v5437_v46 = vld [vmem:[#allocation9 + $0x17a8] sm:$0xff] }
 0x7a9   :  { %v5989_v0 = vsel %vm5979_vm8, nan, %v5988_v22  ;;  %6252 = vmatpush.msra.mxu0 %v5323_v63  ;;  %v6108_v55 = vand.u32 2147483647, %v6107_v49  ;;  %6272 = vmatpush.msra.mxu1 %v5355_v32  ;;  %v6115_v22 = vsel %vm5992_vm10, %v6114_v6, %v12241_v54  ;;  %v5403_v45 = vld [vmem:[#allocation9 + $0x1698] sm:$0xff]  ;;  %v5401_v49 = vld [vmem:[#allocation9 + $0x1688] sm:$0xff] }
 0x7aa   :  { %v6146_v9 = vmul.f32 %v5989_v0, %v5989_v0  ;;  %6230 = vmatpush.msrb.mxu3 %v5422_v5  ;;  %6211 = vmatpush.msrb.mxu2 %v5388_v31  ;;  %v5435_v63 = vld [vmem:[#allocation9 + $0x1798] sm:$0xff]  ;;  %v6117_v0 = vsel %vm12295_vm3, 0, %v6115_v22  ;;  %v5433_v5 = vld [vmem:[#allocation9 + $0x1788] sm:$0xff] }
 0x7ab   :  { %6253 = vmatpush.msra.mxu0 %v5321_v61  ;;  %v6111_v12 = vmul.f32 %v6110_v58, %v6108_v55  ;;  %6273 = vmatpush.msra.mxu1 %v5353_v50  ;;  %v5399_v54 = vld [vmem:[#allocation9 + $0x1678] sm:$0xff]  ;;  %v6134_v50 = vand.u32 3, %v6117_v0 }
 0x7ac   :  { %v6150_v29 = vsub.f32 1.0, %v6146_v9  ;;  %6231 = vmatpush.msrb.mxu3 %v5420_v3  ;;  %6254 = vmatmul.f32.vlgmr.msra.gmra.mxu0 %v12282_v35  ;;  %v5431_v31 = vld [vmem:[#allocation9 + $0x1778] sm:$0xff]  ;;  %v5397_v3 = vld [vmem:[#allocation9 + $0x1668] sm:$0xff] }
 0x7ad   :  { %v6112_v52 = vxor.u32 2147483648, %v6111_v12  ;;  %6274 = vmatmul.f32.vlgmr.msra.gmra.mxu1 %v12284_v23  ;;  %6212 = vmatpush.msrb.mxu2 %v5386_v37  ;;  %v5445_v23 = vld [vmem:[#allocation9 + $0x17e8] sm:$0xff]  ;;  %vm6136_vm15 = vcmp.eq.s32.totalorder %v6134_v50, 0  ;;  %vm6139_vm4 = vcmp.eq.s32.totalorder %v6134_v50, 2  ;;  %vm6135_vm7 = vcmp.lt.s32.totalorder %v6134_v50, 2 }
 0x7ae   :  { %6232 = vmatpush.msrb.mxu3 %v5418_v39  ;;  %6472 = vmatpush.msrb.mxu0 %v6326_v34  ;;  %v12301_v30 = vadd.f32 %v6150_v29, %v6146_v9  ;;  %v5429_v37 = vld [vmem:[#allocation9 + $0x1768] sm:$0xff]  ;;  %v5395_v39 = vld [vmem:[#allocation9 + $0x1658] sm:$0xff] }
 0x7af   :  { %v6113_v15 = vsel %vm5992_vm10, %v6112_v52, %v6111_v12  ;;  %6213 = vmatpush.msrb.mxu2 %v5384_v7  ;;  %6492 = vmatpush.msrb.mxu1 %v6327_v20  ;;  %v5427_v34 = vld [vmem:[#allocation9 + $0x1758] sm:$0xff]  ;;  %v5393_v20 = vld [vmem:[#allocation9 + $0x1648] sm:$0xff] }
 0x7b0   :  { %v6116_v35 = vsel %vm12295_vm3, %v11951_v11, %v6113_v15  ;;  %6233 = vmatpush.msrb.mxu3 %v5416_v57  ;;  %6473 = vmatpush.msrb.mxu0 %v6322_v17  ;;  %v5425_v57 = vld [vmem:[#allocation9 + $0x1748] sm:$0xff] }
 0x7b1   :  { %6278 = vmatpush.msra.mxu2 %v5415_v62  ;;  %v6118_v38 = vmul.f32 %v6116_v35, %v6116_v35  ;;  %6493 = vmatpush.msrb.mxu1 %v6323_v28  ;;  %v5389_v15 = vld [vmem:[#allocation9 + $0x1628] sm:$0xff] }
 0x7b2   :  { %6298 = vmatpush.msra.mxu3 %v5447_v14  ;;  %6214 = vmatmul.f32.vlgmr.msrb.gmra.mxu2 %v12301_v30  ;;  %v5391_v14 = vld [vmem:[#allocation9 + $0x1638] sm:$0xff]  ;;  %v5421_v28 = vld [vmem:[#allocation9 + $0x1728] sm:$0xff] }
 0x7b3   :  { %6279 = vmatpush.msra.mxu2 %v5413_v25  ;;  %v6119_v8 = vmul.f32 -0.001358992, %v6118_v38  ;;  %v6126_v42 = vmul.f32 -0.00019511016, %v6118_v38  ;;  %v5385_v11 = vld [vmem:[#allocation9 + $0x1608] sm:$0xff] }
 0x7b4   :  { %6299 = vmatpush.msra.mxu3 %v5445_v23  ;;  %8470 = vmatmul.msk.f32.vlgmr.msrb.gmra.mxu0 %vm394_vm1, %v8933_v27 }
 0x7b5   :  { %6280 = vmatpush.msra.mxu2 %v5411_v36  ;;  %v6120_v59 = vadd.f32 0.041655596, %v6119_v8  ;;  %v6127_v26 = vadd.f32 0.008332121, %v6126_v42  ;;  %8471 = vmatmul.msk.f32.vlgmr.msrb.gmra.mxu1 %vm394_vm1, %v8933_v27  ;;  %v5417_v36 = vld [vmem:[#allocation9 + $0x1708] sm:$0xff]  ;;  %v6329_v8 = vld [vmem:[#allocation8 + $0x1d8] sm:$0xff] }
 0x7b6   :  { %6300 = vmatpush.msra.mxu3 %v5443_v40  ;;  %v6328_v40 = vld [vmem:[#allocation8 + $0x1d0] sm:$0xff] }
 0x7b7   :  { %6281 = vmatpush.msra.mxu2 %v5409_v44  ;;  %v6121_v2 = vmul.f32 %v6120_v59, %v6118_v38  ;;  %v6128_v10 = vmul.f32 %v6127_v26, %v6118_v38  ;;  %v6324_v42 = vld [vmem:[#allocation8 + $0xd0] sm:$0xff]  ;;  %v6325_v44 = vld [vmem:[#allocation8 + $0xd8] sm:$0xff] }
 0x7b8   :  { %6301 = vmatpush.msra.mxu3 %v5441_v16 }
 0x7b9   :  { %6282 = vmatpush.msra.mxu2 %v5407_v19  ;;  %v6122_v41 = vadd.f32 -0.4999988, %v6121_v2  ;;  %v6129_v18 = vadd.f32 -0.16666654, %v6128_v10 }
 0x7ba   :  { %6302 = vmatpush.msra.mxu3 %v5439_v48 }
 0x7bb   :  { %6283 = vmatpush.msra.mxu2 %v5405_v1  ;;  %v6123_v32 = vmul.f32 %v6122_v41, %v6118_v38  ;;  %v6130_v24 = vmul.f32 %v6129_v18, %v6118_v38  ;;  %v5419_v38 = vld [vmem:[#allocation9 + $0x1718] sm:$0xff] }
 0x7bc   :  { %6303 = vmatpush.msra.mxu3 %v5437_v46 }
 0x7bd   :  { %6284 = vmatpush.msra.mxu2 %v5403_v45  ;;  %v6124_v61 = vadd.f32 1.0, %v6123_v32  ;;  %v6131_v9 = vadd.f32 1.0, %v6130_v24 }
 0x7be   :  { %6304 = vmatpush.msra.mxu3 %v5435_v63 }
 0x7bf   :  { %6285 = vmatpush.msra.mxu2 %v5401_v49  ;;  %v6132_v55 = vmul.f32 %v6131_v9, %v6116_v35  ;;  %v6140_v58 = vxor.u32 2147483648, %v6124_v61  ;;  %v5387_v35 = vld [vmem:[#allocation9 + $0x1618] sm:$0xff] }
 0x7c0   :  { %6305 = vmatpush.msra.mxu3 %v5433_v5 }
 0x7c1   :  { %6286 = vmatpush.msra.mxu2 %v5399_v54  ;;  %v6137_v12 = vxor.u32 2147483648, %v6132_v55  ;;  %v6141_v7 = vsel %vm6139_vm4, %v6140_v58, %v6132_v55 }
 0x7c2   :  { %6306 = vmatpush.msra.mxu3 %v5431_v31 }
 0x7c3   :  { %6287 = vmatpush.msra.mxu2 %v5397_v3  ;;  %v6138_v29 = vsel %vm6136_vm15, %v6124_v61, %v6137_v12 }
 0x7c4   :  { %6307 = vmatpush.msra.mxu3 %v5429_v37  ;;  %v6142_v52 = vsel %vm6135_vm7, %v6138_v29, %v6141_v7 }
 0x7c5   :  { %6288 = vmatpush.msra.mxu2 %v5395_v39  ;;  %v6143_v62 = vsel %vm6133_vm12, nan, %v6142_v52 }
 0x7c6   :  { %6308 = vmatpush.msra.mxu3 %v5427_v34  ;;  %v6147_v17 = vmul.f32 %v6143_v62, %v6143_v62 }
 0x7c7   :  { %6289 = vmatpush.msra.mxu2 %v5393_v20 }
 0x7c8   :  { %6309 = vmatpush.msra.mxu3 %v5425_v57  ;;  %v6151_v25 = vsub.f32 1.0, %v6147_v17 }
 0x7c9   :  { %6290 = vmatpush.msra.mxu2 %v5391_v14 }
 0x7ca   :  { %6310 = vmatpush.msra.mxu3 %v5423_v43  ;;  %v6155_v23 = vadd.f32 %v6151_v25, %v6147_v17 }
 0x7cb   :  { %6291 = vmatpush.msra.mxu2 %v5389_v15 }
 0x7cc   :  { %6311 = vmatpush.msra.mxu3 %v5421_v28 }
 0x7cd   :  { %6234 = vmatmul.f32.vlgmr.msrb.gmra.mxu3 %v6155_v23  ;;  %6292 = vmatpush.msra.mxu2 %v5387_v35 }
 0x7ce   :  { %6312 = vmatpush.msra.mxu3 %v5419_v38 }
 0x7cf   :  { %6293 = vmatpush.msra.mxu2 %v5385_v11 }
 0x7d0   :  { %6313 = vmatpush.msra.mxu3 %v5417_v36  ;;  %6294 = vmatmul.f32.vlgmr.msra.gmra.mxu2 %v12301_v30 }
 0x7d1   :  { %6512 = vmatpush.msrb.mxu2 %v6328_v40 }
 0x7d2   :  { %6532 = vmatpush.msrb.mxu3 %v6329_v8 }
 0x7d3   :  { %6513 = vmatpush.msrb.mxu2 %v6324_v42 }
 0x7d4   :  { %6533 = vmatpush.msrb.mxu3 %v6325_v44 }
 0x7d5   :  { %6314 = vmatmul.f32.vlgmr.msra.gmra.mxu3 %v6155_v23 }
 0x7d8   :  { %8472 = vmatmul.msk.f32.vlgmr.msrb.gmra.mxu2 %vm394_vm1, %v8933_v27 }
 0x7dd   :  { %8473 = vmatmul.msk.f32.vlgmr.msrb.gmra.mxu3 %vm394_vm1, %v8933_v27 }
 0x81d   :  { %v6175_v6 = vpop.f32.mrf.mxu0 }
 0x81f   :  { %v6195_v16 = vpop.f32.mrf.mxu1 }
 0x820   :  { %v12323_v59 = vadd.f32 %v6195_v16, %v6175_v6 }
 0x829   :  { %v6255_v26 = vpop.f32.mrf.mxu0 }
 0x82a   :  { %v6275_v19 = vpop.f32.mrf.mxu1 }
 0x82b   :  { %v12325_v30 = vadd.f32 %v6275_v19, %v6255_v26 }
 0x831   :  { %v12327_v48 = vpop.f32.mrf.mxu0 }
 0x832   :  { %v6538_v2 = vand.u32 2147483647, %v12327_v48  ;;  %v6541_v10 = vand.u32 2139095040, %v12327_v48  ;;  %v12331_v1 = vpop.f32.mrf.mxu1 }
 0x833   :  { %v6692_v22 = vand.u32 2147483647, %v12331_v1  ;;  %v6695_v46 = vand.u32 2139095040, %v12331_v1 }
 0x834   :  { %v6542_v41 = vshrl.u32 %v6541_v10, 23  ;;  %v6545_v18 = vand.u32 8388607, %v6538_v2 }
 0x835   :  { %v6696_v45 = vshrl.u32 %v6695_v46, 23  ;;  %v6699_v32 = vand.u32 8388607, %v6692_v22 }
 0x836   :  { %v8474_v63 = vadd.s32 4294967169, %v6542_v41  ;;  %v6546_v0 = vor.u32 8388608, %v6545_v18 }
 0x837   :  { %v8477_v24 = vadd.s32 4294967169, %v6696_v45  ;;  %v6700_v9 = vor.u32 8388608, %v6699_v32 }
 0x838   :  { %v6548_v49 = vadd.s32 1, %v8474_v63  ;;  %v12339_v61 = vshll.u32 %v6546_v0, 8 }
 0x839   :  { %v6702_v5 = vadd.s32 1, %v8477_v24  ;;  %v12344_v37 = vshll.u32 %v6700_v9, 8 }
 0x83a   :  { %vm6549_vm14 = vcmp.gt.s32.totalorder %v6548_v49, 0  ;;  %v6587_v58 = vand.u32 65535, %v12339_v61  ;;  %v6588_v29 = vshrl.u32 %v12339_v61, 16 }
 0x83b   :  { %v6550_v54 = vsel %vm6549_vm14, %v6548_v49, 0  ;;  %vm6703_vm2 = vcmp.gt.s32.totalorder %v6702_v5, 0 }
 0x83c   :  { %v6552_v50 = vand.u32 31, %v6550_v54  ;;  %v6704_v31 = vsel %vm6703_vm2, %v6702_v5, 0  ;;  %v12346_v12 = vshrl.u32 %v6550_v54, 5 }
 0x83d   :  { %v12342_v3 = vand.u32 31, %v6704_v31  ;;  %v12391_v5 = vshrl.u32 %v6704_v31, 5 }
 0x83e   :  { %v6553_v55 = vsub.s32 32, %v6552_v50  ;;  %v6555_v39 = vshll.u32 %v8683_v56, %v6552_v50  ;;  %v6558_v34 = vshll.u32 %v13489_v21, %v6552_v50  ;;  %v6561_v52 = vshll.u32 %v13462_v47, %v6552_v50 }
 0x83f   :  { %v6564_v62 = vshll.u32 %v13463_v33, %v6552_v50  ;;  %v6567_v17 = vshll.u32 %v13464_v60, %v6552_v50  ;;  %v12360_v35 = vsub.s32 32, %v12342_v3  ;;  %vm6570_vm6 = vcmp.lt.s32.totalorder %v12346_v12, 1 }
 0x840   :  { %v6556_v7 = vshrl.u32 %v13489_v21, %v6553_v55  ;;  %v6559_v20 = vshrl.u32 %v13462_v47, %v6553_v55  ;;  %v6562_v57 = vshrl.u32 %v13463_v33, %v6553_v55  ;;  %v6565_v14 = vshrl.u32 %v13464_v60, %v6553_v55 }
 0x841   :  { %v6568_v43 = vshrl.u32 %v13449_v51, %v6553_v55  ;;  %vm6571_vm11 = vcmp.lt.s32.totalorder %v12346_v12, 2  ;;  %v6554_v11 = vshrl.u32 %v8683_v56, %v6553_v55  ;;  %vm6573_vm0 = vcmp.lt.s32.totalorder %v12346_v12, 4 }
 0x842   :  { %v6557_v15 = vor.u32 %v6556_v7, %v6555_v39  ;;  %v6560_v25 = vor.u32 %v6559_v20, %v6558_v34  ;;  %v6563_v28 = vor.u32 %v6562_v57, %v6561_v52  ;;  %v6566_v23 = vor.u32 %v6565_v14, %v6564_v62 }
 0x843   :  { %v6569_v38 = vor.u32 %v6568_v43, %v6567_v17  ;;  %vm6572_vm5 = vcmp.lt.s32.totalorder %v12346_v12, 3  ;;  %v6709_v44 = vshll.u32 %v8683_v56, %v12342_v3  ;;  %v6710_v19 = vshrl.u32 %v13489_v21, %v12360_v35 }
 0x844   :  { %v6578_v36 = vsel %vm6570_vm6, %v6557_v15, %v6560_v25  ;;  %v6582_v40 = vsel %vm6570_vm6, %v6560_v25, %v6563_v28  ;;  %v6579_v8 = vsel %vm6573_vm0, %v6566_v23, 920167782  ;;  %v6575_v6 = vsel %vm6573_vm0, %v6563_v28, 2102212464 }
 0x845   :  { %v6583_v42 = vsel %vm6573_vm0, %v6569_v38, 1326507024  ;;  %v6580_v16 = vsel %vm6572_vm5, %v6563_v28, %v6579_v8  ;;  %v6712_v41 = vshll.u32 %v13489_v21, %v12342_v3  ;;  %v6713_v18 = vshrl.u32 %v13462_v47, %v12360_v35 }
 0x846   :  { %v6584_v26 = vsel %vm6572_vm5, %v6566_v23, %v6583_v42  ;;  %v6581_v10 = vsel %vm6571_vm11, %v6578_v36, %v6580_v16  ;;  %v6574_v24 = vsel %vm6570_vm6, %v6554_v11, %v6557_v15  ;;  %v6576_v49 = vsel %vm6572_vm5, %v6560_v25, %v6575_v6 }
 0x847   :  { %v6585_v46 = vsel %vm6571_vm11, %v6582_v40, %v6584_v26  ;;  %v6611_v0 = vand.u32 65535, %v6581_v10  ;;  %v6612_v32 = vshrl.u32 %v6581_v10, 16  ;;  %v12393_v9 = vor.u32 %v6710_v19, %v6709_v44 }
 0x848   :  { %v6589_v45 = vand.u32 65535, %v6585_v46  ;;  %v6590_v63 = vshrl.u32 %v6585_v46, 16  ;;  %v12395_v55 = vor.u32 %v6713_v18, %v6712_v41  ;;  %v6716_v39 = vshrl.u32 %v13463_v33, %v12360_v35  ;;  %v6215_v46 = vpop.f32.mrf.mxu2 }
 0x849   :  { %v6614_v7 = vmul.u32 %v6612_v32, %v6587_v58  ;;  %v6615_v20 = vmul.u32 %v6611_v0, %v6588_v29  ;;  %v6715_v52 = vshll.u32 %v13462_v47, %v12342_v3  ;;  %v6613_v14 = vmul.u32 %v6611_v0, %v6587_v58 }
 0x84a   :  { %v6592_v54 = vmul.u32 %v6590_v63, %v6587_v58  ;;  %v6593_v50 = vmul.u32 %v6589_v45, %v6588_v29  ;;  %v6591_v34 = vmul.u32 %v6589_v45, %v6587_v58  ;;  %v6594_v57 = vmul.u32 %v6590_v63, %v6588_v29 }
 0x84b   :  { %v6616_v31 = vmul.u32 %v6612_v32, %v6588_v29  ;;  %v6617_v25 = vshll.u32 %v6614_v7, 16  ;;  %v6619_v23 = vshll.u32 %v6615_v20, 16  ;;  %v12401_v38 = vor.u32 %v6716_v39, %v6715_v52 }
 0x84c   :  { %v6595_v62 = vshll.u32 %v6592_v54, 16  ;;  %v6596_v17 = vshrl.u32 %v6592_v54, 16  ;;  %v6597_v43 = vshll.u32 %v6593_v50, 16  ;;  %v6598_v15 = vshrl.u32 %v6593_v50, 16 }
 0x84d   :  { %vm6621_vm13 = vc.u32 %v6613_v14, %v6617_v25  ;;  %v6623_v36 = vadd.s32 %v6617_v25, %v6613_v14  ;;  %v6719_v40 = vshrl.u32 %v13464_v60, %v12360_v35  ;;  %v6718_v29 = vshll.u32 %v13463_v33, %v12342_v3 }
 0x84e   :  { %vm6599_vm9 = vc.u32 %v6591_v34, %v6595_v62  ;;  %v6601_v28 = vadd.s32 %v6595_v62, %v6591_v34  ;;  %v6622_v58 = vsel %vm6621_vm13, 1, %v8689_v13  ;;  %v6721_v6 = vshll.u32 %v13464_v60, %v12342_v3 }
 0x84f   :  { %v6600_v11 = vsel %vm6599_vm9, 1, %v8689_v13  ;;  %v6624_v44 = vadd.s32 %v6622_v58, %v6616_v31  ;;  %vm6625_vm10 = vc.u32 %v6623_v36, %v6619_v23  ;;  %v6720_v19 = vor.u32 %v6719_v40, %v6718_v29 }
 0x850   :  { %v6602_v8 = vadd.s32 %v6600_v11, %v6594_v57  ;;  %vm6603_vm8 = vc.u32 %v6601_v28, %v6597_v43  ;;  %v6626_v26 = vsel %vm6625_vm10, 1, %v8689_v13  ;;  %v6722_v10 = vshrl.u32 %v13449_v51, %v12360_v35 }
 0x851   :  { %v6604_v42 = vsel %vm6603_vm8, 1, %v8689_v13  ;;  %v6618_v41 = vshrl.u32 %v6614_v7, 16  ;;  %v6620_v18 = vshrl.u32 %v6615_v20, 16  ;;  %v12415_v45 = vadd.s32 %v6623_v36, %v6619_v23  ;;  %v6235_v23 = vpop.f32.mrf.mxu3 }
 0x852   :  { %v6606_v16 = vadd.s32 %v6604_v42, %v6602_v8  ;;  %v6628_v63 = vadd.s32 %v6626_v26, %v6624_v44  ;;  %v6723_v32 = vor.u32 %v6722_v10, %v6721_v6  ;;  %vm6724_vm3 = vcmp.lt.s32.totalorder %v12391_v5, 1 }
 0x853   :  { %vm6727_vm15 = vcmp.lt.s32.totalorder %v12391_v5, 4  ;;  %vm6726_vm4 = vcmp.lt.s32.totalorder %v12391_v5, 3  ;;  %v6732_v54 = vsel %vm6724_vm3, %v12393_v9, %v12395_v55  ;;  %vm6725_vm7 = vcmp.lt.s32.totalorder %v12391_v5, 2  ;;  %v6295_v44 = vpop.f32.mrf.mxu2 }
 0x854   :  { %v6607_v0 = vadd.s32 %v6606_v16, %v6596_v17  ;;  %v6629_v3 = vadd.s32 %v6628_v63, %v6618_v41  ;;  %v6733_v50 = vsel %vm6727_vm15, %v6720_v19, 920167782  ;;  %v6736_v7 = vsel %vm6724_vm3, %v12395_v55, %v12401_v38 }
 0x855   :  { %v6734_v34 = vsel %vm6726_vm4, %v12401_v38, %v6733_v50  ;;  %v6577_v20 = vsel %vm6571_vm11, %v6574_v24, %v6576_v49  ;;  %v6737_v62 = vsel %vm6727_vm15, %v6723_v32, 1326507024  ;;  %v6741_v31 = vand.u32 65535, %v12344_v37 }
 0x856   :  { %v12426_v39 = vadd.s32 %v6607_v0, %v6598_v15  ;;  %v6630_v52 = vadd.s32 %v6629_v3, %v6620_v18  ;;  %v6735_v57 = vsel %vm6725_vm7, %v6732_v54, %v6734_v34  ;;  %v6738_v14 = vsel %vm6726_vm4, %v6720_v19, %v6737_v62 }
 0x857   :  { %v6765_v17 = vand.u32 65535, %v6735_v57  ;;  %v6739_v12 = vsel %vm6725_vm7, %v6736_v7, %v6738_v14  ;;  %v6742_v24 = vshrl.u32 %v12344_v37, 16  ;;  %v6766_v49 = vshrl.u32 %v6735_v57, 16 }
 0x858   :  { %vm6633_vm12 = vc.u32 %v12426_v39, %v12415_v45  ;;  %v6634_v43 = vadd.s32 1, %v6630_v52  ;;  %v6631_v15 = vmul.u32 %v12339_v61, %v6577_v20  ;;  %v6743_v25 = vand.u32 65535, %v6739_v12 }
 0x859   :  { %v6744_v28 = vshrl.u32 %v6739_v12, 16  ;;  %v6768_v36 = vmul.u32 %v6766_v49, %v6741_v31  ;;  %v6769_v40 = vmul.u32 %v6765_v17, %v6742_v24  ;;  %v6216_v8 = vadd.f32 %v6215_v46, %v12323_v59  ;;  %v6315_v12 = vpop.f32.mrf.mxu3 }
 0x85a   :  { %v6635_v11 = vsel %vm6633_vm12, %v6634_v43, %v6630_v52  ;;  %v6747_v42 = vmul.u32 %v6743_v25, %v6742_v24  ;;  %v6708_v6 = vshrl.u32 %v8683_v56, %v12360_v35  ;;  %v6767_v16 = vmul.u32 %v6765_v17, %v6741_v31 }
 0x85b   :  { %v6636_v58 = vadd.s32 %v6635_v11, %v6631_v15  ;;  %v6746_v29 = vmul.u32 %v6744_v28, %v6741_v31  ;;  %v6770_v26 = vmul.u32 %v6766_v49, %v6742_v24  ;;  %v6771_v19 = vshll.u32 %v6768_v36, 16 }
 0x85c   :  { %v6745_v61 = vmul.u32 %v6743_v25, %v6741_v31  ;;  %v6748_v41 = vmul.u32 %v6744_v28, %v6742_v24  ;;  %v6751_v63 = vshll.u32 %v6747_v42, 16  ;;  %v6773_v0 = vshll.u32 %v6769_v40, 16 }
 0x85d   :  { %v6637_v10 = vadd.s32 536870912, %v6636_v58  ;;  %v6749_v18 = vshll.u32 %v6746_v29, 16  ;;  %vm6775_vm14 = vc.u32 %v6767_v16, %v6771_v19  ;;  %v6777_v32 = vadd.s32 %v6771_v19, %v6767_v16 }
 0x85e   :  { %v6776_v46 = vsel %vm6775_vm14, 1, %v8689_v13  ;;  %v6728_v35 = vsel %vm6724_vm3, %v6708_v6, %v12393_v9  ;;  %v6729_v7 = vsel %vm6727_vm15, %v12401_v38, 2102212464  ;;  %v6236_v62 = vadd.f32 %v6235_v23, %v6216_v8  ;;  %v12474_v23 = vpop.f32.mrf.mxu2 }
 0x85f   :  { %v12454_v3 = vshrl.u32 %v6637_v10, 30  ;;  %vm6753_vm2 = vc.u32 %v6745_v61, %v6749_v18  ;;  %v6755_v59 = vadd.s32 %v6749_v18, %v6745_v61  ;;  %v6778_v50 = vadd.s32 %v6776_v46, %v6770_v26 }
 0x860   :  { %v6754_v54 = vsel %vm6753_vm2, 1, %v8689_v13  ;;  %vm6779_vm6 = vc.u32 %v6777_v32, %v6773_v0  ;;  %v6296_v14 = vadd.f32 %v6295_v44, %v12325_v30  ;;  %v6750_v31 = vshrl.u32 %v6746_v29, 16 }
 0x861   :  { %v6639_v34 = vshll.u32 %v12454_v3, 30  ;;  %v6756_v20 = vadd.s32 %v6754_v54, %v6748_v41  ;;  %vm6757_vm11 = vc.u32 %v6755_v59, %v6751_v63  ;;  %v6780_v57 = vsel %vm6779_vm6, 1, %v8689_v13 }
 0x862   :  { %v6758_v52 = vsel %vm6757_vm11, 1, %v8689_v13  ;;  %v6782_v43 = vadd.s32 %v6780_v57, %v6778_v50  ;;  %v6730_v24 = vsel %vm6726_vm4, %v12395_v55, %v6729_v7  ;;  %v6772_v49 = vshrl.u32 %v6768_v36, 16 }
 0x863   :  { %v6640_v9 = vsub.s32 %v6636_v58, %v6639_v34  ;;  %v6760_v17 = vadd.s32 %v6758_v52, %v6756_v20  ;;  %v12472_v38 = vadd.f32 %v6236_v62, %v11930_v53  ;;  %v6316_v15 = vadd.f32 %v6315_v12, %v6296_v14 }
 0x864   :  { %v6752_v30 = vshrl.u32 %v6747_v42, 16  ;;  %v6774_v11 = vshrl.u32 %v6769_v40, 16  ;;  %v6783_v8 = vadd.s32 %v6782_v43, %v6772_v49  ;;  %v6731_v55 = vsel %vm6725_vm7, %v6728_v35, %v6730_v24 }
 0x865   :  { %vm6641_vm0 = vcmp.lt.s32.totalorder %v6640_v9, 0  ;;  %v6642_v25 = vsub.s32 0, %v6640_v9  ;;  %v6761_v28 = vadd.s32 %v6760_v17, %v6750_v31  ;;  %v12477_v58 = vadd.f32 %v6316_v15, %v11935_v4  ;;  %v12496_v17 = vpop.f32.mrf.mxu3 }
 0x866   :  { %v12481_v36 = vadd.s32 %v6777_v32, %v6773_v0  ;;  %v6784_v6 = vadd.s32 %v6783_v8, %v6774_v11  ;;  %v6849_v16 = vand.u32 2139095040, %v12474_v23  ;;  %v6785_v40 = vmul.u32 %v12344_v37, %v6731_v55 }
 0x867   :  { %v6643_v29 = vsel %vm6641_vm0, %v6642_v25, %v6640_v9  ;;  %v6762_v44 = vadd.s32 %v6761_v28, %v6752_v30  ;;  %v6632_v41 = vadd.s32 %v12415_v45, %v12426_v39  ;;  %v6846_v37 = vand.u32 2147483647, %v12474_v23 }
 0x868   :  { %v6644_v53 = vclz %v6643_v29  ;;  %v6788_v42 = vadd.s32 1, %v6784_v6  ;;  %v6850_v19 = vshrl.u32 %v6849_v16, 23  ;;  %v7003_v11 = vand.u32 2139095040, %v12496_v17 }
 0x869   :  { %vm6787_vm5 = vc.u32 %v6762_v44, %v12481_v36  ;;  %v6853_v39 = vand.u32 8388607, %v6846_v37  ;;  %vm12522_vm10 = vcmp.le.f32.partialorder %v6538_v2, 0.7853982  ;;  %vm6540_vm3 = vcmp.lt.s32.totalorder %v12327_v48, 0 }
 0x86a   :  { %v8475_v26 = vadd.s32 4294967294, %v6644_v53  ;;  %v6789_v4 = vsel %vm6787_vm5, %v6788_v42, %v6784_v6  ;;  %v8480_v5 = vadd.s32 4294967169, %v6850_v19  ;;  %vm12570_vm2 = vcmp.le.f32.partialorder %v6692_v22, 0.7853982 }
 0x86b   :  { %v6790_v61 = vadd.s32 %v6789_v4, %v6785_v40  ;;  %v6854_v24 = vor.u32 8388608, %v6853_v39  ;;  %vm6694_vm6 = vcmp.lt.s32.totalorder %v12331_v1, 0 }
 0x86c   :  { %vm8476_vm9 = vcmp.lt.s32.totalorder %v8475_v26, 0  ;;  %v6856_v32 = vadd.s32 1, %v8480_v5  ;;  %v6786_v5 = vadd.s32 %v12481_v36, %v6762_v44 }
 0x86d   :  { %v6647_v10 = vsel %vm8476_vm9, 0, %v8475_v26  ;;  %v6791_v0 = vadd.s32 536870912, %v6790_v61 }
 0x86e   :  { %v6648_v18 = vsub.s32 32, %v6647_v10  ;;  %v6652_v63 = vsub.s32 4294967266, %v6647_v10  ;;  %v6649_v59 = vshll.u32 %v6640_v9, %v6647_v10  ;;  %vm6857_vm13 = vcmp.gt.s32.totalorder %v6856_v32, 0 }
 0x86f   :  { %v12488_v54 = vshrl.u32 %v6791_v0, 30  ;;  %v6858_v7 = vsel %vm6857_vm13, %v6856_v32, 0  ;;  %v12528_v0 = vshll.u32 %v6854_v24, 8 }
 0x870   :  { %v6650_v46 = vshrl.u32 %v6632_v41, %v6648_v18  ;;  %v6653_v35 = vadd.s32 127, %v6652_v63  ;;  %v6860_v52 = vand.u32 31, %v6858_v7  ;;  %v12502_v28 = vshrl.u32 %v6858_v7, 5 }
 0x871   :  { %v6793_v20 = vshll.u32 %v12488_v54, 30  ;;  %v6895_v24 = vand.u32 65535, %v12528_v0 }
 0x872   :  { %v6651_v50 = vor.u32 %v6650_v46, %v6649_v59  ;;  %v6654_v34 = vshll.u32 %v6653_v35, 23  ;;  %v12494_v62 = vsub.s32 32, %v6860_v52  ;;  %v6863_v30 = vshll.u32 %v8683_v56, %v6860_v52 }
 0x873   :  { %v6794_v45 = vsub.s32 %v6790_v61, %v6793_v20  ;;  %v6866_v8 = vshll.u32 %v13489_v21, %v6860_v52  ;;  %v6872_v55 = vshll.u32 %v13463_v33, %v6860_v52  ;;  %v6869_v26 = vshll.u32 %v13462_v47, %v6860_v52 }
 0x874   :  { %v6655_v57 = vor.u32 4788187, %v6654_v34  ;;  %v6658_v9 = vcvt.s32.f32 %v6651_v50  ;;  %v6864_v49 = vshrl.u32 %v13489_v21, %v12494_v62  ;;  %v6867_v15 = vshrl.u32 %v13462_v47, %v12494_v62 }
 0x875   :  { %vm6795_vm8 = vcmp.lt.s32.totalorder %v6794_v45, 0  ;;  %v6796_v31 = vsub.s32 0, %v6794_v45  ;;  %v6870_v29 = vshrl.u32 %v13463_v33, %v12494_v62  ;;  %v6873_v53 = vshrl.u32 %v13464_v60, %v12494_v62 }
 0x876   :  { %v6656_v14 = vand.u32 2147483647, %v6655_v57  ;;  %v6876_v42 = vshrl.u32 %v13449_v51, %v12494_v62  ;;  %v12515_v40 = vor.u32 %v6864_v49, %v6863_v30  ;;  %v12517_v19 = vor.u32 %v6867_v15, %v6866_v8 }
 0x877   :  { %v6797_v12 = vsel %vm6795_vm8, %v6796_v31, %v6794_v45  ;;  %v6874_v4 = vor.u32 %v6873_v53, %v6872_v55  ;;  %v6875_v10 = vshll.u32 %v13464_v60, %v6860_v52  ;;  %v6871_v18 = vor.u32 %v6870_v29, %v6869_v26 }
 0x878   :  { %v6659_v43 = vmul.f32 %v6658_v9, %v6656_v14  ;;  %v6798_v25 = vclz %v6797_v12  ;;  %vm6878_vm4 = vcmp.lt.s32.totalorder %v12502_v28, 1  ;;  %vm6881_vm7 = vcmp.lt.s32.totalorder %v12502_v28, 4 }
 0x879   :  { %v6877_v63 = vor.u32 %v6876_v42, %v6875_v10  ;;  %v7004_v59 = vshrl.u32 %v7003_v11, 23  ;;  %v6886_v36 = vsel %vm6878_vm4, %v12515_v40, %v12517_v19  ;;  %v6887_v44 = vsel %vm6881_vm7, %v6874_v4, 920167782  ;;  %v6359_v42 = vld [vmem:[#allocation9 + $0x18e8] sm:$0xff] }
 0x87a   :  { %v6660_v6 = vxor.u32 2147483648, %v6659_v43  ;;  %v8478_v16 = vadd.s32 4294967294, %v6798_v25  ;;  %vm6879_vm12 = vcmp.lt.s32.totalorder %v12502_v28, 2  ;;  %vm6880_vm14 = vcmp.lt.s32.totalorder %v12502_v28, 3 }
 0x87b   :  { %v6888_v7 = vsel %vm6880_vm14, %v6871_v18, %v6887_v44  ;;  %v6890_v20 = vsel %vm6878_vm4, %v12517_v19, %v6871_v18  ;;  %v6891_v52 = vsel %vm6881_vm7, %v6877_v63, 1326507024  ;;  %v8483_v39 = vadd.s32 4294967169, %v7004_v59 }
 0x87c   :  { %vm8479_vm15 = vcmp.lt.s32.totalorder %v8478_v16, 0  ;;  %v6661_v2 = vsel %vm6540_vm3, %v6660_v6, %v6659_v43  ;;  %v6892_v31 = vsel %vm6880_vm14, %v6874_v4, %v6891_v52  ;;  %v6896_v49 = vshrl.u32 %v12528_v0, 16 }
 0x87d   :  { %v6801_v41 = vsel %vm8479_vm15, 0, %v8478_v16  ;;  %v12552_v57 = vsel %vm12522_vm10, %v12327_v48, %v6661_v2  ;;  %v6893_v12 = vsel %vm6879_vm12, %v6890_v20, %v6892_v31  ;;  %v7010_v55 = vadd.s32 1, %v8483_v39 }
 0x87e   :  { %v6802_v32 = vsub.s32 32, %v6801_v41  ;;  %v6806_v46 = vsub.s32 4294967266, %v6801_v41  ;;  %v6803_v35 = vshll.u32 %v6794_v45, %v6801_v41  ;;  %v6889_v45 = vsel %vm6879_vm12, %v6886_v36, %v6888_v7 }
 0x87f   :  { %v6920_v43 = vshrl.u32 %v6889_v45, 16  ;;  %v12564_v15 = vmul.f32 %v12552_v57, %v12552_v57  ;;  %v6897_v30 = vand.u32 65535, %v6893_v12  ;;  %v6898_v11 = vshrl.u32 %v6893_v12, 16 }
 0x880   :  { %v6804_v50 = vshrl.u32 %v6786_v5, %v6802_v32  ;;  %v6807_v34 = vadd.s32 127, %v6806_v46  ;;  %v6919_v8 = vand.u32 65535, %v6889_v45  ;;  %v7000_v4 = vand.u32 2147483647, %v12496_v17 }
 0x881   :  { %v12566_v29 = vmul.u32 %v6920_v43, %v6895_v24  ;;  %v6900_v16 = vmul.u32 %v6898_v11, %v6895_v24  ;;  %v6901_v26 = vmul.u32 %v6897_v30, %v6896_v49  ;;  %v6674_v10 = vmul.f32 -0.00019511016, %v12564_v15 }
 0x882   :  { %v6805_v14 = vor.u32 %v6804_v50, %v6803_v35  ;;  %v6808_v9 = vshll.u32 %v6807_v34, 23  ;;  %v6899_v41 = vmul.u32 %v6897_v30, %v6895_v24  ;;  %v6902_v32 = vmul.u32 %v6898_v11, %v6896_v49 }
 0x883   :  { %v6903_v63 = vshll.u32 %v6900_v16, 16  ;;  %v12577_v59 = vmul.u32 %v6919_v8, %v6896_v49  ;;  %v6925_v2 = vshll.u32 %v12566_v29, 16  ;;  %vm7011_vm11 = vcmp.gt.s32.totalorder %v7010_v55, 0 }
 0x884   :  { %v6809_v25 = vor.u32 4788187, %v6808_v9  ;;  %v6812_v6 = vcvt.s32.f32 %v6805_v14  ;;  %v6905_v22 = vshll.u32 %v6901_v26, 16  ;;  %v6862_v44 = vshrl.u32 %v8683_v56, %v12494_v62 }
 0x885   :  { %vm6907_vm0 = vc.u32 %v6899_v41, %v6903_v63  ;;  %v6909_v36 = vadd.s32 %v6903_v63, %v6899_v41  ;;  %v6883_v35 = vsel %vm6881_vm7, %v6871_v18, 2102212464  ;;  %v6921_v34 = vmul.u32 %v6919_v8, %v6895_v24  ;;  %v6360_v41 = vld [vmem:[#allocation9 + $0x18f0] sm:$0xff] }
 0x886   :  { %v6810_v53 = vand.u32 2147483647, %v6809_v25  ;;  %v6908_v50 = vsel %vm6907_vm0, 1, %v8689_v13  ;;  %v6675_v7 = vadd.f32 0.008332121, %v6674_v10  ;;  %v6924_v62 = vmul.u32 %v6920_v43, %v6896_v49  ;;  %7168 = vmatpush.msra.mxu0 %v6360_v41 }
 0x887   :  { %v6910_v52 = vadd.s32 %v6908_v50, %v6902_v32  ;;  %vm6911_vm5 = vc.u32 %v6909_v36, %v6905_v22  ;;  %vm6929_vm9 = vc.u32 %v6921_v34, %v6925_v2  ;;  %v6904_v14 = vshrl.u32 %v6900_v16, 16  ;;  %v6358_v36 = vld [vmem:[#allocation9 + $0x18e0] sm:$0xff] }
 0x888   :  { %v6813_v5 = vmul.f32 %v6812_v6, %v6810_v53  ;;  %v6912_v39 = vsel %vm6911_vm5, 1, %v8689_v13  ;;  %v6927_v9 = vshll.u32 %v12577_v59, 16  ;;  %v6930_v31 = vsel %vm6929_vm9, 1, %v8689_v13  ;;  %7169 = vmatpush.msra.mxu0 %v6358_v36 }
 0x889   :  { %v6914_v18 = vadd.s32 %v6912_v39, %v6910_v52  ;;  %v6931_v24 = vadd.s32 %v6925_v2, %v6921_v34  ;;  %v6932_v25 = vadd.s32 %v6930_v31, %v6924_v62  ;;  %v7012_v30 = vsel %vm7011_vm11, %v7010_v55, 0  ;;  %v6356_v39 = vld [vmem:[#allocation9 + $0x18d0] sm:$0xff] }
 0x88a   :  { %v6814_v46 = vxor.u32 2147483648, %v6813_v5  ;;  %v6667_v11 = vmul.f32 -0.001358992, %v12564_v15  ;;  %v6882_v43 = vsel %vm6878_vm4, %v6862_v44, %v12515_v40  ;;  %v6884_v8 = vsel %vm6880_vm14, %v12517_v19, %v6883_v35  ;;  %v6390_v44 = vld [vmem:[#allocation9 + $0x19e0] sm:$0xff]  ;;  %v6388_v62 = vld [vmem:[#allocation9 + $0x19d0] sm:$0xff]  ;;  %7170 = vmatpush.msra.mxu0 %v6356_v39 }
 0x88b   :  { %v6915_v49 = vadd.s32 %v6914_v18, %v6904_v14  ;;  %v6906_v53 = vshrl.u32 %v6901_v26, 16  ;;  %vm6933_vm13 = vc.u32 %v6931_v24, %v6927_v9  ;;  %v7014_v6 = vand.u32 31, %v7012_v30  ;;  %v6392_v26 = vld [vmem:[#allocation9 + $0x19f0] sm:$0xff] }
 0x88c   :  { %v6815_v20 = vsel %vm6694_vm6, %v6814_v46, %v6813_v5  ;;  %v6676_v16 = vmul.f32 %v6675_v7, %v12564_v15  ;;  %v6926_v10 = vshrl.u32 %v12566_v29, 16  ;;  %v6934_v55 = vsel %vm6933_vm13, 1, %v8689_v13  ;;  %7188 = vmatpush.msra.mxu1 %v6392_v26  ;;  %v6384_v26 = vld [vmem:[#allocation9 + $0x19b0] sm:$0xff] }
 0x88d   :  { %v12590_v45 = vsel %vm12570_vm2, %v12331_v1, %v6815_v20  ;;  %v12612_v5 = vand.u32 8388607, %v7000_v4  ;;  %v12615_v63 = vadd.s32 %v6915_v49, %v6906_v53  ;;  %v6936_v32 = vadd.s32 %v6934_v55, %v6932_v25  ;;  %v6380_v39 = vld [vmem:[#allocation9 + $0x1990] sm:$0xff] }
 0x88e   :  { %v12597_v12 = vmul.f32 %v12590_v45, %v12590_v45  ;;  %v12617_v19 = vsub.s32 32, %v7014_v6  ;;  %v6662_v2 = vsub.s32 4, %v12454_v3  ;;  %v6668_v46 = vadd.f32 0.041655596, %v6667_v11  ;;  %7189 = vmatpush.msra.mxu1 %v6390_v44  ;;  %v6354_v11 = vld [vmem:[#allocation9 + $0x18c0] sm:$0xff] }
 0x88f   :  { %v6885_v29 = vsel %vm6879_vm12, %v6882_v43, %v6884_v8  ;;  %v6928_v22 = vshrl.u32 %v12577_v59, 16  ;;  %v12623_v35 = vadd.s32 %v6931_v24, %v6927_v9  ;;  %v6937_v50 = vadd.s32 %v6936_v32, %v6926_v10  ;;  %v6386_v43 = vld [vmem:[#allocation9 + $0x19c0] sm:$0xff]  ;;  %7171 = vmatpush.msra.mxu0 %v6354_v11  ;;  %v6352_v32 = vld [vmem:[#allocation9 + $0x18b0] sm:$0xff] }
 0x890   :  { %v6828_v40 = vmul.f32 -0.00019511016, %v12597_v12  ;;  %v7018_v34 = vshrl.u32 %v13489_v21, %v12617_v19  ;;  %v7021_v7 = vshrl.u32 %v13462_v47, %v12617_v19  ;;  %v6677_v20 = vadd.f32 -0.16666654, %v6676_v16  ;;  %7190 = vmatpush.msra.mxu1 %v6388_v62  ;;  %v6350_v44 = vld [vmem:[#allocation9 + $0x18a0] sm:$0xff] }
 0x891   :  { %v12629_v52 = vshrl.u32 %v7012_v30, 5  ;;  %v7017_v28 = vshll.u32 %v8683_v56, %v7014_v6  ;;  %v7024_v59 = vshrl.u32 %v13463_v33, %v12617_v19  ;;  %v6938_v18 = vadd.s32 %v6937_v50, %v6928_v22  ;;  %7172 = vmatpush.msra.mxu0 %v6352_v32  ;;  %v6382_v50 = vld [vmem:[#allocation9 + $0x19a0] sm:$0xff] }
 0x892   :  { %v6829_v14 = vadd.f32 0.008332121, %v6828_v40  ;;  %vm6941_vm8 = vc.u32 %v12615_v63, %v12623_v35  ;;  %v7020_v9 = vshll.u32 %v13489_v21, %v7014_v6  ;;  %v7023_v24 = vshll.u32 %v13462_v47, %v7014_v6  ;;  %7191 = vmatpush.msra.mxu1 %v6386_v43  ;;  %v6346_v11 = vld [vmem:[#allocation9 + $0x1880] sm:$0xff] }
 0x893   :  { %v12637_v31 = vor.u32 %v7018_v34, %v7017_v28  ;;  %v7026_v25 = vshll.u32 %v13463_v33, %v7014_v6  ;;  %v7027_v30 = vshrl.u32 %v13464_v60, %v12617_v19  ;;  %v6942_v49 = vadd.s32 1, %v6938_v18  ;;  %7173 = vmatpush.msra.mxu0 %v6350_v44  ;;  %v6378_v43 = vld [vmem:[#allocation9 + $0x1980] sm:$0xff] }
 0x894   :  { %v12643_v8 = vor.u32 %v7021_v7, %v7020_v9  ;;  %v7029_v53 = vshll.u32 %v13464_v60, %v7014_v6  ;;  %v7030_v16 = vshrl.u32 %v13449_v51, %v12617_v19  ;;  %v6939_v10 = vmul.u32 %v12528_v0, %v6885_v29  ;;  %7192 = vmatpush.msra.mxu1 %v6384_v26 }
 0x895   :  { %v7008_v55 = vor.u32 8388608, %v12612_v5  ;;  %v12650_v41 = vor.u32 %v7024_v59, %v7023_v24  ;;  %v7028_v40 = vor.u32 %v7027_v30, %v7026_v25  ;;  %v12655_v22 = vsel %vm6540_vm3, %v6662_v2, %v12454_v3  ;;  %v6348_v59 = vld [vmem:[#allocation9 + $0x1890] sm:$0xff] }
 0x896   :  { %v6669_v6 = vmul.f32 %v6668_v46, %v12564_v15  ;;  %v6943_v36 = vsel %vm6941_vm8, %v6942_v49, %v6938_v18  ;;  %v7031_v0 = vor.u32 %v7030_v16, %v7029_v53  ;;  %v6678_v5 = vmul.f32 %v6677_v20, %v12564_v15  ;;  %7193 = vmatpush.msra.mxu1 %v6382_v50 }
 0x897   :  { %v6944_v29 = vadd.s32 %v6943_v36, %v6939_v10  ;;  %vm7032_vm15 = vcmp.lt.s32.totalorder %v12629_v52, 1  ;;  %vm7035_vm4 = vcmp.lt.s32.totalorder %v12629_v52, 4  ;;  %v6821_v3 = vmul.f32 -0.001358992, %v12597_v12  ;;  %7174 = vmatpush.msra.mxu0 %v6348_v59  ;;  %v6376_v36 = vld [vmem:[#allocation9 + $0x1970] sm:$0xff] }
 0x898   :  { %v6830_v2 = vmul.f32 %v6829_v14, %v12597_v12  ;;  %v7040_v46 = vsel %vm7032_vm15, %v12637_v31, %v12643_v8  ;;  %v7041_v34 = vsel %vm7035_vm4, %v7028_v40, 920167782  ;;  %vm7034_vm3 = vcmp.lt.s32.totalorder %v12629_v52, 3  ;;  %7194 = vmatpush.msra.mxu1 %v6380_v39 }
 0x899   :  { %v6945_v7 = vadd.s32 536870912, %v6944_v29  ;;  %v7044_v20 = vsel %vm7032_vm15, %v12643_v8, %v12650_v41  ;;  %v12677_v28 = vshll.u32 %v7008_v55, 8  ;;  %v6816_v62 = vsub.s32 4, %v12488_v54  ;;  %7175 = vmatpush.msra.mxu0 %v6346_v11 }
 0x89a   :  { %vm7033_vm7 = vcmp.lt.s32.totalorder %v12629_v52, 2  ;;  %v7042_v14 = vsel %vm7034_vm3, %v12650_v41, %v7041_v34  ;;  %v7045_v18 = vsel %vm7035_vm4, %v7031_v0, 1326507024  ;;  %v6670_v9 = vadd.f32 -0.4999988, %v6669_v6  ;;  %7195 = vmatpush.msra.mxu1 %v6378_v43  ;;  %v6344_v6 = vld [vmem:[#allocation9 + $0x1870] sm:$0xff] }
 0x89b   :  { %v12686_v24 = vshrl.u32 %v6945_v7, 30  ;;  %v7043_v25 = vsel %vm7033_vm7, %v7040_v46, %v7042_v14  ;;  %v7046_v30 = vsel %vm7034_vm3, %v7028_v40, %v7045_v18  ;;  %v6679_v49 = vadd.f32 1.0, %v6678_v5  ;;  %7176 = vmatpush.msra.mxu0 %v6344_v6  ;;  %v6342_v34 = vld [vmem:[#allocation9 + $0x1860] sm:$0xff]  ;;  %v6340_v18 = vld [vmem:[#allocation9 + $0x1850] sm:$0xff] }
 0x89c   :  { %v6822_v53 = vadd.f32 0.041655596, %v6821_v3  ;;  %v6831_v16 = vadd.f32 -0.16666654, %v6830_v2  ;;  %v7047_v10 = vsel %vm7033_vm7, %v7044_v20, %v7046_v30  ;;  %v7050_v32 = vshrl.u32 %v12677_v28, 16  ;;  %7196 = vmatpush.msra.mxu1 %v6376_v36  ;;  %v6374_v7 = vld [vmem:[#allocation9 + $0x1960] sm:$0xff] }
 0x89d   :  { %v6947_v55 = vshll.u32 %v12686_v24, 30  ;;  %v7051_v26 = vand.u32 65535, %v7047_v10  ;;  %v7049_v40 = vand.u32 65535, %v12677_v28  ;;  %v7052_v0 = vshrl.u32 %v7047_v10, 16  ;;  %7177 = vmatpush.msra.mxu0 %v6342_v34  ;;  %v6370_v10 = vld [vmem:[#allocation9 + $0x1940] sm:$0xff]  ;;  %v6368_v34 = vld [vmem:[#allocation9 + $0x1930] sm:$0xff] }
 0x89e   :  { %v7073_v44 = vand.u32 65535, %v7043_v25  ;;  %v7074_v50 = vshrl.u32 %v7043_v25, 16  ;;  %v6665_v5 = vsel %vm12522_vm10, 0, %v12655_v22  ;;  %v12703_v3 = vsel %vm6694_vm6, %v6816_v62, %v12488_v54  ;;  %7197 = vmatpush.msra.mxu1 %v6374_v7  ;;  %v6372_v25 = vld [vmem:[#allocation9 + $0x1950] sm:$0xff] }
 0x89f   :  { %v12705_v2 = vsub.s32 %v6944_v29, %v6947_v55  ;;  %v12707_v46 = vmul.u32 %v7051_v26, %v7050_v32  ;;  %v12710_v20 = vmul.f32 %v6670_v9, %v12564_v15  ;;  %v12713_v59 = vmul.f32 %v6679_v49, %v12552_v57  ;;  %7178 = vmatpush.msra.mxu0 %v6340_v18 }
 0x8a0   :  { %v7054_v39 = vmul.u32 %v7052_v0, %v7049_v40  ;;  %v12715_v14 = vmul.u32 %v7074_v50, %v7049_v40  ;;  %v6823_v54 = vmul.f32 %v6822_v53, %v12597_v12  ;;  %v6832_v29 = vmul.f32 %v6831_v16, %v12597_v12  ;;  %7198 = vmatpush.msra.mxu1 %v6372_v25  ;;  %v6338_v16 = vld [vmem:[#allocation9 + $0x1840] sm:$0xff] }
 0x8a1   :  { %vm6949_vm12 = vcmp.lt.s32.totalorder %v12705_v2, 0  ;;  %v6950_v62 = vsub.s32 0, %v12705_v2  ;;  %v6940_v15 = vadd.s32 %v12623_v35, %v12615_v63  ;;  %v7053_v57 = vmul.u32 %v7051_v26, %v7049_v40  ;;  %7179 = vmatpush.msra.mxu0 %v6338_v16  ;;  %v6332_v16 = vld [vmem:[#allocation9 + $0x1810] sm:$0xff] }
 0x8a2   :  { %v7057_v9 = vshll.u32 %v7054_v39, 16  ;;  %v7075_v30 = vmul.u32 %v7073_v44, %v7049_v40  ;;  %v7056_v43 = vmul.u32 %v7052_v0, %v7050_v32  ;;  %v7059_v49 = vshll.u32 %v12707_v46, 16  ;;  %7199 = vmatpush.msra.mxu1 %v6370_v10  ;;  %v6336_v0 = vld [vmem:[#allocation9 + $0x1830] sm:$0xff] }
 0x8a3   :  { %v6951_v11 = vsel %vm6949_vm12, %v6950_v62, %v12705_v2  ;;  %v12725_v53 = vmul.u32 %v7073_v44, %v7050_v32  ;;  %v7079_v36 = vshll.u32 %v12715_v14, 16  ;;  %v6824_v63 = vadd.f32 -0.4999988, %v6823_v54  ;;  %7180 = vmatpush.msra.mxu0 %v6336_v0  ;;  %v6334_v54 = vld [vmem:[#allocation9 + $0x1820] sm:$0xff]  ;;  %v6364_v10 = vld [vmem:[#allocation9 + $0x1910] sm:$0xff] }
 0x8a4   :  { %v6952_v55 = vclz %v6951_v11  ;;  %vm7061_vm14 = vc.u32 %v7053_v57, %v7057_v9  ;;  %v7063_v6 = vadd.s32 %v7057_v9, %v7053_v57  ;;  %v6833_v35 = vadd.f32 1.0, %v6832_v29  ;;  %7200 = vmatpush.msra.mxu1 %v6368_v34  ;;  %v6366_v29 = vld [vmem:[#allocation9 + $0x1920] sm:$0xff] }
 0x8a5   :  { %v7062_v26 = vsel %vm7061_vm14, 1, %v8689_v13  ;;  %v7078_v40 = vmul.u32 %v7074_v50, %v7050_v32  ;;  %vm7083_vm11 = vc.u32 %v7075_v30, %v7079_v36  ;;  %v7081_v18 = vshll.u32 %v12725_v53, 16  ;;  %7181 = vmatpush.msra.mxu0 %v6334_v54 }
 0x8a6   :  { %v8481_v7 = vadd.s32 4294967294, %v6952_v55  ;;  %v7064_v44 = vadd.s32 %v7062_v26, %v7056_v43  ;;  %vm7065_vm6 = vc.u32 %v7063_v6, %v7059_v49  ;;  %v7084_v25 = vsel %vm7083_vm11, 1, %v8689_v13  ;;  %7201 = vmatpush.msra.mxu1 %v6366_v29  ;;  %v6330_v26 = vld [vmem:[#allocation9 + $0x1800] sm:$0xff] }
 0x8a7   :  { %v7066_v62 = vsel %vm7065_vm6, 1, %v8689_v13  ;;  %v7085_v57 = vadd.s32 %v7079_v36, %v7075_v30  ;;  %v7058_v32 = vshrl.u32 %v7054_v39, 16  ;;  %v7086_v9 = vadd.s32 %v7084_v25, %v7078_v40  ;;  %7182 = vmatpush.msra.mxu0 %v6332_v16  ;;  %v6362_v40 = vld [vmem:[#allocation9 + $0x1900] sm:$0xff]  ;;  %v6389_v16 = vld [vmem:[#allocation9 + $0x19d8] sm:$0xff] }
 0x8a8   :  { %vm8482_vm0 = vcmp.lt.s32.totalorder %v8481_v7, 0  ;;  %v7068_v50 = vadd.s32 %v7066_v62, %v7064_v44  ;;  %v6825_v11 = vmul.f32 %v6824_v63, %v12597_v12  ;;  %v7016_v49 = vshrl.u32 %v8683_v56, %v12617_v19  ;;  %7202 = vmatpush.msra.mxu1 %v6364_v10  ;;  %v6393_v62 = vld [vmem:[#allocation9 + $0x19f8] sm:$0xff] }
 0x8a9   :  { %v6955_v43 = vsel %vm8482_vm0, 0, %v8481_v7  ;;  %vm7087_vm5 = vc.u32 %v7085_v57, %v7081_v18  ;;  %v7037_v6 = vsel %vm7035_vm4, %v12650_v41, 2102212464  ;;  %v12739_v36 = vmul.f32 %v6833_v35, %v12590_v45  ;;  %7183 = vmatpush.msra.mxu0 %v6330_v26  ;;  %v6361_v41 = vld [vmem:[#allocation9 + $0x18f8] sm:$0xff] }
 0x8aa   :  { %v6956_v55 = vsub.s32 32, %v6955_v43  ;;  %v6960_v30 = vsub.s32 4294967266, %v6955_v43  ;;  %v7069_v39 = vadd.s32 %v7068_v50, %v7058_v32  ;;  %v7060_v12 = vshrl.u32 %v12707_v46, 16  ;;  %7203 = vmatpush.msra.mxu1 %v6362_v40 }
 0x8ab   :  { %v7080_v63 = vshrl.u32 %v12715_v14, 16  ;;  %v7088_v19 = vsel %vm7087_vm5, 1, %v8689_v13  ;;  %v6957_v0 = vshll.u32 %v12705_v2, %v6955_v43  ;;  %v6819_v45 = vsel %vm12570_vm2, 0, %v12703_v3  ;;  %7248 = vmatpush.msrb.mxu0 %v6361_v41  ;;  %v6391_v3 = vld [vmem:[#allocation9 + $0x19e8] sm:$0xff]  ;;  %v6424_v41 = vld [vmem:[#allocation9 + $0x1af0] sm:$0xff] }
 0x8ac   :  { %v6958_v34 = vshrl.u32 %v6940_v15, %v6956_v55  ;;  %v6961_v7 = vadd.s32 127, %v6960_v30  ;;  %v7090_v44 = vadd.s32 %v7088_v19, %v7086_v9  ;;  %v7036_v46 = vsel %vm7032_vm15, %v7016_v49, %v12637_v31  ;;  %7268 = vmatpush.msrb.mxu1 %v6393_v62  ;;  %v6357_v49 = vld [vmem:[#allocation9 + $0x18d8] sm:$0xff]  ;;  %v6456_v62 = vld [vmem:[#allocation9 + $0x1bf0] sm:$0xff]  ;;  %7208 = vmatpush.msra.mxu2 %v6424_v41 }
 0x8ad   :  { %v7038_v14 = vsel %vm7034_vm3, %v12643_v8, %v7037_v6  ;;  %v12754_v35 = vadd.s32 %v7069_v39, %v7060_v12  ;;  %v7082_v25 = vshrl.u32 %v12725_v53, 16  ;;  %v6672_v29 = vadd.f32 1.0, %v12710_v20  ;;  %7249 = vmatpush.msrb.mxu0 %v6359_v42  ;;  %v6353_v39 = vld [vmem:[#allocation9 + $0x18b8] sm:$0xff]  ;;  %7228 = vmatpush.msra.mxu3 %v6456_v62  ;;  %v6339_v62 = vld [vmem:[#allocation9 + $0x1848] sm:$0xff] }
 0x8ae   :  { %v6959_v2 = vor.u32 %v6958_v34, %v6957_v0  ;;  %v6962_v15 = vshll.u32 %v6961_v7, 23  ;;  %v7091_v54 = vadd.s32 %v7090_v44, %v7080_v63  ;;  %v6682_v31 = vand.u32 3, %v6665_v5  ;;  %7269 = vmatpush.msrb.mxu1 %v6391_v3  ;;  %v6385_v12 = vld [vmem:[#allocation9 + $0x19b8] sm:$0xff]  ;;  %v6383_v0 = vld [vmem:[#allocation9 + $0x19a8] sm:$0xff] }
 0x8af   :  { %v6826_v8 = vadd.f32 1.0, %v6825_v11  ;;  %v12762_v32 = vadd.s32 %v7085_v57, %v7081_v18  ;;  %v6836_v50 = vand.u32 3, %v6819_v45  ;;  %v7039_v53 = vsel %vm7033_vm7, %v7036_v46, %v7038_v14  ;;  %7250 = vmatpush.msrb.mxu0 %v6357_v49  ;;  %v6355_v57 = vld [vmem:[#allocation9 + $0x18c8] sm:$0xff]  ;;  %v6377_v49 = vld [vmem:[#allocation9 + $0x1978] sm:$0xff] }
 0x8b0   :  { %v6963_v9 = vor.u32 4788187, %v6962_v15  ;;  %v7092_v43 = vadd.s32 %v7091_v54, %v7082_v25  ;;  %v6685_v20 = vxor.u32 2147483648, %v12713_v59  ;;  %v6839_v61 = vxor.u32 2147483648, %v12739_v36  ;;  %7270 = vmatpush.msrb.mxu1 %v6389_v16  ;;  %v6387_v11 = vld [vmem:[#allocation9 + $0x19c8] sm:$0xff]  ;;  %v6381_v15 = vld [vmem:[#allocation9 + $0x1998] sm:$0xff] }
 0x8b1   :  { %vm7095_vm10 = vc.u32 %v12754_v35, %v12762_v32  ;;  %v6966_v5 = vcvt.s32.f32 %v6959_v2  ;;  %v6688_v52 = vxor.u32 2147483648, %v6672_v29  ;;  %v6842_v10 = vxor.u32 2147483648, %v6826_v8  ;;  %7251 = vmatpush.msrb.mxu0 %v6355_v57  ;;  %v6454_v54 = vld [vmem:[#allocation9 + $0x1be0] sm:$0xff]  ;;  %v6347_v3 = vld [vmem:[#allocation9 + $0x1888] sm:$0xff] }
 0x8b2   :  { %v6964_v22 = vand.u32 2147483647, %v6963_v9  ;;  %v7096_v18 = vadd.s32 1, %v7092_v43  ;;  %v7093_v55 = vmul.u32 %v12677_v28, %v7039_v53  ;;  %vm6684_vm2 = vcmp.eq.s32.totalorder %v6682_v31, 0  ;;  %7271 = vmatpush.msrb.mxu1 %v6387_v11  ;;  %v6351_v28 = vld [vmem:[#allocation9 + $0x18a8] sm:$0xff]  ;;  %7229 = vmatpush.msra.mxu3 %v6454_v54  ;;  %v6420_v9 = vld [vmem:[#allocation9 + $0x1ad0] sm:$0xff] }
 0x8b3   :  { %vm6838_vm9 = vcmp.eq.s32.totalorder %v6836_v50, 0  ;;  %v6686_v63 = vsel %vm6684_vm2, %v6672_v29, %v6685_v20  ;;  %vm6848_vm13 = vcmp.lt.s32.totalorder %v12474_v23, 0  ;;  %7252 = vmatpush.msrb.mxu0 %v6353_v39  ;;  %vm6683_vm8 = vcmp.lt.s32.totalorder %v6682_v31, 2  ;;  %v6379_v29 = vld [vmem:[#allocation9 + $0x1988] sm:$0xff]  ;;  %v6452_v53 = vld [vmem:[#allocation9 + $0x1bd0] sm:$0xff] }
 0x8b4   :  { %v6967_v30 = vmul.f32 %v6966_v5, %v6964_v22  ;;  %v7097_v6 = vsel %vm7095_vm10, %v7096_v18, %v7092_v43  ;;  %v6840_v19 = vsel %vm6838_vm9, %v6826_v8, %v6839_v61  ;;  %vm6687_vm15 = vcmp.eq.s32.totalorder %v6682_v31, 2  ;;  %7272 = vmatpush.msrb.mxu1 %v6385_v12  ;;  %v6345_v43 = vld [vmem:[#allocation9 + $0x1878] sm:$0xff]  ;;  %7230 = vmatpush.msra.mxu3 %v6452_v53  ;;  %v6418_v61 = vld [vmem:[#allocation9 + $0x1ac0] sm:$0xff]  ;;  %v6343_v57 = vld [vmem:[#allocation9 + $0x1868] sm:$0xff] }
 0x8b5   :  { %v7098_v26 = vadd.s32 %v7097_v6, %v7093_v55  ;;  %vm6841_vm4 = vcmp.eq.s32.totalorder %v6836_v50, 2  ;;  %v6689_v34 = vsel %vm6687_vm15, %v6688_v52, %v12713_v59  ;;  %vm6837_vm3 = vcmp.lt.s32.totalorder %v6836_v50, 2  ;;  %7253 = vmatpush.msrb.mxu0 %v6351_v28  ;;  %v6349_v59 = vld [vmem:[#allocation9 + $0x1898] sm:$0xff]  ;;  %v6450_v22 = vld [vmem:[#allocation9 + $0x1bc0] sm:$0xff]  ;;  %v6416_v55 = vld [vmem:[#allocation9 + $0x1ab0] sm:$0xff] }
 0x8b6   :  { %v6968_v40 = vxor.u32 2147483648, %v6967_v30  ;;  %v6843_v7 = vsel %vm6841_vm4, %v6842_v10, %v12739_v36  ;;  %v6690_v45 = vsel %vm6683_vm8, %v6686_v63, %v6689_v34  ;;  %vm12776_vm7 = vcmp.le.f32.partialorder %v6846_v37, 0.7853982  ;;  %7273 = vmatpush.msrb.mxu1 %v6383_v0  ;;  %v6422_v37 = vld [vmem:[#allocation9 + $0x1ae0] sm:$0xff]  ;;  %7231 = vmatpush.msra.mxu3 %v6450_v22  ;;  %v6375_v10 = vld [vmem:[#allocation9 + $0x1968] sm:$0xff]  ;;  %v6341_v63 = vld [vmem:[#allocation9 + $0x1858] sm:$0xff] }
 0x8b7   :  { %v7099_v44 = vadd.s32 536870912, %v7098_v26  ;;  %v6844_v46 = vsel %vm6837_vm3, %v6840_v19, %v6843_v7  ;;  %7254 = vmatpush.msrb.mxu0 %v6349_v59  ;;  %vm6681_vm12 = vweird.f32 %v12327_v48  ;;  %vm6835_vm14 = vweird.f32 %v12331_v1  ;;  %7209 = vmatpush.msra.mxu2 %v6422_v37  ;;  %v6373_v19 = vld [vmem:[#allocation9 + $0x1958] sm:$0xff]  ;;  %v6414_v0 = vld [vmem:[#allocation9 + $0x1aa0] sm:$0xff]  ;;  %v6444_v59 = vld [vmem:[#allocation9 + $0x1b90] sm:$0xff] }
 0x8b8   :  { %v6969_v2 = vsel %vm6848_vm13, %v6968_v40, %v6967_v30  ;;  %7274 = vmatpush.msrb.mxu1 %v6381_v15  ;;  %v6691_v31 = vsel %vm6681_vm12, nan, %v6690_v45  ;;  %v6845_v8 = vsel %vm6835_vm14, nan, %v6844_v46  ;;  %v6970_v16 = vsub.s32 4, %v12686_v24  ;;  %v6448_v30 = vld [vmem:[#allocation9 + $0x1bb0] sm:$0xff]  ;;  %v6446_v34 = vld [vmem:[#allocation9 + $0x1ba0] sm:$0xff]  ;;  %v6371_v45 = vld [vmem:[#allocation9 + $0x1948] sm:$0xff] }
 0x8b9   :  { %v12785_v36 = vsel %vm12776_vm7, %v12474_v23, %v6969_v2  ;;  %v12787_v25 = vshrl.u32 %v7099_v44, 30  ;;  %7255 = vmatpush.msrb.mxu0 %v6347_v3  ;;  %7210 = vmatpush.msra.mxu2 %v6420_v9  ;;  %v7154_v11 = vmul.f32 %v6691_v31, %v6691_v31  ;;  %v7155_v6 = vmul.f32 %v6845_v8, %v6845_v8  ;;  %v6412_v2 = vld [vmem:[#allocation9 + $0x1a90] sm:$0xff]  ;;  %v6369_v31 = vld [vmem:[#allocation9 + $0x1938] sm:$0xff]  ;;  %v6442_v9 = vld [vmem:[#allocation9 + $0x1b80] sm:$0xff] }
 0x8ba   :  { %v12793_v42 = vmul.f32 %v12785_v36, %v12785_v36  ;;  %7275 = vmatpush.msrb.mxu1 %v6379_v29  ;;  %v6971_v40 = vsel %vm6848_vm13, %v6970_v16, %v12686_v24  ;;  %7232 = vmatpush.msra.mxu3 %v6448_v30  ;;  %v6337_v29 = vld [vmem:[#allocation9 + $0x1838] sm:$0xff]  ;;  %v6335_v14 = vld [vmem:[#allocation9 + $0x1828] sm:$0xff]  ;;  %v6440_v16 = vld [vmem:[#allocation9 + $0x1b70] sm:$0xff]  ;;  %vm6989_vm2 = vweird.f32 %v12474_v23  ;;  %vm7002_vm9 = vcmp.lt.s32.totalorder %v12496_v17, 0 }
 0x8bb   :  { %v7101_v50 = vshll.u32 %v12787_v25, 30  ;;  %7256 = vmatpush.msrb.mxu0 %v6345_v43  ;;  %7211 = vmatpush.msra.mxu2 %v6418_v61  ;;  %v7159_v24 = vsub.f32 1.0, %v7155_v6  ;;  %v6973_v15 = vsel %vm12776_vm7, 0, %v6971_v40  ;;  %v7332_v23 = vld [vmem:[#allocation8 + $0xe0] sm:$0xff]  ;;  %vm12835_vm13 = vcmp.le.f32.partialorder %v7000_v4, 0.7853982 }
 0x8bc   :  { %v6975_v48 = vmul.f32 -0.001358992, %v12793_v42  ;;  %v6982_v1 = vmul.f32 -0.00019511016, %v12793_v42  ;;  %7276 = vmatpush.msrb.mxu1 %v6377_v49  ;;  %7233 = vmatpush.msra.mxu3 %v6446_v34  ;;  %v6408_v49 = vld [vmem:[#allocation9 + $0x1a70] sm:$0xff]  ;;  %v6402_v34 = vld [vmem:[#allocation9 + $0x1a40] sm:$0xff]  ;;  %vm7143_vm3 = vweird.f32 %v12496_v17 }
 0x8bd   :  { %v12799_v20 = vsub.s32 %v7098_v26, %v7101_v50  ;;  %7257 = vmatpush.msrb.mxu0 %v6343_v57  ;;  %7212 = vmatpush.msra.mxu2 %v6416_v55  ;;  %v7158_v26 = vsub.f32 1.0, %v7154_v11  ;;  %v12818_v8 = vadd.f32 %v7159_v24, %v7155_v6  ;;  %v6410_v50 = vld [vmem:[#allocation9 + $0x1a80] sm:$0xff]  ;;  %v6333_v57 = vld [vmem:[#allocation9 + $0x1818] sm:$0xff]  ;;  %v6432_v24 = vld [vmem:[#allocation9 + $0x1b30] sm:$0xff] }
 0x8be   :  { %v6976_v5 = vadd.f32 0.041655596, %v6975_v48  ;;  %v6983_v18 = vadd.f32 0.008332121, %v6982_v1  ;;  %7277 = vmatpush.msrb.mxu1 %v6375_v10  ;;  %7234 = vmatpush.msra.mxu3 %v6444_v59  ;;  %v6367_v1 = vld [vmem:[#allocation9 + $0x1928] sm:$0xff]  ;;  %v6406_v10 = vld [vmem:[#allocation9 + $0x1a60] sm:$0xff] }
 0x8bf   :  { %vm7103_vm6 = vcmp.lt.s32.totalorder %v12799_v20, 0  ;;  %v7104_v52 = vsub.s32 0, %v12799_v20  ;;  %7258 = vmatpush.msrb.mxu0 %v6341_v63  ;;  %7213 = vmatpush.msra.mxu2 %v6414_v0  ;;  %v12811_v46 = vadd.f32 %v7158_v26, %v7154_v11  ;;  %v6365_v11 = vld [vmem:[#allocation9 + $0x1918] sm:$0xff]  ;;  %v6438_v55 = vld [vmem:[#allocation9 + $0x1b60] sm:$0xff]  ;;  %v6436_v63 = vld [vmem:[#allocation9 + $0x1b50] sm:$0xff] }
 0x8c0   :  { %v6977_v39 = vmul.f32 %v6976_v5, %v12793_v42  ;;  %v6984_v12 = vmul.f32 %v6983_v18, %v12793_v42  ;;  %7278 = vmatpush.msrb.mxu1 %v6373_v19  ;;  %v7094_v5 = vadd.s32 %v12762_v32, %v12754_v35  ;;  %7235 = vmatpush.msra.mxu3 %v6442_v9  ;;  %v6398_v59 = vld [vmem:[#allocation9 + $0x1a20] sm:$0xff]  ;;  %v6421_v4 = vld [vmem:[#allocation9 + $0x1ad8] sm:$0xff] }
 0x8c1   :  { %v7105_v28 = vsel %vm7103_vm6, %v7104_v52, %v12799_v20  ;;  %7259 = vmatpush.msrb.mxu0 %v6339_v62  ;;  %7214 = vmatpush.msra.mxu2 %v6412_v2  ;;  %v7337_v62 = vld [vmem:[#allocation8 + $0x1e8] sm:$0xff] }
 0x8c2   :  { %v6978_v7 = vadd.f32 -0.4999988, %v6977_v39  ;;  %v6985_v44 = vadd.f32 -0.16666654, %v6984_v12  ;;  %v7106_v41 = vclz %v7105_v28  ;;  %7279 = vmatpush.msrb.mxu1 %v6371_v45  ;;  %7184 = vmatmul.f32.vlgmr.msra.gmra.mxu0 %v12811_v46  ;;  %v6331_v39 = vld [vmem:[#allocation9 + $0x1808] sm:$0xff]  ;;  %v6404_v12 = vld [vmem:[#allocation9 + $0x1a50] sm:$0xff] }
 0x8c3   :  { %7260 = vmatpush.msrb.mxu0 %v6337_v29  ;;  %7204 = vmatmul.f32.vlgmr.msra.gmra.mxu1 %v12818_v8  ;;  %v6396_v29 = vld [vmem:[#allocation9 + $0x1a10] sm:$0xff] }
 0x8c4   :  { %v6979_v37 = vmul.f32 %v6978_v7, %v12793_v42  ;;  %v6986_v54 = vmul.f32 %v6985_v44, %v12793_v42  ;;  %v8484_v3 = vadd.s32 4294967294, %v7106_v41  ;;  %7280 = vmatpush.msrb.mxu1 %v6369_v31  ;;  %v6990_v42 = vand.u32 3, %v6973_v15  ;;  %7215 = vmatpush.msra.mxu2 %v6410_v50  ;;  %v6434_v7 = vld [vmem:[#allocation9 + $0x1b40] sm:$0xff]  ;;  %v6400_v44 = vld [vmem:[#allocation9 + $0x1a30] sm:$0xff]  ;;  %v7333_v15 = vld [vmem:[#allocation8 + $0xe8] sm:$0xff] }
 0x8c5   :  { %7261 = vmatpush.msrb.mxu0 %v6335_v14  ;;  %7236 = vmatpush.msra.mxu3 %v6440_v16  ;;  %v7336_v41 = vld [vmem:[#allocation8 + $0x1e0] sm:$0xff] }
 0x8c6   :  { %v6980_v53 = vadd.f32 1.0, %v6979_v37  ;;  %v6987_v48 = vadd.f32 1.0, %v6986_v54  ;;  %vm8485_vm11 = vcmp.lt.s32.totalorder %v8484_v3, 0  ;;  %7281 = vmatpush.msrb.mxu1 %v6367_v1  ;;  %7216 = vmatpush.msra.mxu2 %v6408_v49  ;;  %vm6992_vm0 = vcmp.eq.s32.totalorder %v6990_v42, 0  ;;  %v6394_v50 = vld [vmem:[#allocation9 + $0x1a00] sm:$0xff]  ;;  %v6457_v1 = vld [vmem:[#allocation9 + $0x1bf8] sm:$0xff] }
 0x8c7   :  { %v7109_v43 = vsel %vm8485_vm11, 0, %v8484_v3  ;;  %7262 = vmatpush.msrb.mxu0 %v6333_v57  ;;  %vm6995_vm5 = vcmp.eq.s32.totalorder %v6990_v42, 2  ;;  %vm6991_vm10 = vcmp.lt.s32.totalorder %v6990_v42, 2  ;;  %7237 = vmatpush.msra.mxu3 %v6438_v55  ;;  %v6430_v3 = vld [vmem:[#allocation9 + $0x1b20] sm:$0xff]  ;;  %v6423_v49 = vld [vmem:[#allocation9 + $0x1ae8] sm:$0xff] }
 0x8c8   :  { %v6988_v61 = vmul.f32 %v6987_v48, %v12785_v36  ;;  %v6996_v22 = vxor.u32 2147483648, %v6980_v53  ;;  %v7110_v18 = vsub.s32 32, %v7109_v43  ;;  %v7114_v52 = vsub.s32 4294967266, %v7109_v43  ;;  %v6363_v36 = vld [vmem:[#allocation9 + $0x1908] sm:$0xff]  ;;  %7282 = vmatpush.msrb.mxu1 %v6365_v11  ;;  %7217 = vmatpush.msra.mxu2 %v6406_v10  ;;  %v6425_v48 = vld [vmem:[#allocation9 + $0x1af8] sm:$0xff] }
 0x8c9   :  { %v7111_v35 = vshll.u32 %v12799_v20, %v7109_v43  ;;  %7263 = vmatpush.msrb.mxu0 %v6331_v39  ;;  %7238 = vmatpush.msra.mxu3 %v6436_v63  ;;  %v6419_v11 = vld [vmem:[#allocation9 + $0x1ac8] sm:$0xff]  ;;  %v6449_v39 = vld [vmem:[#allocation9 + $0x1bb8] sm:$0xff] }
 0x8ca   :  { %v6993_v30 = vxor.u32 2147483648, %v6988_v61  ;;  %v7112_v6 = vshrl.u32 %v7094_v5, %v7110_v18  ;;  %v7115_v32 = vadd.s32 127, %v7114_v52  ;;  %v6997_v26 = vsel %vm6995_vm5, %v6996_v22, %v6988_v61  ;;  %7283 = vmatpush.msrb.mxu1 %v6363_v36  ;;  %7218 = vmatpush.msra.mxu2 %v6404_v12  ;;  %v6455_v61 = vld [vmem:[#allocation9 + $0x1be8] sm:$0xff]  ;;  %v6453_v5 = vld [vmem:[#allocation9 + $0x1bd8] sm:$0xff] }
 0x8cb   :  { %7264 = vmatmul.f32.vlgmr.msrb.gmra.mxu0 %v12811_v46  ;;  %7284 = vmatmul.f32.vlgmr.msrb.gmra.mxu1 %v12818_v8  ;;  %v6428_v8 = vld [vmem:[#allocation9 + $0x1b10] sm:$0xff]  ;;  %v7124_v52 = vsub.s32 4, %v12787_v25  ;;  %v6451_v10 = vld [vmem:[#allocation9 + $0x1bc8] sm:$0xff] }
 0x8cc   :  { %v6994_v19 = vsel %vm6992_vm0, %v6980_v53, %v6993_v30  ;;  %v7113_v28 = vor.u32 %v7112_v6, %v7111_v35  ;;  %v7116_v0 = vshll.u32 %v7115_v32, 23  ;;  %7219 = vmatpush.msra.mxu2 %v6402_v34  ;;  %7239 = vmatpush.msra.mxu3 %v6434_v7  ;;  %v6426_v53 = vld [vmem:[#allocation9 + $0x1b00] sm:$0xff]  ;;  %v6417_v6 = vld [vmem:[#allocation9 + $0x1ab8] sm:$0xff]  ;;  %v6415_v32 = vld [vmem:[#allocation9 + $0x1aa8] sm:$0xff] }
 0x8cd   :  { %v6998_v40 = vsel %vm6991_vm10, %v6994_v19, %v6997_v26  ;;  %7482 = vmatpush.msra.mxu0 %v7336_v41  ;;  %7502 = vmatpush.msra.mxu1 %v7337_v62  ;;  %v7125_v12 = vsel %vm7002_vm9, %v7124_v52, %v12787_v25  ;;  %v6447_v63 = vld [vmem:[#allocation9 + $0x1ba8] sm:$0xff]  ;;  %v6409_v25 = vld [vmem:[#allocation9 + $0x1a78] sm:$0xff] }
 0x8ce   :  { %v6999_v20 = vsel %vm6989_vm2, nan, %v6998_v40  ;;  %v7117_v45 = vor.u32 4788187, %v7116_v0  ;;  %v7120_v54 = vcvt.s32.f32 %v7113_v28  ;;  %7220 = vmatpush.msra.mxu2 %v6400_v44  ;;  %7240 = vmatpush.msra.mxu3 %v6432_v24  ;;  %v6413_v40 = vld [vmem:[#allocation9 + $0x1a98] sm:$0xff]  ;;  %v7127_v0 = vsel %vm12835_vm13, 0, %v7125_v12  ;;  %v6443_v44 = vld [vmem:[#allocation9 + $0x1b88] sm:$0xff] }
 0x8cf   :  { %v7156_v2 = vmul.f32 %v6999_v20, %v6999_v20  ;;  %7483 = vmatpush.msra.mxu0 %v7332_v23  ;;  %7503 = vmatpush.msra.mxu1 %v7333_v15  ;;  %v6445_v28 = vld [vmem:[#allocation9 + $0x1b98] sm:$0xff]  ;;  %v6411_v20 = vld [vmem:[#allocation9 + $0x1a88] sm:$0xff] }
 0x8d0   :  { %v7118_v37 = vand.u32 2147483647, %v7117_v45  ;;  %7221 = vmatpush.msra.mxu2 %v6398_v59  ;;  %7241 = vmatpush.msra.mxu3 %v6430_v3  ;;  %v7144_v45 = vand.u32 3, %v7127_v0  ;;  %v6441_v24 = vld [vmem:[#allocation9 + $0x1b78] sm:$0xff]  ;;  %v6407_v59 = vld [vmem:[#allocation9 + $0x1a68] sm:$0xff] }
 0x8d1   :  { %v7160_v46 = vsub.f32 1.0, %v7156_v2  ;;  %v6439_v15 = vld [vmem:[#allocation9 + $0x1b68] sm:$0xff]  ;;  %v6437_v3 = vld [vmem:[#allocation9 + $0x1b58] sm:$0xff] }
 0x8d2   :  { %v7121_v31 = vmul.f32 %v7120_v54, %v7118_v37  ;;  %7222 = vmatpush.msra.mxu2 %v6396_v29  ;;  %7242 = vmatpush.msra.mxu3 %v6428_v8  ;;  %v6405_v54 = vld [vmem:[#allocation9 + $0x1a58] sm:$0xff]  ;;  %vm7146_vm8 = vcmp.eq.s32.totalorder %v7144_v45, 0  ;;  %vm7149_vm15 = vcmp.eq.s32.totalorder %v7144_v45, 2  ;;  %vm7145_vm4 = vcmp.lt.s32.totalorder %v7144_v45, 2  ;;  %v6399_v42 = vld [vmem:[#allocation9 + $0x1a28] sm:$0xff] }
 0x8d3   :  { %v12828_v14 = vadd.f32 %v7160_v46, %v7156_v2  ;;  %8486 = vmatmul.msk.f32.vlgmr.msra.gmra.mxu0 %vm394_vm1, %v8933_v27  ;;  %8487 = vmatmul.msk.f32.vlgmr.msra.gmra.mxu1 %vm394_vm1, %v8933_v27 }
 0x8d4   :  { %v7122_v9 = vxor.u32 2147483648, %v7121_v31  ;;  %7223 = vmatpush.msra.mxu2 %v6394_v50  ;;  %7243 = vmatpush.msra.mxu3 %v6426_v53  ;;  %v6435_v50 = vld [vmem:[#allocation9 + $0x1b48] sm:$0xff]  ;;  %v6401_v53 = vld [vmem:[#allocation9 + $0x1a38] sm:$0xff] }
 0x8d5   :  { %7224 = vmatmul.f32.vlgmr.msra.gmra.mxu2 %v12828_v14 }
 0x8d6   :  { %v7123_v43 = vsel %vm7002_vm9, %v7122_v9, %v7121_v31  ;;  %7288 = vmatpush.msrb.mxu2 %v6425_v48  ;;  %7308 = vmatpush.msrb.mxu3 %v6457_v1  ;;  %v6403_v31 = vld [vmem:[#allocation9 + $0x1a48] sm:$0xff]  ;;  %v6433_v1 = vld [vmem:[#allocation9 + $0x1b38] sm:$0xff] }
 0x8d7   :  { %v7126_v16 = vsel %vm12835_vm13, %v12496_v17, %v7123_v43  ;;  %v6395_v17 = vld [vmem:[#allocation9 + $0x1a08] sm:$0xff] }
 0x8d8   :  { %v7128_v22 = vmul.f32 %v7126_v16, %v7126_v16  ;;  %7289 = vmatpush.msrb.mxu2 %v6423_v49  ;;  %7309 = vmatpush.msrb.mxu3 %v6455_v61  ;;  %v6431_v49 = vld [vmem:[#allocation9 + $0x1b28] sm:$0xff] }
 0x8da   :  { %v7129_v18 = vmul.f32 -0.001358992, %v7128_v22  ;;  %v7136_v57 = vmul.f32 -0.00019511016, %v7128_v22  ;;  %7290 = vmatpush.msrb.mxu2 %v6421_v4  ;;  %7310 = vmatpush.msrb.mxu3 %v6453_v5  ;;  %v6427_v4 = vld [vmem:[#allocation9 + $0x1b08] sm:$0xff]  ;;  %v7338_v5 = vld [vmem:[#allocation8 + $0x1f0] sm:$0xff] }
 0x8dc   :  { %v7130_v55 = vadd.f32 0.041655596, %v7129_v18  ;;  %v7137_v30 = vadd.f32 0.008332121, %v7136_v57  ;;  %7291 = vmatpush.msrb.mxu2 %v6419_v11  ;;  %7311 = vmatpush.msrb.mxu3 %v6451_v10  ;;  %v7339_v18 = vld [vmem:[#allocation8 + $0x1f8] sm:$0xff]  ;;  %v7334_v57 = vld [vmem:[#allocation8 + $0xf0] sm:$0xff] }
 0x8dd   :  { %v7335_v11 = vld [vmem:[#allocation8 + $0xf8] sm:$0xff] }
 0x8de   :  { %v7131_v36 = vmul.f32 %v7130_v55, %v7128_v22  ;;  %v7138_v35 = vmul.f32 %v7137_v30, %v7128_v22  ;;  %7292 = vmatpush.msrb.mxu2 %v6417_v6  ;;  %7312 = vmatpush.msrb.mxu3 %v6449_v39 }
 0x8e0   :  { %v7132_v19 = vadd.f32 -0.4999988, %v7131_v36  ;;  %v7139_v26 = vadd.f32 -0.16666654, %v7138_v35  ;;  %7293 = vmatpush.msrb.mxu2 %v6415_v32  ;;  %7313 = vmatpush.msrb.mxu3 %v6447_v63 }
 0x8e2   :  { %v7133_v34 = vmul.f32 %v7132_v19, %v7128_v22  ;;  %v7140_v7 = vmul.f32 %v7139_v26, %v7128_v22  ;;  %7294 = vmatpush.msrb.mxu2 %v6413_v40  ;;  %7314 = vmatpush.msrb.mxu3 %v6445_v28  ;;  %v6429_v22 = vld [vmem:[#allocation9 + $0x1b18] sm:$0xff] }
 0x8e4   :  { %v7134_v41 = vadd.f32 1.0, %v7133_v34  ;;  %v7141_v62 = vadd.f32 1.0, %v7140_v7  ;;  %7295 = vmatpush.msrb.mxu2 %v6411_v20  ;;  %7315 = vmatpush.msrb.mxu3 %v6443_v44 }
 0x8e6   :  { %v7142_v23 = vmul.f32 %v7141_v62, %v7126_v16  ;;  %v7150_v2 = vxor.u32 2147483648, %v7134_v41  ;;  %7296 = vmatpush.msrb.mxu2 %v6409_v25  ;;  %7316 = vmatpush.msrb.mxu3 %v6441_v24  ;;  %v6397_v16 = vld [vmem:[#allocation9 + $0x1a18] sm:$0xff] }
 0x8e8   :  { %v7147_v37 = vxor.u32 2147483648, %v7142_v23  ;;  %7297 = vmatpush.msrb.mxu2 %v6407_v59  ;;  %v7151_v29 = vsel %vm7149_vm15, %v7150_v2, %v7142_v23  ;;  %7317 = vmatpush.msrb.mxu3 %v6439_v15 }
 0x8ea   :  { %v7148_v46 = vsel %vm7146_vm8, %v7134_v41, %v7147_v37  ;;  %7298 = vmatpush.msrb.mxu2 %v6405_v54  ;;  %7318 = vmatpush.msrb.mxu3 %v6437_v3 }
 0x8eb   :  { %v7152_v8 = vsel %vm7145_vm4, %v7148_v46, %v7151_v29 }
 0x8ec   :  { %v7153_v9 = vsel %vm7143_vm3, nan, %v7152_v8  ;;  %7299 = vmatpush.msrb.mxu2 %v6403_v31  ;;  %7319 = vmatpush.msrb.mxu3 %v6435_v50 }
 0x8ed   :  { %v7157_v48 = vmul.f32 %v7153_v9, %v7153_v9 }
 0x8ee   :  { %7300 = vmatpush.msrb.mxu2 %v6401_v53  ;;  %7320 = vmatpush.msrb.mxu3 %v6433_v1 }
 0x8ef   :  { %v7161_v43 = vsub.f32 1.0, %v7157_v48 }
 0x8f0   :  { %7301 = vmatpush.msrb.mxu2 %v6399_v42  ;;  %7321 = vmatpush.msrb.mxu3 %v6431_v49 }
 0x8f1   :  { %v7165_v61 = vadd.f32 %v7161_v43, %v7157_v48 }
 0x8f2   :  { %7302 = vmatpush.msrb.mxu2 %v6397_v16  ;;  %7322 = vmatpush.msrb.mxu3 %v6429_v22 }
 0x8f3   :  { %7244 = vmatmul.f32.vlgmr.msra.gmra.mxu3 %v7165_v61 }
 0x8f4   :  { %7303 = vmatpush.msrb.mxu2 %v6395_v17  ;;  %7323 = vmatpush.msrb.mxu3 %v6427_v4 }
 0x8f5   :  { %7304 = vmatmul.f32.vlgmr.msrb.gmra.mxu2 %v12828_v14 }
 0x8f6   :  { %7522 = vmatpush.msra.mxu2 %v7338_v5  ;;  %7542 = vmatpush.msra.mxu3 %v7339_v18 }
 0x8f8   :  { %7523 = vmatpush.msra.mxu2 %v7334_v57  ;;  %7543 = vmatpush.msra.mxu3 %v7335_v11 }
 0x8fb   :  { %7324 = vmatmul.f32.vlgmr.msrb.gmra.mxu3 %v7165_v61 }
 0x8fd   :  { %8488 = vmatmul.msk.f32.vlgmr.msra.gmra.mxu2 %vm394_vm1, %v8933_v27 }
 0x903   :  { %8489 = vmatmul.msk.f32.vlgmr.msra.gmra.mxu3 %vm394_vm1, %v8933_v27 }
 0x93f   :  { %v7185_v52 = vpop.f32.mrf.mxu0 }
 0x940   :  { %v7205_v10 = vpop.f32.mrf.mxu1 }
 0x941   :  { %v12859_v55 = vadd.f32 %v7205_v10, %v7185_v52 }
 0x948   :  { %v7265_v30 = vpop.f32.mrf.mxu0  ;;  %v7285_v6 = vpop.f32.mrf.mxu1 }
 0x949   :  { %v12861_v14 = vadd.f32 %v7285_v6, %v7265_v30 }
 0x950   :  { %v12863_v39 = vpop.f32.mrf.mxu0  ;;  %v12867_v32 = vpop.f32.mrf.mxu1 }
 0x951   :  { %v7548_v36 = vand.u32 2147483647, %v12863_v39  ;;  %v7551_v35 = vand.u32 2139095040, %v12863_v39  ;;  %v7702_v12 = vand.u32 2147483647, %v12867_v32  ;;  %v7705_v27 = vand.u32 2139095040, %v12867_v32 }
 0x953   :  { %v7552_v63 = vshrl.u32 %v7551_v35, 23  ;;  %v7555_v19 = vand.u32 8388607, %v7548_v36  ;;  %v7706_v26 = vshrl.u32 %v7705_v27, 23  ;;  %v7709_v0 = vand.u32 8388607, %v7702_v12 }
 0x955   :  { %v8490_v40 = vadd.s32 4294967169, %v7552_v63  ;;  %v7556_v28 = vor.u32 8388608, %v7555_v19  ;;  %v8493_v34 = vadd.s32 4294967169, %v7706_v26  ;;  %v7710_v41 = vor.u32 8388608, %v7709_v0 }
 0x957   :  { %v7558_v7 = vadd.s32 1, %v8490_v40  ;;  %v7712_v20 = vadd.s32 1, %v8493_v34  ;;  %v12875_v44 = vshll.u32 %v7556_v28, 8  ;;  %v12880_v59 = vshll.u32 %v7710_v41, 8 }
 0x959   :  { %vm7559_vm1 = vcmp.gt.s32.totalorder %v7558_v7, 0  ;;  %vm7713_vm7 = vcmp.gt.s32.totalorder %v7712_v20, 0  ;;  %v7597_v23 = vand.u32 65535, %v12875_v44  ;;  %v7598_v3 = vshrl.u32 %v12875_v44, 16 }
 0x95a   :  { %v7560_v62 = vsel %vm7559_vm1, %v7558_v7, 0  ;;  %v7714_v45 = vsel %vm7713_vm7, %v7712_v20, 0 }
 0x95b   :  { %v7562_v25 = vand.u32 31, %v7560_v62  ;;  %v12878_v2 = vand.u32 31, %v7714_v45  ;;  %v12882_v15 = vshrl.u32 %v7560_v62, 5  ;;  %v12927_v7 = vshrl.u32 %v7714_v45, 5 }
 0x95d   :  { %v7563_v24 = vsub.s32 32, %v7562_v25  ;;  %v7565_v37 = vshll.u32 %v8683_v56, %v7562_v25  ;;  %v7568_v54 = vshll.u32 %v13489_v21, %v7562_v25  ;;  %v7571_v31 = vshll.u32 %v13462_v47, %v7562_v25 }
 0x95e   :  { %v7574_v50 = vshll.u32 %v13463_v33, %v7562_v25  ;;  %v7577_v53 = vshll.u32 %v13464_v60, %v7562_v25  ;;  %v12896_v49 = vsub.s32 32, %v12878_v2  ;;  %vm7580_vm12 = vcmp.lt.s32.totalorder %v12882_v15, 1 }
 0x95f   :  { %v7566_v46 = vshrl.u32 %v13489_v21, %v7563_v24  ;;  %v7569_v29 = vshrl.u32 %v13462_v47, %v7563_v24  ;;  %v7572_v8 = vshrl.u32 %v13463_v33, %v7563_v24  ;;  %v7575_v9 = vshrl.u32 %v13464_v60, %v7563_v24 }
 0x960   :  { %v7578_v48 = vshrl.u32 %v13449_v51, %v7563_v24  ;;  %vm7581_vm14 = vcmp.lt.s32.totalorder %v12882_v15, 2  ;;  %v7564_v22 = vshrl.u32 %v8683_v56, %v7563_v24  ;;  %vm7583_vm6 = vcmp.lt.s32.totalorder %v12882_v15, 4 }
 0x961   :  { %v7567_v1 = vor.u32 %v7566_v46, %v7565_v37  ;;  %v7570_v42 = vor.u32 %v7569_v29, %v7568_v54  ;;  %v7573_v43 = vor.u32 %v7572_v8, %v7571_v31  ;;  %v7576_v16 = vor.u32 %v7575_v9, %v7574_v50 }
 0x962   :  { %v7579_v61 = vor.u32 %v7578_v48, %v7577_v53  ;;  %vm7582_vm11 = vcmp.lt.s32.totalorder %v12882_v15, 3  ;;  %v7719_v57 = vshll.u32 %v8683_v56, %v12878_v2  ;;  %v7720_v30 = vshrl.u32 %v13489_v21, %v12896_v49 }
 0x963   :  { %v7588_v17 = vsel %vm7580_vm12, %v7567_v1, %v7570_v42  ;;  %v7592_v4 = vsel %vm7580_vm12, %v7570_v42, %v7573_v43  ;;  %v7589_v5 = vsel %vm7583_vm6, %v7576_v16, 920167782  ;;  %v7585_v11 = vsel %vm7583_vm6, %v7573_v43, 2102212464 }
 0x964   :  { %v7593_v18 = vsel %vm7583_vm6, %v7579_v61, 1326507024  ;;  %v7590_v52 = vsel %vm7582_vm11, %v7573_v43, %v7589_v5  ;;  %v7722_v27 = vshll.u32 %v13489_v21, %v12878_v2  ;;  %v7723_v63 = vshrl.u32 %v13462_v47, %v12896_v49 }
 0x965   :  { %v7594_v10 = vsel %vm7582_vm11, %v7576_v16, %v7593_v18  ;;  %v7591_v6 = vsel %vm7581_vm14, %v7588_v17, %v7590_v52  ;;  %v7584_v0 = vsel %vm7580_vm12, %v7564_v22, %v7567_v1  ;;  %v7586_v34 = vsel %vm7582_vm11, %v7570_v42, %v7585_v11 }
 0x966   :  { %v7595_v35 = vsel %vm7581_vm14, %v7592_v4, %v7594_v10  ;;  %v7621_v40 = vand.u32 65535, %v7591_v6  ;;  %v7622_v28 = vshrl.u32 %v7591_v6, 16  ;;  %v12929_v20 = vor.u32 %v7720_v30, %v7719_v57  ;;  %v7225_v6 = vpop.f32.mrf.mxu2 }
 0x967   :  { %v7599_v19 = vand.u32 65535, %v7595_v35  ;;  %v7600_v26 = vshrl.u32 %v7595_v35, 16  ;;  %v12931_v25 = vor.u32 %v7723_v63, %v7722_v27  ;;  %v7726_v24 = vshrl.u32 %v13463_v33, %v12896_v49 }
 0x968   :  { %v7624_v54 = vmul.u32 %v7622_v28, %v7597_v23  ;;  %v7625_v46 = vmul.u32 %v7621_v40, %v7598_v3  ;;  %v7725_v29 = vshll.u32 %v13462_v47, %v12878_v2  ;;  %v7623_v50 = vmul.u32 %v7621_v40, %v7597_v23 }
 0x969   :  { %v7602_v41 = vmul.u32 %v7600_v26, %v7597_v23  ;;  %v7603_v62 = vmul.u32 %v7599_v19, %v7598_v3  ;;  %v7601_v37 = vmul.u32 %v7599_v19, %v7597_v23  ;;  %v7604_v31 = vmul.u32 %v7600_v26, %v7598_v3 }
 0x96a   :  { %v7626_v45 = vmul.u32 %v7622_v28, %v7598_v3  ;;  %v7627_v1 = vshll.u32 %v7624_v54, 16  ;;  %v7629_v43 = vshll.u32 %v7625_v46, 16  ;;  %v12937_v16 = vor.u32 %v7726_v24, %v7725_v29 }
 0x96b   :  { %v7605_v8 = vshll.u32 %v7602_v41, 16  ;;  %v7606_v9 = vshrl.u32 %v7602_v41, 16  ;;  %v7607_v53 = vshll.u32 %v7603_v62, 16  ;;  %v7608_v48 = vshrl.u32 %v7603_v62, 16 }
 0x96c   :  { %vm7631_vm5 = vc.u32 %v7623_v50, %v7627_v1  ;;  %v7633_v22 = vadd.s32 %v7627_v1, %v7623_v50  ;;  %v7729_v17 = vshrl.u32 %v13464_v60, %v12896_v49  ;;  %v7728_v3 = vshll.u32 %v13463_v33, %v12878_v2 }
 0x96d   :  { %vm7609_vm0 = vc.u32 %v7601_v37, %v7605_v8  ;;  %v7611_v42 = vadd.s32 %v7605_v8, %v7601_v37  ;;  %v7632_v23 = vsel %vm7631_vm5, 1, %v8689_v13  ;;  %v7731_v57 = vshll.u32 %v13464_v60, %v12878_v2 }
 0x96e   :  { %v7610_v61 = vsel %vm7609_vm0, 1, %v8689_v13  ;;  %v7634_v18 = vadd.s32 %v7632_v23, %v7626_v45  ;;  %vm7635_vm2 = vc.u32 %v7633_v22, %v7629_v43  ;;  %v7730_v10 = vor.u32 %v7729_v17, %v7728_v3 }
 0x96f   :  { %v7612_v4 = vadd.s32 %v7610_v61, %v7604_v31  ;;  %vm7613_vm10 = vc.u32 %v7611_v42, %v7607_v53  ;;  %v7636_v52 = vsel %vm7635_vm2, 1, %v8689_v13  ;;  %v7732_v30 = vshrl.u32 %v13449_v51, %v12896_v49 }
 0x970   :  { %v7614_v5 = vsel %vm7613_vm10, 1, %v8689_v13  ;;  %v7628_v35 = vshrl.u32 %v7624_v54, 16  ;;  %v7630_v27 = vshrl.u32 %v7625_v46, 16  ;;  %v12951_v63 = vadd.s32 %v7633_v22, %v7629_v43 }
 0x971   :  { %v7616_v11 = vadd.s32 %v7614_v5, %v7612_v4  ;;  %v7638_v19 = vadd.s32 %v7636_v52, %v7634_v18  ;;  %v7733_v40 = vor.u32 %v7732_v30, %v7731_v57  ;;  %vm7734_vm9 = vcmp.lt.s32.totalorder %v12927_v7, 1 }
 0x972   :  { %vm7737_vm13 = vcmp.lt.s32.totalorder %v12927_v7, 4  ;;  %vm7736_vm8 = vcmp.lt.s32.totalorder %v12927_v7, 3  ;;  %v7742_v28 = vsel %vm7734_vm9, %v12929_v20, %v12931_v25  ;;  %vm7735_vm15 = vcmp.lt.s32.totalorder %v12927_v7, 2 }
 0x973   :  { %v7617_v26 = vadd.s32 %v7616_v11, %v7606_v9  ;;  %v7639_v2 = vadd.s32 %v7638_v19, %v7628_v35  ;;  %v7743_v41 = vsel %vm7737_vm13, %v7730_v10, 920167782  ;;  %v7746_v37 = vsel %vm7734_vm9, %v12931_v25, %v12937_v16 }
 0x974   :  { %v7744_v24 = vsel %vm7736_vm8, %v12937_v16, %v7743_v41  ;;  %v7587_v54 = vsel %vm7581_vm14, %v7584_v0, %v7586_v34  ;;  %v7747_v31 = vsel %vm7737_vm13, %v7733_v40, 1326507024  ;;  %v7751_v50 = vand.u32 65535, %v12880_v59 }
 0x975   :  { %v12962_v62 = vadd.s32 %v7617_v26, %v7608_v48  ;;  %v7640_v46 = vadd.s32 %v7639_v2, %v7630_v27  ;;  %v7745_v29 = vsel %vm7735_vm15, %v7742_v28, %v7744_v24  ;;  %v7748_v8 = vsel %vm7736_vm8, %v7730_v10, %v7747_v31 }
 0x976   :  { %v7775_v45 = vand.u32 65535, %v7745_v29  ;;  %v7749_v15 = vsel %vm7735_vm15, %v7746_v37, %v7748_v8  ;;  %v7752_v0 = vshrl.u32 %v12880_v59, 16  ;;  %v7776_v34 = vshrl.u32 %v7745_v29, 16  ;;  %v7245_v42 = vpop.f32.mrf.mxu3 }
 0x977   :  { %vm7643_vm4 = vc.u32 %v12962_v62, %v12951_v63  ;;  %v7644_v9 = vadd.s32 1, %v7640_v46  ;;  %v7641_v53 = vmul.u32 %v12875_v44, %v7587_v54  ;;  %v7753_v48 = vand.u32 65535, %v7749_v15 }
 0x978   :  { %v7754_v1 = vshrl.u32 %v7749_v15, 16  ;;  %v7778_v61 = vmul.u32 %v7776_v34, %v7751_v50  ;;  %v7779_v22 = vmul.u32 %v7775_v45, %v7752_v0  ;;  %v7226_v17 = vadd.f32 %v7225_v6, %v12859_v55  ;;  %v7305_v5 = vpop.f32.mrf.mxu2 }
 0x979   :  { %v7645_v43 = vsel %vm7643_vm4, %v7644_v9, %v7640_v46  ;;  %v7757_v3 = vmul.u32 %v7753_v48, %v7752_v0  ;;  %v7718_v18 = vshrl.u32 %v8683_v56, %v12896_v49  ;;  %v7777_v57 = vmul.u32 %v7775_v45, %v7751_v50 }
 0x97a   :  { %v7646_v4 = vadd.s32 %v7645_v43, %v7641_v53  ;;  %v7756_v23 = vmul.u32 %v7754_v1, %v7751_v50  ;;  %v7780_v11 = vmul.u32 %v7776_v34, %v7752_v0  ;;  %v7781_v52 = vshll.u32 %v7778_v61, 16 }
 0x97b   :  { %v7755_v44 = vmul.u32 %v7753_v48, %v7751_v50  ;;  %v7758_v30 = vmul.u32 %v7754_v1, %v7752_v0  ;;  %v7761_v27 = vshll.u32 %v7757_v3, 16  ;;  %v7783_v19 = vshll.u32 %v7779_v22, 16 }
 0x97c   :  { %v7647_v10 = vadd.s32 536870912, %v7646_v4  ;;  %v7759_v35 = vshll.u32 %v7756_v23, 16  ;;  %vm7785_vm3 = vc.u32 %v7777_v57, %v7781_v52  ;;  %v7787_v26 = vadd.s32 %v7781_v52, %v7777_v57 }
 0x97d   :  { %v7786_v6 = vsel %vm7785_vm3, 1, %v8689_v13  ;;  %v7738_v49 = vsel %vm7734_vm9, %v7718_v18, %v12929_v20  ;;  %v7739_v24 = vsel %vm7737_vm13, %v12937_v16, 2102212464  ;;  %v7246_v29 = vadd.f32 %v7245_v42, %v7226_v17 }
 0x97e   :  { %v12990_v40 = vshrl.u32 %v7647_v10, 30  ;;  %vm7763_vm1 = vc.u32 %v7755_v44, %v7759_v35  ;;  %v7765_v55 = vadd.s32 %v7759_v35, %v7755_v44  ;;  %v7788_v28 = vadd.s32 %v7786_v6, %v7780_v11  ;;  %v7325_v9 = vpop.f32.mrf.mxu3 }
 0x97f   :  { %v7764_v2 = vsel %vm7763_vm1, 1, %v8689_v13  ;;  %vm7789_vm7 = vc.u32 %v7787_v26, %v7783_v19  ;;  %v7306_v31 = vadd.f32 %v7305_v5, %v12861_v14  ;;  %v7760_v8 = vshrl.u32 %v7756_v23, 16 }
 0x980   :  { %v7649_v41 = vshll.u32 %v12990_v40, 30  ;;  %v7766_v37 = vadd.s32 %v7764_v2, %v7758_v30  ;;  %vm7767_vm12 = vc.u32 %v7765_v55, %v7761_v27  ;;  %v7790_v46 = vsel %vm7789_vm7, 1, %v8689_v13  ;;  %v13010_v1 = vpop.f32.mrf.mxu2 }
 0x981   :  { %v7768_v54 = vsel %vm7767_vm12, 1, %v8689_v13  ;;  %v7792_v45 = vadd.s32 %v7790_v46, %v7788_v28  ;;  %v7740_v15 = vsel %vm7736_vm8, %v12931_v25, %v7739_v24  ;;  %v7782_v0 = vshrl.u32 %v7778_v61, 16 }
 0x982   :  { %v7650_v20 = vsub.s32 %v7646_v4, %v7649_v41  ;;  %v7770_v50 = vadd.s32 %v7768_v54, %v7766_v37  ;;  %v13008_v16 = vadd.f32 %v7246_v29, %v12472_v38  ;;  %v7326_v34 = vadd.f32 %v7325_v9, %v7306_v31 }
 0x983   :  { %v7762_v14 = vshrl.u32 %v7757_v3, 16  ;;  %v7784_v42 = vshrl.u32 %v7779_v22, 16  ;;  %v7793_v43 = vadd.s32 %v7792_v45, %v7782_v0  ;;  %v7741_v25 = vsel %vm7735_vm15, %v7738_v49, %v7740_v15 }
 0x984   :  { %vm7651_vm14 = vcmp.lt.s32.totalorder %v7650_v20, 0  ;;  %v7652_v53 = vsub.s32 0, %v7650_v20  ;;  %v7771_v48 = vadd.s32 %v7770_v50, %v7760_v8  ;;  %v13013_v17 = vadd.f32 %v7326_v34, %v12477_v58 }
 0x985   :  { %v13017_v61 = vadd.s32 %v7787_v26, %v7783_v19  ;;  %v7794_v5 = vadd.s32 %v7793_v43, %v7784_v42  ;;  %v7859_v18 = vand.u32 2139095040, %v13010_v1  ;;  %v7795_v58 = vmul.u32 %v12880_v59, %v7741_v25 }
 0x986   :  { %v7653_v4 = vsel %vm7651_vm14, %v7652_v53, %v7650_v20  ;;  %v13019_v23 = vadd.s32 %v7771_v48, %v7762_v14  ;;  %v7642_v44 = vadd.s32 %v12951_v63, %v12962_v62  ;;  %v7856_v49 = vand.u32 2147483647, %v13010_v1  ;;  %v13030_v24 = vpop.f32.mrf.mxu3 }
 0x987   :  { %v7654_v38 = vclz %v7653_v4  ;;  %v7798_v22 = vadd.s32 1, %v7794_v5  ;;  %v7860_v3 = vshrl.u32 %v7859_v18, 23  ;;  %v8013_v31 = vand.u32 2139095040, %v13030_v24 }
 0x988   :  { %vm7797_vm6 = vc.u32 %v13019_v23, %v13017_v61  ;;  %v7863_v54 = vand.u32 8388607, %v7856_v49  ;;  %vm7550_vm5 = vcmp.lt.s32.totalorder %v12863_v39, 0  ;;  %vm13041_vm2 = vcmp.le.f32.partialorder %v7548_v36, 0.7853982 }
 0x989   :  { %v8491_v57 = vadd.s32 4294967294, %v7654_v38  ;;  %v7799_v11 = vsel %vm7797_vm6, %v7798_v22, %v7794_v5  ;;  %v8496_v10 = vadd.s32 4294967169, %v7860_v3  ;;  %v8014_v14 = vshrl.u32 %v8013_v31, 23 }
 0x98a   :  { %v7800_v52 = vadd.s32 %v7799_v11, %v7795_v58  ;;  %v7864_v15 = vor.u32 8388608, %v7863_v54  ;;  %vm13119_vm3 = vcmp.le.f32.partialorder %v7702_v12, 0.7853982  ;;  %vm7704_vm1 = vcmp.lt.s32.totalorder %v12867_v32, 0 }
 0x98b   :  { %vm8492_vm11 = vcmp.lt.s32.totalorder %v8491_v57, 0  ;;  %v7866_v19 = vadd.s32 1, %v8496_v10 }
 0x98c   :  { %v7657_v7 = vsel %vm8492_vm11, 0, %v8491_v57  ;;  %v7801_v27 = vadd.s32 536870912, %v7800_v52 }
 0x98d   :  { %v7658_v30 = vsub.s32 32, %v7657_v7  ;;  %v7662_v35 = vsub.s32 4294967266, %v7657_v7  ;;  %v7659_v26 = vshll.u32 %v7650_v20, %v7657_v7  ;;  %vm7867_vm0 = vcmp.gt.s32.totalorder %v7866_v19, 0 }
 0x98e   :  { %v13028_v2 = vshrl.u32 %v7801_v27, 30  ;;  %v7868_v41 = vsel %vm7867_vm0, %v7866_v19, 0 }
 0x98f   :  { %v7660_v55 = vshrl.u32 %v7642_v44, %v7658_v30  ;;  %v7663_v6 = vadd.s32 127, %v7662_v35  ;;  %v7870_v63 = vand.u32 31, %v7868_v41  ;;  %v13047_v53 = vshrl.u32 %v7868_v41, 5 }
 0x990   :  { %v7803_v37 = vshll.u32 %v13028_v2, 30  ;;  %v7672_v44 = vsub.s32 4, %v12990_v40  ;;  %v7796_v35 = vadd.s32 %v13017_v61, %v13019_v23 }
 0x991   :  { %v7661_v59 = vor.u32 %v7660_v55, %v7659_v26  ;;  %v7664_v28 = vshll.u32 %v7663_v6, 23  ;;  %v13035_v29 = vsub.s32 32, %v7870_v63  ;;  %v7873_v4 = vshll.u32 %v8683_v56, %v7870_v63 }
 0x992   :  { %v7804_v46 = vsub.s32 %v7800_v52, %v7803_v37  ;;  %v7876_v36 = vshll.u32 %v13489_v21, %v7870_v63  ;;  %v7879_v25 = vshll.u32 %v13462_v47, %v7870_v63  ;;  %v7882_v5 = vshll.u32 %v13463_v33, %v7870_v63 }
 0x993   :  { %v7665_v62 = vor.u32 4788187, %v7664_v28  ;;  %v7668_v8 = vcvt.s32.f32 %v7661_v59  ;;  %v7874_v0 = vshrl.u32 %v13489_v21, %v13035_v29  ;;  %v7877_v48 = vshrl.u32 %v13462_v47, %v13035_v29 }
 0x994   :  { %vm7805_vm10 = vcmp.lt.s32.totalorder %v7804_v46, 0  ;;  %v7806_v50 = vsub.s32 0, %v7804_v46  ;;  %v7880_v38 = vshrl.u32 %v13463_v33, %v13035_v29  ;;  %v7883_v18 = vshrl.u32 %v13464_v60, %v13035_v29 }
 0x995   :  { %v7666_v20 = vand.u32 2147483647, %v7665_v62  ;;  %v13061_v58 = vor.u32 %v7874_v0, %v7873_v4  ;;  %v7886_v3 = vshrl.u32 %v13449_v51, %v13035_v29  ;;  %v13070_v7 = vor.u32 %v7877_v48, %v7876_v36 }
 0x996   :  { %v7807_v34 = vsel %vm7805_vm10, %v7806_v50, %v7804_v46  ;;  %v7884_v52 = vor.u32 %v7883_v18, %v7882_v5  ;;  %v7885_v10 = vshll.u32 %v13464_v60, %v7870_v63  ;;  %v7881_v19 = vor.u32 %v7880_v38, %v7879_v25 }
 0x997   :  { %v7669_v9 = vmul.f32 %v7668_v8, %v7666_v20  ;;  %v7808_v43 = vclz %v7807_v34  ;;  %v13080_v55 = vshll.u32 %v7864_v15, 8  ;;  %vm7888_vm13 = vcmp.lt.s32.totalorder %v13047_v53, 1 }
 0x998   :  { %v7887_v26 = vor.u32 %v7886_v3, %v7885_v10  ;;  %vm7891_vm8 = vcmp.lt.s32.totalorder %v13047_v53, 4  ;;  %v8499_v59 = vadd.s32 4294967169, %v8014_v14  ;;  %vm7889_vm15 = vcmp.lt.s32.totalorder %v13047_v53, 2 }
 0x999   :  { %v7670_v42 = vxor.u32 2147483648, %v7669_v9  ;;  %v8494_v22 = vadd.s32 4294967294, %v7808_v43  ;;  %v7896_v61 = vsel %vm7888_vm13, %v13061_v58, %v13070_v7  ;;  %v7897_v23 = vsel %vm7891_vm8, %v7884_v52, 920167782 }
 0x99a   :  { %vm7890_vm4 = vcmp.lt.s32.totalorder %v13047_v53, 3  ;;  %v7900_v31 = vsel %vm7888_vm13, %v13070_v7, %v7881_v19  ;;  %v7901_v20 = vsel %vm7891_vm8, %v7887_v26, 1326507024  ;;  %v13103_v8 = vsel %vm7550_vm5, %v7672_v44, %v12990_v40 }
 0x99b   :  { %v7671_v57 = vsel %vm7550_vm5, %v7670_v42, %v7669_v9  ;;  %vm8495_vm9 = vcmp.lt.s32.totalorder %v8494_v22, 0  ;;  %v7898_v54 = vsel %vm7890_vm4, %v7881_v19, %v7897_v23  ;;  %v8010_v50 = vand.u32 2147483647, %v13030_v24 }
 0x99c   :  { %v13068_v11 = vsel %vm13041_vm2, %v12863_v39, %v7671_v57  ;;  %v7811_v27 = vsel %vm8495_vm9, 0, %v8494_v22  ;;  %v7902_v0 = vsel %vm7890_vm4, %v7884_v52, %v7901_v20  ;;  %v7905_v14 = vand.u32 65535, %v13080_v55 }
 0x99d   :  { %v13076_v30 = vmul.f32 %v13068_v11, %v13068_v11  ;;  %v7812_v6 = vsub.s32 32, %v7811_v27  ;;  %v7816_v28 = vsub.s32 4294967266, %v7811_v27  ;;  %v7813_v37 = vshll.u32 %v7804_v46, %v7811_v27 }
 0x99e   :  { %v7899_v46 = vsel %vm7889_vm15, %v7896_v61, %v7898_v54  ;;  %v7903_v48 = vsel %vm7889_vm15, %v7900_v31, %v7902_v0  ;;  %v7906_v42 = vshrl.u32 %v13080_v55, 16  ;;  %v8020_v40 = vadd.s32 1, %v8499_v59 }
 0x99f   :  { %v7684_v41 = vmul.f32 -0.00019511016, %v13076_v30  ;;  %v7814_v63 = vshrl.u32 %v7796_v35, %v7812_v6  ;;  %v7817_v62 = vadd.s32 127, %v7816_v28  ;;  %v7930_v34 = vshrl.u32 %v7899_v46, 16 }
 0x9a0   :  { %v7907_v36 = vand.u32 65535, %v7903_v48  ;;  %v7908_v25 = vshrl.u32 %v7903_v48, 16  ;;  %v7675_v38 = vsel %vm13041_vm2, 0, %v13103_v8  ;;  %v7677_v10 = vmul.f32 -0.001358992, %v13076_v30 }
 0x9a1   :  { %v7815_v9 = vor.u32 %v7814_v63, %v7813_v37  ;;  %v7818_v15 = vshll.u32 %v7817_v62, 23  ;;  %v7685_v43 = vadd.f32 0.008332121, %v7684_v41  ;;  %v13124_v18 = vmul.u32 %v7930_v34, %v7905_v14 }
 0x9a2   :  { %v7910_v3 = vmul.u32 %v7908_v25, %v7905_v14  ;;  %v13126_v52 = vmul.u32 %v7907_v36, %v7906_v42  ;;  %v7929_v44 = vand.u32 65535, %v7899_v46  ;;  %v13131_v35 = vand.u32 8388607, %v8010_v50 }
 0x9a3   :  { %v7819_v4 = vor.u32 4788187, %v7818_v15  ;;  %v7822_v22 = vcvt.s32.f32 %v7815_v9  ;;  %vm8021_vm7 = vcmp.gt.s32.totalorder %v8020_v40, 0  ;;  %v7686_v12 = vmul.f32 %v7685_v43, %v13076_v30  ;;  %v7402_v15 = vld [vmem:[#allocation9 + $0x1df0] sm:$0xff] }
 0x9a4   :  { %v7909_v26 = vmul.u32 %v7907_v36, %v7905_v14  ;;  %v7913_v6 = vshll.u32 %v7910_v3, 16  ;;  %v7872_v59 = vshrl.u32 %v8683_v56, %v13035_v29  ;;  %v7893_v28 = vsel %vm7891_vm8, %v7881_v19, 2102212464  ;;  %v7370_v19 = vld [vmem:[#allocation9 + $0x1cf0] sm:$0xff]  ;;  %8198 = vmatpush.msrb.mxu1 %v7402_v15 }
 0x9a5   :  { %v7820_v57 = vand.u32 2147483647, %v7819_v4  ;;  %v7912_v61 = vmul.u32 %v7908_v25, %v7906_v42  ;;  %v7935_v23 = vshll.u32 %v13124_v18, 16  ;;  %v7915_v37 = vshll.u32 %v13126_v52, 16  ;;  %8178 = vmatpush.msrb.mxu0 %v7370_v19  ;;  %v7362_v15 = vld [vmem:[#allocation9 + $0x1cb0] sm:$0xff] }
 0x9a6   :  { %vm7917_vm12 = vc.u32 %v7909_v26, %v7913_v6  ;;  %v7919_v63 = vadd.s32 %v7913_v6, %v7909_v26  ;;  %v7678_v62 = vadd.f32 0.041655596, %v7677_v10  ;;  %v7931_v31 = vmul.u32 %v7929_v44, %v7905_v14  ;;  %v7366_v6 = vld [vmem:[#allocation9 + $0x1cd0] sm:$0xff] }
 0x9a7   :  { %v7823_v27 = vmul.f32 %v7822_v22, %v7820_v57  ;;  %v7918_v54 = vsel %vm7917_vm12, 1, %v8689_v13  ;;  %v13141_v20 = vmul.u32 %v7929_v44, %v7906_v42  ;;  %v7687_v46 = vadd.f32 -0.16666654, %v7686_v12  ;;  %v7368_v57 = vld [vmem:[#allocation9 + $0x1ce0] sm:$0xff] }
 0x9a8   :  { %v7920_v9 = vadd.s32 %v7918_v54, %v7912_v61  ;;  %vm7921_vm14 = vc.u32 %v7919_v63, %v7915_v37  ;;  %v7934_v43 = vmul.u32 %v7930_v34, %v7906_v42  ;;  %vm7939_vm6 = vc.u32 %v7931_v31, %v7935_v23  ;;  %v7400_v22 = vld [vmem:[#allocation9 + $0x1de0] sm:$0xff]  ;;  %8179 = vmatpush.msrb.mxu0 %v7368_v57 }
 0x9a9   :  { %v7824_v41 = vxor.u32 2147483648, %v7823_v27  ;;  %v7922_v48 = vsel %vm7921_vm14, 1, %v8689_v13  ;;  %v7914_v4 = vshrl.u32 %v7910_v3, 16  ;;  %v7940_v25 = vsel %vm7939_vm6, 1, %v8689_v13  ;;  %8199 = vmatpush.msrb.mxu1 %v7400_v22  ;;  %v7360_v22 = vld [vmem:[#allocation9 + $0x1ca0] sm:$0xff] }
 0x9aa   :  { %v7924_v36 = vadd.s32 %v7922_v48, %v7920_v9  ;;  %v7937_v10 = vshll.u32 %v13141_v20, 16  ;;  %v7941_v44 = vadd.s32 %v7935_v23, %v7931_v31  ;;  %v7942_v12 = vadd.s32 %v7940_v25, %v7934_v43  ;;  %8180 = vmatpush.msrb.mxu0 %v7366_v6  ;;  %v7396_v31 = vld [vmem:[#allocation9 + $0x1dc0] sm:$0xff]  ;;  %v7394_v48 = vld [vmem:[#allocation9 + $0x1db0] sm:$0xff] }
 0x9ab   :  { %v7825_v29 = vsel %vm7704_vm1, %v7824_v41, %v7823_v27  ;;  %v8022_v27 = vsel %vm8021_vm7, %v8020_v40, 0  ;;  %v7679_v34 = vmul.f32 %v7678_v62, %v13076_v30  ;;  %v7688_v42 = vmul.f32 %v7687_v46, %v13076_v30  ;;  %v7398_v41 = vld [vmem:[#allocation9 + $0x1dd0] sm:$0xff] }
 0x9ac   :  { %v13148_v0 = vsel %vm13119_vm3, %v12867_v32, %v7825_v29  ;;  %v7892_v3 = vsel %vm7888_vm13, %v7872_v59, %v13061_v58  ;;  %v7925_v26 = vadd.s32 %v7924_v36, %v7914_v4  ;;  %v7894_v61 = vsel %vm7890_vm4, %v13070_v7, %v7893_v28  ;;  %8200 = vmatpush.msrb.mxu1 %v7398_v41  ;;  %v7364_v59 = vld [vmem:[#allocation9 + $0x1cc0] sm:$0xff] }
 0x9ad   :  { %v13153_v14 = vmul.f32 %v13148_v0, %v13148_v0  ;;  %v7916_v23 = vshrl.u32 %v13126_v52, 16  ;;  %vm7943_vm11 = vc.u32 %v7941_v44, %v7937_v10  ;;  %v8024_v40 = vand.u32 31, %v8022_v27  ;;  %8181 = vmatpush.msrb.mxu0 %v7364_v59 }
 0x9ae   :  { %v7826_v37 = vsub.s32 4, %v13028_v2  ;;  %v7944_v62 = vsel %vm7943_vm11, 1, %v8689_v13  ;;  %v8018_v58 = vor.u32 8388608, %v13131_v35  ;;  %v7936_v7 = vshrl.u32 %v13124_v18, 16  ;;  %8201 = vmatpush.msrb.mxu1 %v7396_v31 }
 0x9af   :  { %v7838_v63 = vmul.f32 -0.00019511016, %v13153_v14  ;;  %v13171_v54 = vadd.s32 %v7925_v26, %v7916_v23  ;;  %v7946_v28 = vadd.s32 %v7944_v62, %v7942_v12  ;;  %v13174_v52 = vsub.s32 32, %v8024_v40  ;;  %8182 = vmatpush.msrb.mxu0 %v7362_v15  ;;  %v7390_v23 = vld [vmem:[#allocation9 + $0x1d90] sm:$0xff] }
 0x9b0   :  { %v7680_v46 = vadd.f32 -0.4999988, %v7679_v34  ;;  %v7689_v29 = vadd.f32 1.0, %v7688_v42  ;;  %v7895_v9 = vsel %vm7889_vm15, %v7892_v3, %v7894_v61  ;;  %v7938_v19 = vshrl.u32 %v13141_v20, 16  ;;  %8202 = vmatpush.msrb.mxu1 %v7394_v48  ;;  %v7358_v61 = vld [vmem:[#allocation9 + $0x1c90] sm:$0xff] }
 0x9b1   :  { %v13179_v43 = vadd.s32 %v7941_v44, %v7937_v10  ;;  %v7947_v4 = vadd.s32 %v7946_v28, %v7936_v7  ;;  %v8028_v18 = vshrl.u32 %v13489_v21, %v13174_v52  ;;  %v8031_v36 = vshrl.u32 %v13462_v47, %v13174_v52  ;;  %v7392_v10 = vld [vmem:[#allocation9 + $0x1da0] sm:$0xff]  ;;  %8183 = vmatpush.msrb.mxu0 %v7360_v22 }
 0x9b2   :  { %v7831_v25 = vmul.f32 -0.001358992, %v13153_v14  ;;  %v7839_v57 = vadd.f32 0.008332121, %v7838_v63  ;;  %v8027_v53 = vshll.u32 %v8683_v56, %v8024_v40  ;;  %v8034_v20 = vshrl.u32 %v13463_v33, %v13174_v52  ;;  %8203 = vmatpush.msrb.mxu1 %v7392_v10  ;;  %v7356_v7 = vld [vmem:[#allocation9 + $0x1c80] sm:$0xff] }
 0x9b3   :  { %v7948_v44 = vadd.s32 %v7947_v4, %v7938_v19  ;;  %vm7951_vm0 = vc.u32 %v13171_v54, %v13179_v43  ;;  %v13191_v12 = vshrl.u32 %v8022_v27, 5  ;;  %v8030_v34 = vshll.u32 %v13489_v21, %v8024_v40  ;;  %8184 = vmatpush.msrb.mxu0 %v7358_v61  ;;  %v7388_v28 = vld [vmem:[#allocation9 + $0x1d80] sm:$0xff] }
 0x9b4   :  { %v13194_v42 = vor.u32 %v8028_v18, %v8027_v53  ;;  %v8033_v3 = vshll.u32 %v13462_v47, %v8024_v40  ;;  %v8036_v26 = vshll.u32 %v13463_v33, %v8024_v40  ;;  %v8037_v6 = vshrl.u32 %v13464_v60, %v13174_v52  ;;  %8204 = vmatpush.msrb.mxu1 %v7390_v23  ;;  %v7352_v4 = vld [vmem:[#allocation9 + $0x1c60] sm:$0xff]  ;;  %v7382_v53 = vld [vmem:[#allocation9 + $0x1d50] sm:$0xff] }
 0x9b5   :  { %v7952_v41 = vadd.s32 1, %v7948_v44  ;;  %v13200_v63 = vor.u32 %v8031_v36, %v8030_v34  ;;  %v8039_v27 = vshll.u32 %v13464_v60, %v8024_v40  ;;  %v8040_v21 = vshrl.u32 %v13449_v51, %v13174_v52  ;;  %8185 = vmatpush.msrb.mxu0 %v7356_v7  ;;  %v7384_v18 = vld [vmem:[#allocation9 + $0x1d60] sm:$0xff]  ;;  %v7346_v7 = vld [vmem:[#allocation9 + $0x1c30] sm:$0xff] }
 0x9b6   :  { %v7840_v62 = vmul.f32 %v7839_v57, %v13153_v14  ;;  %v7949_v47 = vmul.u32 %v13080_v55, %v7895_v9  ;;  %v13207_v33 = vor.u32 %v8034_v20, %v8033_v3  ;;  %v8038_v59 = vor.u32 %v8037_v6, %v8036_v26  ;;  %8205 = vmatpush.msrb.mxu1 %v7388_v28  ;;  %v7348_v6 = vld [vmem:[#allocation9 + $0x1c40] sm:$0xff]  ;;  %v7378_v28 = vld [vmem:[#allocation9 + $0x1d30] sm:$0xff] }
 0x9b7   :  { %v7681_v31 = vmul.f32 %v7680_v46, %v13076_v30  ;;  %v7827_v60 = vsel %vm7704_vm1, %v7826_v37, %v13028_v2  ;;  %v7953_v51 = vsel %vm7951_vm0, %v7952_v41, %v7948_v44  ;;  %v8041_v40 = vor.u32 %v8040_v21, %v8039_v27  ;;  %v7354_v30 = vld [vmem:[#allocation9 + $0x1c70] sm:$0xff]  ;;  %v7380_v61 = vld [vmem:[#allocation9 + $0x1d40] sm:$0xff] }
 0x9b8   :  { %v13217_v55 = vmul.f32 %v7689_v29, %v13068_v11  ;;  %v7954_v9 = vadd.s32 %v7953_v51, %v7949_v47  ;;  %vm8042_vm5 = vcmp.lt.s32.totalorder %v13191_v12, 1  ;;  %vm8045_vm10 = vcmp.lt.s32.totalorder %v13191_v12, 4  ;;  %v7386_v46 = vld [vmem:[#allocation9 + $0x1d70] sm:$0xff]  ;;  %8186 = vmatpush.msrb.mxu0 %v7354_v30 }
 0x9b9   :  { %v7832_v19 = vadd.f32 0.041655596, %v7831_v25  ;;  %v8050_v2 = vsel %vm8042_vm5, %v13194_v42, %v13200_v63  ;;  %v8051_v37 = vsel %vm8045_vm10, %v8038_v59, 920167782  ;;  %v13229_v11 = vshll.u32 %v8018_v58, 8  ;;  %8206 = vmatpush.msrb.mxu1 %v7386_v46 }
 0x9ba   :  { %v7841_v29 = vadd.f32 -0.16666654, %v7840_v62  ;;  %v7955_v15 = vadd.s32 536870912, %v7954_v9  ;;  %vm8044_vm9 = vcmp.lt.s32.totalorder %v13191_v12, 3  ;;  %v8054_v48 = vsel %vm8042_vm5, %v13200_v63, %v13207_v33  ;;  %8187 = vmatpush.msrb.mxu0 %v7352_v4 }
 0x9bb   :  { %v13240_v35 = vand.u32 3, %v7675_v38  ;;  %vm8043_vm13 = vcmp.lt.s32.totalorder %v13191_v12, 2  ;;  %v8052_v58 = vsel %vm8044_vm9, %v13207_v33, %v8051_v37  ;;  %v8055_v36 = vsel %vm8045_vm10, %v8041_v40, 1326507024  ;;  %8207 = vmatpush.msrb.mxu1 %v7384_v18  ;;  %v7350_v38 = vld [vmem:[#allocation9 + $0x1c50] sm:$0xff] }
 0x9bc   :  { %v7829_v25 = vsel %vm13119_vm3, 0, %v7827_v60  ;;  %v13250_v57 = vshrl.u32 %v7955_v15, 30  ;;  %v8053_v45 = vsel %vm8043_vm13, %v8050_v2, %v8052_v58  ;;  %v8056_v8 = vsel %vm8044_vm9, %v8038_v59, %v8055_v36  ;;  %8188 = vmatpush.msrb.mxu0 %v7350_v38  ;;  %v7376_v2 = vld [vmem:[#allocation9 + $0x1d20] sm:$0xff] }
 0x9bd   :  { %v13256_v20 = vadd.f32 1.0, %v7681_v31  ;;  %v7695_v22 = vxor.u32 2147483648, %v13217_v55  ;;  %v7833_v10 = vmul.f32 %v7832_v19, %v13153_v14  ;;  %v8057_v5 = vsel %vm8043_vm13, %v8054_v48, %v8056_v8  ;;  %8208 = vmatpush.msrb.mxu1 %v7382_v53  ;;  %v7344_v19 = vld [vmem:[#allocation9 + $0x1c20] sm:$0xff] }
 0x9be   :  { %v7842_v44 = vmul.f32 %v7841_v29, %v13153_v14  ;;  %v7957_v34 = vshll.u32 %v13250_v57, 30  ;;  %v8060_v3 = vshrl.u32 %v13229_v11, 16  ;;  %v8061_v26 = vand.u32 65535, %v8057_v5  ;;  %8189 = vmatpush.msrb.mxu0 %v7348_v6  ;;  %v7371_v6 = vld [vmem:[#allocation9 + $0x1cf8] sm:$0xff] }
 0x9bf   :  { %v8059_v23 = vand.u32 65535, %v13229_v11  ;;  %v8062_v41 = vshrl.u32 %v8057_v5, 16  ;;  %v8083_v27 = vand.u32 65535, %v8053_v45  ;;  %v8084_v21 = vshrl.u32 %v8053_v45, 16  ;;  %8209 = vmatpush.msrb.mxu1 %v7380_v61  ;;  %v7374_v45 = vld [vmem:[#allocation9 + $0x1d10] sm:$0xff]  ;;  %v7340_v5 = vld [vmem:[#allocation9 + $0x1c00] sm:$0xff] }
 0x9c0   :  { %vm7694_vm2 = vcmp.eq.s32.totalorder %v13240_v35, 0  ;;  %v13267_v62 = vand.u32 3, %v7829_v25  ;;  %v13269_v47 = vsub.s32 %v7954_v9, %v7957_v34  ;;  %v13271_v59 = vmul.u32 %v8061_v26, %v8060_v3  ;;  %8190 = vmatpush.msrb.mxu0 %v7346_v7  ;;  %v7342_v25 = vld [vmem:[#allocation9 + $0x1c10] sm:$0xff]  ;;  %v7403_v61 = vld [vmem:[#allocation9 + $0x1df8] sm:$0xff]  ;;  %v7369_v7 = vld [vmem:[#allocation9 + $0x1ce8] sm:$0xff] }
 0x9c1   :  { %v7698_v31 = vxor.u32 2147483648, %v13256_v20  ;;  %v7834_v60 = vadd.f32 -0.4999988, %v7833_v10  ;;  %v13274_v51 = vmul.u32 %v8062_v41, %v8059_v23  ;;  %v13276_v40 = vmul.u32 %v8084_v21, %v8059_v23  ;;  %8210 = vmatpush.msrb.mxu1 %v7378_v28  ;;  %v7401_v28 = vld [vmem:[#allocation9 + $0x1de8] sm:$0xff] }
 0x9c2   :  { %v13279_v30 = vsel %vm7694_vm2, %v13256_v20, %v7695_v22  ;;  %v7843_v46 = vadd.f32 1.0, %v7842_v44  ;;  %vm7959_vm8 = vcmp.lt.s32.totalorder %v13269_v47, 0  ;;  %v7960_v9 = vsub.s32 0, %v13269_v47  ;;  %8191 = vmatpush.msrb.mxu0 %v7344_v19  ;;  %v7372_v44 = vld [vmem:[#allocation9 + $0x1d00] sm:$0xff] }
 0x9c3   :  { %v13285_v37 = vadd.s32 %v13179_v43, %v13171_v54  ;;  %v8063_v29 = vmul.u32 %v8061_v26, %v8059_v23  ;;  %v8067_v15 = vshll.u32 %v13274_v51, 16  ;;  %v8085_v48 = vmul.u32 %v8083_v27, %v8059_v23  ;;  %8211 = vmatpush.msrb.mxu1 %v7376_v2 }
 0x9c4   :  { %v7961_v4 = vsel %vm7959_vm8, %v7960_v9, %v13269_v47  ;;  %v8066_v18 = vmul.u32 %v8062_v41, %v8060_v3  ;;  %v8069_v58 = vshll.u32 %v13271_v59, 16  ;;  %v13290_v36 = vmul.u32 %v8083_v27, %v8060_v3  ;;  %8192 = vmatpush.msrb.mxu0 %v7342_v25 }
 0x9c5   :  { %v7962_v8 = vclz %v7961_v4  ;;  %vm8071_vm15 = vc.u32 %v8063_v29, %v8067_v15  ;;  %v8073_v38 = vadd.s32 %v8067_v15, %v8063_v29  ;;  %v8089_v54 = vshll.u32 %v13276_v40, 16  ;;  %8212 = vmatpush.msrb.mxu1 %v7374_v45 }
 0x9c6   :  { %v7835_v43 = vmul.f32 %v7834_v60, %v13153_v14  ;;  %v13295_v53 = vmul.f32 %v7843_v46, %v13148_v0  ;;  %v8072_v22 = vsel %vm8071_vm15, 1, %v8689_v13  ;;  %v8088_v10 = vmul.u32 %v8084_v21, %v8060_v3  ;;  %8193 = vmatpush.msrb.mxu0 %v7340_v5  ;;  %v7395_v5 = vld [vmem:[#allocation9 + $0x1db8] sm:$0xff] }
 0x9c7   :  { %vm7848_vm4 = vcmp.eq.s32.totalorder %v13267_v62, 0  ;;  %v8497_v34 = vadd.s32 4294967294, %v7962_v8  ;;  %v8074_v26 = vadd.s32 %v8072_v22, %v8066_v18  ;;  %vm8075_vm3 = vc.u32 %v8073_v38, %v8069_v58  ;;  %8213 = vmatpush.msrb.mxu1 %v7372_v44  ;;  %v7397_v38 = vld [vmem:[#allocation9 + $0x1dc8] sm:$0xff] }
 0x9c8   :  { %vm8093_vm1 = vc.u32 %v8085_v48, %v8089_v54  ;;  %v8076_v14 = vsel %vm8075_vm3, 1, %v8689_v13  ;;  %v8091_v0 = vshll.u32 %v13290_v36, 16  ;;  %v8095_v41 = vadd.s32 %v8089_v54, %v8085_v48  ;;  %8258 = vmatpush.msra.mxu0 %v7371_v6  ;;  %v7399_v48 = vld [vmem:[#allocation9 + $0x1dd8] sm:$0xff]  ;;  %v7361_v6 = vld [vmem:[#allocation9 + $0x1ca8] sm:$0xff] }
 0x9c9   :  { %v8094_v23 = vsel %vm8093_vm1, 1, %v8689_v13  ;;  %vm7693_vm7 = vcmp.lt.s32.totalorder %v13240_v35, 2  ;;  %vm8498_vm12 = vcmp.lt.s32.totalorder %v8497_v34, 0  ;;  %v8068_v3 = vshrl.u32 %v13274_v51, 16  ;;  %8278 = vmatpush.msra.mxu1 %v7403_v61  ;;  %v7367_v51 = vld [vmem:[#allocation9 + $0x1cd8] sm:$0xff]  ;;  %v7393_v61 = vld [vmem:[#allocation9 + $0x1da8] sm:$0xff] }
 0x9ca   :  { %v8078_v27 = vadd.s32 %v8076_v14, %v8074_v26  ;;  %v8096_v21 = vadd.s32 %v8094_v23, %v8088_v10  ;;  %v7836_v60 = vadd.f32 1.0, %v7835_v43  ;;  %v7965_v46 = vsel %vm8498_vm12, 0, %v8497_v34  ;;  %8259 = vmatpush.msra.mxu0 %v7369_v7  ;;  %v7363_v10 = vld [vmem:[#allocation9 + $0x1cb8] sm:$0xff] }
 0x9cb   :  { %v8026_v9 = vshrl.u32 %v8683_v56, %v13174_v52  ;;  %vm8097_vm14 = vc.u32 %v8095_v41, %v8091_v0  ;;  %v7966_v19 = vsub.s32 32, %v7965_v46  ;;  %v7970_v2 = vsub.s32 4294967266, %v7965_v46  ;;  %8279 = vmatpush.msra.mxu1 %v7401_v28  ;;  %v7359_v23 = vld [vmem:[#allocation9 + $0x1c98] sm:$0xff] }
 0x9cc   :  { %v8047_v29 = vsel %vm8045_vm10, %v13207_v33, 2102212464  ;;  %v8079_v15 = vadd.s32 %v8078_v27, %v8068_v3  ;;  %v7849_v4 = vxor.u32 2147483648, %v13295_v53  ;;  %v8070_v18 = vshrl.u32 %v13271_v59, 16  ;;  %8260 = vmatpush.msra.mxu0 %v7367_v51  ;;  %v7365_v33 = vld [vmem:[#allocation9 + $0x1cc8] sm:$0xff] }
 0x9cd   :  { %v8090_v58 = vshrl.u32 %v13276_v40, 16  ;;  %v8098_v56 = vsel %vm8097_vm14, 1, %v8689_v13  ;;  %v7967_v52 = vshll.u32 %v13269_v47, %v7965_v46  ;;  %v7968_v25 = vshrl.u32 %v13285_v37, %v7966_v19  ;;  %8280 = vmatpush.msra.mxu1 %v7399_v48  ;;  %v7387_v46 = vld [vmem:[#allocation9 + $0x1d78] sm:$0xff] }
 0x9ce   :  { %v7971_v45 = vadd.s32 127, %v7970_v2  ;;  %v8100_v8 = vadd.s32 %v8098_v56, %v8096_v21  ;;  %v7852_v54 = vxor.u32 2147483648, %v7836_v60  ;;  %v8046_v43 = vsel %vm8042_vm5, %v8026_v9, %v13194_v42  ;;  %8261 = vmatpush.msra.mxu0 %v7365_v33  ;;  %v7466_v9 = vld [vmem:[#allocation9 + $0x1ff0] sm:$0xff]  ;;  %v7353_v2 = vld [vmem:[#allocation9 + $0x1c68] sm:$0xff]  ;;  %v7351_v56 = vld [vmem:[#allocation9 + $0x1c58] sm:$0xff] }
 0x9cf   :  { %v8048_v59 = vsel %vm8044_vm9, %v13200_v63, %v8047_v29  ;;  %v13321_v13 = vadd.s32 %v8079_v15, %v8070_v18  ;;  %v7969_v47 = vor.u32 %v7968_v25, %v7967_v52  ;;  %v8092_v37 = vshrl.u32 %v13290_v36, 16  ;;  %8281 = vmatpush.msra.mxu1 %v7397_v38  ;;  %v7385_v29 = vld [vmem:[#allocation9 + $0x1d68] sm:$0xff]  ;;  %8238 = vmatpush.msrb.mxu3 %v7466_v9  ;;  %v7464_v18 = vld [vmem:[#allocation9 + $0x1fe0] sm:$0xff]  ;;  %v7383_v52 = vld [vmem:[#allocation9 + $0x1d58] sm:$0xff] }
 0x9d0   :  { %v7972_v40 = vshll.u32 %v7971_v45, 23  ;;  %v8101_v22 = vadd.s32 %v8100_v8, %v8090_v58  ;;  %vm7697_vm6 = vcmp.eq.s32.totalorder %v13240_v35, 2  ;;  %v7850_v42 = vsel %vm7848_vm4, %v7836_v60, %v7849_v4  ;;  %8262 = vmatpush.msra.mxu0 %v7363_v10  ;;  %v7355_v60 = vld [vmem:[#allocation9 + $0x1c78] sm:$0xff]  ;;  %v7430_v33 = vld [vmem:[#allocation9 + $0x1ed0] sm:$0xff]  ;;  %v7420_v9 = vld [vmem:[#allocation9 + $0x1e80] sm:$0xff] }
 0x9d1   :  { %vm7851_vm11 = vcmp.eq.s32.totalorder %v13267_v62, 2  ;;  %v13328_v44 = vadd.s32 %v8095_v41, %v8091_v0  ;;  %v7699_v63 = vsel %vm7697_vm6, %v7698_v31, %v13217_v55  ;;  %v8049_v36 = vsel %vm8043_vm13, %v8046_v43, %v8048_v59  ;;  %8282 = vmatpush.msra.mxu1 %v7395_v5  ;;  %v7391_v41 = vld [vmem:[#allocation9 + $0x1d98] sm:$0xff]  ;;  %8239 = vmatpush.msrb.mxu3 %v7464_v18  ;;  %v7462_v38 = vld [vmem:[#allocation9 + $0x1fd0] sm:$0xff]  ;;  %v7349_v59 = vld [vmem:[#allocation9 + $0x1c48] sm:$0xff] }
 0x9d2   :  { %v7973_v34 = vor.u32 4788187, %v7972_v40  ;;  %v8102_v26 = vadd.s32 %v8101_v22, %v8092_v37  ;;  %v7700_v14 = vsel %vm7693_vm7, %v13279_v30, %v7699_v63  ;;  %vm7847_vm0 = vcmp.lt.s32.totalorder %v13267_v62, 2  ;;  %8263 = vmatpush.msra.mxu0 %v7361_v6  ;;  %v7357_v30 = vld [vmem:[#allocation9 + $0x1c88] sm:$0xff]  ;;  %v7428_v5 = vld [vmem:[#allocation9 + $0x1ec0] sm:$0xff]  ;;  %v7379_v6 = vld [vmem:[#allocation9 + $0x1d38] sm:$0xff] }
 0x9d3   :  { %v7853_v0 = vsel %vm7851_vm11, %v7852_v54, %v13295_v53  ;;  %vm8105_vm5 = vc.u32 %v13321_v13, %v13328_v44  ;;  %v7976_v12 = vcvt.s32.f32 %v7969_v47  ;;  %8283 = vmatpush.msra.mxu1 %v7393_v61  ;;  %v8103_v3 = vmul.u32 %v13229_v11, %v8049_v36  ;;  %v7389_v53 = vld [vmem:[#allocation9 + $0x1d88] sm:$0xff]  ;;  %8240 = vmatpush.msrb.mxu3 %v7462_v38  ;;  %v7347_v36 = vld [vmem:[#allocation9 + $0x1c38] sm:$0xff]  ;;  %v7426_v61 = vld [vmem:[#allocation9 + $0x1eb0] sm:$0xff] }
 0x9d4   :  { %v7854_v55 = vsel %vm7847_vm0, %v7850_v42, %v7853_v0  ;;  %v7974_v20 = vand.u32 2147483647, %v7973_v34  ;;  %v8106_v31 = vadd.s32 1, %v8102_v26  ;;  %8264 = vmatpush.msra.mxu0 %v7359_v23  ;;  %vm7691_vm10 = vweird.f32 %v12863_v39  ;;  %v7434_v39 = vld [vmem:[#allocation9 + $0x1ef0] sm:$0xff]  ;;  %v7381_v47 = vld [vmem:[#allocation9 + $0x1d48] sm:$0xff]  ;;  %v7460_v42 = vld [vmem:[#allocation9 + $0x1fc0] sm:$0xff] }
 0x9d5   :  { %vm7845_vm9 = vweird.f32 %v12867_v32  ;;  %8284 = vmatpush.msra.mxu1 %v7391_v41  ;;  %v7701_v27 = vsel %vm7691_vm10, nan, %v7700_v14  ;;  %vm7858_vm13 = vcmp.lt.s32.totalorder %v13010_v1, 0  ;;  %vm13348_vm2 = vcmp.le.f32.partialorder %v7856_v49, 0.7853982  ;;  %8218 = vmatpush.msrb.mxu2 %v7434_v39  ;;  %v7432_v49 = vld [vmem:[#allocation9 + $0x1ee0] sm:$0xff]  ;;  %v7458_v14 = vld [vmem:[#allocation9 + $0x1fb0] sm:$0xff] }
 0x9d6   :  { %v7977_v35 = vmul.f32 %v7976_v12, %v7974_v20  ;;  %v8107_v62 = vsel %vm8105_vm5, %v8106_v31, %v8102_v26  ;;  %v7855_v21 = vsel %vm7845_vm9, nan, %v7854_v55  ;;  %8265 = vmatpush.msra.mxu0 %v7357_v30  ;;  %v8164_v15 = vmul.f32 %v7701_v27, %v7701_v27  ;;  %8241 = vmatpush.msrb.mxu3 %v7460_v42  ;;  %v7345_v20 = vld [vmem:[#allocation9 + $0x1c28] sm:$0xff]  ;;  %v7424_v41 = vld [vmem:[#allocation9 + $0x1ea0] sm:$0xff]  ;;  %v7375_v27 = vld [vmem:[#allocation9 + $0x1d18] sm:$0xff] }
 0x9d7   :  { %v8108_v7 = vadd.s32 %v8107_v62, %v8103_v3  ;;  %8285 = vmatpush.msra.mxu1 %v7389_v53  ;;  %v8165_v51 = vmul.f32 %v7855_v21, %v7855_v21  ;;  %8219 = vmatpush.msrb.mxu2 %v7432_v49  ;;  %v7980_v22 = vsub.s32 4, %v13250_v57  ;;  %v7377_v12 = vld [vmem:[#allocation9 + $0x1d28] sm:$0xff]  ;;  %v7456_v3 = vld [vmem:[#allocation9 + $0x1fa0] sm:$0xff]  ;;  %v7343_v53 = vld [vmem:[#allocation9 + $0x1c18] sm:$0xff]  ;;  %vm7999_vm7 = vweird.f32 %v13010_v1 }
 0x9d8   :  { %v7978_v28 = vxor.u32 2147483648, %v7977_v35  ;;  %8266 = vmatpush.msra.mxu0 %v7355_v60  ;;  %v8168_v25 = vsub.f32 1.0, %v8164_v15  ;;  %8242 = vmatpush.msrb.mxu3 %v7458_v14  ;;  %v7422_v21 = vld [vmem:[#allocation9 + $0x1e90] sm:$0xff]  ;;  %v7373_v39 = vld [vmem:[#allocation9 + $0x1d08] sm:$0xff]  ;;  %v7440_v14 = vld [vmem:[#allocation9 + $0x1f20] sm:$0xff]  ;;  %vm8012_vm12 = vcmp.lt.s32.totalorder %v13030_v24, 0  ;;  %vm8153_vm5 = vweird.f32 %v13030_v24 }
 0x9d9   :  { %v8109_v11 = vadd.s32 536870912, %v8108_v7  ;;  %8286 = vmatpush.msra.mxu1 %v7387_v46  ;;  %v8169_v45 = vsub.f32 1.0, %v8165_v51  ;;  %8220 = vmatpush.msrb.mxu2 %v7430_v33  ;;  %v7981_v31 = vsel %vm7858_vm13, %v7980_v22, %v13250_v57  ;;  %v7450_v49 = vld [vmem:[#allocation9 + $0x1f70] sm:$0xff]  ;;  %v7412_v22 = vld [vmem:[#allocation9 + $0x1e40] sm:$0xff]  ;;  %vm13401_vm14 = vcmp.le.f32.partialorder %v8010_v50, 0.7853982 }
 0x9da   :  { %v7979_v19 = vsel %vm7858_vm13, %v7978_v28, %v7977_v35  ;;  %8267 = vmatpush.msra.mxu0 %v7353_v2  ;;  %v13368_v40 = vadd.f32 %v8168_v25, %v8164_v15  ;;  %v7983_v57 = vsel %vm13348_vm2, 0, %v7981_v31  ;;  %8243 = vmatpush.msrb.mxu3 %v7456_v3  ;;  %v7463_v50 = vld [vmem:[#allocation9 + $0x1fd8] sm:$0xff] }
 0x9db   :  { %v13357_v48 = vsel %vm13348_vm2, %v13010_v1, %v7979_v19  ;;  %v13359_v4 = vshrl.u32 %v8109_v11, 30  ;;  %8287 = vmatpush.msra.mxu1 %v7385_v29  ;;  %v13370_v37 = vadd.f32 %v8169_v45, %v8165_v51  ;;  %8221 = vmatpush.msrb.mxu2 %v7428_v5  ;;  %v7341_v11 = vld [vmem:[#allocation9 + $0x1c08] sm:$0xff]  ;;  %v7452_v19 = vld [vmem:[#allocation9 + $0x1f80] sm:$0xff]  ;;  %v8000_v32 = vand.u32 3, %v7983_v57  ;;  %v7418_v51 = vld [vmem:[#allocation9 + $0x1e70] sm:$0xff] }
 0x9dc   :  { %v13363_v58 = vmul.f32 %v13357_v48, %v13357_v48  ;;  %8268 = vmatpush.msra.mxu0 %v7351_v56  ;;  %v8104_v56 = vadd.s32 %v13328_v44, %v13321_v13  ;;  %v7416_v45 = vld [vmem:[#allocation9 + $0x1e60] sm:$0xff]  ;;  %v7414_v13 = vld [vmem:[#allocation9 + $0x1e50] sm:$0xff]  ;;  %v7431_v57 = vld [vmem:[#allocation9 + $0x1ed8] sm:$0xff] }
 0x9dd   :  { %v8111_v8 = vshll.u32 %v13359_v4, 30  ;;  %8288 = vmatpush.msra.mxu1 %v7383_v52  ;;  %8194 = vmatmul.f32.vlgmr.msrb.gmra.mxu0 %v13368_v40  ;;  %vm8002_vm4 = vcmp.eq.s32.totalorder %v8000_v32, 0  ;;  %vm8005_vm3 = vcmp.eq.s32.totalorder %v8000_v32, 2  ;;  %v7446_v44 = vld [vmem:[#allocation9 + $0x1f50] sm:$0xff]  ;;  %vm8001_vm1 = vcmp.lt.s32.totalorder %v8000_v32, 2  ;;  %v7444_v5 = vld [vmem:[#allocation9 + $0x1f40] sm:$0xff] }
 0x9de   :  { %v7985_v54 = vmul.f32 -0.001358992, %v13363_v58  ;;  %v7992_v43 = vmul.f32 -0.00019511016, %v13363_v58  ;;  %8269 = vmatpush.msra.mxu0 %v7349_v59  ;;  %8214 = vmatmul.f32.vlgmr.msrb.gmra.mxu1 %v13370_v37 }
 0x9df   :  { %v13373_v10 = vsub.s32 %v8108_v7, %v8111_v8  ;;  %8289 = vmatpush.msra.mxu1 %v7381_v47  ;;  %8222 = vmatpush.msrb.mxu2 %v7426_v61  ;;  %v7454_v7 = vld [vmem:[#allocation9 + $0x1f90] sm:$0xff]  ;;  %v7448_v8 = vld [vmem:[#allocation9 + $0x1f60] sm:$0xff] }
 0x9e0   :  { %v7986_v63 = vadd.f32 0.041655596, %v7985_v54  ;;  %v7993_v34 = vadd.f32 0.008332121, %v7992_v43  ;;  %8270 = vmatpush.msra.mxu0 %v7347_v36  ;;  %8244 = vmatpush.msrb.mxu3 %v7454_v7 }
 0x9e1   :  { %vm8113_vm8 = vcmp.lt.s32.totalorder %v13373_v10, 0  ;;  %v8114_v26 = vsub.s32 0, %v13373_v10  ;;  %8290 = vmatpush.msra.mxu1 %v7379_v6  ;;  %8223 = vmatpush.msrb.mxu2 %v7424_v41  ;;  %v7435_v41 = vld [vmem:[#allocation9 + $0x1ef8] sm:$0xff] }
 0x9e2   :  { %v7987_v0 = vmul.f32 %v7986_v63, %v13363_v58  ;;  %v7994_v55 = vmul.f32 %v7993_v34, %v13363_v58  ;;  %8271 = vmatpush.msra.mxu0 %v7345_v20  ;;  %8245 = vmatpush.msrb.mxu3 %v7452_v19  ;;  %v7410_v63 = vld [vmem:[#allocation9 + $0x1e30] sm:$0xff] }
 0x9e3   :  { %v8115_v23 = vsel %vm8113_vm8, %v8114_v26, %v13373_v10  ;;  %8291 = vmatpush.msra.mxu1 %v7377_v12  ;;  %8224 = vmatpush.msrb.mxu2 %v7422_v21  ;;  %v7442_v34 = vld [vmem:[#allocation9 + $0x1f30] sm:$0xff]  ;;  %v7408_v26 = vld [vmem:[#allocation9 + $0x1e20] sm:$0xff]  ;;  %v7465_v21 = vld [vmem:[#allocation9 + $0x1fe8] sm:$0xff] }
 0x9e4   :  { %v7988_v35 = vadd.f32 -0.4999988, %v7987_v0  ;;  %v7995_v62 = vadd.f32 -0.16666654, %v7994_v55  ;;  %v8116_v30 = vclz %v8115_v23  ;;  %8272 = vmatpush.msra.mxu0 %v7343_v53  ;;  %8246 = vmatpush.msrb.mxu3 %v7450_v49  ;;  %v7406_v0 = vld [vmem:[#allocation9 + $0x1e10] sm:$0xff]  ;;  %v7404_v12 = vld [vmem:[#allocation9 + $0x1e00] sm:$0xff] }
 0x9e5   :  { %8292 = vmatpush.msra.mxu1 %v7375_v27  ;;  %8225 = vmatpush.msrb.mxu2 %v7420_v9  ;;  %v7438_v20 = vld [vmem:[#allocation9 + $0x1f10] sm:$0xff]  ;;  %v7436_v23 = vld [vmem:[#allocation9 + $0x1f00] sm:$0xff]  ;;  %v7433_v53 = vld [vmem:[#allocation9 + $0x1ee8] sm:$0xff] }
 0x9e6   :  { %v7989_v28 = vmul.f32 %v7988_v35, %v13363_v58  ;;  %v7996_v60 = vmul.f32 %v7995_v62, %v13363_v58  ;;  %v8500_v46 = vadd.s32 4294967294, %v8116_v30  ;;  %8273 = vmatpush.msra.mxu0 %v7341_v11  ;;  %8247 = vmatpush.msrb.mxu3 %v7448_v8  ;;  %v7467_v35 = vld [vmem:[#allocation9 + $0x1ff8] sm:$0xff]  ;;  %v8134_v11 = vsub.s32 4, %v13359_v4 }
 0x9e7   :  { %8293 = vmatpush.msra.mxu1 %v7373_v39  ;;  %8274 = vmatmul.f32.vlgmr.msra.gmra.mxu0 %v13368_v40  ;;  %v7461_v39 = vld [vmem:[#allocation9 + $0x1fc8] sm:$0xff] }
 0x9e8   :  { %v7990_v2 = vadd.f32 1.0, %v7989_v28  ;;  %v7997_v29 = vadd.f32 1.0, %v7996_v60  ;;  %vm8501_vm15 = vcmp.lt.s32.totalorder %v8500_v46, 0  ;;  %8294 = vmatmul.f32.vlgmr.msra.gmra.mxu1 %v13370_v37  ;;  %8226 = vmatpush.msrb.mxu2 %v7418_v51  ;;  %v7425_v51 = vld [vmem:[#allocation9 + $0x1ea8] sm:$0xff]  ;;  %v8135_v49 = vsel %vm8012_vm12, %v8134_v11, %v13359_v4  ;;  %v7419_v4 = vld [vmem:[#allocation9 + $0x1e78] sm:$0xff] }
 0x9e9   :  { %v8119_v15 = vsel %vm8501_vm15, 0, %v8500_v46  ;;  %8248 = vmatpush.msrb.mxu3 %v7446_v44  ;;  %v7429_v46 = vld [vmem:[#allocation9 + $0x1ec8] sm:$0xff] }
 0x9ea   :  { %v7998_v18 = vmul.f32 %v7997_v29, %v13357_v48  ;;  %v8006_v58 = vxor.u32 2147483648, %v7990_v2  ;;  %v8120_v52 = vsub.s32 32, %v8119_v15  ;;  %v8124_v25 = vsub.s32 4294967266, %v8119_v15  ;;  %8227 = vmatpush.msrb.mxu2 %v7416_v45  ;;  %v7459_v29 = vld [vmem:[#allocation9 + $0x1fb8] sm:$0xff] }
 0x9eb   :  { %v8121_v48 = vshll.u32 %v13373_v10, %v8119_v15  ;;  %8249 = vmatpush.msrb.mxu3 %v7444_v5  ;;  %v8137_v45 = vsel %vm13401_vm14, 0, %v8135_v49  ;;  %v7415_v5 = vld [vmem:[#allocation9 + $0x1e58] sm:$0xff] }
 0x9ec   :  { %v8003_v33 = vxor.u32 2147483648, %v7998_v18  ;;  %v8122_v38 = vshrl.u32 %v8104_v56, %v8120_v52  ;;  %v8125_v54 = vadd.s32 127, %v8124_v25  ;;  %v8007_v59 = vsel %vm8005_vm3, %v8006_v58, %v7998_v18  ;;  %8228 = vmatpush.msrb.mxu2 %v7414_v13  ;;  %v7457_v18 = vld [vmem:[#allocation9 + $0x1fa8] sm:$0xff]  ;;  %v7423_v52 = vld [vmem:[#allocation9 + $0x1e98] sm:$0xff] }
 0x9ed   :  { %8250 = vmatpush.msrb.mxu3 %v7442_v34  ;;  %v7455_v25 = vld [vmem:[#allocation9 + $0x1f98] sm:$0xff]  ;;  %v8154_v44 = vand.u32 3, %v8137_v45  ;;  %v7413_v34 = vld [vmem:[#allocation9 + $0x1e48] sm:$0xff] }
 0x9ee   :  { %v8004_v43 = vsel %vm8002_vm4, %v7990_v2, %v8003_v33  ;;  %v8123_v40 = vor.u32 %v8122_v38, %v8121_v48  ;;  %v8126_v37 = vshll.u32 %v8125_v54, 23  ;;  %8229 = vmatpush.msrb.mxu2 %v7412_v22  ;;  %v7427_v2 = vld [vmem:[#allocation9 + $0x1eb8] sm:$0xff]  ;;  %v7421_v38 = vld [vmem:[#allocation9 + $0x1e88] sm:$0xff] }
 0x9ef   :  { %v8008_v47 = vsel %vm8001_vm1, %v8004_v43, %v8007_v59  ;;  %8251 = vmatpush.msrb.mxu3 %v7440_v14  ;;  %v7453_v48 = vld [vmem:[#allocation9 + $0x1f88] sm:$0xff]  ;;  %v7451_v43 = vld [vmem:[#allocation9 + $0x1f78] sm:$0xff]  ;;  %vm8156_vm6 = vcmp.eq.s32.totalorder %v8154_v44, 0  ;;  %vm8159_vm11 = vcmp.eq.s32.totalorder %v8154_v44, 2  ;;  %vm8155_vm0 = vcmp.lt.s32.totalorder %v8154_v44, 2 }
 0x9f0   :  { %v8009_v42 = vsel %vm7999_vm7, nan, %v8008_v47  ;;  %v8127_v10 = vor.u32 4788187, %v8126_v37  ;;  %v8130_v61 = vcvt.s32.f32 %v8123_v40  ;;  %8230 = vmatpush.msrb.mxu2 %v7410_v63  ;;  %v7417_v40 = vld [vmem:[#allocation9 + $0x1e68] sm:$0xff] }
 0x9f1   :  { %v8166_v36 = vmul.f32 %v8009_v42, %v8009_v42  ;;  %8252 = vmatpush.msrb.mxu3 %v7438_v20  ;;  %v7449_v37 = vld [vmem:[#allocation9 + $0x1f68] sm:$0xff]  ;;  %v7447_v42 = vld [vmem:[#allocation9 + $0x1f58] sm:$0xff] }
 0x9f2   :  { %v8128_v6 = vand.u32 2147483647, %v8127_v10  ;;  %8231 = vmatpush.msrb.mxu2 %v7408_v26  ;;  %v7445_v26 = vld [vmem:[#allocation9 + $0x1f48] sm:$0xff] }
 0x9f3   :  { %v8170_v1 = vsub.f32 1.0, %v8166_v36  ;;  %8253 = vmatpush.msrb.mxu3 %v7436_v23  ;;  %v7441_v20 = vld [vmem:[#allocation9 + $0x1f28] sm:$0xff]  ;;  %v7439_v23 = vld [vmem:[#allocation9 + $0x1f18] sm:$0xff] }
 0x9f4   :  { %v8131_v55 = vmul.f32 %v8130_v61, %v8128_v6  ;;  %8232 = vmatpush.msrb.mxu2 %v7406_v0  ;;  %v7411_v61 = vld [vmem:[#allocation9 + $0x1e38] sm:$0xff]  ;;  %v7409_v0 = vld [vmem:[#allocation9 + $0x1e28] sm:$0xff] }
 0x9f5   :  { %v13396_v3 = vadd.f32 %v8170_v1, %v8166_v36  ;;  %8318 = vmatpush.msra.mxu3 %v7467_v35  ;;  %v7443_v1 = vld [vmem:[#allocation9 + $0x1f38] sm:$0xff] }
 0x9f6   :  { %v8132_v31 = vxor.u32 2147483648, %v8131_v55  ;;  %8233 = vmatpush.msrb.mxu2 %v7404_v12  ;;  %v7407_v12 = vld [vmem:[#allocation9 + $0x1e18] sm:$0xff] }
 0x9f7   :  { %8234 = vmatmul.f32.vlgmr.msrb.gmra.mxu2 %v13396_v3  ;;  %8319 = vmatpush.msra.mxu3 %v7465_v21  ;;  %v8344_v21 = vld [vmem:[#allocation11] sm:$0x3] }
 0x9f8   :  { %v8133_v30 = vsel %vm8012_vm12, %v8132_v31, %v8131_v55  ;;  %8298 = vmatpush.msra.mxu2 %v7435_v41  ;;  %v7437_v41 = vld [vmem:[#allocation9 + $0x1f08] sm:$0xff] }
 0x9f9   :  { %v8136_v27 = vsel %vm13401_vm14, %v13030_v24, %v8133_v30  ;;  %8320 = vmatpush.msra.mxu3 %v7463_v50  ;;  %v7405_v24 = vld [vmem:[#allocation9 + $0x1e08] sm:$0xff] }
 0x9fa   :  { %v8138_v7 = vmul.f32 %v8136_v27, %v8136_v27  ;;  %8299 = vmatpush.msra.mxu2 %v7433_v53 }
 0x9fb   :  { %8321 = vmatpush.msra.mxu3 %v7461_v39 }
 0x9fc   :  { %v8139_v28 = vmul.f32 -0.001358992, %v8138_v7  ;;  %v8146_v60 = vmul.f32 -0.00019511016, %v8138_v7  ;;  %8300 = vmatpush.msra.mxu2 %v7431_v57 }
 0x9fd   :  { %8322 = vmatpush.msra.mxu3 %v7459_v29  ;;  %v8347_v29 = vperm.slane %v8344_v21, 1 }
 0x9fe   :  { %v8140_v9 = vadd.f32 0.041655596, %v8139_v28  ;;  %v8147_v19 = vadd.f32 0.008332121, %v8146_v60  ;;  %8301 = vmatpush.msra.mxu2 %v7429_v46  ;;  %v8346_v60 = vperm.slane %v8344_v21, 0 }
 0x9ff   :  { %8323 = vmatpush.msra.mxu3 %v7457_v18 }
 0xa00   :  { %v8141_v32 = vmul.f32 %v8140_v9, %v8138_v7  ;;  %v8148_v15 = vmul.f32 %v8147_v19, %v8138_v7  ;;  %8302 = vmatpush.msra.mxu2 %v7427_v2 }
 0xa01   :  { %8324 = vmatpush.msra.mxu3 %v7455_v25 }
 0xa02   :  { %v8142_v58 = vadd.f32 -0.4999988, %v8141_v32  ;;  %v8149_v56 = vadd.f32 -0.16666654, %v8148_v15  ;;  %8303 = vmatpush.msra.mxu2 %v7425_v51 }
 0xa03   :  { %8325 = vmatpush.msra.mxu3 %v7453_v48 }
 0xa04   :  { %v8143_v8 = vmul.f32 %v8142_v58, %v8138_v7  ;;  %v8150_v33 = vmul.f32 %v8149_v56, %v8138_v7  ;;  %8304 = vmatpush.msra.mxu2 %v7423_v52 }
 0xa05   :  { %8326 = vmatpush.msra.mxu3 %v7451_v43 }
 0xa06   :  { %v8144_v54 = vadd.f32 1.0, %v8143_v8  ;;  %v8151_v13 = vadd.f32 1.0, %v8150_v33  ;;  %8305 = vmatpush.msra.mxu2 %v7421_v38 }
 0xa07   :  { %8327 = vmatpush.msra.mxu3 %v7449_v37 }
 0xa08   :  { %v8152_v59 = vmul.f32 %v8151_v13, %v8136_v27  ;;  %v8160_v47 = vxor.u32 2147483648, %v8144_v54  ;;  %8306 = vmatpush.msra.mxu2 %v7419_v4 }
 0xa09   :  { %8328 = vmatpush.msra.mxu3 %v7447_v42 }
 0xa0a   :  { %v8157_v22 = vxor.u32 2147483648, %v8152_v59  ;;  %8307 = vmatpush.msra.mxu2 %v7417_v40  ;;  %v8161_v10 = vsel %vm8159_vm11, %v8160_v47, %v8152_v59 }
 0xa0b   :  { %8329 = vmatpush.msra.mxu3 %v7445_v26 }
 0xa0c   :  { %v8158_v63 = vsel %vm8156_vm6, %v8144_v54, %v8157_v22  ;;  %8308 = vmatpush.msra.mxu2 %v7415_v5 }
 0xa0d   :  { %v8162_v36 = vsel %vm8155_vm0, %v8158_v63, %v8161_v10  ;;  %8330 = vmatpush.msra.mxu3 %v7443_v1 }
 0xa0e   :  { %v8163_v6 = vsel %vm8153_vm5, nan, %v8162_v36  ;;  %8309 = vmatpush.msra.mxu2 %v7413_v34 }
 0xa0f   :  { %v8167_v14 = vmul.f32 %v8163_v6, %v8163_v6  ;;  %8331 = vmatpush.msra.mxu3 %v7441_v20 }
 0xa10   :  { %8310 = vmatpush.msra.mxu2 %v7411_v61 }
 0xa11   :  { %v8171_v55 = vsub.f32 1.0, %v8167_v14  ;;  %8332 = vmatpush.msra.mxu3 %v7439_v23 }
 0xa12   :  { %8311 = vmatpush.msra.mxu2 %v7409_v0 }
 0xa13   :  { %v8175_v31 = vadd.f32 %v8171_v55, %v8167_v14  ;;  %8333 = vmatpush.msra.mxu3 %v7437_v41 }
 0xa14   :  { %8312 = vmatpush.msra.mxu2 %v7407_v12 }
 0xa15   :  { %8254 = vmatmul.f32.vlgmr.msrb.gmra.mxu3 %v8175_v31 }
 0xa16   :  { %8313 = vmatpush.msra.mxu2 %v7405_v24 }
 0xa17   :  { %8314 = vmatmul.f32.vlgmr.msra.gmra.mxu2 %v13396_v3 }
 0xa1d   :  { %8334 = vmatmul.f32.vlgmr.msra.gmra.mxu3 %v8175_v31 }
 0xa5a   :  { %v8195_v35 = vpop.f32.mrf.mxu0 }
 0xa5b   :  { %v8215_v62 = vpop.f32.mrf.mxu1 }
 0xa5c   :  { %v8216_v53 = vadd.f32 %v8215_v62, %v8195_v35 }
 0xa64   :  { %v8275_v7 = vpop.f32.mrf.mxu0 }
 0xa65   :  { %v8295_v57 = vpop.f32.mrf.mxu1 }
 0xa66   :  { %v8296_v46 = vadd.f32 %v8295_v57, %v8275_v7 }
 0xa7a   :  { %v8235_v30 = vpop.f32.mrf.mxu2 }
 0xa7b   :  { %v8236_v27 = vadd.f32 %v8235_v30, %v8216_v53 }
 0xa98   :  { %v8255_v50 = vpop.f32.mrf.mxu3 }
 0xa99   :  { %v8256_v28 = vadd.f32 %v8255_v50, %v8236_v27 }
 0xa9a   :  { %v8315_v39 = vpop.f32.mrf.mxu2 }
 0xa9b   :  { %v8338_v11 = vadd.f32 %v8256_v28, %v13008_v16  ;;  %v8316_v19 = vadd.f32 %v8315_v39, %v8296_v46 }
 0xa9d   :  { %v8350_v9 = vadd.f32 %v8346_v60, %v8338_v11 }
 0xa9f   :  { %8352 = vst [vmem:[#allocation12] sm:$0xff] %v8350_v9 }
 0xaa0   :  { %v8335_v3 = vpop.f32.mrf.mxu3 }
 0xaa1   :  { %v8336_v2 = vadd.f32 %v8335_v3, %v8316_v19 }
 0xaa3   :  { %v8339_v32 = vadd.f32 %v8336_v2, %v13013_v17 }
 0xaa5   :  { %v8351_v15 = vadd.f32 %v8347_v29, %v8339_v32 }
 0xaa7   :  { %8353 = vst [vmem:[#allocation12 + $0x8] sm:$0xff] %v8351_v15 }
 0xaa8   :  { %8364 = dma.vmem_to_hbm [thread:$0]  %s8360_s8, 256, %s8362_s2, [#allocation5]  }
 0xaa9   :  { %8672 = dma.done.wait [#allocation5], 256  }
 0xaaa   :  { %8673 = vsyncadd [#allocation5], 4294967040 }
 0xaab   :  { %8369 = vsyncpa [#allocation4], 1 }
 0xaac   :  { %8370 = vsyncpa [#allocation7], 1 }
 0xaad   :  { %8371 = vsyncpa [#allocation10], 1 }
 0xaae   :  { %8372 = vsyncpa [#allocation5], 1 }

</bundles_post_ra>
